<compile_context>
chip_gen: v6e
topology: v6e:2x2x1
jax: 0.10.0
libtpu: 0.0.40
codegen_flags: <defaults>
</compile_context>

<pallas_src>
import jax
import jax.numpy as jnp
import numpy as np
from jax import lax
from jax.experimental import pallas as pl
from jax.experimental.pallas import tpu as pltpu

EPS = 1e-5      # nn.BatchNorm2d default
LANE = 128      # TPU lane width; channels are zero-padded to this


def _double_conv_kernel(x_ref, w1_ref, w2_ref, g1_ref, be1_ref, g2_ref, be2_ref,
                        o_ref, xp_ref, col_ref):
    """Fused (conv3x3 -> BN(train) -> ReLU) x 2, everything resident in VMEM.

    x_ref   : (N, H, W, C)        channel-padded input (pad lanes are zero)
    w*_ref  : (9*C, C)            im2col weights, tap-major, zero padded
    g*,be*  : (1, C)              BN gamma/beta, zero padded
    o_ref   : (N*H*W, C)          lane-dense output slab (cols >= Cout are 0)
    xp_ref  : (N, H+2, W+2, C)    zero-halo scratch, reused by both stages
    col_ref : (N*H*W, 9*C)        im2col scratch, reused by both stages
    """
    N, H2, W2, C = xp_ref.shape
    H, W = H2 - 2, W2 - 2
    nhw = N * H * W
    inv_nhw = 1.0 / float(nhw)

    # Stage-1 input: zero the halo buffer once, then fill the interior.
    xp_ref[...] = jnp.zeros_like(xp_ref)
    xp_ref[:, 1:H + 1, 1:W + 1, :] = x_ref[...]

    def stage(w_ref, g_ref, b_ref):
        # im2col: 9 shifted windows written as lane-tile-aligned column blocks.
        for dy in range(3):
            for dx in range(3):
                t = dy * 3 + dx
                col_ref[:, t * C:(t + 1) * C] = (
                    xp_ref[:, dy:dy + H, dx:dx + W, :].reshape(nhw, C))
        # Single MXU matmul over the folded (tap * Cin) contraction axis.
        acc = jnp.dot(col_ref[...], w_ref[...],
                      preferred_element_type=jnp.float32)        # (nhw, C)
        # One-pass batch statistics (training-mode BN) folded to scale/shift.
        s = jnp.sum(acc, axis=0, keepdims=True)                   # (1, C)
        ss = jnp.sum(acc * acc, axis=0, keepdims=True)            # (1, C)
        mean = s * inv_nhw
        var = jnp.maximum(ss * inv_nhw - mean * mean, 0.0)
        scale = g_ref[...] * lax.rsqrt(var + EPS)
        shift = b_ref[...] - mean * scale
        # Conv bias intentionally omitted: the batch-mean subtraction above
        # cancels a per-channel bias exactly.
        return jnp.maximum(acc * scale + shift, 0.0)              # fused BN+ReLU

    y1 = stage(w1_ref, g1_ref, be1_ref)
    # Keep the stage-1 activation in VMEM: write it back into the interior of
    # the halo buffer (the halo ring stays zero from the initial memset).
    xp_ref[:, 1:H + 1, 1:W + 1, :] = y1.reshape(N, H, W, C)

    o_ref[...] = stage(w2_ref, g2_ref, be2_ref)


def _pack_weights(w_hwio, cin, cout):
    """(3,3,cin,cout) -> (9*LANE, LANE), tap-major rows, zero padded."""
    w = w_hwio.reshape(9, cin, cout)
    w = jnp.pad(w, ((0, 0), (0, LANE - cin), (0, LANE - cout)))
    return w.reshape(9 * LANE, LANE)


def _pack_vec(v, cout):
    return jnp.pad(v, (0, LANE - cout)).reshape(1, LANE)


@jax.jit
def double_conv(x_nchw, params):
    """DoubleConv forward. Input/output are NCHW (PyTorch convention)."""
    N, Cin, H, W = x_nchw.shape
    Cout = params["w1"].shape[-1]
    assert Cin <= LANE and Cout <= LANE  # TODO(synk): tile channel blocks > 128

    # NCHW -> NHWC, channels zero-padded to the lane width (lane-dense layout).
    x = jnp.transpose(x_nchw, (0, 2, 3, 1))
    x = jnp.pad(x, ((0, 0), (0, 0), (0, 0), (0, LANE - Cin)))

    w1 = _pack_weights(params["w1"], Cin, Cout)
    w2 = _pack_weights(params["w2"], Cout, Cout)
    g1, be1 = _pack_vec(params["g1"], Cout), _pack_vec(params["be1"], Cout)
    g2, be2 = _pack_vec(params["g2"], Cout), _pack_vec(params["be2"], Cout)

    nhw = N * H * W
    vmem = pl.BlockSpec(memory_space=pltpu.MemorySpace.VMEM)
    flops = 2 * (2 * nhw * (9 * LANE) * LANE)                 # two im2col matmuls
    bytes_accessed = 4 * (x.size + w1.size + w2.size + 4 * LANE + nhw * LANE)

    out = pl.pallas_call(
        _double_conv_kernel,
        out_shape=jax.ShapeDtypeStruct((nhw, LANE), jnp.float32),
        in_specs=[vmem] * 7,
        out_specs=vmem,
        scratch_shapes=[
            pltpu.VMEM((N, H + 2, W + 2, LANE), jnp.float32),   # halo buffer
            pltpu.VMEM((nhw, 9 * LANE), jnp.float32),           # im2col buffer
        ],
        compiler_params=pltpu.CompilerParams(vmem_limit_bytes=32 * 1024 * 1024),
        cost_estimate=pl.CostEstimate(flops=flops, transcendentals=2 * LANE,
                                      bytes_accessed=bytes_accessed),
    )(x, w1, w2, g1, be1, g2, be2)

    out = out.reshape(N, H, W, LANE)[..., :Cout]
    return jnp.transpose(out, (0, 3, 1, 2))                     # NHWC -> NCHW


def _ref_stage(x_nhwc, w_hwio, b, gamma, beta):
    """Pure-JAX reference for one stage (conv bias included, as in the module)."""
    y = lax.conv_general_dilated(
        x_nhwc, w_hwio, window_strides=(1, 1), padding="SAME",
        dimension_numbers=("NHWC", "HWIO", "NHWC")) + b
    mean = y.mean(axis=(0, 1, 2))
    var = ((y - mean) ** 2).mean(axis=(0, 1, 2))
    y = (y - mean) / jnp.sqrt(var + EPS) * gamma + beta
    return jnp.maximum(y, 0.0)


def init_params(key, in_ch, out_ch):
    """Deterministic init mimicking nn.Conv2d / nn.BatchNorm2d defaults."""
    k1, k2, k3, k4 = jax.random.split(key, 4)
    lim1 = 1.0 / np.sqrt(in_ch * 9)
    lim2 = 1.0 / np.sqrt(out_ch * 9)
    return {
        # conv weights stored HWIO (3, 3, Cin, Cout); biases kept for module
        # parity (the kernel drops them because training-mode BN cancels them).
        "w1": jax.random.uniform(k1, (3, 3, in_ch, out_ch), jnp.float32, -lim1, lim1),
        "b1": jax.random.uniform(k2, (out_ch,), jnp.float32, -lim1, lim1),
        "g1": jnp.ones((out_ch,), jnp.float32),
        "be1": jnp.zeros((out_ch,), jnp.float32),
        "w2": jax.random.uniform(k3, (3, 3, out_ch, out_ch), jnp.float32, -lim2, lim2),
        "b2": jax.random.uniform(k4, (out_ch,), jnp.float32, -lim2, lim2),
        "g2": jnp.ones((out_ch,), jnp.float32),
        "be2": jnp.zeros((out_ch,), jnp.float32),
    }


if __name__ == "__main__":
    key = jax.random.PRNGKey(0)
    kx, kp = jax.random.split(key)

    N, in_ch, out_ch, H, W = 2, 4, 8, 16, 16
    x = jax.random.normal(kx, (N, in_ch, H, W), jnp.float32)    # NCHW like PyTorch
    params = init_params(kp, in_ch, out_ch)

    out = double_conv(x, params)
    out = jax.block_until_ready(out)
    assert out.shape == (N, out_ch, H, W), out.shape

    # Correctness check against a pure-JAX reference of the module's math
    # (conv bias included there; it cancels through training-mode BN).
    x_nhwc = jnp.transpose(x, (0, 2, 3, 1))
    r = _ref_stage(x_nhwc, params["w1"], params["b1"], params["g1"], params["be1"])
    r = _ref_stage(r, params["w2"], params["b2"], params["g2"], params["be2"])
    ref = jnp.transpose(r, (0, 3, 1, 2))
    np.testing.assert_allclose(np.asarray(out), np.asarray(ref), rtol=1e-4, atol=1e-4)

    print("KERNEL_OK")
</pallas_src>

<mosaic_0001>
module attributes {stable_mosaic.version = 11 : i64} {
  func.func @_double_conv_kernel(%arg0: memref<2x16x16x128xf32, #tpu.memory_space<vmem>>, %arg1: memref<1152x128xf32, #tpu.memory_space<vmem>>, %arg2: memref<1152x128xf32, #tpu.memory_space<vmem>>, %arg3: memref<1x128xf32, #tpu.memory_space<vmem>>, %arg4: memref<1x128xf32, #tpu.memory_space<vmem>>, %arg5: memref<1x128xf32, #tpu.memory_space<vmem>>, %arg6: memref<1x128xf32, #tpu.memory_space<vmem>>, %arg7: memref<512x128xf32, #tpu.memory_space<vmem>>, %arg8: memref<2x18x18x128xf32, #tpu.memory_space<vmem>>, %arg9: memref<512x1152xf32, #tpu.memory_space<vmem>>) attributes {dimension_semantics = [], scalar_prefetch = 0 : i64, scratch_operands = 2 : i64, tpu.core_type = #tpu.core_type<tc>} {
    %cst = arith.constant 0.000000e+00 : f32
    %0 = vector.broadcast %cst : f32 to vector<2x18x18x128xf32>
    %c0 = arith.constant 0 : index
    %c0_0 = arith.constant 0 : index
    %c0_1 = arith.constant 0 : index
    %c0_2 = arith.constant 0 : index
    %1 = vector.load %arg8[%c0, %c0_0, %c0_1, %c0_2] : memref<2x18x18x128xf32, #tpu.memory_space<vmem>>, vector<2x18x18x128xf32>
    tpu.vector_store %arg8[%c0, %c0_0, %c0_1, %c0_2], %0 {strides = array<i32>} : memref<2x18x18x128xf32, #tpu.memory_space<vmem>>, vector<2x18x18x128xf32>,
    %c0_3 = arith.constant 0 : index
    %c0_4 = arith.constant 0 : index
    %c0_5 = arith.constant 0 : index
    %c0_6 = arith.constant 0 : index
    %2 = vector.load %arg0[%c0_3, %c0_4, %c0_5, %c0_6] : memref<2x16x16x128xf32, #tpu.memory_space<vmem>>, vector<2x16x16x128xf32>
    %c0_7 = arith.constant 0 : index
    %c1 = arith.constant 1 : index
    %c1_8 = arith.constant 1 : index
    %c0_9 = arith.constant 0 : index
    %3 = vector.load %arg8[%c0_7, %c1, %c1_8, %c0_9] : memref<2x18x18x128xf32, #tpu.memory_space<vmem>>, vector<2x16x16x128xf32>
    tpu.vector_store %arg8[%c0_7, %c1, %c1_8, %c0_9], %2 {strides = array<i32>} : memref<2x18x18x128xf32, #tpu.memory_space<vmem>>, vector<2x16x16x128xf32>,
    %c0_10 = arith.constant 0 : index
    %c0_11 = arith.constant 0 : index
    %c0_12 = arith.constant 0 : index
    %c0_13 = arith.constant 0 : index
    %4 = vector.load %arg8[%c0_10, %c0_11, %c0_12, %c0_13] : memref<2x18x18x128xf32, #tpu.memory_space<vmem>>, vector<2x16x16x128xf32>
    %5 = vector.shape_cast %4 : vector<2x16x16x128xf32> to vector<512x128xf32>
    %c0_14 = arith.constant 0 : index
    %c0_15 = arith.constant 0 : index
    %6 = vector.load %arg9[%c0_14, %c0_15] : memref<512x1152xf32, #tpu.memory_space<vmem>>, vector<512x128xf32>
    tpu.vector_store %arg9[%c0_14, %c0_15], %5 {strides = array<i32>} : memref<512x1152xf32, #tpu.memory_space<vmem>>, vector<512x128xf32>,
    %c0_16 = arith.constant 0 : index
    %c0_17 = arith.constant 0 : index
    %c1_18 = arith.constant 1 : index
    %c0_19 = arith.constant 0 : index
    %7 = vector.load %arg8[%c0_16, %c0_17, %c1_18, %c0_19] : memref<2x18x18x128xf32, #tpu.memory_space<vmem>>, vector<2x16x16x128xf32>
    %8 = vector.shape_cast %7 : vector<2x16x16x128xf32> to vector<512x128xf32>
    %c0_20 = arith.constant 0 : index
    %c128 = arith.constant 128 : index
    %9 = vector.load %arg9[%c0_20, %c128] : memref<512x1152xf32, #tpu.memory_space<vmem>>, vector<512x128xf32>
    tpu.vector_store %arg9[%c0_20, %c128], %8 {strides = array<i32>} : memref<512x1152xf32, #tpu.memory_space<vmem>>, vector<512x128xf32>,
    %c0_21 = arith.constant 0 : index
    %c0_22 = arith.constant 0 : index
    %c2 = arith.constant 2 : index
    %c0_23 = arith.constant 0 : index
    %10 = vector.load %arg8[%c0_21, %c0_22, %c2, %c0_23] : memref<2x18x18x128xf32, #tpu.memory_space<vmem>>, vector<2x16x16x128xf32>
    %11 = vector.shape_cast %10 : vector<2x16x16x128xf32> to vector<512x128xf32>
    %c0_24 = arith.constant 0 : index
    %c256 = arith.constant 256 : index
    %12 = vector.load %arg9[%c0_24, %c256] : memref<512x1152xf32, #tpu.memory_space<vmem>>, vector<512x128xf32>
    tpu.vector_store %arg9[%c0_24, %c256], %11 {strides = array<i32>} : memref<512x1152xf32, #tpu.memory_space<vmem>>, vector<512x128xf32>,
    %c0_25 = arith.constant 0 : index
    %c1_26 = arith.constant 1 : index
    %c0_27 = arith.constant 0 : index
    %c0_28 = arith.constant 0 : index
    %13 = vector.load %arg8[%c0_25, %c1_26, %c0_27, %c0_28] : memref<2x18x18x128xf32, #tpu.memory_space<vmem>>, vector<2x16x16x128xf32>
    %14 = vector.shape_cast %13 : vector<2x16x16x128xf32> to vector<512x128xf32>
    %c0_29 = arith.constant 0 : index
    %c384 = arith.constant 384 : index
    %15 = vector.load %arg9[%c0_29, %c384] : memref<512x1152xf32, #tpu.memory_space<vmem>>, vector<512x128xf32>
    tpu.vector_store %arg9[%c0_29, %c384], %14 {strides = array<i32>} : memref<512x1152xf32, #tpu.memory_space<vmem>>, vector<512x128xf32>,
    %c0_30 = arith.constant 0 : index
    %c1_31 = arith.constant 1 : index
    %c1_32 = arith.constant 1 : index
    %c0_33 = arith.constant 0 : index
    %16 = vector.load %arg8[%c0_30, %c1_31, %c1_32, %c0_33] : memref<2x18x18x128xf32, #tpu.memory_space<vmem>>, vector<2x16x16x128xf32>
    %17 = vector.shape_cast %16 : vector<2x16x16x128xf32> to vector<512x128xf32>
    %c0_34 = arith.constant 0 : index
    %c512 = arith.constant 512 : index
    %18 = vector.load %arg9[%c0_34, %c512] : memref<512x1152xf32, #tpu.memory_space<vmem>>, vector<512x128xf32>
    tpu.vector_store %arg9[%c0_34, %c512], %17 {strides = array<i32>} : memref<512x1152xf32, #tpu.memory_space<vmem>>, vector<512x128xf32>,
    %c0_35 = arith.constant 0 : index
    %c1_36 = arith.constant 1 : index
    %c2_37 = arith.constant 2 : index
    %c0_38 = arith.constant 0 : index
    %19 = vector.load %arg8[%c0_35, %c1_36, %c2_37, %c0_38] : memref<2x18x18x128xf32, #tpu.memory_space<vmem>>, vector<2x16x16x128xf32>
    %20 = vector.shape_cast %19 : vector<2x16x16x128xf32> to vector<512x128xf32>
    %c0_39 = arith.constant 0 : index
    %c640 = arith.constant 640 : index
    %21 = vector.load %arg9[%c0_39, %c640] : memref<512x1152xf32, #tpu.memory_space<vmem>>, vector<512x128xf32>
    tpu.vector_store %arg9[%c0_39, %c640], %20 {strides = array<i32>} : memref<512x1152xf32, #tpu.memory_space<vmem>>, vector<512x128xf32>,
    %c0_40 = arith.constant 0 : index
    %c2_41 = arith.constant 2 : index
    %c0_42 = arith.constant 0 : index
    %c0_43 = arith.constant 0 : index
    %22 = vector.load %arg8[%c0_40, %c2_41, %c0_42, %c0_43] : memref<2x18x18x128xf32, #tpu.memory_space<vmem>>, vector<2x16x16x128xf32>
    %23 = vector.shape_cast %22 : vector<2x16x16x128xf32> to vector<512x128xf32>
    %c0_44 = arith.constant 0 : index
    %c768 = arith.constant 768 : index
    %24 = vector.load %arg9[%c0_44, %c768] : memref<512x1152xf32, #tpu.memory_space<vmem>>, vector<512x128xf32>
    tpu.vector_store %arg9[%c0_44, %c768], %23 {strides = array<i32>} : memref<512x1152xf32, #tpu.memory_space<vmem>>, vector<512x128xf32>,
    %c0_45 = arith.constant 0 : index
    %c2_46 = arith.constant 2 : index
    %c1_47 = arith.constant 1 : index
    %c0_48 = arith.constant 0 : index
    %25 = vector.load %arg8[%c0_45, %c2_46, %c1_47, %c0_48] : memref<2x18x18x128xf32, #tpu.memory_space<vmem>>, vector<2x16x16x128xf32>
    %26 = vector.shape_cast %25 : vector<2x16x16x128xf32> to vector<512x128xf32>
    %c0_49 = arith.constant 0 : index
    %c896 = arith.constant 896 : index
    %27 = vector.load %arg9[%c0_49, %c896] : memref<512x1152xf32, #tpu.memory_space<vmem>>, vector<512x128xf32>
    tpu.vector_store %arg9[%c0_49, %c896], %26 {strides = array<i32>} : memref<512x1152xf32, #tpu.memory_space<vmem>>, vector<512x128xf32>,
    %c0_50 = arith.constant 0 : index
    %c2_51 = arith.constant 2 : index
    %c2_52 = arith.constant 2 : index
    %c0_53 = arith.constant 0 : index
    %28 = vector.load %arg8[%c0_50, %c2_51, %c2_52, %c0_53] : memref<2x18x18x128xf32, #tpu.memory_space<vmem>>, vector<2x16x16x128xf32>
    %29 = vector.shape_cast %28 : vector<2x16x16x128xf32> to vector<512x128xf32>
    %c0_54 = arith.constant 0 : index
    %c1024 = arith.constant 1024 : index
    %30 = vector.load %arg9[%c0_54, %c1024] : memref<512x1152xf32, #tpu.memory_space<vmem>>, vector<512x128xf32>
    tpu.vector_store %arg9[%c0_54, %c1024], %29 {strides = array<i32>} : memref<512x1152xf32, #tpu.memory_space<vmem>>, vector<512x128xf32>,
    %c0_55 = arith.constant 0 : index
    %c0_56 = arith.constant 0 : index
    %31 = vector.load %arg9[%c0_55, %c0_56] : memref<512x1152xf32, #tpu.memory_space<vmem>>, vector<512x1152xf32>
    %c0_57 = arith.constant 0 : index
    %c0_58 = arith.constant 0 : index
    %32 = vector.load %arg1[%c0_57, %c0_58] : memref<1152x128xf32, #tpu.memory_space<vmem>>, vector<1152x128xf32>
    %cst_59 = arith.constant dense<0.000000e+00> : vector<512x128xf32>
    %33 = tpu.matmul %31, %32, %cst_59 {dimension_numbers = #tpu.dot_dimension_numbers<[1], [0], [0], [1], [0, 0, 1, 1], [], []>} : vector<512x1152xf32>, vector<1152x128xf32>, vector<512x128xf32> -> vector<512x128xf32>
    %cst_60 = arith.constant dense<0.000000e+00> : vector<128xf32>
    %34 = vector.multi_reduction <add>, %33, %cst_60 [0] : vector<512x128xf32> to vector<128xf32>
    %35 = vector.shape_cast %34 : vector<128xf32> to vector<1x128xf32>
    %36 = arith.mulf %33, %33 : vector<512x128xf32>
    %cst_61 = arith.constant dense<0.000000e+00> : vector<128xf32>
    %37 = vector.multi_reduction <add>, %36, %cst_61 [0] : vector<512x128xf32> to vector<128xf32>
    %38 = vector.shape_cast %37 : vector<128xf32> to vector<1x128xf32>
    %cst_62 = arith.constant 0.001953125 : f32
    %39 = vector.broadcast %cst_62 : f32 to vector<1x128xf32>
    %40 = arith.mulf %35, %39 : vector<1x128xf32>
    %cst_63 = arith.constant 0.001953125 : f32
    %41 = vector.broadcast %cst_63 : f32 to vector<1x128xf32>
    %42 = arith.mulf %38, %41 : vector<1x128xf32>
    %43 = arith.mulf %40, %40 : vector<1x128xf32>
    %44 = arith.subf %42, %43 : vector<1x128xf32>
    %cst_64 = arith.constant 0.000000e+00 : f32
    %45 = vector.broadcast %cst_64 : f32 to vector<1x128xf32>
    %46 = arith.maximumf %44, %45 : vector<1x128xf32>
    %c0_65 = arith.constant 0 : index
    %c0_66 = arith.constant 0 : index
    %47 = vector.load %arg3[%c0_65, %c0_66] : memref<1x128xf32, #tpu.memory_space<vmem>>, vector<1x128xf32>
    %cst_67 = arith.constant 9.99999974E-6 : f32
    %48 = vector.broadcast %cst_67 : f32 to vector<1x128xf32>
    %49 = arith.addf %46, %48 : vector<1x128xf32>
    %50 = math.rsqrt %49 : vector<1x128xf32>
    %51 = arith.mulf %47, %50 : vector<1x128xf32>
    %c0_68 = arith.constant 0 : index
    %c0_69 = arith.constant 0 : index
    %52 = vector.load %arg4[%c0_68, %c0_69] : memref<1x128xf32, #tpu.memory_space<vmem>>, vector<1x128xf32>
    %53 = arith.mulf %40, %51 : vector<1x128xf32>
    %54 = arith.subf %52, %53 : vector<1x128xf32>
    %55 = vector.broadcast %51 : vector<1x128xf32> to vector<512x128xf32>
    %56 = arith.mulf %33, %55 : vector<512x128xf32>
    %57 = vector.broadcast %54 : vector<1x128xf32> to vector<512x128xf32>
    %58 = arith.addf %56, %57 : vector<512x128xf32>
    %cst_70 = arith.constant 0.000000e+00 : f32
    %59 = vector.broadcast %cst_70 : f32 to vector<512x128xf32>
    %60 = arith.maximumf %58, %59 : vector<512x128xf32>
    %61 = vector.shape_cast %60 : vector<512x128xf32> to vector<2x16x16x128xf32>
    %c0_71 = arith.constant 0 : index
    %c1_72 = arith.constant 1 : index
    %c1_73 = arith.constant 1 : index
    %c0_74 = arith.constant 0 : index
    %62 = vector.load %arg8[%c0_71, %c1_72, %c1_73, %c0_74] : memref<2x18x18x128xf32, #tpu.memory_space<vmem>>, vector<2x16x16x128xf32>
    tpu.vector_store %arg8[%c0_71, %c1_72, %c1_73, %c0_74], %61 {strides = array<i32>} : memref<2x18x18x128xf32, #tpu.memory_space<vmem>>, vector<2x16x16x128xf32>,
    %c0_75 = arith.constant 0 : index
    %c0_76 = arith.constant 0 : index
    %c0_77 = arith.constant 0 : index
    %c0_78 = arith.constant 0 : index
    %63 = vector.load %arg8[%c0_75, %c0_76, %c0_77, %c0_78] : memref<2x18x18x128xf32, #tpu.memory_space<vmem>>, vector<2x16x16x128xf32>
    %64 = vector.shape_cast %63 : vector<2x16x16x128xf32> to vector<512x128xf32>
    %c0_79 = arith.constant 0 : index
    %c0_80 = arith.constant 0 : index
    %65 = vector.load %arg9[%c0_79, %c0_80] : memref<512x1152xf32, #tpu.memory_space<vmem>>, vector<512x128xf32>
    tpu.vector_store %arg9[%c0_79, %c0_80], %64 {strides = array<i32>} : memref<512x1152xf32, #tpu.memory_space<vmem>>, vector<512x128xf32>,
    %c0_81 = arith.constant 0 : index
    %c0_82 = arith.constant 0 : index
    %c1_83 = arith.constant 1 : index
    %c0_84 = arith.constant 0 : index
    %66 = vector.load %arg8[%c0_81, %c0_82, %c1_83, %c0_84] : memref<2x18x18x128xf32, #tpu.memory_space<vmem>>, vector<2x16x16x128xf32>
    %67 = vector.shape_cast %66 : vector<2x16x16x128xf32> to vector<512x128xf32>
    %c0_85 = arith.constant 0 : index
    %c128_86 = arith.constant 128 : index
    %68 = vector.load %arg9[%c0_85, %c128_86] : memref<512x1152xf32, #tpu.memory_space<vmem>>, vector<512x128xf32>
    tpu.vector_store %arg9[%c0_85, %c128_86], %67 {strides = array<i32>} : memref<512x1152xf32, #tpu.memory_space<vmem>>, vector<512x128xf32>,
    %c0_87 = arith.constant 0 : index
    %c0_88 = arith.constant 0 : index
    %c2_89 = arith.constant 2 : index
    %c0_90 = arith.constant 0 : index
    %69 = vector.load %arg8[%c0_87, %c0_88, %c2_89, %c0_90] : memref<2x18x18x128xf32, #tpu.memory_space<vmem>>, vector<2x16x16x128xf32>
    %70 = vector.shape_cast %69 : vector<2x16x16x128xf32> to vector<512x128xf32>
    %c0_91 = arith.constant 0 : index
    %c256_92 = arith.constant 256 : index
    %71 = vector.load %arg9[%c0_91, %c256_92] : memref<512x1152xf32, #tpu.memory_space<vmem>>, vector<512x128xf32>
    tpu.vector_store %arg9[%c0_91, %c256_92], %70 {strides = array<i32>} : memref<512x1152xf32, #tpu.memory_space<vmem>>, vector<512x128xf32>,
    %c0_93 = arith.constant 0 : index
    %c1_94 = arith.constant 1 : index
    %c0_95 = arith.constant 0 : index
    %c0_96 = arith.constant 0 : index
    %72 = vector.load %arg8[%c0_93, %c1_94, %c0_95, %c0_96] : memref<2x18x18x128xf32, #tpu.memory_space<vmem>>, vector<2x16x16x128xf32>
    %73 = vector.shape_cast %72 : vector<2x16x16x128xf32> to vector<512x128xf32>
    %c0_97 = arith.constant 0 : index
    %c384_98 = arith.constant 384 : index
    %74 = vector.load %arg9[%c0_97, %c384_98] : memref<512x1152xf32, #tpu.memory_space<vmem>>, vector<512x128xf32>
    tpu.vector_store %arg9[%c0_97, %c384_98], %73 {strides = array<i32>} : memref<512x1152xf32, #tpu.memory_space<vmem>>, vector<512x128xf32>,
    %c0_99 = arith.constant 0 : index
    %c1_100 = arith.constant 1 : index
    %c1_101 = arith.constant 1 : index
    %c0_102 = arith.constant 0 : index
    %75 = vector.load %arg8[%c0_99, %c1_100, %c1_101, %c0_102] : memref<2x18x18x128xf32, #tpu.memory_space<vmem>>, vector<2x16x16x128xf32>
    %76 = vector.shape_cast %75 : vector<2x16x16x128xf32> to vector<512x128xf32>
    %c0_103 = arith.constant 0 : index
    %c512_104 = arith.constant 512 : index
    %77 = vector.load %arg9[%c0_103, %c512_104] : memref<512x1152xf32, #tpu.memory_space<vmem>>, vector<512x128xf32>
    tpu.vector_store %arg9[%c0_103, %c512_104], %76 {strides = array<i32>} : memref<512x1152xf32, #tpu.memory_space<vmem>>, vector<512x128xf32>,
    %c0_105 = arith.constant 0 : index
    %c1_106 = arith.constant 1 : index
    %c2_107 = arith.constant 2 : index
    %c0_108 = arith.constant 0 : index
    %78 = vector.load %arg8[%c0_105, %c1_106, %c2_107, %c0_108] : memref<2x18x18x128xf32, #tpu.memory_space<vmem>>, vector<2x16x16x128xf32>
    %79 = vector.shape_cast %78 : vector<2x16x16x128xf32> to vector<512x128xf32>
    %c0_109 = arith.constant 0 : index
    %c640_110 = arith.constant 640 : index
    %80 = vector.load %arg9[%c0_109, %c640_110] : memref<512x1152xf32, #tpu.memory_space<vmem>>, vector<512x128xf32>
    tpu.vector_store %arg9[%c0_109, %c640_110], %79 {strides = array<i32>} : memref<512x1152xf32, #tpu.memory_space<vmem>>, vector<512x128xf32>,
    %c0_111 = arith.constant 0 : index
    %c2_112 = arith.constant 2 : index
    %c0_113 = arith.constant 0 : index
    %c0_114 = arith.constant 0 : index
    %81 = vector.load %arg8[%c0_111, %c2_112, %c0_113, %c0_114] : memref<2x18x18x128xf32, #tpu.memory_space<vmem>>, vector<2x16x16x128xf32>
    %82 = vector.shape_cast %81 : vector<2x16x16x128xf32> to vector<512x128xf32>
    %c0_115 = arith.constant 0 : index
    %c768_116 = arith.constant 768 : index
    %83 = vector.load %arg9[%c0_115, %c768_116] : memref<512x1152xf32, #tpu.memory_space<vmem>>, vector<512x128xf32>
    tpu.vector_store %arg9[%c0_115, %c768_116], %82 {strides = array<i32>} : memref<512x1152xf32, #tpu.memory_space<vmem>>, vector<512x128xf32>,
    %c0_117 = arith.constant 0 : index
    %c2_118 = arith.constant 2 : index
    %c1_119 = arith.constant 1 : index
    %c0_120 = arith.constant 0 : index
    %84 = vector.load %arg8[%c0_117, %c2_118, %c1_119, %c0_120] : memref<2x18x18x128xf32, #tpu.memory_space<vmem>>, vector<2x16x16x128xf32>
    %85 = vector.shape_cast %84 : vector<2x16x16x128xf32> to vector<512x128xf32>
    %c0_121 = arith.constant 0 : index
    %c896_122 = arith.constant 896 : index
    %86 = vector.load %arg9[%c0_121, %c896_122] : memref<512x1152xf32, #tpu.memory_space<vmem>>, vector<512x128xf32>
    tpu.vector_store %arg9[%c0_121, %c896_122], %85 {strides = array<i32>} : memref<512x1152xf32, #tpu.memory_space<vmem>>, vector<512x128xf32>,
    %c0_123 = arith.constant 0 : index
    %c2_124 = arith.constant 2 : index
    %c2_125 = arith.constant 2 : index
    %c0_126 = arith.constant 0 : index
    %87 = vector.load %arg8[%c0_123, %c2_124, %c2_125, %c0_126] : memref<2x18x18x128xf32, #tpu.memory_space<vmem>>, vector<2x16x16x128xf32>
    %88 = vector.shape_cast %87 : vector<2x16x16x128xf32> to vector<512x128xf32>
    %c0_127 = arith.constant 0 : index
    %c1024_128 = arith.constant 1024 : index
    %89 = vector.load %arg9[%c0_127, %c1024_128] : memref<512x1152xf32, #tpu.memory_space<vmem>>, vector<512x128xf32>
    tpu.vector_store %arg9[%c0_127, %c1024_128], %88 {strides = array<i32>} : memref<512x1152xf32, #tpu.memory_space<vmem>>, vector<512x128xf32>,
    %c0_129 = arith.constant 0 : index
    %c0_130 = arith.constant 0 : index
    %90 = vector.load %arg9[%c0_129, %c0_130] : memref<512x1152xf32, #tpu.memory_space<vmem>>, vector<512x1152xf32>
    %c0_131 = arith.constant 0 : index
    %c0_132 = arith.constant 0 : index
    %91 = vector.load %arg2[%c0_131, %c0_132] : memref<1152x128xf32, #tpu.memory_space<vmem>>, vector<1152x128xf32>
    %cst_133 = arith.constant dense<0.000000e+00> : vector<512x128xf32>
    %92 = tpu.matmul %90, %91, %cst_133 {dimension_numbers = #tpu.dot_dimension_numbers<[1], [0], [0], [1], [0, 0, 1, 1], [], []>} : vector<512x1152xf32>, vector<1152x128xf32>, vector<512x128xf32> -> vector<512x128xf32>
    %cst_134 = arith.constant dense<0.000000e+00> : vector<128xf32>
    %93 = vector.multi_reduction <add>, %92, %cst_134 [0] : vector<512x128xf32> to vector<128xf32>
    %94 = vector.shape_cast %93 : vector<128xf32> to vector<1x128xf32>
    %95 = arith.mulf %92, %92 : vector<512x128xf32>
    %cst_135 = arith.constant dense<0.000000e+00> : vector<128xf32>
    %96 = vector.multi_reduction <add>, %95, %cst_135 [0] : vector<512x128xf32> to vector<128xf32>
    %97 = vector.shape_cast %96 : vector<128xf32> to vector<1x128xf32>
    %cst_136 = arith.constant 0.001953125 : f32
    %98 = vector.broadcast %cst_136 : f32 to vector<1x128xf32>
    %99 = arith.mulf %94, %98 : vector<1x128xf32>
    %cst_137 = arith.constant 0.001953125 : f32
    %100 = vector.broadcast %cst_137 : f32 to vector<1x128xf32>
    %101 = arith.mulf %97, %100 : vector<1x128xf32>
    %102 = arith.mulf %99, %99 : vector<1x128xf32>
    %103 = arith.subf %101, %102 : vector<1x128xf32>
    %cst_138 = arith.constant 0.000000e+00 : f32
    %104 = vector.broadcast %cst_138 : f32 to vector<1x128xf32>
    %105 = arith.maximumf %103, %104 : vector<1x128xf32>
    %c0_139 = arith.constant 0 : index
    %c0_140 = arith.constant 0 : index
    %106 = vector.load %arg5[%c0_139, %c0_140] : memref<1x128xf32, #tpu.memory_space<vmem>>, vector<1x128xf32>
    %cst_141 = arith.constant 9.99999974E-6 : f32
    %107 = vector.broadcast %cst_141 : f32 to vector<1x128xf32>
    %108 = arith.addf %105, %107 : vector<1x128xf32>
    %109 = math.rsqrt %108 : vector<1x128xf32>
    %110 = arith.mulf %106, %109 : vector<1x128xf32>
    %c0_142 = arith.constant 0 : index
    %c0_143 = arith.constant 0 : index
    %111 = vector.load %arg6[%c0_142, %c0_143] : memref<1x128xf32, #tpu.memory_space<vmem>>, vector<1x128xf32>
    %112 = arith.mulf %99, %110 : vector<1x128xf32>
    %113 = arith.subf %111, %112 : vector<1x128xf32>
    %114 = vector.broadcast %110 : vector<1x128xf32> to vector<512x128xf32>
    %115 = arith.mulf %92, %114 : vector<512x128xf32>
    %116 = vector.broadcast %113 : vector<1x128xf32> to vector<512x128xf32>
    %117 = arith.addf %115, %116 : vector<512x128xf32>
    %cst_144 = arith.constant 0.000000e+00 : f32
    %118 = vector.broadcast %cst_144 : f32 to vector<512x128xf32>
    %119 = arith.maximumf %117, %118 : vector<512x128xf32>
    %c0_145 = arith.constant 0 : index
    %c0_146 = arith.constant 0 : index
    %120 = vector.load %arg7[%c0_145, %c0_146] : memref<512x128xf32, #tpu.memory_space<vmem>>, vector<512x128xf32>
    tpu.vector_store %arg7[%c0_145, %c0_146], %119 {strides = array<i32>} : memref<512x128xf32, #tpu.memory_space<vmem>>, vector<512x128xf32>,
    return
  }
}

</mosaic_0001>

<bundles_post_ra>
// kernel: double_conv.1
= control target key start
LH: loop header
LB: loop body
LE: loop exit
PB: predicated region body
PF: predicated region fallthrough
CT: control target
= control target key end

     0   :  { %v9254_v0 = vmov 0.0   ;;  %s14047_s1 = inlined_call_operand.vmem [shape: f32[1152,128], index: 1, kind: input, shape index: {}]   ;;  %s14048_s0 = inlined_call_operand.vmem [shape: f32[2,16,16,128], index: 0, kind: input, shape index: {}]   ;;  %s14049_s2 = inlined_call_operand.vmem [shape: f32[1152,128], index: 2, kind: input, shape index: {}]   ;;  %s14050_s3 = inlined_call_operand.vmem [shape: f32[1,128], index: 3, kind: input, shape index: {}]   ;;  %s14051_s4 = inlined_call_operand.vmem [shape: f32[1,128], index: 4, kind: input, shape index: {}]   ;;  %s14052_s5 = inlined_call_operand.vmem [shape: f32[1,128], index: 5, kind: input, shape index: {}]   ;;  %s14053_s6 = inlined_call_operand.vmem [shape: f32[1,128], index: 6, kind: input, shape index: {}]   ;;  %s14054_s7 = inlined_call_operand.vmem [shape: f32[512,128], index: 7, kind: output, shape index: {}]  }
   0x1   :  { %2136 = vmatprep.subr.mxu0 %v9254_v0  ;;  %26 = vst [vmem:[#allocation2] sm:$0xff] %v9254_v0  ;;  %27 = vst [vmem:[#allocation2 + $0x8] sm:$0xff] %v9254_v0  ;;  %v2007_v1 = vld [vmem:[%s14047_s1 + $0x78] sm:$0xff]  ;;  %2521 = vmatprep.subr.mxu1 %v9254_v0  ;;  %v2006_v3 = vld [vmem:[%s14047_s1 + $0x70] sm:$0xff] }
   0x2   :  { %28 = vst [vmem:[#allocation2 + $0x10] sm:$0x3] %v9254_v0  ;;  %29 = vst [vmem:[#allocation2 + $0x18] sm:$0xff] %v9254_v0  ;;  %v2039_v2 = vld [vmem:[%s14047_s1 + $0x178] sm:$0xff]  ;;  %2137 = vmatpush1.msra.mxu0 %v2007_v1  ;;  %v2038_v4 = vld [vmem:[%s14047_s1 + $0x170] sm:$0xff] }
   0x3   :  { %30 = vst [vmem:[#allocation2 + $0x20] sm:$0xff] %v9254_v0  ;;  %31 = vst [vmem:[#allocation2 + $0x28] sm:$0x3] %v9254_v0  ;;  %2522 = vmatpush1.msra.mxu1 %v2039_v2  ;;  %2138 = vmatprep.subr.mxu0 %v9254_v0  ;;  %v2005_v5 = vld [vmem:[%s14047_s1 + $0x68] sm:$0xff]  ;;  %v2004_v7 = vld [vmem:[%s14047_s1 + $0x60] sm:$0xff] }
   0x4   :  { %32 = vst [vmem:[#allocation2 + $0x30] sm:$0xff] %v9254_v0  ;;  %33 = vst [vmem:[#allocation2 + $0x38] sm:$0xff] %v9254_v0  ;;  %2523 = vmatprep.subr.mxu1 %v9254_v0  ;;  %v2037_v6 = vld [vmem:[%s14047_s1 + $0x168] sm:$0xff]  ;;  %2139 = vmatpush1.msra.mxu0 %v2006_v3  ;;  %v2036_v8 = vld [vmem:[%s14047_s1 + $0x160] sm:$0xff] }
   0x5   :  { %34 = vst [vmem:[#allocation2 + $0x40] sm:$0x3] %v9254_v0  ;;  %35 = vst [vmem:[#allocation2 + $0x48] sm:$0xff] %v9254_v0  ;;  %2524 = vmatpush1.msra.mxu1 %v2038_v4  ;;  %2140 = vmatprep.subr.mxu0 %v9254_v0  ;;  %v2003_v9 = vld [vmem:[%s14047_s1 + $0x58] sm:$0xff]  ;;  %v2002_v11 = vld [vmem:[%s14047_s1 + $0x50] sm:$0xff] }
   0x6   :  { %36 = vst [vmem:[#allocation2 + $0x50] sm:$0xff] %v9254_v0  ;;  %37 = vst [vmem:[#allocation2 + $0x58] sm:$0x3] %v9254_v0  ;;  %2525 = vmatprep.subr.mxu1 %v9254_v0  ;;  %2141 = vmatpush1.msra.mxu0 %v2005_v5  ;;  %v2035_v10 = vld [vmem:[%s14047_s1 + $0x158] sm:$0xff]  ;;  %v2034_v12 = vld [vmem:[%s14047_s1 + $0x150] sm:$0xff] }
   0x7   :  { %38 = vst [vmem:[#allocation2 + $0x60] sm:$0xff] %v9254_v0  ;;  %39 = vst [vmem:[#allocation2 + $0x68] sm:$0xff] %v9254_v0  ;;  %2526 = vmatpush1.msra.mxu1 %v2037_v6  ;;  %2142 = vmatprep.subr.mxu0 %v9254_v0  ;;  %v2001_v13 = vld [vmem:[%s14047_s1 + $0x48] sm:$0xff]  ;;  %v2000_v15 = vld [vmem:[%s14047_s1 + $0x40] sm:$0xff] }
   0x8   :  { %40 = vst [vmem:[#allocation2 + $0x70] sm:$0x3] %v9254_v0  ;;  %41 = vst [vmem:[#allocation2 + $0x78] sm:$0xff] %v9254_v0  ;;  %2527 = vmatprep.subr.mxu1 %v9254_v0  ;;  %2143 = vmatpush1.msra.mxu0 %v2004_v7  ;;  %v2033_v14 = vld [vmem:[%s14047_s1 + $0x148] sm:$0xff]  ;;  %v2032_v16 = vld [vmem:[%s14047_s1 + $0x140] sm:$0xff] }
   0x9   :  { %42 = vst [vmem:[#allocation2 + $0x80] sm:$0xff] %v9254_v0  ;;  %43 = vst [vmem:[#allocation2 + $0x88] sm:$0x3] %v9254_v0  ;;  %2528 = vmatpush1.msra.mxu1 %v2036_v8  ;;  %2144 = vmatprep.subr.mxu0 %v9254_v0  ;;  %v1999_v17 = vld [vmem:[%s14047_s1 + $0x38] sm:$0xff]  ;;  %v1998_v19 = vld [vmem:[%s14047_s1 + $0x30] sm:$0xff] }
   0xa   :  { %44 = vst [vmem:[#allocation2 + $0x90] sm:$0xff] %v9254_v0  ;;  %45 = vst [vmem:[#allocation2 + $0x98] sm:$0xff] %v9254_v0  ;;  %2529 = vmatprep.subr.mxu1 %v9254_v0  ;;  %2145 = vmatpush1.msra.mxu0 %v2003_v9  ;;  %v2031_v18 = vld [vmem:[%s14047_s1 + $0x138] sm:$0xff]  ;;  %v2030_v20 = vld [vmem:[%s14047_s1 + $0x130] sm:$0xff] }
   0xb   :  { %46 = vst [vmem:[#allocation2 + $0xa0] sm:$0x3] %v9254_v0  ;;  %47 = vst [vmem:[#allocation2 + $0xa8] sm:$0xff] %v9254_v0  ;;  %2530 = vmatpush1.msra.mxu1 %v2035_v10  ;;  %2146 = vmatprep.subr.mxu0 %v9254_v0  ;;  %v1997_v21 = vld [vmem:[%s14047_s1 + $0x28] sm:$0xff]  ;;  %v1996_v23 = vld [vmem:[%s14047_s1 + $0x20] sm:$0xff] }
   0xc   :  { %48 = vst [vmem:[#allocation2 + $0xb0] sm:$0xff] %v9254_v0  ;;  %49 = vst [vmem:[#allocation2 + $0xb8] sm:$0x3] %v9254_v0  ;;  %2531 = vmatprep.subr.mxu1 %v9254_v0  ;;  %2147 = vmatpush1.msra.mxu0 %v2002_v11  ;;  %v2029_v22 = vld [vmem:[%s14047_s1 + $0x128] sm:$0xff]  ;;  %v2028_v24 = vld [vmem:[%s14047_s1 + $0x120] sm:$0xff] }
   0xd   :  { %50 = vst [vmem:[#allocation2 + $0xc0] sm:$0xff] %v9254_v0  ;;  %51 = vst [vmem:[#allocation2 + $0xc8] sm:$0xff] %v9254_v0  ;;  %2532 = vmatpush1.msra.mxu1 %v2034_v12  ;;  %2148 = vmatprep.subr.mxu0 %v9254_v0  ;;  %v9500_v25 = vld [vmem:[%s14048_s0] sm:$0xff]  ;;  %v1995_v26 = vld [vmem:[%s14047_s1 + $0x18] sm:$0xff] }
   0xe   :  { %52 = vst [vmem:[#allocation2 + $0xd0] sm:$0x3] %v9254_v0  ;;  %53 = vst [vmem:[#allocation2 + $0xd8] sm:$0xff] %v9254_v0  ;;  %2533 = vmatprep.subr.mxu1 %v9254_v0  ;;  %2149 = vmatpush1.msra.mxu0 %v2001_v13  ;;  %v2027_v27 = vld [vmem:[%s14047_s1 + $0x118] sm:$0xff]  ;;  %v1994_v28 = vld [vmem:[%s14047_s1 + $0x10] sm:$0xff] }
   0xf   :  { %54 = vst [vmem:[#allocation2 + $0xe0] sm:$0xff] %v9254_v0  ;;  %55 = vst [vmem:[#allocation2 + $0xe8] sm:$0x3] %v9254_v0  ;;  %2534 = vmatpush1.msra.mxu1 %v2033_v14  ;;  %2150 = vmatprep.subr.mxu0 %v9254_v0  ;;  %v9517_v29 = vld [vmem:[%s14048_s0 + $0x8] sm:$0xff]  ;;  %v9522_v30 = vld [vmem:[%s14048_s0 + $0x10] sm:$0xff] }
  0x10   :  { %56 = vst [vmem:[#allocation2 + $0xf0] sm:$0xff] %v9254_v0  ;;  %57 = vst [vmem:[#allocation2 + $0xf8] sm:$0xff] %v9254_v0  ;;  %2535 = vmatprep.subr.mxu1 %v9254_v0  ;;  %2151 = vmatpush1.msra.mxu0 %v2000_v15  ;;  %v2026_v31 = vld [vmem:[%s14047_s1 + $0x110] sm:$0xff]  ;;  %v9534_v32 = vld [vmem:[%s14048_s0 + $0x18] sm:$0xff] }
  0x11   :  { %58 = vst [vmem:[#allocation2 + $0x100] sm:$0x3] %v9254_v0  ;;  %59 = vst [vmem:[#allocation2 + $0x108] sm:$0xff] %v9254_v0  ;;  %2536 = vmatpush1.msra.mxu1 %v2032_v16  ;;  %2152 = vmatprep.subr.mxu0 %v9254_v0  ;;  %v9539_v33 = vld [vmem:[%s14048_s0 + $0x20] sm:$0xff]  ;;  %v1993_v34 = vld [vmem:[%s14047_s1 + $0x8] sm:$0xff] }
  0x12   :  { %60 = vst [vmem:[#allocation2 + $0x110] sm:$0xff] %v9254_v0  ;;  %61 = vst [vmem:[#allocation2 + $0x118] sm:$0x3] %v9254_v0  ;;  %2537 = vmatprep.subr.mxu1 %v9254_v0  ;;  %2153 = vmatpush1.msra.mxu0 %v1999_v17  ;;  %v9549_v35 = vld [vmem:[%s14048_s0 + $0x28] sm:$0xff]  ;;  %v9554_v36 = vld [vmem:[%s14048_s0 + $0x30] sm:$0xff] }
  0x13   :  { %62 = vst [vmem:[#allocation2 + $0x120] sm:$0xff] %v9254_v0  ;;  %63 = vst [vmem:[#allocation2 + $0x128] sm:$0xff] %v9254_v0  ;;  %2538 = vmatpush1.msra.mxu1 %v2031_v18  ;;  %2154 = vmatprep.subr.mxu0 %v9254_v0  ;;  %v2025_v37 = vld [vmem:[%s14047_s1 + $0x108] sm:$0xff]  ;;  %v9566_v38 = vld [vmem:[%s14048_s0 + $0x38] sm:$0xff] }
  0x14   :  { %64 = vst [vmem:[#allocation2 + $0x130] sm:$0x3] %v9254_v0  ;;  %65 = vst [vmem:[#allocation2 + $0x138] sm:$0xff] %v9254_v0  ;;  %2539 = vmatprep.subr.mxu1 %v9254_v0  ;;  %2155 = vmatpush1.msra.mxu0 %v1998_v19  ;;  %v9571_v39 = vld [vmem:[%s14048_s0 + $0x40] sm:$0xff]  ;;  %v9581_v41 = vld [vmem:[%s14048_s0 + $0x48] sm:$0xff] }
  0x15   :  { %66 = vst [vmem:[#allocation2 + $0x140] sm:$0xff] %v9254_v0  ;;  %67 = vst [vmem:[#allocation2 + $0x148] sm:$0x3] %v9254_v0  ;;  %2540 = vmatpush1.msra.mxu1 %v2030_v20  ;;  %2156 = vmatprep.subr.mxu0 %v9254_v0  ;;  %v1992_v40 = vld [vmem:[%s14047_s1] sm:$0xff]  ;;  %v9586_v42 = vld [vmem:[%s14048_s0 + $0x50] sm:$0xff] }
  0x16   :  { %68 = vst [vmem:[#allocation2 + $0x150] sm:$0xff] %v9254_v0  ;;  %69 = vst [vmem:[#allocation2 + $0x158] sm:$0xff] %v9254_v0  ;;  %2541 = vmatprep.subr.mxu1 %v9254_v0  ;;  %2157 = vmatpush1.msra.mxu0 %v1997_v21  ;;  %v2024_v43 = vld [vmem:[%s14047_s1 + $0x100] sm:$0xff]  ;;  %v9598_v44 = vld [vmem:[%s14048_s0 + $0x58] sm:$0xff] }
  0x17   :  { %70 = vst [vmem:[#allocation2 + $0x160] sm:$0x3] %v9254_v0  ;;  %71 = vst [vmem:[#allocation2 + $0x168] sm:$0xff] %v9254_v0  ;;  %2542 = vmatpush1.msra.mxu1 %v2029_v22  ;;  %2158 = vmatprep.subr.mxu0 %v9254_v0  ;;  %v9603_v45 = vld [vmem:[%s14048_s0 + $0x60] sm:$0xff]  ;;  %v2023_v46 = vld [vmem:[%s14047_s1 + $0xf8] sm:$0xff] }
  0x18   :  { %72 = vst [vmem:[#allocation2 + $0x170] sm:$0xff] %v9254_v0  ;;  %73 = vst [vmem:[#allocation2 + $0x178] sm:$0x3] %v9254_v0  ;;  %2543 = vmatprep.subr.mxu1 %v9254_v0  ;;  %2159 = vmatpush1.msra.mxu0 %v1996_v23  ;;  %v9613_v47 = vld [vmem:[%s14048_s0 + $0x68] sm:$0xff]  ;;  %v2055_v48 = vld [vmem:[%s14047_s1 + $0x1f8] sm:$0xff] }
  0x19   :  { %74 = vst [vmem:[#allocation2 + $0x180] sm:$0xff] %v9254_v0  ;;  %75 = vst [vmem:[#allocation2 + $0x188] sm:$0xff] %v9254_v0  ;;  %2544 = vmatpush1.msra.mxu1 %v2028_v24  ;;  %2160 = vmatprep.subr.mxu0 %v9254_v0  ;;  %v9624_v49 = vld [vmem:[%s14048_s0 + $0x70] sm:$0xff]  ;;  %v9629_v50 = vld [vmem:[%s14048_s0 + $0x78] sm:$0xff] }
  0x1a   :  { %76 = vst [vmem:[#allocation2 + $0x190] sm:$0x3] %v9254_v0  ;;  %77 = vst [vmem:[#allocation2 + $0x198] sm:$0xff] %v9254_v0  ;;  %2545 = vmatprep.subr.mxu1 %v9254_v0  ;;  %2161 = vmatpush1.msra.mxu0 %v1995_v26  ;;  %v2022_v51 = vld [vmem:[%s14047_s1 + $0xf0] sm:$0xff]  ;;  %v2021_v53 = vld [vmem:[%s14047_s1 + $0xe8] sm:$0xff] }
  0x1b   :  { %78 = vst [vmem:[#allocation2 + $0x1a0] sm:$0xff] %v9254_v0  ;;  %79 = vst [vmem:[#allocation2 + $0x1a8] sm:$0x3] %v9254_v0  ;;  %2546 = vmatpush1.msra.mxu1 %v2027_v27  ;;  %2162 = vmatprep.subr.mxu0 %v9254_v0  ;;  %v2054_v52 = vld [vmem:[%s14047_s1 + $0x1f0] sm:$0xff]  ;;  %v2053_v54 = vld [vmem:[%s14047_s1 + $0x1e8] sm:$0xff] }
  0x1c   :  { %80 = vst [vmem:[#allocation2 + $0x1b0] sm:$0xff] %v9254_v0  ;;  %81 = vst [vmem:[#allocation2 + $0x1b8] sm:$0xff] %v9254_v0  ;;  %2547 = vmatprep.subr.mxu1 %v9254_v0  ;;  %2163 = vmatpush1.msra.mxu0 %v1994_v28  ;;  %v2020_v55 = vld [vmem:[%s14047_s1 + $0xe0] sm:$0xff]  ;;  %v2019_v57 = vld [vmem:[%s14047_s1 + $0xd8] sm:$0xff] }
  0x1d   :  { %82 = vst [vmem:[#allocation2 + $0x1c0] sm:$0x3] %v9254_v0  ;;  %83 = vst [vmem:[#allocation2 + $0x1c8] sm:$0xff] %v9254_v0  ;;  %2548 = vmatpush1.msra.mxu1 %v2026_v31  ;;  %2164 = vmatprep.subr.mxu0 %v9254_v0  ;;  %v2052_v56 = vld [vmem:[%s14047_s1 + $0x1e0] sm:$0xff]  ;;  %v2051_v58 = vld [vmem:[%s14047_s1 + $0x1d8] sm:$0xff] }
  0x1e   :  { %84 = vst [vmem:[#allocation2 + $0x1d0] sm:$0xff] %v9254_v0  ;;  %85 = vst [vmem:[#allocation2 + $0x1d8] sm:$0x3] %v9254_v0  ;;  %2549 = vmatprep.subr.mxu1 %v9254_v0  ;;  %2165 = vmatpush1.msra.mxu0 %v1993_v34  ;;  %v2018_v59 = vld [vmem:[%s14047_s1 + $0xd0] sm:$0xff]  ;;  %v9676_v61 = vld [vmem:[%s14048_s0 + $0x80] sm:$0xff] }
  0x1f   :  { %86 = vst [vmem:[#allocation2 + $0x1e0] sm:$0xff] %v9254_v0  ;;  %87 = vst [vmem:[#allocation2 + $0x1e8] sm:$0xff] %v9254_v0  ;;  %2550 = vmatpush1.msra.mxu1 %v2025_v37  ;;  %2166 = vmatprep.subr.mxu0 %v9254_v0  ;;  %v2050_v60 = vld [vmem:[%s14047_s1 + $0x1d0] sm:$0xff]  ;;  %v9682_v62 = vld [vmem:[%s14048_s0 + $0x88] sm:$0xff] }
  0x20   :  { %88 = vst [vmem:[#allocation2 + $0x1f0] sm:$0x3] %v9254_v0  ;;  %89 = vst [vmem:[#allocation2 + $0x1f8] sm:$0xff] %v9254_v0  ;;  %2551 = vmatprep.subr.mxu1 %v9254_v0  ;;  %2167 = vmatpush1.msra.mxu0 %v1992_v40  ;;  %v2017_v63 = vld [vmem:[%s14047_s1 + $0xc8] sm:$0xff]  ;;  %v9696_v2 = vld [vmem:[%s14048_s0 + $0x90] sm:$0xff] }
  0x21   :  { %90 = vst [vmem:[#allocation2 + $0x200] sm:$0xff] %v9254_v0  ;;  %91 = vst [vmem:[#allocation2 + $0x208] sm:$0x3] %v9254_v0  ;;  %2552 = vmatpush1.msra.mxu1 %v2024_v43  ;;  %2168 = vmatprep.subr.mxu0 %v9254_v0  ;;  %v2049_v1 = vld [vmem:[%s14047_s1 + $0x1c8] sm:$0xff]  ;;  %v2016_v3 = vld [vmem:[%s14047_s1 + $0xc0] sm:$0xff] }
  0x22   :  { %92 = vst [vmem:[#allocation2 + $0x210] sm:$0xff] %v9254_v0  ;;  %93 = vst [vmem:[#allocation2 + $0x218] sm:$0xff] %v9254_v0  ;;  %2553 = vmatprep.subr.mxu1 %v9254_v0  ;;  %2169 = vmatpush2.msra.mxu0 %v2023_v46  ;;  %v9705_v4 = vld [vmem:[%s14048_s0 + $0x98] sm:$0xff]  ;;  %v9710_v5 = vld [vmem:[%s14048_s0 + $0xa0] sm:$0xff] }
  0x23   :  { %94 = vst [vmem:[#allocation2 + $0x220] sm:$0x3] %v9254_v0  ;;  %95 = vst [vmem:[#allocation2 + $0x228] sm:$0xff] %v9254_v0  ;;  %2554 = vmatpush2.msra.mxu1 %v2055_v48  ;;  %2170 = vmatprep.subr.mxu0 %v9254_v0  ;;  %v2048_v6 = vld [vmem:[%s14047_s1 + $0x1c0] sm:$0xff]  ;;  %v9722_v7 = vld [vmem:[%s14048_s0 + $0xa8] sm:$0xff] }
  0x24   :  { %96 = vst [vmem:[#allocation2 + $0x230] sm:$0xff] %v9254_v0  ;;  %97 = vst [vmem:[#allocation2 + $0x238] sm:$0x3] %v9254_v0  ;;  %2555 = vmatprep.subr.mxu1 %v9254_v0  ;;  %2171 = vmatpush2.msra.mxu0 %v2022_v51  ;;  %v9727_v8 = vld [vmem:[%s14048_s0 + $0xb0] sm:$0xff]  ;;  %v2015_v9 = vld [vmem:[%s14047_s1 + $0xb8] sm:$0xff] }
  0x25   :  { %98 = vst [vmem:[#allocation2 + $0x240] sm:$0xff] %v9254_v0  ;;  %99 = vst [vmem:[#allocation2 + $0x248] sm:$0xff] %v9254_v0  ;;  %2556 = vmatpush2.msra.mxu1 %v2054_v52  ;;  %2172 = vmatprep.subr.mxu0 %v9254_v0  ;;  %v9737_v10 = vld [vmem:[%s14048_s0 + $0xb8] sm:$0xff]  ;;  %v9742_v11 = vld [vmem:[%s14048_s0 + $0xc0] sm:$0xff] }
  0x26   :  { %100 = vst [vmem:[#allocation2 + $0x250] sm:$0x3] %v9254_v0  ;;  %101 = vst [vmem:[#allocation2 + $0x258] sm:$0xff] %v9254_v0  ;;  %2557 = vmatprep.subr.mxu1 %v9254_v0  ;;  %2173 = vmatpush2.msra.mxu0 %v2021_v53  ;;  %v2047_v12 = vld [vmem:[%s14047_s1 + $0x1b8] sm:$0xff]  ;;  %v9754_v13 = vld [vmem:[%s14048_s0 + $0xc8] sm:$0xff] }
  0x27   :  { %102 = vst [vmem:[#allocation2 + $0x260] sm:$0xff] %v9254_v0  ;;  %103 = vst [vmem:[#allocation2 + $0x268] sm:$0x3] %v9254_v0  ;;  %2558 = vmatpush2.msra.mxu1 %v2053_v54  ;;  %2174 = vmatprep.subr.mxu0 %v9254_v0  ;;  %v9759_v14 = vld [vmem:[%s14048_s0 + $0xd0] sm:$0xff]  ;;  %v9766_v15 = vld [vmem:[%s14048_s0 + $0xd8] sm:$0xff] }
  0x28   :  { %104 = vst [vmem:[#allocation2 + $0x270] sm:$0xff] %v9254_v0  ;;  %105 = vst [vmem:[#allocation2 + $0x278] sm:$0xff] %v9254_v0  ;;  %2559 = vmatprep.subr.mxu1 %v9254_v0  ;;  %2175 = vmatpush2.msra.mxu0 %v2020_v55  ;;  %v9771_v16 = vld [vmem:[%s14048_s0 + $0xe0] sm:$0xff]  ;;  %v9776_v17 = vld [vmem:[%s14048_s0 + $0xe8] sm:$0xff] }
  0x29   :  { %106 = vst [vmem:[#allocation2 + $0x280] sm:$0x3] %v9254_v0  ;;  %107 = vst [vmem:[#allocation2 + $0x288] sm:$0xff] %v9254_v0  ;;  %2560 = vmatpush2.msra.mxu1 %v2052_v56  ;;  %2176 = vmatprep.subr.mxu0 %v9254_v0  ;;  %v2014_v18 = vld [vmem:[%s14047_s1 + $0xb0] sm:$0xff]  ;;  %v2013_v21 = vld [vmem:[%s14047_s1 + $0xa8] sm:$0xff] }
  0x2a   :  { %108 = vst [vmem:[#allocation2 + $0x290] sm:$0xff] %v9254_v0  ;;  %109 = vst [vmem:[#allocation2 + $0x298] sm:$0x3] %v9254_v0  ;;  %2561 = vmatprep.subr.mxu1 %v9254_v0  ;;  %2177 = vmatpush2.msra.mxu0 %v2019_v57  ;;  %v2046_v19 = vld [vmem:[%s14047_s1 + $0x1b0] sm:$0xff]  ;;  %v2045_v22 = vld [vmem:[%s14047_s1 + $0x1a8] sm:$0xff] }
  0x2b   :  { %110 = vst [vmem:[#allocation2 + $0x2a0] sm:$0xff] %v9254_v0  ;;  %111 = vst [vmem:[#allocation2 + $0x2a8] sm:$0xff] %v9254_v0  ;;  %2562 = vmatpush2.msra.mxu1 %v2051_v58  ;;  %2178 = vmatprep.subr.mxu0 %v9254_v0  ;;  %v164_v20 = vld [vmem:[%s14048_s0 + $0xf0] sm:$0xff]  ;;  %v2012_v23 = vld [vmem:[%s14047_s1 + $0xa0] sm:$0xff] }
  0x2c   :  { %112 = vst [vmem:[#allocation2 + $0x2b0] sm:$0x3] %v9254_v0  ;;  %113 = vst [vmem:[#allocation2 + $0x2b8] sm:$0xff] %v9254_v0  ;;  %2563 = vmatprep.subr.mxu1 %v9254_v0  ;;  %2179 = vmatpush2.msra.mxu0 %v2018_v59  ;;  %v2044_v24 = vld [vmem:[%s14047_s1 + $0x1a0] sm:$0xff]  ;;  %v2011_v26 = vld [vmem:[%s14047_s1 + $0x98] sm:$0xff] }
  0x2d   :  { %114 = vst [vmem:[#allocation2 + $0x2c0] sm:$0xff] %v9254_v0  ;;  %115 = vst [vmem:[#allocation2 + $0x2c8] sm:$0x3] %v9254_v0  ;;  %2564 = vmatpush2.msra.mxu1 %v2050_v60  ;;  %2180 = vmatprep.subr.mxu0 %v9254_v0  ;;  %v2043_v27 = vld [vmem:[%s14047_s1 + $0x198] sm:$0xff]  ;;  %v2010_v28 = vld [vmem:[%s14047_s1 + $0x90] sm:$0xff] }
  0x2e   :  { %116 = vst [vmem:[#allocation2 + $0x2d0] sm:$0xff] %v9254_v0  ;;  %117 = vst [vmem:[#allocation2 + $0x2d8] sm:$0xff] %v9254_v0  ;;  %2565 = vmatprep.subr.mxu1 %v9254_v0  ;;  %2181 = vmatpush2.msra.mxu0 %v2017_v63  ;;  %v2042_v31 = vld [vmem:[%s14047_s1 + $0x190] sm:$0xff]  ;;  %v2009_v34 = vld [vmem:[%s14047_s1 + $0x88] sm:$0xff] }
  0x2f   :  { %118 = vst [vmem:[#allocation2 + $0x2e0] sm:$0x3] %v9254_v0  ;;  %119 = vst [vmem:[#allocation2 + $0x2e8] sm:$0xff] %v9254_v0  ;;  %2566 = vmatpush2.msra.mxu1 %v2049_v1  ;;  %2182 = vmatprep.subr.mxu0 %v9254_v0  ;;  %v2041_v37 = vld [vmem:[%s14047_s1 + $0x188] sm:$0xff]  ;;  %v165_v43 = vld [vmem:[%s14048_s0 + $0xf8] sm:$0xff] }
  0x30   :  { %120 = vst [vmem:[#allocation2 + $0x2f0] sm:$0xff] %v9254_v0  ;;  %121 = vst [vmem:[#allocation2 + $0x2f8] sm:$0x3] %v9254_v0  ;;  %2567 = vmatprep.subr.mxu1 %v9254_v0  ;;  %2183 = vmatpush2.msra.mxu0 %v2016_v3  ;;  %v391_v40 = vld [vmem:[#allocation2 + $0x1] sm:$0xff]  ;;  %v2071_v55 = vld [vmem:[%s14047_s1 + $0x278] sm:$0xff] }
  0x31   :  { %122 = vst [vmem:[#allocation2 + $0x300] sm:$0xff] %v9254_v0  ;;  %123 = vst [vmem:[#allocation2 + $0x308] sm:$0xff] %v9254_v0  ;;  %2568 = vmatpush2.msra.mxu1 %v2048_v6  ;;  %2184 = vmatprep.subr.mxu0 %v9254_v0  ;;  %v9838_v46 = vld [vmem:[%s14048_s0 + $0x100] sm:$0xff]  ;;  %v9849_v51 = vld [vmem:[%s14048_s0 + $0x108] sm:$0xff] }
  0x32   :  { %124 = vst [vmem:[#allocation2 + $0x310] sm:$0x3] %v9254_v0  ;;  %125 = vst [vmem:[#allocation2 + $0x318] sm:$0xff] %v9254_v0  ;;  %2569 = vmatprep.subr.mxu1 %v9254_v0  ;;  %2185 = vmatpush2.msra.mxu0 %v2015_v9  ;;  %v2008_v48 = vld [vmem:[%s14047_s1 + $0x80] sm:$0xff]  ;;  %v392_v56 = vld [vmem:[#allocation2 + $0x9] sm:$0xff] }
  0x33   :  { %126 = vst [vmem:[#allocation2 + $0x320] sm:$0xff] %v9254_v0  ;;  %127 = vst [vmem:[#allocation2 + $0x328] sm:$0x3] %v9254_v0  ;;  %2570 = vmatpush2.msra.mxu1 %v2047_v12  ;;  %2186 = vmatprep.subr.mxu0 %v9254_v0  ;;  %v2040_v52 = vld [vmem:[%s14047_s1 + $0x180] sm:$0xff]  ;;  %v9864_v58 = vld [vmem:[%s14048_s0 + $0x110] sm:$0xff] }
  0x34   :  { %128 = vst [vmem:[#allocation2 + $0x330] sm:$0xff] %v9254_v0  ;;  %129 = vst [vmem:[#allocation2 + $0x338] sm:$0xff] %v9254_v0  ;;  %2571 = vmatprep.subr.mxu1 %v9254_v0  ;;  %2187 = vmatpush2.msra.mxu0 %v2014_v18  ;;  %v519_v54 = vld [vmem:[#allocation2 + $0x2] sm:$0xff]  ;;  %v2070_v59 = vld [vmem:[%s14047_s1 + $0x270] sm:$0xff] }
  0x35   :  { %130 = vst [vmem:[#allocation2 + $0x340] sm:$0x3] %v9254_v0  ;;  %131 = vst [vmem:[#allocation2 + $0x348] sm:$0xff] %v9254_v0  ;;  %2572 = vmatpush2.msra.mxu1 %v2046_v19  ;;  %2188 = vmatprep.subr.mxu0 %v9254_v0  ;;  %v520_v60 = vld [vmem:[#allocation2 + $0xa] sm:$0xff]  ;;  %v9879_v3 = vld [vmem:[%s14048_s0 + $0x118] sm:$0xff] }
  0x36   :  { %132 = vst [vmem:[#allocation2 + $0x350] sm:$0xff] %v9254_v0  ;;  %133 = vst [vmem:[#allocation2 + $0x358] sm:$0x3] %v9254_v0  ;;  %2573 = vmatprep.subr.mxu1 %v9254_v0  ;;  %2189 = vmatpush2.msra.mxu0 %v2013_v21  ;;  %v2069_v1 = vld [vmem:[%s14047_s1 + $0x268] sm:$0xff]  ;;  %v2068_v6 = vld [vmem:[%s14047_s1 + $0x260] sm:$0xff] }
  0x37   :  { %199 = vst [vmem:[#allocation2 + $0x19] sm:$0xff] %v9500_v25  ;;  %200 = vst [vmem:[#allocation2 + $0x21] sm:$0xff] %v9517_v29  ;;  %2574 = vmatpush2.msra.mxu1 %v2045_v22  ;;  %2190 = vmatprep.subr.mxu0 %v9254_v0  ;;  %v9894_v18 = vld [vmem:[%s14048_s0 + $0x120] sm:$0xff]  ;;  %v2066_v19 = vld [vmem:[%s14047_s1 + $0x250] sm:$0xff] }
  0x38   :  { %201 = vst [vmem:[#allocation2 + $0x31] sm:$0xff] %v9522_v30  ;;  %202 = vst [vmem:[#allocation2 + $0x39] sm:$0xff] %v9534_v32  ;;  %2575 = vmatprep.subr.mxu1 %v9254_v0  ;;  %2191 = vmatpush2.msra.mxu0 %v2012_v23  ;;  %v9909_v22 = vld [vmem:[%s14048_s0 + $0x128] sm:$0xff]  ;;  %v2064_v23 = vld [vmem:[%s14047_s1 + $0x240] sm:$0xff] }
  0x39   :  { %203 = vst [vmem:[#allocation2 + $0x49] sm:$0xff] %v9539_v33  ;;  %204 = vst [vmem:[#allocation2 + $0x51] sm:$0xff] %v9549_v35  ;;  %2576 = vmatpush2.msra.mxu1 %v2044_v24  ;;  %2192 = vmatprep.subr.mxu0 %v9254_v0 }
  0x3a   :  { %205 = vst [vmem:[#allocation2 + $0x61] sm:$0xff] %v9554_v36  ;;  %206 = vst [vmem:[#allocation2 + $0x69] sm:$0xff] %v9566_v38  ;;  %2577 = vmatprep.subr.mxu1 %v9254_v0  ;;  %2193 = vmatpush2.msra.mxu0 %v2011_v26 }
  0x3b   :  { %207 = vst [vmem:[#allocation2 + $0x79] sm:$0xff] %v9571_v39  ;;  %208 = vst [vmem:[#allocation2 + $0x81] sm:$0xff] %v9581_v41  ;;  %2578 = vmatpush2.msra.mxu1 %v2043_v27  ;;  %2194 = vmatprep.subr.mxu0 %v9254_v0  ;;  %v9924_v27 = vld [vmem:[%s14048_s0 + $0x130] sm:$0xff] }
  0x3c   :  { %209 = vst [vmem:[#allocation2 + $0x91] sm:$0xff] %v9586_v42  ;;  %210 = vst [vmem:[#allocation2 + $0x99] sm:$0xff] %v9598_v44  ;;  %2579 = vmatprep.subr.mxu1 %v9254_v0  ;;  %2195 = vmatpush2.msra.mxu0 %v2010_v28  ;;  %v2062_v28 = vld [vmem:[%s14047_s1 + $0x230] sm:$0xff] }
  0x3d   :  { %211 = vst [vmem:[#allocation2 + $0xa9] sm:$0xff] %v9603_v45  ;;  %212 = vst [vmem:[#allocation2 + $0xb1] sm:$0xff] %v9613_v47  ;;  %2580 = vmatpush2.msra.mxu1 %v2042_v31  ;;  %2196 = vmatprep.subr.mxu0 %v9254_v0 }
  0x3e   :  { %213 = vst [vmem:[#allocation2 + $0xc1] sm:$0xff] %v9624_v49  ;;  %214 = vst [vmem:[#allocation2 + $0xc9] sm:$0xff] %v9629_v50  ;;  %2581 = vmatprep.subr.mxu1 %v9254_v0  ;;  %2197 = vmatpush2.msra.mxu0 %v2009_v34  ;;  %v647_v53 = vld [vmem:[#allocation2 + $0x18] sm:$0xff]  ;;  %v648_v57 = vld [vmem:[#allocation2 + $0x20] sm:$0xff] }
  0x3f   :  { %215 = vst [vmem:[#allocation2 + $0xd9] sm:$0xff] %v9676_v61  ;;  %216 = vst [vmem:[#allocation2 + $0xe1] sm:$0xff] %v9682_v62  ;;  %2582 = vmatpush2.msra.mxu1 %v2041_v37  ;;  %2198 = vmatprep.subr.mxu0 %v9254_v0  ;;  %v649_v63 = vld [vmem:[#allocation2 + $0x30] sm:$0xff]  ;;  %v521_v9 = vld [vmem:[#allocation2 + $0x1a] sm:$0xff] }
  0x40   :  { %217 = vst [vmem:[#allocation2 + $0xf1] sm:$0xff] %v9696_v2  ;;  %218 = vst [vmem:[#allocation2 + $0xf9] sm:$0xff] %v9705_v4  ;;  %2200 = vmatprep.mubr.f32.mxu0 %v391_v40  ;;  %2199 = vmatpush2.msra.mxu0 %v2008_v48  ;;  %v650_v12 = vld [vmem:[#allocation2 + $0x38] sm:$0xff]  ;;  %v651_v21 = vld [vmem:[#allocation2 + $0x48] sm:$0xff] }
  0x41   :  { %219 = vst [vmem:[#allocation2 + $0x109] sm:$0xff] %v9710_v5  ;;  %220 = vst [vmem:[#allocation2 + $0x111] sm:$0xff] %v9722_v7  ;;  %2583 = vmatprep.subr.mxu1 %v9254_v0  ;;  %2201 = vmatmul.mubr.f32.vlgmr.msra.gmra.mxu0 %v9254_v0  ;;  %v523_v24 = vld [vmem:[#allocation2 + $0x32] sm:$0xff]  ;;  %v524_v31 = vld [vmem:[#allocation2 + $0x3a] sm:$0xff] }
  0x42   :  { %221 = vst [vmem:[#allocation2 + $0x121] sm:$0xff] %v9727_v8  ;;  %222 = vst [vmem:[#allocation2 + $0x129] sm:$0xff] %v9737_v10  ;;  %2584 = vmatpush2.msra.mxu1 %v2040_v52  ;;  %2585 = vmatprep.mubr.f32.mxu1 %v647_v53  ;;  %v652_v26 = vld [vmem:[#allocation2 + $0x50] sm:$0xff]  ;;  %v653_v34 = vld [vmem:[#allocation2 + $0x60] sm:$0xff] }
  0x43   :  { %223 = vst [vmem:[#allocation2 + $0x139] sm:$0xff] %v9742_v11  ;;  %224 = vst [vmem:[#allocation2 + $0x141] sm:$0xff] %v9754_v13  ;;  %2906 = vmatprep.subr.mxu0 %v9254_v0  ;;  %2586 = vmatmul.mubr.f32.vlgmr.msra.gmra.mxu1 %v519_v54  ;;  %v9939_v37 = vld [vmem:[%s14048_s0 + $0x138] sm:$0xff]  ;;  %v2060_v40 = vld [vmem:[%s14047_s1 + $0x220] sm:$0xff] }
  0x44   :  { %225 = vst [vmem:[#allocation2 + $0x151] sm:$0xff] %v9759_v14  ;;  %226 = vst [vmem:[#allocation2 + $0x159] sm:$0xff] %v9766_v15  ;;  %2907 = vmatpush1.msra.mxu0 %v2071_v55  ;;  %2205 = vmatprep.mubr.f32.mxu0 %v392_v56  ;;  %v654_v48 = vld [vmem:[#allocation2 + $0x68] sm:$0xff]  ;;  %v9954_v52 = vld [vmem:[%s14048_s0 + $0x140] sm:$0xff] }
  0x45   :  { %227 = vst [vmem:[#allocation2 + $0x169] sm:$0xff] %v9771_v16  ;;  %228 = vst [vmem:[#allocation2 + $0x171] sm:$0xff] %v9776_v17  ;;  %2590 = vmatprep.mubr.f32.mxu1 %v648_v57  ;;  %2206 = vmatmul.mubr.f32.gmra.mxu0 %v9254_v0  ;;  %v526_v54 = vld [vmem:[#allocation2 + $0x52] sm:$0xff]  ;;  %v9969_v56 = vld [vmem:[%s14048_s0 + $0x148] sm:$0xff] }
  0x46   :  { %229 = vst [vmem:[#allocation2 + $0x181] sm:$0xff] %v164_v20  ;;  %230 = vst [vmem:[#allocation2 + $0x189] sm:$0xff] %v165_v43  ;;  %2908 = vmatprep.subr.mxu0 %v9254_v0  ;;  %2210 = vmatprep.mubr.f32.mxu0 %v9500_v25  ;;  %v2067_v25 = vld [vmem:[%s14047_s1 + $0x258] sm:$0xff]  ;;  %v522_v20 = vld [vmem:[#allocation2 + $0x22] sm:$0xff] }
  0x47   :  { %231 = vst [vmem:[#allocation2 + $0x1c9] sm:$0xff] %v9838_v46  ;;  %232 = vst [vmem:[#allocation2 + $0x1d1] sm:$0xff] %v9849_v51  ;;  %2909 = vmatpush1.msra.mxu0 %v2070_v59  ;;  %2591 = vmatmul.mubr.f32.gmra.mxu1 %v520_v60  ;;  %v525_v43 = vld [vmem:[#allocation2 + $0x4a] sm:$0xff]  ;;  %v655_v55 = vld [vmem:[#allocation2 + $0x78] sm:$0xff] }
  0x48   :  { %233 = vst [vmem:[#allocation2 + $0x1e1] sm:$0xff] %v9864_v58  ;;  %234 = vst [vmem:[#allocation2 + $0x1e9] sm:$0xff] %v9879_v3  ;;  %2910 = vmatprep.subr.mxu0 %v9254_v0  ;;  %2595 = vmatprep.mubr.f32.mxu1 %v649_v63  ;;  %v527_v59 = vld [vmem:[#allocation2 + $0x62] sm:$0xff] }
  0x49   :  { %2911 = vmatpush1.msra.mxu0 %v2069_v1  ;;  %235 = vst [vmem:[#allocation2 + $0x1f9] sm:$0xff] %v9894_v18  ;;  %236 = vst [vmem:[#allocation2 + $0x201] sm:$0xff] %v9909_v22  ;;  %v656_v60 = vld [vmem:[#allocation2 + $0x80] sm:$0xff]  ;;  %v2103_v1 = vld [vmem:[%s14047_s1 + $0x378] sm:$0xff]  ;;  %3291 = vmatprep.subr.mxu1 %v9254_v0 }
  0x4a   :  { %2211 = vmatmul.mubr.f32.gmra.mxu0 %v647_v53  ;;  %2912 = vmatprep.subr.mxu0 %v9254_v0  ;;  %237 = vst [vmem:[#allocation2 + $0x211] sm:$0xff] %v9924_v27  ;;  %238 = vst [vmem:[#allocation2 + $0x219] sm:$0xff] %v9939_v37  ;;  %v2058_v53 = vld [vmem:[%s14047_s1 + $0x210] sm:$0xff] }
  0x4b   :  { %2215 = vmatprep.mubr.f32.mxu0 %v9517_v29  ;;  %2913 = vmatpush1.msra.mxu0 %v2068_v6  ;;  %v2065_v29 = vld [vmem:[%s14047_s1 + $0x248] sm:$0xff]  ;;  %239 = vst [vmem:[#allocation2 + $0x229] sm:$0xff] %v9954_v52  ;;  %240 = vst [vmem:[#allocation2 + $0x231] sm:$0xff] %v9969_v56 }
  0x4c   :  { %2596 = vmatmul.mubr.f32.gmra.mxu1 %v521_v9  ;;  %2914 = vmatprep.subr.mxu0 %v9254_v0  ;;  %v528_v6 = vld [vmem:[#allocation2 + $0x6a] sm:$0xff] }
  0x4d   :  { %2600 = vmatprep.mubr.f32.mxu1 %v650_v12  ;;  %2915 = vmatpush1.msra.mxu0 %v2067_v25  ;;  %v657_v9 = vld [vmem:[#allocation2 + $0x90] sm:$0xff] }
  0x4e   :  { %2216 = vmatmul.mubr.f32.gmra.mxu0 %v648_v57  ;;  %2916 = vmatprep.subr.mxu0 %v9254_v0  ;;  %v2056_v57 = vld [vmem:[%s14047_s1 + $0x200] sm:$0xff]  ;;  %v2102_v25 = vld [vmem:[%s14047_s1 + $0x370] sm:$0xff] }
  0x4f   :  { %2220 = vmatprep.mubr.f32.mxu0 %v9522_v30  ;;  %2917 = vmatpush1.msra.mxu0 %v2066_v19  ;;  %v2063_v30 = vld [vmem:[%s14047_s1 + $0x238] sm:$0xff] }
  0x50   :  { %2601 = vmatmul.mubr.f32.gmra.mxu1 %v522_v20  ;;  %2918 = vmatprep.subr.mxu0 %v9254_v0  ;;  %v529_v19 = vld [vmem:[#allocation2 + $0x7a] sm:$0xff] }
  0x51   :  { %2605 = vmatprep.mubr.f32.mxu1 %v651_v21  ;;  %2919 = vmatpush1.msra.mxu0 %v2065_v29  ;;  %v658_v20 = vld [vmem:[#allocation2 + $0x98] sm:$0xff]  ;;  %v2101_v29 = vld [vmem:[%s14047_s1 + $0x368] sm:$0xff] }
  0x52   :  { %2221 = vmatmul.mubr.f32.gmra.mxu0 %v649_v63  ;;  %2920 = vmatprep.subr.mxu0 %v9254_v0  ;;  %v9984_v63 = vld [vmem:[%s14048_s0 + $0x150] sm:$0xff] }
  0x53   :  { %2225 = vmatprep.mubr.f32.mxu0 %v9534_v32  ;;  %2921 = vmatpush1.msra.mxu0 %v2064_v23  ;;  %v2061_v32 = vld [vmem:[%s14047_s1 + $0x228] sm:$0xff]  ;;  %241 = vst [vmem:[#allocation2 + $0x241] sm:$0xff] %v9984_v63 }
  0x54   :  { %2606 = vmatmul.mubr.f32.gmra.mxu1 %v523_v24  ;;  %2922 = vmatprep.subr.mxu0 %v9254_v0  ;;  %v530_v23 = vld [vmem:[#allocation2 + $0x82] sm:$0xff] }
  0x55   :  { %2610 = vmatprep.mubr.f32.mxu1 %v652_v26  ;;  %2923 = vmatpush1.msra.mxu0 %v2063_v30  ;;  %v659_v24 = vld [vmem:[#allocation2 + $0xa8] sm:$0xff]  ;;  %v2100_v30 = vld [vmem:[%s14047_s1 + $0x360] sm:$0xff] }
  0x56   :  { %2226 = vmatmul.mubr.f32.gmra.mxu0 %v650_v12  ;;  %2924 = vmatprep.subr.mxu0 %v9254_v0  ;;  %v9999_v12 = vld [vmem:[%s14048_s0 + $0x158] sm:$0xff] }
  0x57   :  { %2230 = vmatprep.mubr.f32.mxu0 %v9539_v33  ;;  %2925 = vmatpush1.msra.mxu0 %v2062_v28  ;;  %v2059_v33 = vld [vmem:[%s14047_s1 + $0x218] sm:$0xff]  ;;  %242 = vst [vmem:[#allocation2 + $0x249] sm:$0xff] %v9999_v12 }
  0x58   :  { %2611 = vmatmul.mubr.f32.gmra.mxu1 %v524_v31  ;;  %2926 = vmatprep.subr.mxu0 %v9254_v0  ;;  %v531_v28 = vld [vmem:[#allocation2 + $0x92] sm:$0xff] }
  0x59   :  { %2615 = vmatprep.mubr.f32.mxu1 %v653_v34  ;;  %2927 = vmatpush1.msra.mxu0 %v2061_v32  ;;  %v660_v31 = vld [vmem:[#allocation2 + $0xb0] sm:$0xff]  ;;  %v2099_v32 = vld [vmem:[%s14047_s1 + $0x358] sm:$0xff] }
  0x5a   :  { %2231 = vmatmul.mubr.f32.gmra.mxu0 %v651_v21  ;;  %2928 = vmatprep.subr.mxu0 %v9254_v0  ;;  %v10007_v21 = vld [vmem:[#allocation2] sm:$0xff] }
  0x5b   :  { %2235 = vmatprep.mubr.f32.mxu0 %v9549_v35  ;;  %2929 = vmatpush1.msra.mxu0 %v2060_v40  ;;  %v2057_v35 = vld [vmem:[%s14047_s1 + $0x208] sm:$0xff]  ;;  %v532_v40 = vld [vmem:[#allocation2 + $0x9a] sm:$0xff] }
  0x5c   :  { %2616 = vmatmul.mubr.f32.gmra.mxu1 %v525_v43  ;;  %2930 = vmatprep.subr.mxu0 %v9254_v0  ;;  %v661_v43 = vld [vmem:[#allocation2 + $0xc0] sm:$0xff] }
  0x5d   :  { %2620 = vmatprep.mubr.f32.mxu1 %v654_v48  ;;  %2931 = vmatpush1.msra.mxu0 %v2059_v33  ;;  %v2098_v33 = vld [vmem:[%s14047_s1 + $0x350] sm:$0xff] }
  0x5e   :  { %2236 = vmatmul.mubr.f32.gmra.mxu0 %v652_v26  ;;  %2932 = vmatprep.subr.mxu0 %v9254_v0  ;;  %v10031_v26 = vld [vmem:[%s14048_s0 + $0x168] sm:$0xff] }
  0x5f   :  { %2240 = vmatprep.mubr.f32.mxu0 %v9554_v36  ;;  %2933 = vmatpush1.msra.mxu0 %v2058_v53  ;;  %v2087_v36 = vld [vmem:[%s14047_s1 + $0x2f8] sm:$0xff]  ;;  %244 = vst [vmem:[#allocation2 + $0x261] sm:$0xff] %v10031_v26  ;;  %v533_v53 = vld [vmem:[#allocation2 + $0xaa] sm:$0xff] }
  0x60   :  { %2621 = vmatmul.mubr.f32.gmra.mxu1 %v526_v54  ;;  %2934 = vmatprep.subr.mxu0 %v9254_v0  ;;  %v662_v54 = vld [vmem:[#allocation2 + $0xc8] sm:$0xff] }
  0x61   :  { %2625 = vmatprep.mubr.f32.mxu1 %v655_v55  ;;  %2935 = vmatpush1.msra.mxu0 %v2057_v35  ;;  %v2097_v35 = vld [vmem:[%s14047_s1 + $0x348] sm:$0xff] }
  0x62   :  { %2241 = vmatmul.mubr.f32.gmra.mxu0 %v653_v34  ;;  %2936 = vmatprep.subr.mxu0 %v9254_v0  ;;  %v10046_v34 = vld [vmem:[%s14048_s0 + $0x170] sm:$0xff] }
  0x63   :  { %2245 = vmatprep.mubr.f32.mxu0 %v9566_v38  ;;  %2937 = vmatpush1.msra.mxu0 %v2056_v57  ;;  %v2086_v38 = vld [vmem:[%s14047_s1 + $0x2f0] sm:$0xff]  ;;  %245 = vst [vmem:[#allocation2 + $0x271] sm:$0xff] %v10046_v34 }
  0x64   :  { %2626 = vmatmul.mubr.f32.gmra.mxu1 %v527_v59  ;;  %2938 = vmatprep.subr.mxu0 %v9254_v0  ;;  %v534_v57 = vld [vmem:[#allocation2 + $0xb2] sm:$0xff] }
  0x65   :  { %2630 = vmatprep.mubr.f32.mxu1 %v656_v60  ;;  %2939 = vmatpush2.msra.mxu0 %v2087_v36  ;;  %v663_v59 = vld [vmem:[#allocation2 + $0xd8] sm:$0xff]  ;;  %v2096_v36 = vld [vmem:[%s14047_s1 + $0x340] sm:$0xff] }
  0x66   :  { %2246 = vmatmul.mubr.f32.gmra.mxu0 %v654_v48  ;;  %3292 = vmatpush1.msra.mxu1 %v2103_v1  ;;  %v10061_v48 = vld [vmem:[%s14048_s0 + $0x178] sm:$0xff]  ;;  %v535_v1 = vld [vmem:[#allocation2 + $0xc2] sm:$0xff] }
  0x67   :  { %2250 = vmatprep.mubr.f32.mxu0 %v9571_v39  ;;  %2940 = vmatprep.subr.mxu0 %v9254_v0  ;;  %v2085_v39 = vld [vmem:[%s14047_s1 + $0x2e8] sm:$0xff]  ;;  %v10016_v0 = vld [vmem:[%s14048_s0 + $0x160] sm:$0xff]  ;;  %246 = vst [vmem:[#allocation2 + $0x279] sm:$0xff] %v10061_v48 }
  0x68   :  { %2631 = vmatmul.mubr.f32.gmra.mxu1 %v528_v6  ;;  %2941 = vmatpush2.msra.mxu0 %v2086_v38  ;;  %243 = vst [vmem:[#allocation2 + $0x259] sm:$0xff] %v10016_v0  ;;  %v664_v6 = vld [vmem:[#allocation2 + $0xe0] sm:$0xff]  ;;  %v2079_v38 = vld [vmem:[%s14047_s1 + $0x2b8] sm:$0xff] }
  0x69   :  { %2635 = vmatprep.mubr.f32.mxu1 %v657_v9  ;;  %3293 = vmatprep.subr.mxu1 %v10007_v21 }
  0x6a   :  { %2251 = vmatmul.mubr.f32.gmra.mxu0 %v655_v55  ;;  %3294 = vmatpush1.msra.mxu1 %v2102_v25  ;;  %v10076_v55 = vld [vmem:[%s14048_s0 + $0x180] sm:$0xff]  ;;  %v665_v25 = vld [vmem:[#allocation2 + $0xf0] sm:$0xff] }
  0x6b   :  { %2255 = vmatprep.mubr.f32.mxu0 %v9581_v41  ;;  %2942 = vmatprep.subr.mxu0 %v10007_v21  ;;  %v2084_v41 = vld [vmem:[%s14047_s1 + $0x2e0] sm:$0xff]  ;;  %247 = vst [vmem:[#allocation2 + $0x289] sm:$0xff] %v10076_v55 }
  0x6c   :  { %2636 = vmatmul.mubr.f32.gmra.mxu1 %v529_v19  ;;  %2943 = vmatpush2.msra.mxu0 %v2085_v39  ;;  %v10118_v19 = vld [vmem:[%s14048_s0 + $0x198] sm:$0xff] }
  0x6d   :  { %2640 = vmatprep.mubr.f32.mxu1 %v658_v20  ;;  %3295 = vmatprep.subr.mxu1 %v10007_v21  ;;  %250 = vst [vmem:[#allocation2 + $0x2a9] sm:$0xff] %v10118_v19  ;;  %v666_v39 = vld [vmem:[#allocation2 + $0xf8] sm:$0xff] }
  0x6e   :  { %2256 = vmatmul.mubr.f32.gmra.mxu0 %v656_v60  ;;  %3296 = vmatpush1.msra.mxu1 %v2101_v29  ;;  %v10091_v60 = vld [vmem:[%s14048_s0 + $0x188] sm:$0xff]  ;;  %v10127_v29 = vld [vmem:[%s14048_s0 + $0x1a0] sm:$0xff] }
  0x6f   :  { %2260 = vmatprep.mubr.f32.mxu0 %v9586_v42  ;;  %2944 = vmatprep.subr.mxu0 %v10007_v21  ;;  %v2083_v42 = vld [vmem:[%s14047_s1 + $0x2d8] sm:$0xff]  ;;  %248 = vst [vmem:[#allocation2 + $0x291] sm:$0xff] %v10091_v60  ;;  %251 = vst [vmem:[#allocation2 + $0x2b9] sm:$0xff] %v10127_v29 }
  0x70   :  { %2641 = vmatmul.mubr.f32.gmra.mxu1 %v530_v23  ;;  %2945 = vmatpush2.msra.mxu0 %v2084_v41  ;;  %v2078_v23 = vld [vmem:[%s14047_s1 + $0x2b0] sm:$0xff] }
  0x71   :  { %2645 = vmatprep.mubr.f32.mxu1 %v659_v24  ;;  %3297 = vmatprep.subr.mxu1 %v10007_v21  ;;  %v2094_v41 = vld [vmem:[%s14047_s1 + $0x330] sm:$0xff] }
  0x72   :  { %2261 = vmatmul.mubr.f32.gmra.mxu0 %v657_v9  ;;  %3298 = vmatpush1.msra.mxu1 %v2100_v30  ;;  %v536_v9 = vld [vmem:[#allocation2 + $0xca] sm:$0xff] }
  0x73   :  { %2265 = vmatprep.mubr.f32.mxu0 %v9598_v44  ;;  %2946 = vmatprep.subr.mxu0 %v10007_v21  ;;  %v2082_v44 = vld [vmem:[%s14047_s1 + $0x2d0] sm:$0xff]  ;;  %v10140_v30 = vld [vmem:[%s14048_s0 + $0x1a8] sm:$0xff] }
  0x74   :  { %2646 = vmatmul.mubr.f32.gmra.mxu1 %v531_v28  ;;  %2947 = vmatpush2.msra.mxu0 %v2083_v42  ;;  %252 = vst [vmem:[#allocation2 + $0x2c1] sm:$0xff] %v10140_v30  ;;  %v668_v28 = vld [vmem:[#allocation2 + $0x110] sm:$0xff]  ;;  %v2077_v42 = vld [vmem:[%s14047_s1 + $0x2a8] sm:$0xff] }
  0x75   :  { %2650 = vmatprep.mubr.f32.mxu1 %v660_v31  ;;  %3299 = vmatprep.subr.mxu1 %v10007_v21 }
  0x76   :  { %2266 = vmatmul.mubr.f32.gmra.mxu0 %v658_v20  ;;  %3300 = vmatpush1.msra.mxu1 %v2099_v32  ;;  %v537_v20 = vld [vmem:[#allocation2 + $0xda] sm:$0xff] }
  0x77   :  { %2270 = vmatprep.mubr.f32.mxu0 %v9603_v45  ;;  %2948 = vmatprep.subr.mxu0 %v10007_v21  ;;  %v2081_v45 = vld [vmem:[%s14047_s1 + $0x2c8] sm:$0xff]  ;;  %v669_v32 = vld [vmem:[#allocation2 + $0x120] sm:$0xff] }
  0x78   :  { %2651 = vmatmul.mubr.f32.gmra.mxu1 %v532_v40  ;;  %2949 = vmatpush2.msra.mxu0 %v2082_v44  ;;  %v2093_v40 = vld [vmem:[%s14047_s1 + $0x328] sm:$0xff] }
  0x79   :  { %2655 = vmatprep.mubr.f32.mxu1 %v661_v43  ;;  %3301 = vmatprep.subr.mxu1 %v10007_v21  ;;  %v670_v44 = vld [vmem:[#allocation2 + $0x128] sm:$0xff] }
  0x7a   :  { %2271 = vmatmul.mubr.f32.gmra.mxu0 %v659_v24  ;;  %3302 = vmatpush1.msra.mxu1 %v2098_v33  ;;  %v667_v24 = vld [vmem:[#allocation2 + $0x108] sm:$0xff]  ;;  %v10171_v33 = vld [vmem:[%s14048_s0 + $0x1c0] sm:$0xff] }
  0x7b   :  { %2275 = vmatprep.mubr.f32.mxu0 %v9613_v47  ;;  %2950 = vmatprep.subr.mxu0 %v10007_v21  ;;  %v2080_v47 = vld [vmem:[%s14047_s1 + $0x2c0] sm:$0xff]  ;;  %255 = vst [vmem:[#allocation2 + $0x2e9] sm:$0xff] %v10171_v33 }
  0x7c   :  { %2656 = vmatmul.mubr.f32.gmra.mxu1 %v533_v53  ;;  %2951 = vmatpush2.msra.mxu0 %v2081_v45  ;;  %v542_v53 = vld [vmem:[#allocation2 + $0x112] sm:$0xff] }
  0x7d   :  { %2660 = vmatprep.mubr.f32.mxu1 %v662_v54  ;;  %3303 = vmatprep.subr.mxu1 %v10007_v21  ;;  %v671_v45 = vld [vmem:[#allocation2 + $0x138] sm:$0xff] }
  0x7e   :  { %2276 = vmatmul.mubr.f32.gmra.mxu0 %v660_v31  ;;  %3304 = vmatpush1.msra.mxu1 %v2097_v35  ;;  %v10149_v31 = vld [vmem:[%s14048_s0 + $0x1b0] sm:$0xff]  ;;  %v10188_v35 = vld [vmem:[%s14048_s0 + $0x1c8] sm:$0xff] }
  0x7f   :  { %2280 = vmatprep.mubr.f32.mxu0 %v9624_v49  ;;  %2952 = vmatprep.subr.mxu0 %v10007_v21  ;;  %v10103_v49 = vld [vmem:[%s14048_s0 + $0x190] sm:$0xff]  ;;  %253 = vst [vmem:[#allocation2 + $0x2d1] sm:$0xff] %v10149_v31  ;;  %256 = vst [vmem:[#allocation2 + $0x2f1] sm:$0xff] %v10188_v35 }
  0x80   :  { %2661 = vmatmul.mubr.f32.gmra.mxu1 %v534_v57  ;;  %2953 = vmatpush2.msra.mxu0 %v2080_v47  ;;  %249 = vst [vmem:[#allocation2 + $0x2a1] sm:$0xff] %v10103_v49  ;;  %v2090_v57 = vld [vmem:[%s14047_s1 + $0x310] sm:$0xff]  ;;  %v672_v47 = vld [vmem:[#allocation2 + $0x140] sm:$0xff] }
  0x81   :  { %2665 = vmatprep.mubr.f32.mxu1 %v663_v59  ;;  %3305 = vmatprep.subr.mxu1 %v10007_v21 }
  0x82   :  { %2281 = vmatmul.mubr.f32.gmra.mxu0 %v661_v43  ;;  %3306 = vmatpush1.msra.mxu1 %v2096_v36  ;;  %v10162_v43 = vld [vmem:[%s14048_s0 + $0x1b8] sm:$0xff]  ;;  %v10203_v36 = vld [vmem:[%s14048_s0 + $0x1d0] sm:$0xff] }
  0x83   :  { %2285 = vmatprep.mubr.f32.mxu0 %v9629_v50  ;;  %2954 = vmatprep.subr.mxu0 %v10007_v21  ;;  %v2095_v50 = vld [vmem:[%s14047_s1 + $0x338] sm:$0xff]  ;;  %254 = vst [vmem:[#allocation2 + $0x2d9] sm:$0xff] %v10162_v43  ;;  %257 = vst [vmem:[#allocation2 + $0x301] sm:$0xff] %v10203_v36 }
  0x84   :  { %2666 = vmatmul.mubr.f32.gmra.mxu1 %v535_v1  ;;  %3307 = vmatprep.subr.mxu1 %v10007_v21  ;;  %v544_v1 = vld [vmem:[#allocation2 + $0x12a] sm:$0xff] }
  0x85   :  { %2670 = vmatprep.mubr.f32.mxu1 %v664_v6  ;;  %2955 = vmatpush2.msra.mxu0 %v2079_v38  ;;  %v10218_v38 = vld [vmem:[%s14048_s0 + $0x1d8] sm:$0xff] }
  0x86   :  { %2286 = vmatmul.mubr.f32.gmra.mxu0 %v662_v54  ;;  %2956 = vmatprep.subr.mxu0 %v10007_v21  ;;  %v2076_v54 = vld [vmem:[%s14047_s1 + $0x2a0] sm:$0xff]  ;;  %258 = vst [vmem:[#allocation2 + $0x309] sm:$0xff] %v10218_v38 }
  0x87   :  { %2290 = vmatprep.mubr.f32.mxu0 %v9676_v61  ;;  %3308 = vmatpush1.msra.mxu1 %v2095_v50  ;;  %v538_v61 = vld [vmem:[#allocation2 + $0xe2] sm:$0xff]  ;;  %v545_v50 = vld [vmem:[#allocation2 + $0x13a] sm:$0xff] }
  0x88   :  { %2671 = vmatmul.mubr.f32.gmra.mxu1 %v536_v9  ;;  %3309 = vmatprep.subr.mxu1 %v10007_v21  ;;  %v673_v9 = vld [vmem:[#allocation2 + $0x150] sm:$0xff] }
  0x89   :  { %2675 = vmatprep.mubr.f32.mxu1 %v665_v25  ;;  %2957 = vmatpush2.msra.mxu0 %v2078_v23  ;;  %v546_v23 = vld [vmem:[#allocation2 + $0x142] sm:$0xff] }
  0x8a   :  { %2291 = vmatmul.mubr.f32.gmra.mxu0 %v663_v59  ;;  %2958 = vmatprep.subr.mxu0 %v10007_v21  ;;  %v543_v59 = vld [vmem:[#allocation2 + $0x122] sm:$0xff] }
  0x8b   :  { %2295 = vmatprep.mubr.f32.mxu0 %v9682_v62  ;;  %v539_v62 = vld [vmem:[#allocation2 + $0xf2] sm:$0xff]  ;;  %3310 = vmatpush1.msra.mxu1 %v2094_v41  ;;  %v10248_v41 = vld [vmem:[%s14048_s0 + $0x1e8] sm:$0xff] }
  0x8c   :  { %2676 = vmatmul.mubr.f32.gmra.mxu1 %v537_v20  ;;  %3311 = vmatprep.subr.mxu1 %v10007_v21  ;;  %v674_v20 = vld [vmem:[#allocation2 + $0x158] sm:$0xff]  ;;  %260 = vst [vmem:[#allocation2 + $0x321] sm:$0xff] %v10248_v41 }
  0x8d   :  { %2680 = vmatprep.mubr.f32.mxu1 %v666_v39  ;;  %2959 = vmatpush2.msra.mxu0 %v2077_v42  ;;  %v196_v42 = vld [vmem:[%s14048_s0 + $0x1f0] sm:$0xff] }
  0x8e   :  { %2296 = vmatmul.mubr.f32.gmra.mxu0 %v664_v6  ;;  %2960 = vmatprep.subr.mxu0 %v10007_v21  ;;  %v2075_v6 = vld [vmem:[%s14047_s1 + $0x298] sm:$0xff]  ;;  %261 = vst [vmem:[#allocation2 + $0x331] sm:$0xff] %v196_v42  ;;  %v685_v42 = vld [vmem:[#allocation2 + $0x210] sm:$0xff] }
  0x8f   :  { %2300 = vmatprep.mubr.f32.mxu0 %v9696_v2  ;;  %v540_v2 = vld [vmem:[#allocation2 + $0xfa] sm:$0xff]  ;;  %3312 = vmatpush1.msra.mxu1 %v2093_v40 }
  0x90   :  { %2681 = vmatmul.mubr.f32.gmra.mxu1 %v538_v61  ;;  %3313 = vmatprep.subr.mxu1 %v10007_v21  ;;  %v2117_v61 = vld [vmem:[%s14047_s1 + $0x3e8] sm:$0xff]  ;;  %v548_v40 = vld [vmem:[#allocation2 + $0x15a] sm:$0xff] }
  0x91   :  { %2685 = vmatprep.mubr.f32.mxu1 %v667_v24  ;;  %2961 = vmatpush2.msra.mxu0 %v2076_v54  ;;  %v678_v54 = vld [vmem:[#allocation2 + $0x188] sm:$0xff] }
  0x92   :  { %2301 = vmatmul.mubr.f32.gmra.mxu0 %v665_v25  ;;  %2962 = vmatprep.subr.mxu0 %v10007_v21  ;;  %v2119_v25 = vld [vmem:[%s14047_s1 + $0x3f8] sm:$0xff] }
  0x93   :  { %2305 = vmatprep.mubr.f32.mxu0 %v9705_v4  ;;  %v541_v4 = vld [vmem:[#allocation2 + $0x10a] sm:$0xff]  ;;  %2963 = vmatpush2.msra.mxu0 %v2075_v6 }
  0x94   :  { %2686 = vmatmul.mubr.f32.gmra.mxu1 %v539_v62  ;;  %2964 = vmatprep.subr.mxu0 %v10007_v21  ;;  %v2116_v62 = vld [vmem:[%s14047_s1 + $0x3e0] sm:$0xff]  ;;  %v680_v6 = vld [vmem:[#allocation2 + $0x1d0] sm:$0xff] }
  0x95   :  { %2690 = vmatprep.mubr.f32.mxu1 %v668_v28 }
  0x96   :  { %2306 = vmatmul.mubr.f32.gmra.mxu0 %v666_v39  ;;  %v10233_v39 = vld [vmem:[%s14048_s0 + $0x1e0] sm:$0xff] }
  0x97   :  { %2310 = vmatprep.mubr.f32.mxu0 %v9710_v5  ;;  %v2092_v5 = vld [vmem:[%s14047_s1 + $0x320] sm:$0xff]  ;;  %259 = vst [vmem:[#allocation2 + $0x319] sm:$0xff] %v10233_v39 }
  0x98   :  { %2691 = vmatmul.mubr.f32.gmra.mxu1 %v540_v2  ;;  %v676_v2 = vld [vmem:[#allocation2 + $0x170] sm:$0xff] }
  0x99   :  { %2695 = vmatprep.mubr.f32.mxu1 %v669_v32  ;;  %3314 = vmatpush1.msra.mxu1 %v2092_v5  ;;  %v2073_v5 = vld [vmem:[%s14047_s1 + $0x288] sm:$0xff] }
  0x9a   :  { %2311 = vmatmul.mubr.f32.gmra.mxu0 %v667_v24  ;;  %3315 = vmatprep.subr.mxu1 %v10007_v21  ;;  %v675_v24 = vld [vmem:[#allocation2 + $0x168] sm:$0xff] }
  0x9b   :  { %2315 = vmatprep.mubr.f32.mxu0 %v9722_v7  ;;  %v2091_v7 = vld [vmem:[%s14047_s1 + $0x318] sm:$0xff] }
  0x9c   :  { %2696 = vmatmul.mubr.f32.gmra.mxu1 %v541_v4  ;;  %v677_v4 = vld [vmem:[#allocation2 + $0x180] sm:$0xff] }
  0x9d   :  { %2700 = vmatprep.mubr.f32.mxu1 %v670_v44  ;;  %3316 = vmatpush1.msra.mxu1 %v2091_v7  ;;  %v2111_v7 = vld [vmem:[%s14047_s1 + $0x3b8] sm:$0xff] }
  0x9e   :  { %2316 = vmatmul.mubr.f32.gmra.mxu0 %v668_v28  ;;  %3317 = vmatprep.subr.mxu1 %v10007_v21  ;;  %v547_v28 = vld [vmem:[#allocation2 + $0x152] sm:$0xff] }
  0x9f   :  { %2320 = vmatprep.mubr.f32.mxu0 %v9727_v8  ;;  %v2089_v8 = vld [vmem:[%s14047_s1 + $0x308] sm:$0xff]  ;;  %3318 = vmatpush1.msra.mxu1 %v2090_v57  ;;  %v550_v57 = vld [vmem:[#allocation2 + $0x172] sm:$0xff] }
  0xa0   :  { %2701 = vmatmul.mubr.f32.gmra.mxu1 %v542_v53  ;;  %3319 = vmatprep.subr.mxu1 %v10007_v21  ;;  %v549_v53 = vld [vmem:[#allocation2 + $0x16a] sm:$0xff] }
  0xa1   :  { %2705 = vmatprep.mubr.f32.mxu1 %v671_v45  ;;  %3320 = vmatpush1.msra.mxu1 %v2089_v8  ;;  %v2109_v8 = vld [vmem:[%s14047_s1 + $0x3a8] sm:$0xff] }
  0xa2   :  { %2321 = vmatmul.mubr.f32.gmra.mxu0 %v669_v32  ;;  %3321 = vmatprep.subr.mxu1 %v10007_v21  ;;  %v2114_v32 = vld [vmem:[%s14047_s1 + $0x3d0] sm:$0xff] }
  0xa3   :  { %2325 = vmatprep.mubr.f32.mxu0 %v9737_v10  ;;  %v2088_v10 = vld [vmem:[%s14047_s1 + $0x300] sm:$0xff] }
  0xa4   :  { %2706 = vmatmul.mubr.f32.gmra.mxu1 %v543_v59  ;;  %v679_v59 = vld [vmem:[#allocation2 + $0x1c8] sm:$0xff] }
  0xa5   :  { %2710 = vmatprep.mubr.f32.mxu1 %v672_v47  ;;  %3322 = vmatpush1.msra.mxu1 %v2088_v10  ;;  %v2108_v10 = vld [vmem:[%s14047_s1 + $0x3a0] sm:$0xff] }
  0xa6   :  { %2326 = vmatmul.mubr.f32.gmra.mxu0 %v670_v44  ;;  %3323 = vmatprep.subr.mxu1 %v10007_v21  ;;  %v197_v44 = vld [vmem:[%s14048_s0 + $0x1f8] sm:$0xff] }
  0xa7   :  { %2330 = vmatprep.mubr.f32.mxu0 %v9742_v11  ;;  %v2118_v11 = vld [vmem:[%s14047_s1 + $0x3f0] sm:$0xff]  ;;  %3324 = vmatpush2.msra.mxu1 %v2119_v25  ;;  %262 = vst [vmem:[#allocation2 + $0x339] sm:$0xff] %v197_v44  ;;  %v552_v25 = vld [vmem:[#allocation2 + $0x1ba] sm:$0xff]  ;;  %v690_v44 = vld [vmem:[#allocation2 + $0x248] sm:$0xff] }
  0xa8   :  { %2711 = vmatmul.mubr.f32.gmra.mxu1 %v544_v1  ;;  %3325 = vmatprep.subr.mxu1 %v10007_v21  ;;  %v551_v1 = vld [vmem:[#allocation2 + $0x1b2] sm:$0xff] }
  0xa9   :  { %2715 = vmatprep.mubr.f32.mxu1 %v673_v9  ;;  %3326 = vmatpush2.msra.mxu1 %v2118_v11  ;;  %v2107_v11 = vld [vmem:[%s14047_s1 + $0x398] sm:$0xff] }
  0xaa   :  { %2331 = vmatmul.mubr.f32.gmra.mxu0 %v671_v45  ;;  %3327 = vmatprep.subr.mxu1 %v10007_v21  ;;  %v423_v45 = vld [vmem:[#allocation2 + $0x1b1] sm:$0xff] }
  0xab   :  { %2335 = vmatprep.mubr.f32.mxu0 %v9754_v13  ;;  %v2074_v13 = vld [vmem:[%s14047_s1 + $0x290] sm:$0xff]  ;;  %3328 = vmatpush2.msra.mxu1 %v2117_v61 }
  0xac   :  { %2716 = vmatmul.mubr.f32.gmra.mxu1 %v545_v50  ;;  %3329 = vmatprep.subr.mxu1 %v10007_v21  ;;  %v10309_v50 = vld [vmem:[%s14047_s1 + $0x478] sm:$0xff]  ;;  %v2106_v61 = vld [vmem:[%s14047_s1 + $0x390] sm:$0xff] }
  0xad   :  { %2720 = vmatprep.mubr.f32.mxu1 %v674_v20  ;;  %2965 = vmatpush2.msra.mxu0 %v2074_v13  ;;  %v2104_v13 = vld [vmem:[%s14047_s1 + $0x380] sm:$0xff] }
  0xae   :  { %2336 = vmatmul.mubr.f32.gmra.mxu0 %v672_v47  ;;  %3330 = vmatpush2.msra.mxu1 %v2116_v62  ;;  %v424_v47 = vld [vmem:[#allocation2 + $0x1b9] sm:$0xff] }
  0xaf   :  { %2340 = vmatprep.mubr.f32.mxu0 %v9759_v14  ;;  %v2115_v14 = vld [vmem:[%s14047_s1 + $0x3d8] sm:$0xff]  ;;  %3331 = vmatprep.subr.mxu1 %v10007_v21 }
  0xb0   :  { %2721 = vmatmul.mubr.f32.gmra.mxu1 %v546_v23  ;;  %2966 = vmatprep.subr.mxu0 %v10007_v21  ;;  %v553_v23 = vld [vmem:[#allocation2 + $0x1ca] sm:$0xff]  ;;  %v554_v62 = vld [vmem:[#allocation2 + $0x1d2] sm:$0xff] }
  0xb1   :  { %2725 = vmatprep.mubr.f32.mxu1 %v675_v24  ;;  %3332 = vmatpush2.msra.mxu1 %v2115_v14  ;;  %v556_v14 = vld [vmem:[#allocation2 + $0x1ea] sm:$0xff] }
  0xb2   :  { %2341 = vmatmul.mubr.f32.gmra.mxu0 %v673_v9  ;;  %3333 = vmatprep.subr.mxu1 %v10007_v21  ;;  %v2072_v9 = vld [vmem:[%s14047_s1 + $0x280] sm:$0xff] }
  0xb3   :  { %2345 = vmatprep.mubr.f32.mxu0 %v9766_v15  ;;  %v2113_v15 = vld [vmem:[%s14047_s1 + $0x3c8] sm:$0xff]  ;;  %3334 = vmatpush2.msra.mxu1 %v2114_v32  ;;  %v686_v32 = vld [vmem:[#allocation2 + $0x218] sm:$0xff] }
  0xb4   :  { %2726 = vmatmul.mubr.f32.gmra.mxu1 %v547_v28  ;;  %3335 = vmatprep.subr.mxu1 %v10007_v21  ;;  %v683_v28 = vld [vmem:[#allocation2 + $0x1f8] sm:$0xff] }
  0xb5   :  { %2730 = vmatprep.mubr.f32.mxu1 %v676_v2  ;;  %3336 = vmatpush2.msra.mxu1 %v2113_v15  ;;  %v689_v15 = vld [vmem:[#allocation2 + $0x240] sm:$0xff] }
  0xb6   :  { %2346 = vmatmul.mubr.f32.gmra.mxu0 %v674_v20  ;;  %3337 = vmatprep.subr.mxu1 %v10007_v21  ;;  %v681_v20 = vld [vmem:[#allocation2 + $0x1e0] sm:$0xff] }
  0xb7   :  { %2350 = vmatprep.mubr.f32.mxu0 %v9771_v16  ;;  %v2112_v16 = vld [vmem:[%s14047_s1 + $0x3c0] sm:$0xff]  ;;  %2967 = vmatpush2.msra.mxu0 %v2073_v5  ;;  %v691_v5 = vld [vmem:[#allocation2 + $0x258] sm:$0xff] }
  0xb8   :  { %2731 = vmatmul.mubr.f32.gmra.mxu1 %v548_v40  ;;  %2968 = vmatprep.subr.mxu0 %v10007_v21  ;;  %v687_v40 = vld [vmem:[#allocation2 + $0x228] sm:$0xff] }
  0xb9   :  { %2735 = vmatprep.mubr.f32.mxu1 %v677_v4  ;;  %3338 = vmatpush2.msra.mxu1 %v2112_v16  ;;  %v688_v4 = vld [vmem:[#allocation2 + $0x230] sm:$0xff]  ;;  %v694_v16 = vld [vmem:[#allocation2 + $0x278] sm:$0xff] }
  0xba   :  { %2351 = vmatmul.mubr.f32.gmra.mxu0 %v675_v24  ;;  %3339 = vmatprep.subr.mxu1 %v10007_v21  ;;  %v682_v24 = vld [vmem:[#allocation2 + $0x1e8] sm:$0xff] }
  0xbb   :  { %2355 = vmatprep.mubr.f32.mxu0 %v9776_v17  ;;  %v2110_v17 = vld [vmem:[%s14047_s1 + $0x3b0] sm:$0xff]  ;;  %3340 = vmatpush2.msra.mxu1 %v2111_v7 }
  0xbc   :  { %2736 = vmatmul.mubr.f32.gmra.mxu1 %v549_v53  ;;  %3341 = vmatprep.subr.mxu1 %v10007_v21  ;;  %v692_v53 = vld [vmem:[#allocation2 + $0x260] sm:$0xff] }
  0xbd   :  { %2740 = vmatprep.mubr.f32.mxu1 %v678_v54  ;;  %3342 = vmatpush2.msra.mxu1 %v2110_v17  ;;  %v693_v54 = vld [vmem:[#allocation2 + $0x270] sm:$0xff] }
  0xbe   :  { %2356 = vmatmul.mubr.f32.gmra.mxu0 %v676_v2  ;;  %3343 = vmatprep.subr.mxu1 %v10007_v21  ;;  %v684_v2 = vld [vmem:[#allocation2 + $0x200] sm:$0xff] }
  0xbf   :  { %2360 = vmatprep.mubr.f32.mxu0 %v423_v45  ;;  %3344 = vmatpush2.msra.mxu1 %v2109_v8  ;;  %v695_v45 = vld [vmem:[#allocation2 + $0x288] sm:$0xff] }
  0xc0   :  { %2741 = vmatmul.mubr.f32.gmra.mxu1 %v550_v57  ;;  %3345 = vmatprep.subr.mxu1 %v10007_v21 }
  0xc1   :  { %2745 = vmatprep.mubr.f32.mxu1 %v679_v59  ;;  %2969 = vmatpush2.msra.mxu0 %v2072_v9 }
  0xc2   :  { %2361 = vmatmul.mubr.f32.gmra.mxu0 %v10007_v21  ;;  %3346 = vmatpush2.msra.mxu1 %v2108_v10 }
  0xc3   :  { %2365 = vmatprep.mubr.f32.mxu0 %v424_v47  ;;  %3347 = vmatprep.subr.mxu1 %v10007_v21 }
  0xc4   :  { %2746 = vmatmul.mubr.f32.gmra.mxu1 %v551_v1  ;;  %8986 = vmatprep.subr.mxu0 %v10309_v50  ;;  %v697_v1 = vld [vmem:[#allocation2 + $0x2a0] sm:$0xff] }
  0xc5   :  { %2750 = vmatprep.mubr.f32.mxu1 %v680_v6  ;;  %3348 = vmatpush2.msra.mxu1 %v2107_v11 }
  0xc6   :  { %2366 = vmatmul.mubr.f32.gmra.mxu0 %v10007_v21  ;;  %3349 = vmatprep.subr.mxu1 %v10007_v21 }
  0xc7   :  { %2370 = vmatprep.mubr.f32.mxu0 %v9838_v46  ;;  %v2105_v46 = vld [vmem:[%s14047_s1 + $0x388] sm:$0xff]  ;;  %3350 = vmatpush2.msra.mxu1 %v2106_v61 }
  0xc8   :  { %2751 = vmatmul.mubr.f32.gmra.mxu1 %v552_v25  ;;  %3351 = vmatprep.subr.mxu1 %v10007_v21 }
  0xc9   :  { %2755 = vmatprep.mubr.f32.mxu1 %v681_v20  ;;  %3352 = vmatpush2.msra.mxu1 %v2105_v46 }
  0xca   :  { %2371 = vmatmul.mubr.f32.gmra.mxu0 %v679_v59  ;;  %3353 = vmatprep.subr.mxu1 %v10007_v21 }
  0xcb   :  { %2375 = vmatprep.mubr.f32.mxu0 %v9849_v51  ;;  %3354 = vmatpush2.msra.mxu1 %v2104_v13  ;;  %v555_v51 = vld [vmem:[#allocation2 + $0x1e2] sm:$0xff]  ;;  %v699_v13 = vld [vmem:[#allocation2 + $0x2b8] sm:$0xff] }
  0xcc   :  { %2756 = vmatmul.mubr.f32.gmra.mxu1 %v553_v23  ;;  %6415 = vmatprep.subr.mxu1 %v10007_v21  ;;  %v558_v21 = vld [vmem:[#allocation2 + $0x202] sm:$0xff] }
  0xcd   :  { %2760 = vmatprep.mubr.f32.mxu1 %v682_v24 }
  0xce   :  { %2376 = vmatmul.mubr.f32.gmra.mxu0 %v680_v6 }
  0xcf   :  { %2380 = vmatprep.mubr.f32.mxu0 %v9864_v58  ;;  %v557_v58 = vld [vmem:[#allocation2 + $0x1fa] sm:$0xff] }
  0xd0   :  { %2761 = vmatmul.mubr.f32.gmra.mxu1 %v554_v62 }
  0xd1   :  { %2765 = vmatprep.mubr.f32.mxu1 %v683_v28 }
  0xd2   :  { %2381 = vmatmul.mubr.f32.gmra.mxu0 %v681_v20  ;;  %v698_v20 = vld [vmem:[#allocation2 + $0x2a8] sm:$0xff] }
  0xd3   :  { %2385 = vmatprep.mubr.f32.mxu0 %v9879_v3  ;;  %v559_v3 = vld [vmem:[#allocation2 + $0x212] sm:$0xff] }
  0xd4   :  { %2766 = vmatmul.mubr.f32.gmra.mxu1 %v555_v51 }
  0xd5   :  { %2770 = vmatprep.mubr.f32.mxu1 %v684_v2 }
  0xd6   :  { %2386 = vmatmul.mubr.f32.gmra.mxu0 %v682_v24 }
  0xd7   :  { %2390 = vmatprep.mubr.f32.mxu0 %v9894_v18  ;;  %v560_v18 = vld [vmem:[#allocation2 + $0x21a] sm:$0xff] }
  0xd8   :  { %2771 = vmatmul.mubr.f32.gmra.mxu1 %v556_v14 }
  0xd9   :  { %2775 = vmatprep.mubr.f32.mxu1 %v685_v42 }
  0xda   :  { %2391 = vmatmul.mubr.f32.gmra.mxu0 %v683_v28 }
  0xdb   :  { %2395 = vmatprep.mubr.f32.mxu0 %v9909_v22  ;;  %v561_v22 = vld [vmem:[#allocation2 + $0x22a] sm:$0xff] }
  0xdc   :  { %2776 = vmatmul.mubr.f32.gmra.mxu1 %v557_v58 }
  0xdd   :  { %2780 = vmatprep.mubr.f32.mxu1 %v686_v32 }
  0xde   :  { %2396 = vmatmul.mubr.f32.gmra.mxu0 %v684_v2 }
  0xdf   :  { %2400 = vmatprep.mubr.f32.mxu0 %v9924_v27  ;;  %v562_v27 = vld [vmem:[#allocation2 + $0x232] sm:$0xff] }
  0xe0   :  { %2781 = vmatmul.mubr.f32.gmra.mxu1 %v558_v21 }
  0xe1   :  { %2785 = vmatprep.mubr.f32.mxu1 %v687_v40 }
  0xe2   :  { %2401 = vmatmul.mubr.f32.gmra.mxu0 %v685_v42  ;;  %v700_v42 = vld [vmem:[#allocation2 + $0x2c0] sm:$0xff] }
  0xe3   :  { %2405 = vmatprep.mubr.f32.mxu0 %v9939_v37  ;;  %v563_v37 = vld [vmem:[#allocation2 + $0x242] sm:$0xff] }
  0xe4   :  { %2786 = vmatmul.mubr.f32.gmra.mxu1 %v559_v3 }
  0xe5   :  { %2790 = vmatprep.mubr.f32.mxu1 %v688_v4 }
  0xe6   :  { %2406 = vmatmul.mubr.f32.gmra.mxu0 %v686_v32 }
  0xe7   :  { %2410 = vmatprep.mubr.f32.mxu0 %v9954_v52  ;;  %v564_v52 = vld [vmem:[#allocation2 + $0x24a] sm:$0xff] }
  0xe8   :  { %2791 = vmatmul.mubr.f32.gmra.mxu1 %v560_v18 }
  0xe9   :  { %2795 = vmatprep.mubr.f32.mxu1 %v689_v15 }
  0xea   :  { %2411 = vmatmul.mubr.f32.gmra.mxu0 %v687_v40 }
  0xeb   :  { %2415 = vmatprep.mubr.f32.mxu0 %v9969_v56  ;;  %v565_v56 = vld [vmem:[#allocation2 + $0x25a] sm:$0xff] }
  0xec   :  { %2796 = vmatmul.mubr.f32.gmra.mxu1 %v561_v22 }
  0xed   :  { %2800 = vmatprep.mubr.f32.mxu1 %v690_v44 }
  0xee   :  { %2416 = vmatmul.mubr.f32.gmra.mxu0 %v688_v4  ;;  %v701_v4 = vld [vmem:[#allocation2 + $0x2d0] sm:$0xff] }
  0xef   :  { %2420 = vmatprep.mubr.f32.mxu0 %v9984_v63  ;;  %v566_v63 = vld [vmem:[#allocation2 + $0x262] sm:$0xff] }
  0xf0   :  { %2801 = vmatmul.mubr.f32.gmra.mxu1 %v562_v27 }
  0xf1   :  { %2805 = vmatprep.mubr.f32.mxu1 %v691_v5 }
  0xf2   :  { %2421 = vmatmul.mubr.f32.gmra.mxu0 %v689_v15 }
  0xf3   :  { %2425 = vmatprep.mubr.f32.mxu0 %v9999_v12  ;;  %v567_v12 = vld [vmem:[#allocation2 + $0x272] sm:$0xff] }
  0xf4   :  { %2806 = vmatmul.mubr.f32.gmra.mxu1 %v563_v37 }
  0xf5   :  { %2810 = vmatprep.mubr.f32.mxu1 %v692_v53 }
  0xf6   :  { %2426 = vmatmul.mubr.f32.gmra.mxu0 %v690_v44 }
  0xf7   :  { %2430 = vmatprep.mubr.f32.mxu0 %v10016_v0  ;;  %v696_v0 = vld [vmem:[#allocation2 + $0x290] sm:$0xff] }
  0xf8   :  { %2811 = vmatmul.mubr.f32.gmra.mxu1 %v564_v52 }
  0xf9   :  { %2815 = vmatprep.mubr.f32.mxu1 %v693_v54 }
  0xfa   :  { %2431 = vmatmul.mubr.f32.gmra.mxu0 %v691_v5  ;;  %v702_v5 = vld [vmem:[#allocation2 + $0x2d8] sm:$0xff] }
  0xfb   :  { %2435 = vmatprep.mubr.f32.mxu0 %v10031_v26  ;;  %v568_v26 = vld [vmem:[#allocation2 + $0x27a] sm:$0xff] }
  0xfc   :  { %2816 = vmatmul.mubr.f32.gmra.mxu1 %v565_v56 }
  0xfd   :  { %2820 = vmatprep.mubr.f32.mxu1 %v694_v16 }
  0xfe   :  { %2436 = vmatmul.mubr.f32.gmra.mxu0 %v692_v53 }
  0xff   :  { %2440 = vmatprep.mubr.f32.mxu0 %v10046_v34 }
 0x100   :  { %2821 = vmatmul.mubr.f32.gmra.mxu1 %v566_v63 }
 0x101   :  { %2825 = vmatprep.mubr.f32.mxu1 %v695_v45  ;;  %v2202_v7 = vpop.f32.mrf.mxu0 }
 0x102   :  { %2441 = vmatmul.mubr.f32.gmra.mxu0 %v693_v54 }
 0x103   :  { %2445 = vmatprep.mubr.f32.mxu0 %v10061_v48  ;;  %v2587_v57 = vpop.f32.mrf.mxu1  ;;  %v2204_v59 = vpop.f32.mrf.mxu0  ;;  %v569_v48 = vld [vmem:[#allocation2 + $0x28a] sm:$0xff] }
 0x104   :  { %2826 = vmatmul.mubr.f32.gmra.mxu1 %v567_v12  ;;  %v10346_v17 = vadd.f32 %v2587_v57, %v2202_v7  ;;  %v704_v57 = vld [vmem:[#allocation2 + $0x2f0] sm:$0xff] }
 0x105   :  { %2830 = vmatprep.mubr.f32.mxu1 %v696_v0  ;;  %v2589_v47 = vpop.f32.mrf.mxu1  ;;  %v2207_v8 = vpop.f32.mrf.mxu0 }
 0x106   :  { %2446 = vmatmul.mubr.f32.gmra.mxu0 %v694_v16  ;;  %v703_v16 = vld [vmem:[#allocation2 + $0x2e8] sm:$0xff] }
 0x107   :  { %2450 = vmatprep.mubr.f32.mxu0 %v10076_v55  ;;  %v2592_v34 = vpop.f32.mrf.mxu1  ;;  %v2209_v6 = vpop.f32.mrf.mxu0  ;;  %v570_v55 = vld [vmem:[#allocation2 + $0x292] sm:$0xff] }
 0x108   :  { %2831 = vmatmul.mubr.f32.gmra.mxu1 %v568_v26  ;;  %v10349_v9 = vadd.f32 %v2592_v34, %v2207_v8  ;;  %v705_v34 = vld [vmem:[#allocation2 + $0x300] sm:$0xff] }
 0x109   :  { %2835 = vmatprep.mubr.f32.mxu1 %v697_v1  ;;  %v2594_v10 = vpop.f32.mrf.mxu1 }
 0x10a   :  { %v2212_v25 = vpop.f32.mrf.mxu0  ;;  %2451 = vmatmul.mubr.f32.gmra.mxu0 %v695_v45 }
 0x10b   :  { %2455 = vmatprep.mubr.f32.mxu0 %v10091_v60  ;;  %v571_v60 = vld [vmem:[#allocation2 + $0x2a2] sm:$0xff] }
 0x10c   :  { %v2597_v11 = vpop.f32.mrf.mxu1  ;;  %2836 = vmatmul.mubr.f32.gmra.mxu1 %v569_v48  ;;  %v2214_v61 = vpop.f32.mrf.mxu0 }
 0x10d   :  { %v10352_v23 = vadd.f32 %v2597_v11, %v2212_v25  ;;  %2840 = vmatprep.mubr.f32.mxu1 %v698_v20  ;;  %v706_v11 = vld [vmem:[#allocation2 + $0x308] sm:$0xff] }
 0x10e   :  { %v2599_v24 = vpop.f32.mrf.mxu1  ;;  %v2217_v46 = vpop.f32.mrf.mxu0  ;;  %2456 = vmatmul.mubr.f32.gmra.mxu0 %v696_v0 }
 0x10f   :  { %2460 = vmatprep.mubr.f32.mxu0 %v10103_v49  ;;  %v572_v49 = vld [vmem:[#allocation2 + $0x2aa] sm:$0xff] }
 0x110   :  { %v2602_v62 = vpop.f32.mrf.mxu1  ;;  %2841 = vmatmul.mubr.f32.gmra.mxu1 %v570_v55  ;;  %v2219_v28 = vpop.f32.mrf.mxu0 }
 0x111   :  { %v10355_v51 = vadd.f32 %v2602_v62, %v2217_v46  ;;  %2845 = vmatprep.mubr.f32.mxu1 %v699_v13  ;;  %v707_v62 = vld [vmem:[#allocation2 + $0x318] sm:$0xff] }
 0x112   :  { %v2604_v2 = vpop.f32.mrf.mxu1  ;;  %v2222_v14 = vpop.f32.mrf.mxu0  ;;  %2461 = vmatmul.mubr.f32.gmra.mxu0 %v697_v1 }
 0x113   :  { %2465 = vmatprep.mubr.f32.mxu0 %v10118_v19  ;;  %v573_v19 = vld [vmem:[#allocation2 + $0x2ba] sm:$0xff] }
 0x114   :  { %v2607_v58 = vpop.f32.mrf.mxu1  ;;  %2846 = vmatmul.mubr.f32.gmra.mxu1 %v571_v60  ;;  %v2224_v32 = vpop.f32.mrf.mxu0 }
 0x115   :  { %v10358_v21 = vadd.f32 %v2607_v58, %v2222_v14  ;;  %2850 = vmatprep.mubr.f32.mxu1 %v700_v42  ;;  %v708_v58 = vld [vmem:[#allocation2 + $0x320] sm:$0xff] }
 0x116   :  { %v2609_v40 = vpop.f32.mrf.mxu1  ;;  %v2227_v3 = vpop.f32.mrf.mxu0  ;;  %2466 = vmatmul.mubr.f32.gmra.mxu0 %v698_v20 }
 0x117   :  { %2470 = vmatprep.mubr.f32.mxu0 %v10127_v29  ;;  %v574_v29 = vld [vmem:[#allocation2 + $0x2c2] sm:$0xff] }
 0x118   :  { %v2612_v18 = vpop.f32.mrf.mxu1  ;;  %2851 = vmatmul.mubr.f32.gmra.mxu1 %v572_v49  ;;  %v2229_v15 = vpop.f32.mrf.mxu0 }
 0x119   :  { %v10361_v22 = vadd.f32 %v2612_v18, %v2227_v3  ;;  %2855 = vmatprep.mubr.f32.mxu1 %v701_v4  ;;  %v709_v18 = vld [vmem:[#allocation2 + $0x330] sm:$0xff] }
 0x11a   :  { %v2614_v44 = vpop.f32.mrf.mxu1  ;;  %v2232_v27 = vpop.f32.mrf.mxu0  ;;  %2471 = vmatmul.mubr.f32.gmra.mxu0 %v699_v13 }
 0x11b   :  { %2475 = vmatprep.mubr.f32.mxu0 %v10140_v30  ;;  %v575_v30 = vld [vmem:[#allocation2 + $0x2d2] sm:$0xff] }
 0x11c   :  { %v2617_v37 = vpop.f32.mrf.mxu1  ;;  %2856 = vmatmul.mubr.f32.gmra.mxu1 %v573_v19  ;;  %v2234_v53 = vpop.f32.mrf.mxu0 }
 0x11d   :  { %v10364_v52 = vadd.f32 %v2617_v37, %v2232_v27  ;;  %2860 = vmatprep.mubr.f32.mxu1 %v702_v5  ;;  %v710_v37 = vld [vmem:[#allocation2 + $0x338] sm:$0xff] }
 0x11e   :  { %v2619_v54 = vpop.f32.mrf.mxu1  ;;  %v2237_v56 = vpop.f32.mrf.mxu0  ;;  %2476 = vmatmul.mubr.f32.gmra.mxu0 %v700_v42 }
 0x11f   :  { %2480 = vmatprep.mubr.f32.mxu0 %v10149_v31  ;;  %v576_v31 = vld [vmem:[#allocation2 + $0x2da] sm:$0xff] }
 0x120   :  { %v2622_v63 = vpop.f32.mrf.mxu1  ;;  %2861 = vmatmul.mubr.f32.gmra.mxu1 %v574_v29  ;;  %v2239_v45 = vpop.f32.mrf.mxu0  ;;  %v903_v54 = vld [vmem:[#allocation2 + $0x1a] sm:$0xff] }
 0x121   :  { %v10367_v12 = vadd.f32 %v2622_v63, %v2237_v56  ;;  %2865 = vmatprep.mubr.f32.mxu1 %v703_v16  ;;  %v1160_v45 = vld [vmem:[#allocation2 + $0x31] sm:$0xff] }
 0x122   :  { %v2624_v7 = vpop.f32.mrf.mxu1  ;;  %v2242_v0 = vpop.f32.mrf.mxu0  ;;  %2481 = vmatmul.mubr.f32.gmra.mxu0 %v701_v4 }
 0x123   :  { %2485 = vmatprep.mubr.f32.mxu0 %v10162_v43  ;;  %v577_v43 = vld [vmem:[#allocation2 + $0x2ea] sm:$0xff] }
 0x124   :  { %v2627_v59 = vpop.f32.mrf.mxu1  ;;  %2866 = vmatmul.mubr.f32.gmra.mxu1 %v575_v30  ;;  %v2244_v26 = vpop.f32.mrf.mxu0  ;;  %v775_v30 = vld [vmem:[#allocation2 + $0x19] sm:$0xff] }
 0x125   :  { %v10370_v47 = vadd.f32 %v2627_v59, %v2242_v0  ;;  %2870 = vmatprep.mubr.f32.mxu1 %v704_v57  ;;  %v2134_v26 = vld [vmem:[%s14047_s1 + $0x470] sm:$0xff] }
 0x126   :  { %v2629_v8 = vpop.f32.mrf.mxu1  ;;  %v2247_v1 = vpop.f32.mrf.mxu0  ;;  %2486 = vmatmul.mubr.f32.gmra.mxu0 %v702_v5 }
 0x127   :  { %2490 = vmatprep.mubr.f32.mxu0 %v10171_v33  ;;  %v578_v33 = vld [vmem:[#allocation2 + $0x2f2] sm:$0xff] }
 0x128   :  { %v2632_v6 = vpop.f32.mrf.mxu1  ;;  %2871 = vmatmul.mubr.f32.gmra.mxu1 %v576_v31  ;;  %v2249_v48 = vpop.f32.mrf.mxu0 }
 0x129   :  { %v10373_v10 = vadd.f32 %v2632_v6, %v2247_v1  ;;  %2875 = vmatprep.mubr.f32.mxu1 %v705_v34  ;;  %v1161_v1 = vld [vmem:[#allocation2 + $0x39] sm:$0xff]  ;;  %v2133_v6 = vld [vmem:[%s14047_s1 + $0x468] sm:$0xff] }
 0x12a   :  { %v2634_v25 = vpop.f32.mrf.mxu1  ;;  %v2252_v20 = vpop.f32.mrf.mxu0  ;;  %2491 = vmatmul.mubr.f32.gmra.mxu0 %v703_v16 }
 0x12b   :  { %2495 = vmatprep.mubr.f32.mxu0 %v10188_v35  ;;  %v579_v35 = vld [vmem:[#allocation2 + $0x302] sm:$0xff]  ;;  %v905_v25 = vld [vmem:[#allocation2 + $0x32] sm:$0xff] }
 0x12c   :  { %v2637_v61 = vpop.f32.mrf.mxu1  ;;  %2876 = vmatmul.mubr.f32.gmra.mxu1 %v577_v43  ;;  %v2254_v55 = vpop.f32.mrf.mxu0 }
 0x12d   :  { %v10376_v24 = vadd.f32 %v2637_v61, %v2252_v20  ;;  %2880 = vmatprep.mubr.f32.mxu1 %v706_v11 }
 0x12e   :  { %v2639_v46 = vpop.f32.mrf.mxu1  ;;  %v2257_v13 = vpop.f32.mrf.mxu0  ;;  %2496 = vmatmul.mubr.f32.gmra.mxu0 %v704_v57  ;;  %v904_v57 = vld [vmem:[#allocation2 + $0x22] sm:$0xff] }
 0x12f   :  { %2500 = vmatprep.mubr.f32.mxu0 %v10203_v36  ;;  %v580_v36 = vld [vmem:[#allocation2 + $0x30a] sm:$0xff]  ;;  %v2131_v46 = vld [vmem:[%s14047_s1 + $0x458] sm:$0xff] }
 0x130   :  { %v2642_v28 = vpop.f32.mrf.mxu1  ;;  %2881 = vmatmul.mubr.f32.gmra.mxu1 %v578_v33  ;;  %v2259_v60 = vpop.f32.mrf.mxu0  ;;  %v1162_v33 = vld [vmem:[#allocation2 + $0x49] sm:$0xff] }
 0x131   :  { %v10379_v2 = vadd.f32 %v2642_v28, %v2257_v13  ;;  %2885 = vmatprep.mubr.f32.mxu1 %v707_v62  ;;  %v906_v28 = vld [vmem:[#allocation2 + $0x3a] sm:$0xff] }
 0x132   :  { %v2644_v14 = vpop.f32.mrf.mxu1  ;;  %v2262_v42 = vpop.f32.mrf.mxu0  ;;  %2501 = vmatmul.mubr.f32.gmra.mxu0 %v705_v34  ;;  %v776_v34 = vld [vmem:[#allocation2 + $0x21] sm:$0xff] }
 0x133   :  { %2505 = vmatprep.mubr.f32.mxu0 %v10218_v38  ;;  %v581_v38 = vld [vmem:[#allocation2 + $0x31a] sm:$0xff]  ;;  %v2130_v14 = vld [vmem:[%s14047_s1 + $0x450] sm:$0xff] }
 0x134   :  { %v2647_v32 = vpop.f32.mrf.mxu1  ;;  %2886 = vmatmul.mubr.f32.gmra.mxu1 %v579_v35  ;;  %v2264_v49 = vpop.f32.mrf.mxu0  ;;  %v1034_v35 = vld [vmem:[#allocation2 + $0x48] sm:$0xff] }
 0x135   :  { %v10382_v40 = vadd.f32 %v2647_v32, %v2262_v42  ;;  %2890 = vmatprep.mubr.f32.mxu1 %v708_v58  ;;  %v1163_v32 = vld [vmem:[#allocation2 + $0x51] sm:$0xff]  ;;  %v2129_v49 = vld [vmem:[%s14047_s1 + $0x448] sm:$0xff] }
 0x136   :  { %v2649_v3 = vpop.f32.mrf.mxu1  ;;  %v2267_v4 = vpop.f32.mrf.mxu0  ;;  %2506 = vmatmul.mubr.f32.gmra.mxu0 %v706_v11  ;;  %v1033_v11 = vld [vmem:[#allocation2 + $0x38] sm:$0xff] }
 0x137   :  { %2510 = vmatprep.mubr.f32.mxu0 %v10233_v39  ;;  %v582_v39 = vld [vmem:[#allocation2 + $0x322] sm:$0xff] }
 0x138   :  { %v2652_v15 = vpop.f32.mrf.mxu1  ;;  %2891 = vmatmul.mubr.f32.gmra.mxu1 %v580_v36  ;;  %v2269_v19 = vpop.f32.mrf.mxu0 }
 0x139   :  { %v10385_v44 = vadd.f32 %v2652_v15, %v2267_v4  ;;  %2895 = vmatprep.mubr.f32.mxu1 %v709_v18  ;;  %v907_v4 = vld [vmem:[#allocation2 + $0x4a] sm:$0xff]  ;;  %v2128_v19 = vld [vmem:[%s14047_s1 + $0x440] sm:$0xff] }
 0x13a   :  { %v2654_v27 = vpop.f32.mrf.mxu1  ;;  %v2272_v5 = vpop.f32.mrf.mxu0  ;;  %2511 = vmatmul.mubr.f32.gmra.mxu0 %v707_v62  ;;  %v1035_v15 = vld [vmem:[#allocation2 + $0x50] sm:$0xff] }
 0x13b   :  { %2515 = vmatprep.mubr.f32.mxu0 %v10248_v41  ;;  %v1032_v41 = vld [vmem:[#allocation2 + $0x30] sm:$0xff] }
 0x13c   :  { %v2657_v53 = vpop.f32.mrf.mxu1  ;;  %2896 = vmatmul.mubr.f32.gmra.mxu1 %v581_v38  ;;  %v2274_v29 = vpop.f32.mrf.mxu0 }
 0x13d   :  { %v10388_v56 = vadd.f32 %v2657_v53, %v2272_v5  ;;  %2900 = vmatprep.mubr.f32.mxu1 %v710_v37  ;;  %v1164_v5 = vld [vmem:[#allocation2 + $0x61] sm:$0xff]  ;;  %v2127_v37 = vld [vmem:[%s14047_s1 + $0x438] sm:$0xff] }
 0x13e   :  { %v2659_v16 = vpop.f32.mrf.mxu1  ;;  %v2277_v63 = vpop.f32.mrf.mxu0  ;;  %2516 = vmatmul.mubr.f32.gmra.mxu0 %v708_v58 }
 0x13f   :  { %2970 = vmatprep.mubr.f32.mxu0 %v903_v54  ;;  %v908_v54 = vld [vmem:[#allocation2 + $0x52] sm:$0xff]  ;;  %v1036_v16 = vld [vmem:[#allocation2 + $0x60] sm:$0xff] }
 0x140   :  { %v2662_v7 = vpop.f32.mrf.mxu1  ;;  %2901 = vmatmul.mubr.f32.gmra.mxu1 %v582_v39  ;;  %v2279_v0 = vpop.f32.mrf.mxu0 }
 0x141   :  { %v10390_v59 = vadd.f32 %v2662_v7, %v2277_v63  ;;  %3355 = vmatprep.mubr.f32.mxu1 %v1160_v45  ;;  %v2126_v7 = vld [vmem:[%s14047_s1 + $0x430] sm:$0xff] }
 0x142   :  { %v2664_v31 = vpop.f32.mrf.mxu1  ;;  %v2282_v8 = vpop.f32.mrf.mxu0  ;;  %2971 = vmatmul.mubr.f32.vlgmr.msra.gmra.mxu0 %v775_v30  ;;  %v1165_v30 = vld [vmem:[#allocation2 + $0x69] sm:$0xff] }
 0x143   :  { %8987 = vmatpush3.msra.mxu0 %v10309_v50  ;;  %2975 = vmatprep.mubr.f32.mxu0 %v904_v57  ;;  %v2132_v50 = vld [vmem:[%s14047_s1 + $0x460] sm:$0xff]  ;;  %v1037_v31 = vld [vmem:[#allocation2 + $0x68] sm:$0xff] }
 0x144   :  { %v2667_v48 = vpop.f32.mrf.mxu1  ;;  %v2284_v43 = vpop.f32.mrf.mxu0  ;;  %3356 = vmatmul.mubr.f32.vlgmr.msra.gmra.mxu1 %v1032_v41  ;;  %8988 = vmatprep.subr.mxu0 %v2134_v26  ;;  %v909_v41 = vld [vmem:[#allocation2 + $0x62] sm:$0xff] }
 0x145   :  { %v10399_v20 = vadd.f32 %v2667_v48, %v2282_v8  ;;  %3360 = vmatprep.mubr.f32.mxu1 %v1161_v1  ;;  %8989 = vmatpush3.msra.mxu0 %v2134_v26  ;;  %v910_v43 = vld [vmem:[#allocation2 + $0x6a] sm:$0xff] }
 0x146   :  { %v2669_v61 = vpop.f32.mrf.mxu1  ;;  %v2287_v55 = vpop.f32.mrf.mxu0  ;;  %2976 = vmatmul.mubr.f32.gmra.mxu0 %v776_v34  ;;  %8990 = vmatprep.subr.mxu0 %v2133_v6  ;;  %v1166_v34 = vld [vmem:[#allocation2 + $0x79] sm:$0xff] }
 0x147   :  { %2980 = vmatprep.mubr.f32.mxu0 %v905_v25  ;;  %8991 = vmatpush3.msra.mxu0 %v2133_v6 }
 0x148   :  { %v2672_v13 = vpop.f32.mrf.mxu1  ;;  %v2289_v62 = vpop.f32.mrf.mxu0  ;;  %3361 = vmatmul.mubr.f32.gmra.mxu1 %v1033_v11  ;;  %8992 = vmatprep.subr.mxu0 %v2132_v50  ;;  %v1038_v11 = vld [vmem:[#allocation2 + $0x78] sm:$0xff] }
 0x149   :  { %v10407_v60 = vadd.f32 %v2672_v13, %v2287_v55  ;;  %3365 = vmatprep.mubr.f32.mxu1 %v1162_v33  ;;  %8993 = vmatpush3.msra.mxu0 %v2132_v50  ;;  %v1167_v55 = vld [vmem:[#allocation2 + $0x81] sm:$0xff] }
 0x14a   :  { %v2674_v42 = vpop.f32.mrf.mxu1  ;;  %v2292_v58 = vpop.f32.mrf.mxu0  ;;  %2981 = vmatmul.mubr.f32.gmra.mxu0 %v1160_v45  ;;  %8994 = vmatprep.subr.mxu0 %v2131_v46  ;;  %v911_v13 = vld [vmem:[#allocation2 + $0x7a] sm:$0xff] }
 0x14b   :  { %2985 = vmatprep.mubr.f32.mxu0 %v906_v28  ;;  %8995 = vmatpush3.msra.mxu0 %v2131_v46  ;;  %v1039_v28 = vld [vmem:[#allocation2 + $0x80] sm:$0xff]  ;;  %v1168_v42 = vld [vmem:[#allocation2 + $0x91] sm:$0xff] }
 0x14c   :  { %v2677_v36 = vpop.f32.mrf.mxu1  ;;  %v2294_v3 = vpop.f32.mrf.mxu0  ;;  %3366 = vmatmul.mubr.f32.gmra.mxu1 %v1034_v35  ;;  %8996 = vmatprep.subr.mxu0 %v2130_v14 }
 0x14d   :  { %v10415_v18 = vadd.f32 %v2677_v36, %v2292_v58  ;;  %3370 = vmatprep.mubr.f32.mxu1 %v1163_v32  ;;  %8997 = vmatpush3.msra.mxu0 %v2130_v14  ;;  %v1040_v3 = vld [vmem:[#allocation2 + $0x90] sm:$0xff] }
 0x14e   :  { %v2679_v38 = vpop.f32.mrf.mxu1  ;;  %v2297_v27 = vpop.f32.mrf.mxu0  ;;  %2986 = vmatmul.mubr.f32.gmra.mxu0 %v1161_v1  ;;  %8998 = vmatprep.subr.mxu0 %v2129_v49 }
 0x14f   :  { %2990 = vmatprep.mubr.f32.mxu0 %v907_v4  ;;  %8999 = vmatpush3.msra.mxu0 %v2129_v49  ;;  %v912_v49 = vld [vmem:[#allocation2 + $0x82] sm:$0xff] }
 0x150   :  { %v2682_v53 = vpop.f32.mrf.mxu1  ;;  %v2299_v29 = vpop.f32.mrf.mxu0  ;;  %3371 = vmatmul.mubr.f32.gmra.mxu1 %v1035_v15  ;;  %9000 = vmatprep.subr.mxu0 %v2128_v19  ;;  %v2125_v38 = vld [vmem:[%s14047_s1 + $0x428] sm:$0xff] }
 0x151   :  { %v10423_v39 = vadd.f32 %v2682_v53, %v2297_v27  ;;  %3375 = vmatprep.mubr.f32.mxu1 %v1164_v5  ;;  %9001 = vmatpush3.msra.mxu0 %v2128_v19  ;;  %v1169_v19 = vld [vmem:[#allocation2 + $0x99] sm:$0xff] }
 0x152   :  { %v2684_v63 = vpop.f32.mrf.mxu1  ;;  %v2302_v45 = vpop.f32.mrf.mxu0  ;;  %2991 = vmatmul.mubr.f32.gmra.mxu0 %v1162_v33  ;;  %9002 = vmatprep.subr.mxu0 %v2127_v37  ;;  %v1041_v29 = vld [vmem:[#allocation2 + $0x98] sm:$0xff] }
 0x153   :  { %2995 = vmatprep.mubr.f32.mxu0 %v908_v54  ;;  %9003 = vmatpush3.msra.mxu0 %v2127_v37  ;;  %v913_v37 = vld [vmem:[#allocation2 + $0x92] sm:$0xff]  ;;  %v1170_v63 = vld [vmem:[#allocation2 + $0xa9] sm:$0xff] }
 0x154   :  { %v2687_v0 = vpop.f32.mrf.mxu1  ;;  %v2304_v57 = vpop.f32.mrf.mxu0  ;;  %3376 = vmatmul.mubr.f32.gmra.mxu1 %v1036_v16  ;;  %9004 = vmatprep.subr.mxu0 %v2126_v7 }
 0x155   :  { %v10428_v26 = vadd.f32 %v2687_v0, %v2302_v45  ;;  %3380 = vmatprep.mubr.f32.mxu1 %v1165_v30  ;;  %9005 = vmatpush3.msra.mxu0 %v2126_v7  ;;  %v914_v7 = vld [vmem:[#allocation2 + $0x9a] sm:$0xff]  ;;  %v1042_v57 = vld [vmem:[#allocation2 + $0xa8] sm:$0xff] }
 0x156   :  { %v2689_v8 = vpop.f32.mrf.mxu1  ;;  %v2307_v1 = vpop.f32.mrf.mxu0  ;;  %2996 = vmatmul.mubr.f32.gmra.mxu0 %v1163_v32  ;;  %9006 = vmatprep.subr.mxu0 %v2125_v38 }
 0x157   :  { %3000 = vmatprep.mubr.f32.mxu0 %v909_v41  ;;  %9007 = vmatpush3.msra.mxu0 %v2125_v38  ;;  %v1171_v8 = vld [vmem:[#allocation2 + $0xb1] sm:$0xff] }
 0x158   :  { %v2692_v6 = vpop.f32.mrf.mxu1  ;;  %v2309_v48 = vpop.f32.mrf.mxu0  ;;  %3381 = vmatmul.mubr.f32.gmra.mxu1 %v1037_v31 }
 0x159   :  { %v10430_v25 = vadd.f32 %v2692_v6, %v2307_v1  ;;  %3385 = vmatprep.mubr.f32.mxu1 %v1166_v34  ;;  %v915_v6 = vld [vmem:[#allocation2 + $0xaa] sm:$0xff] }
 0x15a   :  { %v2694_v50 = vpop.f32.mrf.mxu1  ;;  %v2312_v61 = vpop.f32.mrf.mxu0  ;;  %3001 = vmatmul.mubr.f32.gmra.mxu0 %v1164_v5 }
 0x15b   :  { %3005 = vmatprep.mubr.f32.mxu0 %v910_v43  ;;  %v1043_v43 = vld [vmem:[#allocation2 + $0xb0] sm:$0xff] }
 0x15c   :  { %v2697_v33 = vpop.f32.mrf.mxu1  ;;  %v2314_v46 = vpop.f32.mrf.mxu0  ;;  %3386 = vmatmul.mubr.f32.gmra.mxu1 %v1038_v11 }
 0x15d   :  { %v10432_v62 = vadd.f32 %v2697_v33, %v2312_v61  ;;  %3390 = vmatprep.mubr.f32.mxu1 %v1167_v55  ;;  %v1172_v61 = vld [vmem:[#allocation2 + $0xc1] sm:$0xff]  ;;  %v916_v46 = vld [vmem:[#allocation2 + $0xb2] sm:$0xff] }
 0x15e   :  { %v2699_v35 = vpop.f32.mrf.mxu1  ;;  %v2317_v14 = vpop.f32.mrf.mxu0  ;;  %3006 = vmatmul.mubr.f32.gmra.mxu0 %v1165_v30 }
 0x15f   :  { %3010 = vmatprep.mubr.f32.mxu0 %v911_v13 }
 0x160   :  { %v2702_v58 = vpop.f32.mrf.mxu1  ;;  %v2319_v32 = vpop.f32.mrf.mxu0  ;;  %3391 = vmatmul.mubr.f32.gmra.mxu1 %v1039_v28  ;;  %v1044_v28 = vld [vmem:[#allocation2 + $0xc0] sm:$0xff] }
 0x161   :  { %v10434_v36 = vadd.f32 %v2702_v58, %v2317_v14  ;;  %3395 = vmatprep.mubr.f32.mxu1 %v1168_v42  ;;  %v2124_v58 = vld [vmem:[%s14047_s1 + $0x420] sm:$0xff] }
 0x162   :  { %v2704_v4 = vpop.f32.mrf.mxu1  ;;  %v2322_v15 = vpop.f32.mrf.mxu0  ;;  %3011 = vmatmul.mubr.f32.gmra.mxu0 %v1166_v34  ;;  %9008 = vmatprep.subr.mxu0 %v2124_v58 }
 0x163   :  { %3015 = vmatprep.mubr.f32.mxu0 %v912_v49  ;;  %9009 = vmatpush3.msra.mxu0 %v2124_v58  ;;  %v921_v58 = vld [vmem:[#allocation2 + $0xf2] sm:$0xff] }
 0x164   :  { %v2707_v27 = vpop.f32.mrf.mxu1  ;;  %v2324_v5 = vpop.f32.mrf.mxu0  ;;  %3396 = vmatmul.mubr.f32.gmra.mxu1 %v1040_v3  ;;  %v917_v3 = vld [vmem:[#allocation2 + $0xc2] sm:$0xff] }
 0x165   :  { %v10439_v53 = vadd.f32 %v2707_v27, %v2322_v15  ;;  %3400 = vmatprep.mubr.f32.mxu1 %v1169_v19  ;;  %v1045_v15 = vld [vmem:[#allocation2 + $0xc8] sm:$0xff]  ;;  %v1174_v27 = vld [vmem:[#allocation2 + $0xd9] sm:$0xff] }
 0x166   :  { %v2709_v54 = vpop.f32.mrf.mxu1  ;;  %v2327_v16 = vpop.f32.mrf.mxu0  ;;  %3016 = vmatmul.mubr.f32.gmra.mxu0 %v1167_v55 }
 0x167   :  { %3020 = vmatprep.mubr.f32.mxu0 %v913_v37 }
 0x168   :  { %v2712_v45 = vpop.f32.mrf.mxu1  ;;  %v2329_v30 = vpop.f32.mrf.mxu0  ;;  %3401 = vmatmul.mubr.f32.gmra.mxu1 %v1041_v29  ;;  %v918_v29 = vld [vmem:[#allocation2 + $0xca] sm:$0xff] }
 0x169   :  { %v10441_v0 = vadd.f32 %v2712_v45, %v2327_v16  ;;  %3405 = vmatprep.mubr.f32.mxu1 %v1170_v63  ;;  %v1046_v16 = vld [vmem:[#allocation2 + $0xd8] sm:$0xff]  ;;  %v1175_v30 = vld [vmem:[#allocation2 + $0xe1] sm:$0xff] }
 0x16a   :  { %v2714_v41 = vpop.f32.mrf.mxu1  ;;  %v2332_v31 = vpop.f32.mrf.mxu0  ;;  %3021 = vmatmul.mubr.f32.gmra.mxu0 %v1168_v42  ;;  %v1173_v42 = vld [vmem:[#allocation2 + $0xc9] sm:$0xff] }
 0x16b   :  { %3025 = vmatprep.mubr.f32.mxu0 %v914_v7  ;;  %v919_v41 = vld [vmem:[#allocation2 + $0xda] sm:$0xff] }
 0x16c   :  { %v2717_v1 = vpop.f32.mrf.mxu1  ;;  %v2334_v34 = vpop.f32.mrf.mxu0  ;;  %3406 = vmatmul.mubr.f32.gmra.mxu1 %v1042_v57 }
 0x16d   :  { %v10443_v48 = vadd.f32 %v2717_v1, %v2332_v31  ;;  %3410 = vmatprep.mubr.f32.mxu1 %v1171_v8 }
 0x16e   :  { %v2719_v11 = vpop.f32.mrf.mxu1  ;;  %v2337_v50 = vpop.f32.mrf.mxu0  ;;  %3026 = vmatmul.mubr.f32.gmra.mxu0 %v1169_v19 }
 0x16f   :  { %3030 = vmatprep.mubr.f32.mxu0 %v915_v6  ;;  %v1176_v6 = vld [vmem:[#allocation2 + $0xf1] sm:$0xff] }
 0x170   :  { %v2722_v55 = vpop.f32.mrf.mxu1  ;;  %v2339_v33 = vpop.f32.mrf.mxu0  ;;  %3411 = vmatmul.mubr.f32.gmra.mxu1 %v1043_v43 }
 0x171   :  { %v10445_v13 = vadd.f32 %v2722_v55, %v2337_v50  ;;  %3415 = vmatprep.mubr.f32.mxu1 %v1172_v61  ;;  %v920_v50 = vld [vmem:[#allocation2 + $0xe2] sm:$0xff]  ;;  %v1048_v55 = vld [vmem:[#allocation2 + $0xf0] sm:$0xff] }
 0x172   :  { %v2724_v35 = vpop.f32.mrf.mxu1  ;;  %v2342_v14 = vpop.f32.mrf.mxu0  ;;  %3031 = vmatmul.mubr.f32.gmra.mxu0 %v1170_v63 }
 0x173   :  { %3035 = vmatprep.mubr.f32.mxu0 %v916_v46  ;;  %v2123_v35 = vld [vmem:[%s14047_s1 + $0x418] sm:$0xff] }
 0x174   :  { %v2727_v32 = vpop.f32.mrf.mxu1  ;;  %v2344_v49 = vpop.f32.mrf.mxu0  ;;  %3416 = vmatmul.mubr.f32.gmra.mxu1 %v1044_v28  ;;  %v1177_v28 = vld [vmem:[#allocation2 + $0xf9] sm:$0xff]  ;;  %9010 = vmatprep.subr.mxu0 %v2123_v35 }
 0x175   :  { %v10450_v4 = vadd.f32 %v2727_v32, %v2342_v14  ;;  %3420 = vmatprep.mubr.f32.mxu1 %v1173_v42  ;;  %v1049_v49 = vld [vmem:[#allocation2 + $0xf8] sm:$0xff]  ;;  %9011 = vmatpush3.msra.mxu0 %v2123_v35 }
 0x176   :  { %v2729_v19 = vpop.f32.mrf.mxu1  ;;  %v2347_v38 = vpop.f32.mrf.mxu0  ;;  %3036 = vmatmul.mubr.f32.gmra.mxu0 %v1171_v8  ;;  %v1047_v8 = vld [vmem:[#allocation2 + $0xe0] sm:$0xff] }
 0x177   :  { %3040 = vmatprep.mubr.f32.mxu0 %v917_v3  ;;  %v1178_v19 = vld [vmem:[#allocation2 + $0x109] sm:$0xff] }
 0x178   :  { %v2732_v5 = vpop.f32.mrf.mxu1  ;;  %v2349_v37 = vpop.f32.mrf.mxu0  ;;  %3421 = vmatmul.mubr.f32.gmra.mxu1 %v1045_v15 }
 0x179   :  { %v10452_v54 = vadd.f32 %v2732_v5, %v2347_v38  ;;  %3425 = vmatprep.mubr.f32.mxu1 %v1174_v27  ;;  %v922_v5 = vld [vmem:[#allocation2 + $0xfa] sm:$0xff] }
 0x17a   :  { %v2734_v63 = vpop.f32.mrf.mxu1  ;;  %v2352_v45 = vpop.f32.mrf.mxu0  ;;  %3041 = vmatmul.mubr.f32.gmra.mxu0 %v1172_v61 }
 0x17b   :  { %3045 = vmatprep.mubr.f32.mxu0 %v918_v29  ;;  %v1050_v29 = vld [vmem:[#allocation2 + $0x108] sm:$0xff] }
 0x17c   :  { %v2737_v7 = vpop.f32.mrf.mxu1  ;;  %v2354_v57 = vpop.f32.mrf.mxu0  ;;  %3426 = vmatmul.mubr.f32.gmra.mxu1 %v1046_v16 }
 0x17d   :  { %v10454_v31 = vadd.f32 %v2737_v7, %v2352_v45  ;;  %3430 = vmatprep.mubr.f32.mxu1 %v1175_v30  ;;  %v1179_v45 = vld [vmem:[#allocation2 + $0x111] sm:$0xff] }
 0x17e   :  { %v2739_v1 = vpop.f32.mrf.mxu1  ;;  %v2357_v34 = vpop.f32.mrf.mxu0  ;;  %3046 = vmatmul.mubr.f32.gmra.mxu0 %v1173_v42 }
 0x17f   :  { %3050 = vmatprep.mubr.f32.mxu0 %v919_v41  ;;  %v923_v41 = vld [vmem:[#allocation2 + $0x10a] sm:$0xff] }
 0x180   :  { %v2742_v43 = vpop.f32.mrf.mxu1  ;;  %v2359_v11 = vpop.f32.mrf.mxu0  ;;  %3431 = vmatmul.mubr.f32.gmra.mxu1 %v1047_v8  ;;  %v1051_v8 = vld [vmem:[#allocation2 + $0x110] sm:$0xff] }
 0x181   :  { %v10456_v61 = vadd.f32 %v2742_v43, %v2357_v34  ;;  %3435 = vmatprep.mubr.f32.mxu1 %v1176_v6  ;;  %v1180_v43 = vld [vmem:[#allocation2 + $0x121] sm:$0xff] }
 0x182   :  { %v2744_v33 = vpop.f32.mrf.mxu1  ;;  %v2362_v46 = vpop.f32.mrf.mxu0  ;;  %3051 = vmatmul.mubr.f32.gmra.mxu0 %v1174_v27 }
 0x183   :  { %3055 = vmatprep.mubr.f32.mxu0 %v920_v50  ;;  %v1052_v33 = vld [vmem:[#allocation2 + $0x120] sm:$0xff] }
 0x184   :  { %v2747_v14 = vpop.f32.mrf.mxu1  ;;  %v2364_v42 = vpop.f32.mrf.mxu0  ;;  %3436 = vmatmul.mubr.f32.gmra.mxu1 %v1048_v55  ;;  %v924_v55 = vld [vmem:[#allocation2 + $0x112] sm:$0xff] }
 0x185   :  { %v10461_v32 = vadd.f32 %v2747_v14, %v2362_v46  ;;  %3440 = vmatprep.mubr.f32.mxu1 %v1177_v28  ;;  %v1181_v14 = vld [vmem:[#allocation2 + $0x129] sm:$0xff] }
 0x186   :  { %v2749_v3 = vpop.f32.mrf.mxu1  ;;  %v2367_v15 = vpop.f32.mrf.mxu0  ;;  %3056 = vmatmul.mubr.f32.gmra.mxu0 %v1175_v30  ;;  %v2122_v42 = vld [vmem:[%s14047_s1 + $0x410] sm:$0xff] }
 0x187   :  { %3060 = vmatprep.mubr.f32.mxu0 %v921_v58  ;;  %9012 = vmatprep.subr.mxu0 %v2122_v42 }
 0x188   :  { %v2752_v38 = vpop.f32.mrf.mxu1  ;;  %v2369_v27 = vpop.f32.mrf.mxu0  ;;  %3441 = vmatmul.mubr.f32.gmra.mxu1 %v1049_v49  ;;  %v925_v49 = vld [vmem:[#allocation2 + $0x122] sm:$0xff]  ;;  %9013 = vmatpush3.msra.mxu0 %v2122_v42 }
 0x189   :  { %v10463_v37 = vadd.f32 %v2752_v38, %v2367_v15  ;;  %3445 = vmatprep.mubr.f32.mxu1 %v1178_v19  ;;  %v1053_v15 = vld [vmem:[#allocation2 + $0x128] sm:$0xff] }
 0x18a   :  { %v2754_v16 = vpop.f32.mrf.mxu1  ;;  %v2372_v63 = vpop.f32.mrf.mxu0  ;;  %3061 = vmatmul.mubr.f32.gmra.mxu0 %v1176_v6 }
 0x18b   :  { %3065 = vmatprep.mubr.f32.mxu0 %v922_v5  ;;  %v926_v16 = vld [vmem:[#allocation2 + $0x12a] sm:$0xff] }
 0x18c   :  { %v2757_v7 = vpop.f32.mrf.mxu1  ;;  %v2374_v57 = vpop.f32.mrf.mxu0  ;;  %3446 = vmatmul.mubr.f32.gmra.mxu1 %v1050_v29 }
 0x18d   :  { %v10465_v30 = vadd.f32 %v2757_v7, %v2372_v63  ;;  %3450 = vmatprep.mubr.f32.mxu1 %v1179_v45  ;;  %v1054_v7 = vld [vmem:[#allocation2 + $0x138] sm:$0xff] }
 0x18e   :  { %v2759_v1 = vpop.f32.mrf.mxu1  ;;  %v2377_v34 = vpop.f32.mrf.mxu0  ;;  %3066 = vmatmul.mubr.f32.gmra.mxu0 %v1177_v28 }
 0x18f   :  { %3070 = vmatprep.mubr.f32.mxu0 %v923_v41 }
 0x190   :  { %v2762_v11 = vpop.f32.mrf.mxu1  ;;  %v2379_v50 = vpop.f32.mrf.mxu0  ;;  %3451 = vmatmul.mubr.f32.gmra.mxu1 %v1051_v8  ;;  %v1183_v8 = vld [vmem:[#allocation2 + $0x141] sm:$0xff] }
 0x191   :  { %v10467_v6 = vadd.f32 %v2762_v11, %v2377_v34  ;;  %3455 = vmatprep.mubr.f32.mxu1 %v1180_v43  ;;  %v927_v11 = vld [vmem:[#allocation2 + $0x13a] sm:$0xff] }
 0x192   :  { %v2764_v46 = vpop.f32.mrf.mxu1  ;;  %v2382_v35 = vpop.f32.mrf.mxu0  ;;  %3071 = vmatmul.mubr.f32.gmra.mxu0 %v1178_v19  ;;  %v1182_v19 = vld [vmem:[#allocation2 + $0x139] sm:$0xff] }
 0x193   :  { %3075 = vmatprep.mubr.f32.mxu0 %v924_v55  ;;  %v1055_v50 = vld [vmem:[#allocation2 + $0x140] sm:$0xff]  ;;  %v1184_v46 = vld [vmem:[#allocation2 + $0x151] sm:$0xff] }
 0x194   :  { %v2767_v28 = vpop.f32.mrf.mxu1  ;;  %v2384_v58 = vpop.f32.mrf.mxu0  ;;  %3456 = vmatmul.mubr.f32.gmra.mxu1 %v1052_v33 }
 0x195   :  { %v10472_v3 = vadd.f32 %v2767_v28, %v2382_v35  ;;  %3460 = vmatprep.mubr.f32.mxu1 %v1181_v14  ;;  %v928_v28 = vld [vmem:[#allocation2 + $0x142] sm:$0xff]  ;;  %v1056_v58 = vld [vmem:[#allocation2 + $0x150] sm:$0xff] }
 0x196   :  { %v2769_v38 = vpop.f32.mrf.mxu1  ;;  %v2387_v27 = vpop.f32.mrf.mxu0  ;;  %3076 = vmatmul.mubr.f32.gmra.mxu0 %v1179_v45 }
 0x197   :  { %3080 = vmatprep.mubr.f32.mxu0 %v925_v49  ;;  %v1185_v38 = vld [vmem:[#allocation2 + $0x159] sm:$0xff] }
 0x198   :  { %v2772_v5 = vpop.f32.mrf.mxu1  ;;  %v2389_v29 = vpop.f32.mrf.mxu0  ;;  %3461 = vmatmul.mubr.f32.gmra.mxu1 %v1053_v15 }
 0x199   :  { %v10474_v63 = vadd.f32 %v2772_v5, %v2387_v27  ;;  %3465 = vmatprep.mubr.f32.mxu1 %v1182_v19  ;;  %v2121_v27 = vld [vmem:[%s14047_s1 + $0x408] sm:$0xff]  ;;  %v929_v29 = vld [vmem:[#allocation2 + $0x152] sm:$0xff] }
 0x19a   :  { %v2774_v57 = vpop.f32.mrf.mxu1  ;;  %v2392_v41 = vpop.f32.mrf.mxu0  ;;  %3081 = vmatmul.mubr.f32.gmra.mxu0 %v1180_v43  ;;  %9014 = vmatprep.subr.mxu0 %v2121_v27 }
 0x19b   :  { %3085 = vmatprep.mubr.f32.mxu0 %v926_v16  ;;  %9015 = vmatpush3.msra.mxu0 %v2121_v27 }
 0x19c   :  { %v2777_v1 = vpop.f32.mrf.mxu1  ;;  %v2394_v34 = vpop.f32.mrf.mxu0  ;;  %3466 = vmatmul.mubr.f32.gmra.mxu1 %v1054_v7  ;;  %v1057_v7 = vld [vmem:[#allocation2 + $0x158] sm:$0xff] }
 0x19d   :  { %v10476_v45 = vadd.f32 %v2777_v1, %v2392_v41  ;;  %3470 = vmatprep.mubr.f32.mxu1 %v1183_v8 }
 0x19e   :  { %v2779_v55 = vpop.f32.mrf.mxu1  ;;  %v2397_v33 = vpop.f32.mrf.mxu0  ;;  %3086 = vmatmul.mubr.f32.gmra.mxu0 %v1181_v14 }
 0x19f   :  { %3090 = vmatprep.mubr.f32.mxu0 %v927_v11  ;;  %v930_v11 = vld [vmem:[#allocation2 + $0x15a] sm:$0xff]  ;;  %v1058_v55 = vld [vmem:[#allocation2 + $0x168] sm:$0xff] }
 0x1a0   :  { %v2782_v35 = vpop.f32.mrf.mxu1  ;;  %v2399_v42 = vpop.f32.mrf.mxu0  ;;  %3471 = vmatmul.mubr.f32.gmra.mxu1 %v1055_v50 }
 0x1a1   :  { %v10478_v43 = vadd.f32 %v2782_v35, %v2397_v33  ;;  %3475 = vmatprep.mubr.f32.mxu1 %v1184_v46  ;;  %v1187_v42 = vld [vmem:[#allocation2 + $0x171] sm:$0xff] }
 0x1a2   :  { %v2784_v49 = vpop.f32.mrf.mxu1  ;;  %v2402_v15 = vpop.f32.mrf.mxu0  ;;  %3091 = vmatmul.mubr.f32.gmra.mxu0 %v1182_v19  ;;  %v1186_v19 = vld [vmem:[#allocation2 + $0x169] sm:$0xff] }
 0x1a3   :  { %3095 = vmatprep.mubr.f32.mxu0 %v928_v28  ;;  %v931_v49 = vld [vmem:[#allocation2 + $0x16a] sm:$0xff] }
 0x1a4   :  { %v2787_v14 = vpop.f32.mrf.mxu1  ;;  %v2404_v5 = vpop.f32.mrf.mxu0  ;;  %3476 = vmatmul.mubr.f32.gmra.mxu1 %v1056_v58 }
 0x1a5   :  { %v10483_v16 = vadd.f32 %v2787_v14, %v2402_v15  ;;  %3480 = vmatprep.mubr.f32.mxu1 %v1185_v38  ;;  %v1059_v15 = vld [vmem:[#allocation2 + $0x170] sm:$0xff]  ;;  %v1188_v5 = vld [vmem:[#allocation2 + $0x181] sm:$0xff] }
 0x1a6   :  { %v2789_v57 = vpop.f32.mrf.mxu1  ;;  %v2407_v41 = vpop.f32.mrf.mxu0  ;;  %3096 = vmatmul.mubr.f32.gmra.mxu0 %v1183_v8 }
 0x1a7   :  { %3100 = vmatprep.mubr.f32.mxu0 %v929_v29  ;;  %v932_v57 = vld [vmem:[#allocation2 + $0x172] sm:$0xff] }
 0x1a8   :  { %v2792_v1 = vpop.f32.mrf.mxu1  ;;  %v2409_v34 = vpop.f32.mrf.mxu0  ;;  %3481 = vmatmul.mubr.f32.gmra.mxu1 %v1057_v7 }
 0x1a9   :  { %v10485_v50 = vadd.f32 %v2792_v1, %v2407_v41  ;;  %3485 = vmatprep.mubr.f32.mxu1 %v1186_v19  ;;  %v1060_v41 = vld [vmem:[#allocation2 + $0x180] sm:$0xff] }
 0x1aa   :  { %v2794_v33 = vpop.f32.mrf.mxu1  ;;  %v2412_v35 = vpop.f32.mrf.mxu0  ;;  %3101 = vmatmul.mubr.f32.gmra.mxu0 %v1184_v46 }
 0x1ab   :  { %14117 = vst [vmem:[#allocation4_spill] sm:$0xff] %v10485_v50  ;;  %3105 = vmatprep.mubr.f32.mxu0 %v930_v11  ;;  %v1189_v11 = vld [vmem:[#allocation2 + $0x189] sm:$0xff] }
 0x1ac   :  { %v2797_v28 = vpop.f32.mrf.mxu1  ;;  %v2414_v58 = vpop.f32.mrf.mxu0  ;;  %3486 = vmatmul.mubr.f32.gmra.mxu1 %v1058_v55  ;;  %v2120_v55 = vld [vmem:[%s14047_s1 + $0x400] sm:$0xff] }
 0x1ad   :  { %v10487_v8 = vadd.f32 %v2797_v28, %v2412_v35  ;;  %3490 = vmatprep.mubr.f32.mxu1 %v1187_v42  ;;  %v933_v35 = vld [vmem:[#allocation2 + $0x182] sm:$0xff]  ;;  %9016 = vmatprep.subr.mxu0 %v2120_v55 }
 0x1ae   :  { %v2799_v27 = vpop.f32.mrf.mxu1  ;;  %v2417_v14 = vpop.f32.mrf.mxu0  ;;  %3106 = vmatmul.mubr.f32.gmra.mxu0 %v1185_v38  ;;  %v1061_v58 = vld [vmem:[#allocation2 + $0x188] sm:$0xff] }
 0x1af   :  { %14118 = vst [vmem:[#allocation5_spill] sm:$0xff] %v10487_v8  ;;  %3110 = vmatprep.mubr.f32.mxu0 %v931_v49  ;;  %9017 = vmatpush3.msra.mxu0 %v2120_v55  ;;  %v10496_v27 = vld [vmem:[#allocation2] sm:$0xff] }
 0x1b0   :  { %v2802_v29 = vpop.f32.mrf.mxu1  ;;  %v2419_v7 = vpop.f32.mrf.mxu0  ;;  %3491 = vmatmul.mubr.f32.gmra.mxu1 %v1059_v15  ;;  %6800 = vmatprep.subr.mxu0 %v10496_v27  ;;  %v10558_v50 = vld [vmem:[#allocation2 + $0x2a2] sm:$0xff] }
 0x1b1   :  { %v10489_v46 = vadd.f32 %v2802_v29, %v2417_v14  ;;  %3495 = vmatprep.mubr.f32.mxu1 %v1188_v5  ;;  %v934_v7 = vld [vmem:[#allocation2 + $0x18a] sm:$0xff] }
 0x1b2   :  { %v2804_v1 = vpop.f32.mrf.mxu1  ;;  %v2422_v34 = vpop.f32.mrf.mxu0  ;;  %3111 = vmatmul.mubr.f32.gmra.mxu0 %v1186_v19  ;;  %v1190_v19 = vld [vmem:[#allocation2 + $0x199] sm:$0xff] }
 0x1b3   :  { %14119 = vst [vmem:[#allocation6_spill] sm:$0xff] %v10489_v46  ;;  %3115 = vmatprep.mubr.f32.mxu0 %v932_v57 }
 0x1b4   :  { %v2807_v38 = vpop.f32.mrf.mxu1  ;;  %v2424_v33 = vpop.f32.mrf.mxu0  ;;  %3496 = vmatmul.mubr.f32.gmra.mxu1 %v1060_v41 }
 0x1b5   :  { %v10494_v28 = vadd.f32 %v2807_v38, %v2422_v34  ;;  %3500 = vmatprep.mubr.f32.mxu1 %v1189_v11  ;;  %v1191_v34 = vld [vmem:[#allocation2 + $0x1a1] sm:$0xff]  ;;  %v935_v38 = vld [vmem:[#allocation2 + $0x1ca] sm:$0xff] }
 0x1b6   :  { %v2809_v49 = vpop.f32.mrf.mxu1  ;;  %v2427_v15 = vpop.f32.mrf.mxu0  ;;  %3116 = vmatmul.mubr.f32.gmra.mxu0 %v1187_v42 }
 0x1b7   :  { %14120 = vst [vmem:[#allocation7_spill] sm:$0xff] %v10494_v28  ;;  %3120 = vmatprep.mubr.f32.mxu0 %v933_v35 }
 0x1b8   :  { %v2812_v14 = vpop.f32.mrf.mxu1  ;;  %v2429_v29 = vpop.f32.mrf.mxu0  ;;  %3501 = vmatmul.mubr.f32.gmra.mxu1 %v1061_v58  ;;  %v1192_v58 = vld [vmem:[#allocation2 + $0x1e1] sm:$0xff] }
 0x1b9   :  { %v10499_v57 = vadd.f32 %v2812_v14, %v2427_v15  ;;  %3505 = vmatprep.mubr.f32.mxu1 %v1190_v19  ;;  %v807_v15 = vld [vmem:[#allocation2 + $0x1c9] sm:$0xff] }
 0x1ba   :  { %v2814_v41 = vpop.f32.mrf.mxu1  ;;  %v2432_v1 = vpop.f32.mrf.mxu0  ;;  %3121 = vmatmul.mubr.f32.gmra.mxu0 %v1188_v5  ;;  %v936_v5 = vld [vmem:[#allocation2 + $0x1d2] sm:$0xff] }
 0x1bb   :  { %14121 = vst [vmem:[#allocation8_spill] sm:$0xff] %v10499_v57  ;;  %3125 = vmatprep.mubr.f32.mxu0 %v934_v7  ;;  %v1064_v7 = vld [vmem:[#allocation2 + $0x1e0] sm:$0xff] }
 0x1bc   :  { %v2817_v55 = vpop.f32.mrf.mxu1  ;;  %v2434_v42 = vpop.f32.mrf.mxu0  ;;  %3506 = vmatmul.mubr.f32.gmra.mxu1 %v10496_v27 }
 0x1bd   :  { %v10502_v33 = vadd.f32 %v2817_v55, %v2432_v1  ;;  %3510 = vmatprep.mubr.f32.mxu1 %v1191_v34  ;;  %v1193_v1 = vld [vmem:[#allocation2 + $0x1e9] sm:$0xff]  ;;  %v808_v34 = vld [vmem:[#allocation2 + $0x1d1] sm:$0xff] }
 0x1be   :  { %v2819_v35 = vpop.f32.mrf.mxu1  ;;  %v2437_v49 = vpop.f32.mrf.mxu0  ;;  %3126 = vmatmul.mubr.f32.gmra.mxu0 %v1189_v11 }
 0x1bf   :  { %14122 = vst [vmem:[#allocation9_spill] sm:$0xff] %v10502_v33  ;;  %3130 = vmatprep.mubr.f32.mxu0 %v935_v38  ;;  %v937_v38 = vld [vmem:[#allocation2 + $0x1e2] sm:$0xff] }
 0x1c0   :  { %v2822_v19 = vpop.f32.mrf.mxu1  ;;  %v2439_v14 = vpop.f32.mrf.mxu0  ;;  %3511 = vmatmul.mubr.f32.gmra.mxu1 %v10496_v27 }
 0x1c1   :  { %v10505_v29 = vadd.f32 %v2822_v19, %v2437_v49  ;;  %3515 = vmatprep.mubr.f32.mxu1 %v1192_v58  ;;  %v1065_v14 = vld [vmem:[#allocation2 + $0x1e8] sm:$0xff]  ;;  %v1194_v49 = vld [vmem:[#allocation2 + $0x1f9] sm:$0xff] }
 0x1c2   :  { %v2824_v41 = vpop.f32.mrf.mxu1  ;;  %v2442_v42 = vpop.f32.mrf.mxu0  ;;  %3131 = vmatmul.mubr.f32.gmra.mxu0 %v807_v15  ;;  %v938_v15 = vld [vmem:[#allocation2 + $0x1ea] sm:$0xff] }
 0x1c3   :  { %14123 = vst [vmem:[#allocation10_spill] sm:$0xff] %v10505_v29  ;;  %3135 = vmatprep.mubr.f32.mxu0 %v936_v5  ;;  %v1066_v5 = vld [vmem:[#allocation2 + $0x1f8] sm:$0xff] }
 0x1c4   :  { %v2827_v55 = vpop.f32.mrf.mxu1  ;;  %v2444_v11 = vpop.f32.mrf.mxu0  ;;  %3516 = vmatmul.mubr.f32.gmra.mxu1 %v1064_v7 }
 0x1c5   :  { %v10507_v35 = vadd.f32 %v2827_v55, %v2442_v42  ;;  %3520 = vmatprep.mubr.f32.mxu1 %v1193_v1  ;;  %v1195_v42 = vld [vmem:[#allocation2 + $0x201] sm:$0xff] }
 0x1c6   :  { %v2829_v33 = vpop.f32.mrf.mxu1  ;;  %v2447_v57 = vpop.f32.mrf.mxu0  ;;  %3136 = vmatmul.mubr.f32.gmra.mxu0 %v808_v34 }
 0x1c7   :  { %14124 = vst [vmem:[#allocation11_spill] sm:$0xff] %v10507_v35  ;;  %3140 = vmatprep.mubr.f32.mxu0 %v937_v38  ;;  %v939_v33 = vld [vmem:[#allocation2 + $0x1fa] sm:$0xff] }
 0x1c8   :  { %v2832_v19 = vpop.f32.mrf.mxu1  ;;  %v2449_v41 = vpop.f32.mrf.mxu0  ;;  %3521 = vmatmul.mubr.f32.gmra.mxu1 %v1065_v14  ;;  %v1067_v38 = vld [vmem:[#allocation2 + $0x200] sm:$0xff] }
 0x1c9   :  { %v10509_v29 = vadd.f32 %v2832_v19, %v2447_v57  ;;  %3525 = vmatprep.mubr.f32.mxu1 %v1194_v49  ;;  %v1196_v57 = vld [vmem:[#allocation2 + $0x211] sm:$0xff] }
 0x1ca   :  { %v2834_v11 = vpop.f32.mrf.mxu1  ;;  %v2452_v7 = vpop.f32.mrf.mxu0  ;;  %3141 = vmatmul.mubr.f32.gmra.mxu0 %v1192_v58 }
 0x1cb   :  { %14125 = vst [vmem:[#allocation12_spill] sm:$0xff] %v10509_v29  ;;  %3145 = vmatprep.mubr.f32.mxu0 %v938_v15  ;;  %v940_v11 = vld [vmem:[#allocation2 + $0x202] sm:$0xff]  ;;  %v1068_v15 = vld [vmem:[#allocation2 + $0x210] sm:$0xff] }
 0x1cc   :  { %v2837_v55 = vpop.f32.mrf.mxu1  ;;  %v2454_v35 = vpop.f32.mrf.mxu0  ;;  %3526 = vmatmul.mubr.f32.gmra.mxu1 %v1066_v5 }
 0x1cd   :  { %v10511_v34 = vadd.f32 %v2837_v55, %v2452_v7  ;;  %3530 = vmatprep.mubr.f32.mxu1 %v1195_v42  ;;  %v1197_v7 = vld [vmem:[#allocation2 + $0x219] sm:$0xff] }
 0x1ce   :  { %v2839_v41 = vpop.f32.mrf.mxu1  ;;  %v2457_v14 = vpop.f32.mrf.mxu0  ;;  %3146 = vmatmul.mubr.f32.gmra.mxu0 %v1193_v1 }
 0x1cf   :  { %14126 = vst [vmem:[#allocation13_spill] sm:$0xff] %v10511_v34  ;;  %3150 = vmatprep.mubr.f32.mxu0 %v939_v33  ;;  %v941_v41 = vld [vmem:[#allocation2 + $0x212] sm:$0xff] }
 0x1d0   :  { %v2842_v19 = vpop.f32.mrf.mxu1  ;;  %v2459_v29 = vpop.f32.mrf.mxu0  ;;  %3531 = vmatmul.mubr.f32.gmra.mxu1 %v1067_v38  ;;  %v1069_v33 = vld [vmem:[#allocation2 + $0x218] sm:$0xff] }
 0x1d1   :  { %v10513_v58 = vadd.f32 %v2842_v19, %v2457_v14  ;;  %3535 = vmatprep.mubr.f32.mxu1 %v1196_v57  ;;  %v1198_v14 = vld [vmem:[#allocation2 + $0x229] sm:$0xff] }
 0x1d2   :  { %v2844_v35 = vpop.f32.mrf.mxu1  ;;  %v2462_v5 = vpop.f32.mrf.mxu0  ;;  %3151 = vmatmul.mubr.f32.gmra.mxu0 %v1194_v49 }
 0x1d3   :  { %14127 = vst [vmem:[#allocation14_spill] sm:$0xff] %v10513_v58  ;;  %3155 = vmatprep.mubr.f32.mxu0 %v940_v11  ;;  %v942_v35 = vld [vmem:[#allocation2 + $0x21a] sm:$0xff]  ;;  %v1070_v11 = vld [vmem:[#allocation2 + $0x228] sm:$0xff] }
 0x1d4   :  { %v2847_v55 = vpop.f32.mrf.mxu1  ;;  %v2464_v34 = vpop.f32.mrf.mxu0  ;;  %3536 = vmatmul.mubr.f32.gmra.mxu1 %v1068_v15 }
 0x1d5   :  { %v10515_v1 = vadd.f32 %v2847_v55, %v2462_v5  ;;  %3540 = vmatprep.mubr.f32.mxu1 %v1197_v7  ;;  %v1199_v5 = vld [vmem:[#allocation2 + $0x231] sm:$0xff] }
 0x1d6   :  { %v2849_v29 = vpop.f32.mrf.mxu1  ;;  %v2467_v38 = vpop.f32.mrf.mxu0  ;;  %3156 = vmatmul.mubr.f32.gmra.mxu0 %v1195_v42 }
 0x1d7   :  { %14128 = vst [vmem:[#allocation15_spill] sm:$0xff] %v10515_v1  ;;  %3160 = vmatprep.mubr.f32.mxu0 %v941_v41  ;;  %v943_v29 = vld [vmem:[#allocation2 + $0x22a] sm:$0xff] }
 0x1d8   :  { %v2852_v19 = vpop.f32.mrf.mxu1  ;;  %v2469_v58 = vpop.f32.mrf.mxu0  ;;  %3541 = vmatmul.mubr.f32.gmra.mxu1 %v1069_v33  ;;  %v1071_v41 = vld [vmem:[#allocation2 + $0x230] sm:$0xff] }
 0x1d9   :  { %v10517_v49 = vadd.f32 %v2852_v19, %v2467_v38  ;;  %3545 = vmatprep.mubr.f32.mxu1 %v1198_v14  ;;  %v1200_v38 = vld [vmem:[#allocation2 + $0x241] sm:$0xff] }
 0x1da   :  { %v2854_v34 = vpop.f32.mrf.mxu1  ;;  %v2472_v15 = vpop.f32.mrf.mxu0  ;;  %3161 = vmatmul.mubr.f32.gmra.mxu0 %v1196_v57 }
 0x1db   :  { %14129 = vst [vmem:[#allocation16_spill] sm:$0xff] %v10517_v49  ;;  %3165 = vmatprep.mubr.f32.mxu0 %v942_v35  ;;  %v944_v34 = vld [vmem:[#allocation2 + $0x232] sm:$0xff]  ;;  %v1072_v35 = vld [vmem:[#allocation2 + $0x240] sm:$0xff] }
 0x1dc   :  { %v2857_v55 = vpop.f32.mrf.mxu1  ;;  %v2474_v1 = vpop.f32.mrf.mxu0  ;;  %3546 = vmatmul.mubr.f32.gmra.mxu1 %v1070_v11 }
 0x1dd   :  { %v10519_v42 = vadd.f32 %v2857_v55, %v2472_v15  ;;  %3550 = vmatprep.mubr.f32.mxu1 %v1199_v5  ;;  %v1201_v15 = vld [vmem:[#allocation2 + $0x249] sm:$0xff] }
 0x1de   :  { %v2859_v58 = vpop.f32.mrf.mxu1  ;;  %v2477_v33 = vpop.f32.mrf.mxu0  ;;  %3166 = vmatmul.mubr.f32.gmra.mxu0 %v1197_v7 }
 0x1df   :  { %14130 = vst [vmem:[#allocation17_spill] sm:$0xff] %v10519_v42  ;;  %3170 = vmatprep.mubr.f32.mxu0 %v943_v29  ;;  %v945_v58 = vld [vmem:[#allocation2 + $0x242] sm:$0xff] }
 0x1e0   :  { %v2862_v19 = vpop.f32.mrf.mxu1  ;;  %v2479_v49 = vpop.f32.mrf.mxu0  ;;  %3551 = vmatmul.mubr.f32.gmra.mxu1 %v1071_v41  ;;  %v1073_v29 = vld [vmem:[#allocation2 + $0x248] sm:$0xff] }
 0x1e1   :  { %v10521_v57 = vadd.f32 %v2862_v19, %v2477_v33  ;;  %3555 = vmatprep.mubr.f32.mxu1 %v1200_v38  ;;  %v1202_v33 = vld [vmem:[#allocation2 + $0x259] sm:$0xff] }
 0x1e2   :  { %v2864_v1 = vpop.f32.mrf.mxu1  ;;  %v2482_v11 = vpop.f32.mrf.mxu0  ;;  %3171 = vmatmul.mubr.f32.gmra.mxu0 %v1198_v14 }
 0x1e3   :  { %14131 = vst [vmem:[#allocation18_spill] sm:$0xff] %v10521_v57  ;;  %3175 = vmatprep.mubr.f32.mxu0 %v944_v34  ;;  %v946_v1 = vld [vmem:[#allocation2 + $0x24a] sm:$0xff]  ;;  %v1074_v34 = vld [vmem:[#allocation2 + $0x258] sm:$0xff] }
 0x1e4   :  { %v2867_v55 = vpop.f32.mrf.mxu1  ;;  %v2484_v42 = vpop.f32.mrf.mxu0  ;;  %3556 = vmatmul.mubr.f32.gmra.mxu1 %v1072_v35 }
 0x1e5   :  { %v10523_v7 = vadd.f32 %v2867_v55, %v2482_v11  ;;  %3560 = vmatprep.mubr.f32.mxu1 %v1201_v15  ;;  %v1203_v11 = vld [vmem:[#allocation2 + $0x261] sm:$0xff] }
 0x1e6   :  { %v2869_v49 = vpop.f32.mrf.mxu1  ;;  %v2487_v41 = vpop.f32.mrf.mxu0  ;;  %3176 = vmatmul.mubr.f32.gmra.mxu0 %v1199_v5 }
 0x1e7   :  { %14132 = vst [vmem:[#allocation19_spill] sm:$0xff] %v10523_v7  ;;  %3180 = vmatprep.mubr.f32.mxu0 %v945_v58  ;;  %v10527_v49 = vld [vmem:[#allocation2 + $0x25a] sm:$0xff] }
 0x1e8   :  { %v2872_v19 = vpop.f32.mrf.mxu1  ;;  %v2489_v57 = vpop.f32.mrf.mxu0  ;;  %3561 = vmatmul.mubr.f32.gmra.mxu1 %v1073_v29 }
 0x1e9   :  { %v10525_v14 = vadd.f32 %v2872_v19, %v2487_v41  ;;  %3565 = vmatprep.mubr.f32.mxu1 %v1202_v33  ;;  %v1075_v57 = vld [vmem:[#allocation2 + $0x260] sm:$0xff]  ;;  %v1204_v41 = vld [vmem:[#allocation2 + $0x271] sm:$0xff] }
 0x1ea   :  { %v2874_v42 = vpop.f32.mrf.mxu1  ;;  %v2492_v35 = vpop.f32.mrf.mxu0  ;;  %3181 = vmatmul.mubr.f32.gmra.mxu0 %v1200_v38  ;;  %v10532_v38 = vld [vmem:[#allocation2 + $0x262] sm:$0xff] }
 0x1eb   :  { %14133 = vst [vmem:[#allocation20_spill] sm:$0xff] %v10525_v14  ;;  %3185 = vmatprep.mubr.f32.mxu0 %v946_v1 }
 0x1ec   :  { %v2877_v55 = vpop.f32.mrf.mxu1  ;;  %v2494_v7 = vpop.f32.mrf.mxu0  ;;  %3566 = vmatmul.mubr.f32.gmra.mxu1 %v1074_v34 }
 0x1ed   :  { %v10529_v5 = vadd.f32 %v2877_v55, %v2492_v35  ;;  %3570 = vmatprep.mubr.f32.mxu1 %v1203_v11  ;;  %v1076_v7 = vld [vmem:[#allocation2 + $0x270] sm:$0xff]  ;;  %v1205_v55 = vld [vmem:[#allocation2 + $0x279] sm:$0xff] }
 0x1ee   :  { %v2879_v58 = vpop.f32.mrf.mxu1  ;;  %v2497_v29 = vpop.f32.mrf.mxu0  ;;  %3186 = vmatmul.mubr.f32.gmra.mxu0 %v1201_v15 }
 0x1ef   :  { %14134 = vst [vmem:[#allocation21_spill] sm:$0xff] %v10529_v5  ;;  %3190 = vmatprep.mubr.f32.mxu0 %v10527_v49  ;;  %v10537_v5 = vld [vmem:[#allocation2 + $0x272] sm:$0xff] }
 0x1f0   :  { %v2882_v19 = vpop.f32.mrf.mxu1  ;;  %v2499_v42 = vpop.f32.mrf.mxu0  ;;  %3571 = vmatmul.mubr.f32.gmra.mxu1 %v1075_v57  ;;  %v1077_v57 = vld [vmem:[#allocation2 + $0x278] sm:$0xff] }
 0x1f1   :  { %v10534_v1 = vadd.f32 %v2882_v19, %v2497_v29  ;;  %3575 = vmatprep.mubr.f32.mxu1 %v1204_v41  ;;  %v1206_v19 = vld [vmem:[#allocation2 + $0x289] sm:$0xff] }
 0x1f2   :  { %v2884_v34 = vpop.f32.mrf.mxu1  ;;  %v2502_v35 = vpop.f32.mrf.mxu0  ;;  %3191 = vmatmul.mubr.f32.gmra.mxu0 %v1202_v33 }
 0x1f3   :  { %14135 = vst [vmem:[#allocation22_spill] sm:$0xff] %v10534_v1  ;;  %3195 = vmatprep.mubr.f32.mxu0 %v10532_v38  ;;  %v10542_v1 = vld [vmem:[#allocation2 + $0x27a] sm:$0xff] }
 0x1f4   :  { %v2887_v58 = vpop.f32.mrf.mxu1  ;;  %v2504_v15 = vpop.f32.mrf.mxu0  ;;  %3576 = vmatmul.mubr.f32.gmra.mxu1 %v1076_v7  ;;  %v1078_v7 = vld [vmem:[#allocation2 + $0x288] sm:$0xff] }
 0x1f5   :  { %v10539_v14 = vadd.f32 %v2887_v58, %v2502_v35  ;;  %3580 = vmatprep.mubr.f32.mxu1 %v1205_v55  ;;  %v1207_v58 = vld [vmem:[#allocation2 + $0x291] sm:$0xff] }
 0x1f6   :  { %v2889_v42 = vpop.f32.mrf.mxu1  ;;  %v2507_v29 = vpop.f32.mrf.mxu0  ;;  %3196 = vmatmul.mubr.f32.gmra.mxu0 %v1203_v11 }
 0x1f7   :  { %14136 = vst [vmem:[#allocation23_spill] sm:$0xff] %v10539_v14  ;;  %3200 = vmatprep.mubr.f32.mxu0 %v10537_v5  ;;  %v10547_v14 = vld [vmem:[#allocation2 + $0x28a] sm:$0xff] }
 0x1f8   :  { %v2892_v34 = vpop.f32.mrf.mxu1  ;;  %v2509_v33 = vpop.f32.mrf.mxu0  ;;  %3581 = vmatmul.mubr.f32.gmra.mxu1 %v1077_v57  ;;  %v1079_v57 = vld [vmem:[#allocation2 + $0x290] sm:$0xff] }
 0x1f9   :  { %v10544_v28 = vadd.f32 %v2892_v34, %v2507_v29  ;;  %3585 = vmatprep.mubr.f32.mxu1 %v1206_v19  ;;  %v1208_v34 = vld [vmem:[#allocation2 + $0x2a1] sm:$0xff] }
 0x1fa   :  { %v2894_v15 = vpop.f32.mrf.mxu1  ;;  %v2512_v35 = vpop.f32.mrf.mxu0  ;;  %3201 = vmatmul.mubr.f32.gmra.mxu0 %v1204_v41 }
 0x1fb   :  { %14137 = vst [vmem:[#allocation24_spill] sm:$0xff] %v10544_v28  ;;  %3205 = vmatprep.mubr.f32.mxu0 %v10542_v1  ;;  %v10552_v28 = vld [vmem:[#allocation2 + $0x292] sm:$0xff] }
 0x1fc   :  { %v2897_v42 = vpop.f32.mrf.mxu1  ;;  %v2514_v11 = vpop.f32.mrf.mxu0  ;;  %3586 = vmatmul.mubr.f32.gmra.mxu1 %v1078_v7  ;;  %v1080_v7 = vld [vmem:[#allocation2 + $0x2a0] sm:$0xff] }
 0x1fd   :  { %v10549_v46 = vadd.f32 %v2897_v42, %v2512_v35  ;;  %3590 = vmatprep.mubr.f32.mxu1 %v1207_v58  ;;  %v1209_v42 = vld [vmem:[#allocation2 + $0x2a9] sm:$0xff] }
 0x1fe   :  { %v2899_v33 = vpop.f32.mrf.mxu1  ;;  %v2517_v29 = vpop.f32.mrf.mxu0  ;;  %3206 = vmatmul.mubr.f32.gmra.mxu0 %v1205_v55 }
 0x1ff   :  { %14138 = vst [vmem:[#allocation25_spill] sm:$0xff] %v10549_v46  ;;  %3210 = vmatprep.mubr.f32.mxu0 %v10547_v14 }
 0x200   :  { %v2902_v15 = vpop.f32.mrf.mxu1  ;;  %v2519_v41 = vpop.f32.mrf.mxu0  ;;  %3591 = vmatmul.mubr.f32.gmra.mxu1 %v1079_v57 }
 0x201   :  { %v10554_v8 = vadd.f32 %v2902_v15, %v2517_v29  ;;  %3595 = vmatprep.mubr.f32.mxu1 %v1208_v34  ;;  %v1081_v29 = vld [vmem:[#allocation2 + $0x2a8] sm:$0xff] }
 0x202   :  { %v2904_v11 = vpop.f32.mrf.mxu1  ;;  %v2972_v35 = vpop.f32.mrf.mxu0  ;;  %3211 = vmatmul.mubr.f32.gmra.mxu0 %v1206_v19 }
 0x203   :  { %14139 = vst [vmem:[#allocation26_spill] sm:$0xff] %v10554_v8  ;;  %v2973_v33 = vadd.f32 %v2972_v35, %v10346_v17  ;;  %3215 = vmatprep.mubr.f32.mxu0 %v10552_v28  ;;  %v1210_v11 = vld [vmem:[#allocation2 + $0x2b9] sm:$0xff]  ;;  %v1211_v8 = vld [vmem:[#allocation2 + $0x2c1] sm:$0xff] }
 0x204   :  { %v2974_v55 = vpop.f32.mrf.mxu0  ;;  %v3357_v46 = vpop.f32.mrf.mxu1  ;;  %3596 = vmatmul.mubr.f32.gmra.mxu1 %v1080_v7 }
 0x205   :  { %v10560_v57 = vadd.f32 %v3357_v46, %v2973_v33  ;;  %3600 = vmatprep.mubr.f32.mxu1 %v1209_v42  ;;  %v10564_v55 = vld [vmem:[#allocation2 + $0x2aa] sm:$0xff]  ;;  %v1082_v46 = vld [vmem:[#allocation2 + $0x2b8] sm:$0xff] }
 0x206   :  { %v2977_v15 = vpop.f32.mrf.mxu0  ;;  %3216 = vmatmul.mubr.f32.gmra.mxu0 %v1207_v58  ;;  %v3359_v41 = vpop.f32.mrf.mxu1 }
 0x207   :  { %14140 = vst [vmem:[#allocation27_spill] sm:$0xff] %v10560_v57  ;;  %v2978_v19 = vadd.f32 %v2977_v15, %v10349_v9  ;;  %3220 = vmatprep.mubr.f32.mxu0 %v10558_v50  ;;  %v10570_v41 = vld [vmem:[#allocation2 + $0x2ba] sm:$0xff] }
 0x208   :  { %v2979_v17 = vpop.f32.mrf.mxu0  ;;  %v3362_v35 = vpop.f32.mrf.mxu1  ;;  %3601 = vmatmul.mubr.f32.gmra.mxu1 %v1081_v29 }
 0x209   :  { %v10566_v7 = vadd.f32 %v3362_v35, %v2978_v19  ;;  %3605 = vmatprep.mubr.f32.mxu1 %v1210_v11  ;;  %v1083_v19 = vld [vmem:[#allocation2 + $0x2c0] sm:$0xff] }
 0x20a   :  { %v2982_v33 = vpop.f32.mrf.mxu0  ;;  %3221 = vmatmul.mubr.f32.gmra.mxu0 %v1208_v34  ;;  %v3364_v57 = vpop.f32.mrf.mxu1 }
 0x20b   :  { %14141 = vst [vmem:[#allocation28_spill] sm:$0xff] %v10566_v7  ;;  %v2983_v58 = vadd.f32 %v2982_v33, %v10352_v23  ;;  %3225 = vmatprep.mubr.f32.mxu0 %v10564_v55  ;;  %v1212_v7 = vld [vmem:[#allocation2 + $0x2d1] sm:$0xff]  ;;  %v10576_v33 = vld [vmem:[#allocation2 + $0x2c2] sm:$0xff] }
 0x20c   :  { %v2984_v9 = vpop.f32.mrf.mxu0  ;;  %v3367_v15 = vpop.f32.mrf.mxu1  ;;  %3606 = vmatmul.mubr.f32.gmra.mxu1 %v1082_v46 }
 0x20d   :  { %v10572_v29 = vadd.f32 %v3367_v15, %v2983_v58  ;;  %3610 = vmatprep.mubr.f32.mxu1 %v1211_v8  ;;  %v1084_v58 = vld [vmem:[#allocation2 + $0x2d0] sm:$0xff] }
 0x20e   :  { %v2987_v17 = vpop.f32.mrf.mxu0  ;;  %3226 = vmatmul.mubr.f32.gmra.mxu0 %v1209_v42  ;;  %v3369_v35 = vpop.f32.mrf.mxu1 }
 0x20f   :  { %14142 = vst [vmem:[#allocation29_spill] sm:$0xff] %v10572_v29  ;;  %v2988_v34 = vadd.f32 %v2987_v17, %v10355_v51  ;;  %3230 = vmatprep.mubr.f32.mxu0 %v10570_v41  ;;  %v1213_v29 = vld [vmem:[#allocation2 + $0x2d9] sm:$0xff] }
 0x210   :  { %v2989_v23 = vpop.f32.mrf.mxu0  ;;  %v3372_v57 = vpop.f32.mrf.mxu1  ;;  %3611 = vmatmul.mubr.f32.gmra.mxu1 %v1083_v19  ;;  %v10582_v35 = vld [vmem:[#allocation2 + $0x2d2] sm:$0xff] }
 0x211   :  { %v10578_v46 = vadd.f32 %v3372_v57, %v2988_v34  ;;  %3615 = vmatprep.mubr.f32.mxu1 %v1212_v7  ;;  %v1085_v34 = vld [vmem:[#allocation2 + $0x2d8] sm:$0xff] }
 0x212   :  { %v2992_v9 = vpop.f32.mrf.mxu0  ;;  %3231 = vmatmul.mubr.f32.gmra.mxu0 %v1210_v11  ;;  %v3374_v15 = vpop.f32.mrf.mxu1 }
 0x213   :  { %14143 = vst [vmem:[#allocation30_spill] sm:$0xff] %v10578_v46  ;;  %v2993_v42 = vadd.f32 %v2992_v9, %v10358_v21  ;;  %3235 = vmatprep.mubr.f32.mxu0 %v10576_v33  ;;  %v1214_v46 = vld [vmem:[#allocation2 + $0x2e9] sm:$0xff]  ;;  %v10588_v15 = vld [vmem:[#allocation2 + $0x2da] sm:$0xff] }
 0x214   :  { %v2994_v51 = vpop.f32.mrf.mxu0  ;;  %v3377_v17 = vpop.f32.mrf.mxu1  ;;  %3616 = vmatmul.mubr.f32.gmra.mxu1 %v1084_v58 }
 0x215   :  { %v10584_v19 = vadd.f32 %v3377_v17, %v2993_v42  ;;  %3620 = vmatprep.mubr.f32.mxu1 %v1213_v29  ;;  %v1086_v42 = vld [vmem:[#allocation2 + $0x2e8] sm:$0xff] }
 0x216   :  { %v2997_v23 = vpop.f32.mrf.mxu0  ;;  %3236 = vmatmul.mubr.f32.gmra.mxu0 %v1211_v8  ;;  %v3379_v57 = vpop.f32.mrf.mxu1 }
 0x217   :  { %14144 = vst [vmem:[#allocation31_spill] sm:$0xff] %v10584_v19  ;;  %v2998_v11 = vadd.f32 %v2997_v23, %v10361_v22  ;;  %3240 = vmatprep.mubr.f32.mxu0 %v10582_v35  ;;  %v1215_v19 = vld [vmem:[#allocation2 + $0x2f1] sm:$0xff] }
 0x218   :  { %v2999_v21 = vpop.f32.mrf.mxu0  ;;  %v3382_v9 = vpop.f32.mrf.mxu1  ;;  %3621 = vmatmul.mubr.f32.gmra.mxu1 %v1085_v34  ;;  %v10594_v57 = vld [vmem:[#allocation2 + $0x2ea] sm:$0xff] }
 0x219   :  { %v10590_v58 = vadd.f32 %v3382_v9, %v2998_v11  ;;  %3625 = vmatprep.mubr.f32.mxu1 %v1214_v46  ;;  %v1087_v11 = vld [vmem:[#allocation2 + $0x2f0] sm:$0xff] }
 0x21a   :  { %v3002_v51 = vpop.f32.mrf.mxu0  ;;  %3241 = vmatmul.mubr.f32.gmra.mxu0 %v1212_v7  ;;  %v3384_v17 = vpop.f32.mrf.mxu1 }
 0x21b   :  { %14145 = vst [vmem:[#allocation32_spill] sm:$0xff] %v10590_v58  ;;  %v3003_v8 = vadd.f32 %v3002_v51, %v10364_v52  ;;  %3245 = vmatprep.mubr.f32.mxu0 %v10588_v15  ;;  %v1216_v58 = vld [vmem:[#allocation2 + $0x301] sm:$0xff]  ;;  %v10600_v17 = vld [vmem:[#allocation2 + $0x2f2] sm:$0xff] }
 0x21c   :  { %v3004_v22 = vpop.f32.mrf.mxu0  ;;  %v3387_v23 = vpop.f32.mrf.mxu1  ;;  %3626 = vmatmul.mubr.f32.gmra.mxu1 %v1086_v42 }
 0x21d   :  { %v10596_v34 = vadd.f32 %v3387_v23, %v3003_v8  ;;  %3630 = vmatprep.mubr.f32.mxu1 %v1215_v19  ;;  %v1088_v8 = vld [vmem:[#allocation2 + $0x300] sm:$0xff] }
 0x21e   :  { %v3007_v21 = vpop.f32.mrf.mxu0  ;;  %3246 = vmatmul.mubr.f32.gmra.mxu0 %v1213_v29  ;;  %v3389_v9 = vpop.f32.mrf.mxu1 }
 0x21f   :  { %14146 = vst [vmem:[#allocation33_spill] sm:$0xff] %v10596_v34  ;;  %v3008_v7 = vadd.f32 %v3007_v21, %v10367_v12  ;;  %3250 = vmatprep.mubr.f32.mxu0 %v10594_v57  ;;  %v1217_v34 = vld [vmem:[#allocation2 + $0x309] sm:$0xff] }
 0x220   :  { %v3009_v52 = vpop.f32.mrf.mxu0  ;;  %v3392_v51 = vpop.f32.mrf.mxu1  ;;  %3631 = vmatmul.mubr.f32.gmra.mxu1 %v1087_v11  ;;  %v10606_v9 = vld [vmem:[#allocation2 + $0x302] sm:$0xff] }
 0x221   :  { %v10602_v42 = vadd.f32 %v3392_v51, %v3008_v7  ;;  %3635 = vmatprep.mubr.f32.mxu1 %v1216_v58  ;;  %v1089_v7 = vld [vmem:[#allocation2 + $0x308] sm:$0xff] }
 0x222   :  { %v3012_v22 = vpop.f32.mrf.mxu0  ;;  %3251 = vmatmul.mubr.f32.gmra.mxu0 %v1214_v46  ;;  %v3394_v23 = vpop.f32.mrf.mxu1 }
 0x223   :  { %14147 = vst [vmem:[#allocation34_spill] sm:$0xff] %v10602_v42  ;;  %v3013_v29 = vadd.f32 %v3012_v22, %v10370_v47  ;;  %3255 = vmatprep.mubr.f32.mxu0 %v10600_v17  ;;  %v1218_v42 = vld [vmem:[#allocation2 + $0x319] sm:$0xff]  ;;  %v10612_v23 = vld [vmem:[#allocation2 + $0x30a] sm:$0xff] }
 0x224   :  { %v3014_v12 = vpop.f32.mrf.mxu0  ;;  %v3397_v21 = vpop.f32.mrf.mxu1  ;;  %3636 = vmatmul.mubr.f32.gmra.mxu1 %v1088_v8 }
 0x225   :  { %v10608_v11 = vadd.f32 %v3397_v21, %v3013_v29  ;;  %3640 = vmatprep.mubr.f32.mxu1 %v1217_v34  ;;  %v1090_v29 = vld [vmem:[#allocation2 + $0x318] sm:$0xff] }
 0x226   :  { %v3017_v52 = vpop.f32.mrf.mxu0  ;;  %3256 = vmatmul.mubr.f32.gmra.mxu0 %v1215_v19  ;;  %v3399_v51 = vpop.f32.mrf.mxu1 }
 0x227   :  { %14148 = vst [vmem:[#allocation35_spill] sm:$0xff] %v10608_v11  ;;  %v3018_v46 = vadd.f32 %v3017_v52, %v10373_v10  ;;  %3260 = vmatprep.mubr.f32.mxu0 %v10606_v9  ;;  %v1219_v11 = vld [vmem:[#allocation2 + $0x321] sm:$0xff] }
 0x228   :  { %v3019_v47 = vpop.f32.mrf.mxu0  ;;  %v3402_v22 = vpop.f32.mrf.mxu1  ;;  %3641 = vmatmul.mubr.f32.gmra.mxu1 %v1089_v7  ;;  %v10618_v51 = vld [vmem:[#allocation2 + $0x31a] sm:$0xff] }
 0x229   :  { %v10614_v8 = vadd.f32 %v3402_v22, %v3018_v46  ;;  %3645 = vmatprep.mubr.f32.mxu1 %v1218_v42  ;;  %v1091_v46 = vld [vmem:[#allocation2 + $0x320] sm:$0xff] }
 0x22a   :  { %v3022_v12 = vpop.f32.mrf.mxu0  ;;  %3261 = vmatmul.mubr.f32.gmra.mxu0 %v1216_v58  ;;  %v3404_v21 = vpop.f32.mrf.mxu1 }
 0x22b   :  { %14149 = vst [vmem:[#allocation36_spill] sm:$0xff] %v10614_v8  ;;  %v3023_v19 = vadd.f32 %v3022_v12, %v10376_v24  ;;  %3265 = vmatprep.mubr.f32.mxu0 %v10612_v23  ;;  %v1220_v8 = vld [vmem:[#allocation2 + $0x331] sm:$0xff]  ;;  %v10624_v21 = vld [vmem:[#allocation2 + $0x322] sm:$0xff] }
 0x22c   :  { %v3024_v10 = vpop.f32.mrf.mxu0  ;;  %v3407_v52 = vpop.f32.mrf.mxu1  ;;  %3646 = vmatmul.mubr.f32.gmra.mxu1 %v1090_v29 }
 0x22d   :  { %v10620_v7 = vadd.f32 %v3407_v52, %v3023_v19  ;;  %3650 = vmatprep.mubr.f32.mxu1 %v1219_v11  ;;  %v1092_v19 = vld [vmem:[#allocation2 + $0x330] sm:$0xff] }
 0x22e   :  { %v3027_v47 = vpop.f32.mrf.mxu0  ;;  %3266 = vmatmul.mubr.f32.gmra.mxu0 %v1217_v34  ;;  %v3409_v22 = vpop.f32.mrf.mxu1 }
 0x22f   :  { %14150 = vst [vmem:[#allocation37_spill] sm:$0xff] %v10620_v7  ;;  %v3028_v58 = vadd.f32 %v3027_v47, %v10379_v2  ;;  %3270 = vmatprep.mubr.f32.mxu0 %v10618_v51  ;;  %v1221_v7 = vld [vmem:[#allocation2 + $0x339] sm:$0xff] }
 0x230   :  { %v3029_v24 = vpop.f32.mrf.mxu0  ;;  %v3412_v12 = vpop.f32.mrf.mxu1  ;;  %3651 = vmatmul.mubr.f32.gmra.mxu1 %v1091_v46  ;;  %v10630_v22 = vld [vmem:[#allocation2 + $0x332] sm:$0xff] }
 0x231   :  { %v10626_v29 = vadd.f32 %v3412_v12, %v3028_v58  ;;  %3655 = vmatprep.mubr.f32.mxu1 %v1220_v8  ;;  %v1093_v58 = vld [vmem:[#allocation2 + $0x338] sm:$0xff] }
 0x232   :  { %v3032_v10 = vpop.f32.mrf.mxu0  ;;  %3271 = vmatmul.mubr.f32.gmra.mxu0 %v1218_v42  ;;  %v3414_v52 = vpop.f32.mrf.mxu1 }
 0x233   :  { %14151 = vst [vmem:[#allocation38_spill] sm:$0xff] %v10626_v29  ;;  %v3033_v34 = vadd.f32 %v3032_v10, %v10382_v40  ;;  %3275 = vmatprep.mubr.f32.mxu0 %v10624_v21  ;;  %v1222_v29 = vld [vmem:[#allocation2 + $0x349] sm:$0xff]  ;;  %v10636_v52 = vld [vmem:[#allocation2 + $0x33a] sm:$0xff] }
 0x234   :  { %v3034_v2 = vpop.f32.mrf.mxu0  ;;  %v3417_v47 = vpop.f32.mrf.mxu1  ;;  %3656 = vmatmul.mubr.f32.gmra.mxu1 %v1092_v19 }
 0x235   :  { %v10632_v46 = vadd.f32 %v3417_v47, %v3033_v34  ;;  %3660 = vmatprep.mubr.f32.mxu1 %v1221_v7  ;;  %v1223_v47 = vld [vmem:[#allocation2 + $0x351] sm:$0xff] }
 0x236   :  { %v3037_v24 = vpop.f32.mrf.mxu0  ;;  %3276 = vmatmul.mubr.f32.gmra.mxu0 %v1219_v11  ;;  %v3419_v12 = vpop.f32.mrf.mxu1  ;;  %v6286_v11 = vld [vmem:[%s14049_s2 + $0x78] sm:$0xff] }
 0x237   :  { %v3038_v42 = vadd.f32 %v3037_v24, %v10385_v44  ;;  %3280 = vmatprep.mubr.f32.mxu0 %v10630_v22  ;;  %6416 = vmatpush1.msra.mxu1 %v6286_v11  ;;  %v1288_v12 = vld [vmem:[#allocation2 + $0x32] sm:$0xff] }
 0x238   :  { %v3039_v40 = vpop.f32.mrf.mxu0  ;;  %v3422_v10 = vpop.f32.mrf.mxu1  ;;  %3661 = vmatmul.mubr.f32.gmra.mxu1 %v1093_v58  ;;  %6417 = vmatprep.subr.mxu1 %v10496_v27 }
 0x239   :  { %v10638_v19 = vadd.f32 %v3422_v10, %v3038_v42  ;;  %3665 = vmatprep.mubr.f32.mxu1 %v1222_v29 }
 0x23a   :  { %v3042_v34 = vpop.f32.mrf.mxu0  ;;  %3281 = vmatmul.mubr.f32.gmra.mxu0 %v1220_v8  ;;  %v3424_v2 = vpop.f32.mrf.mxu1 }
 0x23b   :  { %v3043_v44 = vadd.f32 %v3042_v34, %v10388_v56  ;;  %3285 = vmatprep.mubr.f32.mxu0 %v10636_v52  ;;  %v1289_v56 = vld [vmem:[#allocation2 + $0x3a] sm:$0xff]  ;;  %v1290_v2 = vld [vmem:[#allocation2 + $0x4a] sm:$0xff] }
 0x23c   :  { %v3044_v24 = vpop.f32.mrf.mxu0  ;;  %v3427_v58 = vpop.f32.mrf.mxu1  ;;  %3666 = vmatmul.mubr.f32.gmra.mxu1 %v10496_v27 }
 0x23d   :  { %v10647_v29 = vadd.f32 %v3427_v58, %v3043_v44  ;;  %3670 = vmatprep.mubr.f32.mxu1 %v1223_v47  ;;  %v6285_v44 = vld [vmem:[%s14049_s2 + $0x70] sm:$0xff] }
 0x23e   :  { %v3047_v8 = vpop.f32.mrf.mxu0  ;;  %3286 = vmatmul.mubr.f32.gmra.mxu0 %v1221_v7  ;;  %v3429_v42 = vpop.f32.mrf.mxu1  ;;  %6418 = vmatpush1.msra.mxu1 %v6285_v44 }
 0x23f   :  { %14152 = vst [vmem:[#allocation39_spill] sm:$0xff] %v10647_v29  ;;  %v3048_v40 = vadd.f32 %v3047_v8, %v10390_v59  ;;  %9018 = vmatprep.mubr.f32.mxu0 %v1288_v12  ;;  %v1291_v59 = vld [vmem:[#allocation2 + $0x52] sm:$0xff]  ;;  %6419 = vmatprep.subr.mxu1 %v10496_v27  ;;  %v1292_v8 = vld [vmem:[#allocation2 + $0x62] sm:$0xff]  ;;  %v1294_v29 = vld [vmem:[#allocation2 + $0x7a] sm:$0xff] }
 0x240   :  { %v3049_v10 = vpop.f32.mrf.mxu0  ;;  %v3432_v34 = vpop.f32.mrf.mxu1  ;;  %3671 = vmatmul.mubr.f32.gmra.mxu1 %v10496_v27 }
 0x241   :  { %v10651_v11 = vadd.f32 %v3432_v34, %v3048_v40 }
 0x242   :  { %v3052_v24 = vpop.f32.mrf.mxu0  ;;  %v3434_v47 = vpop.f32.mrf.mxu1  ;;  %9019 = vmatmul.mubr.f32.vlgmr.msra.gmra.mxu0 %v1289_v56 }
 0x243   :  { %v3053_v7 = vadd.f32 %v3052_v24, %v10399_v20  ;;  %9021 = vmatprep.mubr.f32.mxu0 %v1290_v2  ;;  %v1293_v47 = vld [vmem:[#allocation2 + $0x6a] sm:$0xff] }
 0x244   :  { %v3054_v58 = vpop.f32.mrf.mxu0  ;;  %v3437_v12 = vpop.f32.mrf.mxu1  ;;  %v6284_v2 = vld [vmem:[%s14049_s2 + $0x68] sm:$0xff] }
 0x245   :  { %v10658_v42 = vadd.f32 %v3437_v12, %v3053_v7  ;;  %6420 = vmatpush1.msra.mxu1 %v6284_v2 }
 0x246   :  { %v3057_v40 = vpop.f32.mrf.mxu0  ;;  %v3439_v10 = vpop.f32.mrf.mxu1  ;;  %9022 = vmatmul.mubr.f32.gmra.mxu0 %v1291_v59  ;;  %v1295_v59 = vld [vmem:[#allocation2 + $0x82] sm:$0xff]  ;;  %6421 = vmatprep.subr.mxu1 %v10496_v27 }
 0x247   :  { %v3058_v34 = vadd.f32 %v3057_v40, %v10407_v60  ;;  %9024 = vmatprep.mubr.f32.mxu0 %v1292_v8  ;;  %v1296_v8 = vld [vmem:[#allocation2 + $0x92] sm:$0xff] }
 0x248   :  { %v3059_v56 = vpop.f32.mrf.mxu0  ;;  %v3442_v44 = vpop.f32.mrf.mxu1 }
 0x249   :  { %v10661_v20 = vadd.f32 %v3442_v44, %v3058_v34  ;;  %v1297_v44 = vld [vmem:[#allocation2 + $0x9a] sm:$0xff] }
 0x24a   :  { %v3062_v24 = vpop.f32.mrf.mxu0  ;;  %v3444_v58 = vpop.f32.mrf.mxu1  ;;  %9025 = vmatmul.mubr.f32.gmra.mxu0 %v1293_v47 }
 0x24b   :  { %v3063_v7 = vadd.f32 %v3062_v24, %v10415_v18  ;;  %9027 = vmatprep.mubr.f32.mxu0 %v1294_v29  ;;  %v1298_v58 = vld [vmem:[#allocation2 + $0xaa] sm:$0xff]  ;;  %v6283_v29 = vld [vmem:[%s14049_s2 + $0x60] sm:$0xff] }
 0x24c   :  { %v3064_v60 = vpop.f32.mrf.mxu0  ;;  %v3447_v12 = vpop.f32.mrf.mxu1  ;;  %6422 = vmatpush1.msra.mxu1 %v6283_v29 }
 0x24d   :  { %v10668_v40 = vadd.f32 %v3447_v12, %v3063_v7  ;;  %6423 = vmatprep.subr.mxu1 %v10496_v27 }
 0x24e   :  { %v3067_v10 = vpop.f32.mrf.mxu0  ;;  %v3449_v34 = vpop.f32.mrf.mxu1  ;;  %9028 = vmatmul.mubr.f32.gmra.mxu0 %v1295_v59  ;;  %v1299_v59 = vld [vmem:[#allocation2 + $0xb2] sm:$0xff] }
 0x24f   :  { %v3068_v56 = vadd.f32 %v3067_v10, %v10423_v39  ;;  %9030 = vmatprep.mubr.f32.mxu0 %v1296_v8  ;;  %v1300_v8 = vld [vmem:[#allocation2 + $0xc2] sm:$0xff] }
 0x250   :  { %v3069_v47 = vpop.f32.mrf.mxu0  ;;  %v3452_v2 = vpop.f32.mrf.mxu1 }
 0x251   :  { %v10671_v18 = vadd.f32 %v3452_v2, %v3068_v56  ;;  %v1301_v2 = vld [vmem:[#allocation2 + $0xca] sm:$0xff] }
 0x252   :  { %v3072_v24 = vpop.f32.mrf.mxu0  ;;  %v3454_v60 = vpop.f32.mrf.mxu1  ;;  %9031 = vmatmul.mubr.f32.gmra.mxu0 %v1297_v44 }
 0x253   :  { %v3073_v7 = vadd.f32 %v3072_v24, %v10428_v26  ;;  %9033 = vmatprep.mubr.f32.mxu0 %v1298_v58  ;;  %v1302_v60 = vld [vmem:[#allocation2 + $0xda] sm:$0xff] }
 0x254   :  { %v3074_v39 = vpop.f32.mrf.mxu0  ;;  %v3457_v12 = vpop.f32.mrf.mxu1  ;;  %v6282_v58 = vld [vmem:[%s14049_s2 + $0x58] sm:$0xff] }
 0x255   :  { %v10678_v10 = vadd.f32 %v3457_v12, %v3073_v7  ;;  %6424 = vmatpush1.msra.mxu1 %v6282_v58 }
 0x256   :  { %v3077_v34 = vpop.f32.mrf.mxu0  ;;  %v3459_v56 = vpop.f32.mrf.mxu1  ;;  %9034 = vmatmul.mubr.f32.gmra.mxu0 %v1299_v59  ;;  %v1303_v59 = vld [vmem:[#allocation2 + $0xe2] sm:$0xff]  ;;  %6425 = vmatprep.subr.mxu1 %v10496_v27  ;;  %v6281_v27 = vld [vmem:[%s14049_s2 + $0x50] sm:$0xff] }
 0x257   :  { %v3078_v47 = vadd.f32 %v3077_v34, %v10430_v25  ;;  %9036 = vmatprep.mubr.f32.mxu0 %v1300_v8  ;;  %v1304_v8 = vld [vmem:[#allocation2 + $0xf2] sm:$0xff]  ;;  %6426 = vmatpush1.msra.mxu1 %v6281_v27 }
 0x258   :  { %v3079_v44 = vpop.f32.mrf.mxu0  ;;  %v3462_v29 = vpop.f32.mrf.mxu1 }
 0x259   :  { %v10681_v26 = vadd.f32 %v3462_v29, %v3078_v47  ;;  %v1305_v29 = vld [vmem:[#allocation2 + $0xfa] sm:$0xff] }
 0x25a   :  { %v3082_v24 = vpop.f32.mrf.mxu0  ;;  %v3464_v39 = vpop.f32.mrf.mxu1  ;;  %9037 = vmatmul.mubr.f32.gmra.mxu0 %v1301_v2 }
 0x25b   :  { %v3083_v7 = vadd.f32 %v3082_v24, %v10432_v62  ;;  %9039 = vmatprep.mubr.f32.mxu0 %v1302_v60  ;;  %v1306_v39 = vld [vmem:[#allocation2 + $0x10a] sm:$0xff] }
 0x25c   :  { %v3084_v25 = vpop.f32.mrf.mxu0  ;;  %v3467_v12 = vpop.f32.mrf.mxu1 }
 0x25d   :  { %v10688_v34 = vadd.f32 %v3467_v12, %v3083_v7 }
 0x25e   :  { %v3087_v56 = vpop.f32.mrf.mxu0  ;;  %v3469_v47 = vpop.f32.mrf.mxu1  ;;  %9040 = vmatmul.mubr.f32.gmra.mxu0 %v1303_v59  ;;  %v1307_v59 = vld [vmem:[#allocation2 + $0x112] sm:$0xff] }
 0x25f   :  { %v3088_v44 = vadd.f32 %v3087_v56, %v10434_v36  ;;  %9042 = vmatprep.mubr.f32.mxu0 %v1304_v8  ;;  %v10697_v36 = vld [vmem:[#allocation2] sm:$0xff] }
 0x260   :  { %v3089_v2 = vpop.f32.mrf.mxu0  ;;  %v3472_v58 = vpop.f32.mrf.mxu1  ;;  %6427 = vmatprep.subr.mxu1 %v10697_v36  ;;  %v1308_v8 = vld [vmem:[#allocation2 + $0x122] sm:$0xff] }
 0x261   :  { %v10691_v62 = vadd.f32 %v3472_v58, %v3088_v44 }
 0x262   :  { %v3092_v60 = vpop.f32.mrf.mxu0  ;;  %v3474_v24 = vpop.f32.mrf.mxu1  ;;  %9043 = vmatmul.mubr.f32.gmra.mxu0 %v1305_v29  ;;  %v1309_v29 = vld [vmem:[#allocation2 + $0x12a] sm:$0xff] }
 0x263   :  { %v3093_v7 = vadd.f32 %v3092_v60, %v10439_v53  ;;  %9045 = vmatprep.mubr.f32.mxu0 %v1306_v39  ;;  %v1310_v39 = vld [vmem:[#allocation2 + $0x13a] sm:$0xff]  ;;  %v6280_v60 = vld [vmem:[%s14049_s2 + $0x48] sm:$0xff] }
 0x264   :  { %v3094_v25 = vpop.f32.mrf.mxu0  ;;  %v3477_v12 = vpop.f32.mrf.mxu1  ;;  %6428 = vmatpush1.msra.mxu1 %v6280_v60 }
 0x265   :  { %v10700_v56 = vadd.f32 %v3477_v12, %v3093_v7  ;;  %6429 = vmatprep.subr.mxu1 %v10697_v36 }
 0x266   :  { %v3097_v47 = vpop.f32.mrf.mxu0  ;;  %v3479_v44 = vpop.f32.mrf.mxu1  ;;  %9046 = vmatmul.mubr.f32.gmra.mxu0 %v1307_v59  ;;  %v1311_v59 = vld [vmem:[#allocation2 + $0x142] sm:$0xff] }
 0x267   :  { %v3098_v2 = vadd.f32 %v3097_v47, %v10441_v0  ;;  %9048 = vmatprep.mubr.f32.mxu0 %v1308_v8  ;;  %v1312_v8 = vld [vmem:[#allocation2 + $0x152] sm:$0xff] }
 0x268   :  { %v3099_v58 = vpop.f32.mrf.mxu0  ;;  %v3482_v53 = vpop.f32.mrf.mxu1 }
 0x269   :  { %v10703_v27 = vadd.f32 %v3482_v53, %v3098_v2  ;;  %v1313_v53 = vld [vmem:[#allocation2 + $0x15a] sm:$0xff] }
 0x26a   :  { %v3102_v24 = vpop.f32.mrf.mxu0  ;;  %v3484_v25 = vpop.f32.mrf.mxu1  ;;  %9049 = vmatmul.mubr.f32.gmra.mxu0 %v1309_v29 }
 0x26b   :  { %v3103_v7 = vadd.f32 %v3102_v24, %v10443_v48  ;;  %9051 = vmatprep.mubr.f32.mxu0 %v1310_v39  ;;  %v1314_v25 = vld [vmem:[#allocation2 + $0x16a] sm:$0xff]  ;;  %v6279_v39 = vld [vmem:[%s14049_s2 + $0x40] sm:$0xff] }
 0x26c   :  { %v3104_v0 = vpop.f32.mrf.mxu0  ;;  %v3487_v12 = vpop.f32.mrf.mxu1  ;;  %6430 = vmatpush1.msra.mxu1 %v6279_v39 }
 0x26d   :  { %v10710_v47 = vadd.f32 %v3487_v12, %v3103_v7  ;;  %6431 = vmatprep.subr.mxu1 %v10697_v36 }
 0x26e   :  { %v3107_v44 = vpop.f32.mrf.mxu0  ;;  %v3489_v2 = vpop.f32.mrf.mxu1  ;;  %9052 = vmatmul.mubr.f32.gmra.mxu0 %v1311_v59  ;;  %v1315_v59 = vld [vmem:[#allocation2 + $0x172] sm:$0xff] }
 0x26f   :  { %v3108_v58 = vadd.f32 %v3107_v44, %v10445_v13  ;;  %9054 = vmatprep.mubr.f32.mxu0 %v1312_v8  ;;  %v1316_v8 = vld [vmem:[#allocation2 + $0x182] sm:$0xff] }
 0x270   :  { %v3109_v29 = vpop.f32.mrf.mxu0  ;;  %v3492_v60 = vpop.f32.mrf.mxu1 }
 0x271   :  { %v10713_v48 = vadd.f32 %v3492_v60, %v3108_v58  ;;  %v1317_v60 = vld [vmem:[#allocation2 + $0x18a] sm:$0xff] }
 0x272   :  { %v3112_v24 = vpop.f32.mrf.mxu0  ;;  %v3494_v0 = vpop.f32.mrf.mxu1  ;;  %9055 = vmatmul.mubr.f32.gmra.mxu0 %v1313_v53 }
 0x273   :  { %v3113_v7 = vadd.f32 %v3112_v24, %v10450_v4  ;;  %9057 = vmatprep.mubr.f32.mxu0 %v1314_v25  ;;  %v1318_v0 = vld [vmem:[#allocation2 + $0x19a] sm:$0xff] }
 0x274   :  { %v3114_v13 = vpop.f32.mrf.mxu0  ;;  %v3497_v12 = vpop.f32.mrf.mxu1  ;;  %v6278_v25 = vld [vmem:[%s14049_s2 + $0x38] sm:$0xff] }
 0x275   :  { %v10720_v44 = vadd.f32 %v3497_v12, %v3113_v7  ;;  %6432 = vmatpush1.msra.mxu1 %v6278_v25 }
 0x276   :  { %v3117_v2 = vpop.f32.mrf.mxu0  ;;  %v3499_v58 = vpop.f32.mrf.mxu1  ;;  %9058 = vmatmul.mubr.f32.gmra.mxu0 %v1315_v59  ;;  %v1319_v59 = vld [vmem:[#allocation2 + $0x1a2] sm:$0xff]  ;;  %6433 = vmatprep.subr.mxu1 %v10697_v36 }
 0x277   :  { %v3118_v29 = vadd.f32 %v3117_v2, %v10452_v54  ;;  %9060 = vmatprep.mubr.f32.mxu0 %v1316_v8  ;;  %v1320_v8 = vld [vmem:[#allocation2 + $0x1e2] sm:$0xff] }
 0x278   :  { %v3119_v53 = vpop.f32.mrf.mxu0  ;;  %v3502_v39 = vpop.f32.mrf.mxu1 }
 0x279   :  { %v10723_v4 = vadd.f32 %v3502_v39, %v3118_v29  ;;  %v1321_v39 = vld [vmem:[#allocation2 + $0x1ea] sm:$0xff] }
 0x27a   :  { %v3122_v24 = vpop.f32.mrf.mxu0  ;;  %v3504_v13 = vpop.f32.mrf.mxu1  ;;  %9061 = vmatmul.mubr.f32.gmra.mxu0 %v1317_v60 }
 0x27b   :  { %v3123_v7 = vadd.f32 %v3122_v24, %v10454_v31  ;;  %9063 = vmatprep.mubr.f32.mxu0 %v1318_v0  ;;  %v1322_v13 = vld [vmem:[#allocation2 + $0x1fa] sm:$0xff]  ;;  %v6277_v0 = vld [vmem:[%s14049_s2 + $0x30] sm:$0xff] }
 0x27c   :  { %v3124_v54 = vpop.f32.mrf.mxu0  ;;  %v3507_v12 = vpop.f32.mrf.mxu1  ;;  %6434 = vmatpush1.msra.mxu1 %v6277_v0 }
 0x27d   :  { %v10730_v2 = vadd.f32 %v3507_v12, %v3123_v7  ;;  %6435 = vmatprep.subr.mxu1 %v10697_v36 }
 0x27e   :  { %v3127_v58 = vpop.f32.mrf.mxu0  ;;  %v3509_v29 = vpop.f32.mrf.mxu1  ;;  %9064 = vmatmul.mubr.f32.gmra.mxu0 %v1319_v59  ;;  %v1323_v59 = vld [vmem:[#allocation2 + $0x202] sm:$0xff] }
 0x27f   :  { %v3128_v53 = vadd.f32 %v3127_v58, %v10456_v61  ;;  %9066 = vmatprep.mubr.f32.mxu0 %v1320_v8  ;;  %v1324_v8 = vld [vmem:[#allocation2 + $0x212] sm:$0xff] }
 0x280   :  { %v3129_v60 = vpop.f32.mrf.mxu0  ;;  %v3512_v25 = vpop.f32.mrf.mxu1 }
 0x281   :  { %v10733_v31 = vadd.f32 %v3512_v25, %v3128_v53  ;;  %v1325_v25 = vld [vmem:[#allocation2 + $0x21a] sm:$0xff] }
 0x282   :  { %v3132_v24 = vpop.f32.mrf.mxu0  ;;  %v3514_v54 = vpop.f32.mrf.mxu1  ;;  %9067 = vmatmul.mubr.f32.gmra.mxu0 %v1321_v39 }
 0x283   :  { %v3133_v7 = vadd.f32 %v3132_v24, %v10461_v32  ;;  %9069 = vmatprep.mubr.f32.mxu0 %v1322_v13  ;;  %v1326_v54 = vld [vmem:[#allocation2 + $0x22a] sm:$0xff] }
 0x284   :  { %v3134_v61 = vpop.f32.mrf.mxu0  ;;  %v3517_v12 = vpop.f32.mrf.mxu1 }
 0x285   :  { %v10740_v58 = vadd.f32 %v3517_v12, %v3133_v7  ;;  %v1327_v7 = vld [vmem:[#allocation2 + $0x232] sm:$0xff] }
 0x286   :  { %v3137_v29 = vpop.f32.mrf.mxu0  ;;  %v3519_v53 = vpop.f32.mrf.mxu1  ;;  %9070 = vmatmul.mubr.f32.gmra.mxu0 %v1323_v59 }
 0x287   :  { %14153 = vst [vmem:[#allocation40_spill] sm:$0xff] %v10740_v58  ;;  %v3138_v60 = vadd.f32 %v3137_v29, %v10463_v37  ;;  %9072 = vmatprep.mubr.f32.mxu0 %v1324_v8  ;;  %v1328_v53 = vld [vmem:[#allocation2 + $0x242] sm:$0xff] }
 0x288   :  { %v3139_v39 = vpop.f32.mrf.mxu0  ;;  %v3522_v0 = vpop.f32.mrf.mxu1 }
 0x289   :  { %v10743_v32 = vadd.f32 %v3522_v0, %v3138_v60  ;;  %v6276_v60 = vld [vmem:[%s14049_s2 + $0x28] sm:$0xff] }
 0x28a   :  { %v3142_v13 = vpop.f32.mrf.mxu0  ;;  %v3524_v24 = vpop.f32.mrf.mxu1  ;;  %9073 = vmatmul.mubr.f32.gmra.mxu0 %v1325_v25  ;;  %6436 = vmatpush1.msra.mxu1 %v6276_v60 }
 0x28b   :  { %v3143_v61 = vadd.f32 %v3142_v13, %v10465_v30  ;;  %9075 = vmatprep.mubr.f32.mxu0 %v1326_v54  ;;  %6437 = vmatprep.subr.mxu1 %v10697_v36  ;;  %v9250_v54 = vld [vmem:[#allocation2 + $0x24a] sm:$0xff] }
 0x28c   :  { %v3144_v12 = vpop.f32.mrf.mxu0  ;;  %v3527_v58 = vpop.f32.mrf.mxu1 }
 0x28d   :  { %v10746_v59 = vadd.f32 %v3527_v58, %v3143_v61 }
 0x28e   :  { %v3147_v37 = vpop.f32.mrf.mxu0  ;;  %v3529_v8 = vpop.f32.mrf.mxu1  ;;  %9076 = vmatmul.mubr.f32.gmra.mxu0 %v1327_v7  ;;  %v6275_v7 = vld [vmem:[%s14049_s2 + $0x20] sm:$0xff] }
 0x28f   :  { %v3148_v29 = vadd.f32 %v3147_v37, %v10467_v6  ;;  %9078 = vmatprep.mubr.f32.mxu0 %v1328_v53  ;;  %6438 = vmatpush1.msra.mxu1 %v6275_v7 }
 0x290   :  { %v3149_v25 = vpop.f32.mrf.mxu0  ;;  %v3532_v39 = vpop.f32.mrf.mxu1  ;;  %6439 = vmatprep.subr.mxu1 %v10697_v36 }
 0x291   :  { %v10752_v30 = vadd.f32 %v3532_v39, %v3148_v29 }
 0x292   :  { %v3152_v0 = vpop.f32.mrf.mxu0  ;;  %v3534_v58 = vpop.f32.mrf.mxu1  ;;  %9079 = vmatmul.mubr.f32.gmra.mxu0 %v9250_v54 }
 0x293   :  { %v3153_v13 = vadd.f32 %v3152_v0, %v10472_v3  ;;  %9081 = vmatprep.mubr.f32.mxu0 %v10527_v49 }
 0x294   :  { %v3154_v6 = vpop.f32.mrf.mxu0  ;;  %v3537_v24 = vpop.f32.mrf.mxu1 }
 0x295   :  { %v10757_v61 = vadd.f32 %v3537_v24, %v3153_v13 }
 0x296   :  { %v3157_v12 = vpop.f32.mrf.mxu0  ;;  %v3539_v53 = vpop.f32.mrf.mxu1  ;;  %9082 = vmatmul.mubr.f32.gmra.mxu0 %v10532_v38 }
 0x297   :  { %v3158_v37 = vadd.f32 %v3157_v12, %v10474_v63  ;;  %9084 = vmatprep.mubr.f32.mxu0 %v10537_v5  ;;  %v6274_v63 = vld [vmem:[%s14049_s2 + $0x18] sm:$0xff] }
 0x298   :  { %v3159_v3 = vpop.f32.mrf.mxu0  ;;  %v3542_v49 = vpop.f32.mrf.mxu1  ;;  %6440 = vmatpush1.msra.mxu1 %v6274_v63 }
 0x299   :  { %v10766_v8 = vadd.f32 %v3542_v49, %v3158_v37  ;;  %6441 = vmatprep.subr.mxu1 %v10697_v36  ;;  %v14154_v37 = vld [vmem:[#allocation4_spill] sm:$0xff] }
 0x29a   :  { %v3162_v29 = vpop.f32.mrf.mxu0  ;;  %v3544_v60 = vpop.f32.mrf.mxu1  ;;  %9085 = vmatmul.mubr.f32.gmra.mxu0 %v10542_v1 }
 0x29b   :  { %v3163_v25 = vadd.f32 %v3162_v29, %v10476_v45  ;;  %9087 = vmatprep.mubr.f32.mxu0 %v10547_v14  ;;  %v14155_v60 = vld [vmem:[#allocation5_spill] sm:$0xff] }
 0x29c   :  { %v3164_v38 = vpop.f32.mrf.mxu0  ;;  %v3547_v39 = vpop.f32.mrf.mxu1 }
 0x29d   :  { %v10771_v0 = vadd.f32 %v3547_v39, %v3163_v25 }
 0x29e   :  { %v3167_v5 = vpop.f32.mrf.mxu0  ;;  %v3549_v58 = vpop.f32.mrf.mxu1  ;;  %9088 = vmatmul.mubr.f32.gmra.mxu0 %v10552_v28 }
 0x29f   :  { %v3168_v54 = vadd.f32 %v3167_v5, %v10478_v43  ;;  %9090 = vmatprep.mubr.f32.mxu0 %v10558_v50  ;;  %v6273_v43 = vld [vmem:[%s14049_s2 + $0x10] sm:$0xff] }
 0x2a0   :  { %v3169_v45 = vpop.f32.mrf.mxu0  ;;  %v3552_v14 = vpop.f32.mrf.mxu1  ;;  %6442 = vmatpush1.msra.mxu1 %v6273_v43  ;;  %v14156_v58 = vld [vmem:[#allocation6_spill] sm:$0xff] }
 0x2a1   :  { %v10780_v1 = vadd.f32 %v3552_v14, %v3168_v54  ;;  %6443 = vmatprep.subr.mxu1 %v10697_v36 }
 0x2a2   :  { %v3172_v13 = vpop.f32.mrf.mxu0  ;;  %v3554_v6 = vpop.f32.mrf.mxu1  ;;  %9091 = vmatmul.mubr.f32.gmra.mxu0 %v10564_v55 }
 0x2a3   :  { %v3173_v24 = vadd.f32 %v3172_v13, %v10483_v16  ;;  %9093 = vmatprep.mubr.f32.mxu0 %v10570_v41  ;;  %v14157_v6 = vld [vmem:[#allocation7_spill] sm:$0xff] }
 0x2a4   :  { %v3174_v28 = vpop.f32.mrf.mxu0  ;;  %v3557_v7 = vpop.f32.mrf.mxu1 }
 0x2a5   :  { %v10785_v12 = vadd.f32 %v3557_v7, %v3173_v24 }
 0x2a6   :  { %v3177_v50 = vpop.f32.mrf.mxu0  ;;  %v3559_v53 = vpop.f32.mrf.mxu1  ;;  %9094 = vmatmul.mubr.f32.gmra.mxu0 %v10576_v33 }
 0x2a7   :  { %v3178_v3 = vadd.f32 %v3177_v50, %v14154_v37  ;;  %9096 = vmatprep.mubr.f32.mxu0 %v10582_v35  ;;  %v6272_v35 = vld [vmem:[%s14049_s2 + $0x8] sm:$0xff]  ;;  %v14158_v53 = vld [vmem:[#allocation8_spill] sm:$0xff] }
 0x2a8   :  { %v3179_v16 = vpop.f32.mrf.mxu0  ;;  %v3562_v55 = vpop.f32.mrf.mxu1  ;;  %6444 = vmatpush1.msra.mxu1 %v6272_v35 }
 0x2a9   :  { %v10794_v41 = vadd.f32 %v3562_v55, %v3178_v3  ;;  %6445 = vmatprep.subr.mxu1 %v10697_v36  ;;  %v1350_v3 = vld [vmem:[#allocation2 + $0x34a] sm:$0xff] }
 0x2aa   :  { %v3182_v49 = vpop.f32.mrf.mxu0  ;;  %v3564_v29 = vpop.f32.mrf.mxu1  ;;  %9097 = vmatmul.mubr.f32.gmra.mxu0 %v10588_v15 }
 0x2ab   :  { %v3183_v25 = vadd.f32 %v3182_v49, %v14155_v60  ;;  %9099 = vmatprep.mubr.f32.mxu0 %v10594_v57  ;;  %v14159_v29 = vld [vmem:[#allocation9_spill] sm:$0xff] }
 0x2ac   :  { %v3184_v33 = vpop.f32.mrf.mxu0  ;;  %v3567_v38 = vpop.f32.mrf.mxu1 }
 0x2ad   :  { %v10799_v39 = vadd.f32 %v3567_v38, %v3183_v25 }
 0x2ae   :  { %v3187_v63 = vpop.f32.mrf.mxu0  ;;  %v3569_v5 = vpop.f32.mrf.mxu1  ;;  %9100 = vmatmul.mubr.f32.gmra.mxu0 %v10600_v17 }
 0x2af   :  { %v3188_v54 = vadd.f32 %v3187_v63, %v14156_v58  ;;  %9102 = vmatprep.mubr.f32.mxu0 %v10606_v9  ;;  %v6271_v9 = vld [vmem:[%s14049_s2] sm:$0xff]  ;;  %v14160_v5 = vld [vmem:[#allocation10_spill] sm:$0xff] }
 0x2b0   :  { %v3189_v15 = vpop.f32.mrf.mxu0  ;;  %v3572_v57 = vpop.f32.mrf.mxu1  ;;  %6446 = vmatpush1.msra.mxu1 %v6271_v9  ;;  %v6301_v9 = vld [vmem:[%s14049_s2 + $0xf0] sm:$0xff] }
 0x2b1   :  { %v10808_v45 = vadd.f32 %v3572_v57, %v3188_v54  ;;  %6447 = vmatprep.subr.mxu1 %v10697_v36 }
 0x2b2   :  { %v3192_v14 = vpop.f32.mrf.mxu0  ;;  %v3574_v13 = vpop.f32.mrf.mxu1  ;;  %9103 = vmatmul.mubr.f32.gmra.mxu0 %v10612_v23 }
 0x2b3   :  { %v3193_v24 = vadd.f32 %v3192_v14, %v14157_v6  ;;  %9105 = vmatprep.mubr.f32.mxu0 %v10618_v51  ;;  %v14161_v13 = vld [vmem:[#allocation11_spill] sm:$0xff] }
 0x2b4   :  { %v3194_v17 = vpop.f32.mrf.mxu0  ;;  %v3577_v28 = vpop.f32.mrf.mxu1 }
 0x2b5   :  { %v10813_v7 = vadd.f32 %v3577_v28, %v3193_v24 }
 0x2b6   :  { %v3197_v43 = vpop.f32.mrf.mxu0  ;;  %v3579_v50 = vpop.f32.mrf.mxu1  ;;  %9106 = vmatmul.mubr.f32.gmra.mxu0 %v10624_v21  ;;  %v1351_v21 = vld [vmem:[#allocation2 + $0x352] sm:$0xff] }
 0x2b7   :  { %v3198_v37 = vadd.f32 %v3197_v43, %v14158_v53  ;;  %9108 = vmatprep.mubr.f32.mxu0 %v10630_v22  ;;  %v6302_v22 = vld [vmem:[%s14049_s2 + $0xf8] sm:$0xff]  ;;  %v14162_v53 = vld [vmem:[#allocation12_spill] sm:$0xff] }
 0x2b8   :  { %v3199_v23 = vpop.f32.mrf.mxu0  ;;  %v3582_v51 = vpop.f32.mrf.mxu1  ;;  %6448 = vmatpush2.msra.mxu1 %v6302_v22  ;;  %v6300_v22 = vld [vmem:[%s14049_s2 + $0xe8] sm:$0xff] }
 0x2b9   :  { %v10822_v16 = vadd.f32 %v3582_v51, %v3198_v37  ;;  %6449 = vmatprep.subr.mxu1 %v10697_v36 }
 0x2ba   :  { %v3202_v55 = vpop.f32.mrf.mxu0  ;;  %v3584_v49 = vpop.f32.mrf.mxu1  ;;  %9109 = vmatmul.mubr.f32.gmra.mxu0 %v10636_v52  ;;  %6450 = vmatpush2.msra.mxu1 %v6301_v9 }
 0x2bb   :  { %v3203_v60 = vadd.f32 %v3202_v55, %v14159_v29  ;;  %9111 = vmatprep.mubr.f32.mxu0 %v1350_v3  ;;  %6451 = vmatprep.subr.mxu1 %v10697_v36  ;;  %v14163_v29 = vld [vmem:[#allocation13_spill] sm:$0xff] }
 0x2bc   :  { %v3204_v25 = vpop.f32.mrf.mxu0  ;;  %v3587_v33 = vpop.f32.mrf.mxu1  ;;  %6452 = vmatpush2.msra.mxu1 %v6300_v22 }
 0x2bd   :  { %v10826_v38 = vadd.f32 %v3587_v33, %v3203_v60  ;;  %6453 = vmatprep.subr.mxu1 %v10697_v36 }
 0x2be   :  { %v3207_v35 = vpop.f32.mrf.mxu0  ;;  %v3589_v63 = vpop.f32.mrf.mxu1  ;;  %9112 = vmatmul.mubr.f32.gmra.mxu0 %v1351_v21 }
 0x2bf   :  { %v3208_v58 = vadd.f32 %v3207_v35, %v14160_v5  ;;  %v14164_v5 = vld [vmem:[#allocation14_spill] sm:$0xff] }
 0x2c0   :  { %v3209_v52 = vpop.f32.mrf.mxu0  ;;  %v3592_v54 = vpop.f32.mrf.mxu1 }
 0x2c1   :  { %v10833_v15 = vadd.f32 %v3592_v54, %v3208_v58 }
 0x2c2   :  { %v3212_v57 = vpop.f32.mrf.mxu0  ;;  %v3594_v14 = vpop.f32.mrf.mxu1 }
 0x2c3   :  { %v3213_v6 = vadd.f32 %v3212_v57, %v14161_v13 }
 0x2c4   :  { %v3214_v24 = vpop.f32.mrf.mxu0  ;;  %v3597_v17 = vpop.f32.mrf.mxu1 }
 0x2c5   :  { %v10836_v28 = vadd.f32 %v3597_v17, %v3213_v6  ;;  %v14165_v6 = vld [vmem:[#allocation15_spill] sm:$0xff] }
 0x2c6   :  { %v3217_v43 = vpop.f32.mrf.mxu0  ;;  %v3599_v50 = vpop.f32.mrf.mxu1 }
 0x2c7   :  { %v3218_v37 = vadd.f32 %v3217_v43, %v14162_v53  ;;  %v6299_v50 = vld [vmem:[%s14049_s2 + $0xe0] sm:$0xff] }
 0x2c8   :  { %v3219_v23 = vpop.f32.mrf.mxu0  ;;  %v3602_v51 = vpop.f32.mrf.mxu1  ;;  %6454 = vmatpush2.msra.mxu1 %v6299_v50 }
 0x2c9   :  { %v10843_v3 = vadd.f32 %v3602_v51, %v3218_v37  ;;  %v14166_v23 = vld [vmem:[#allocation16_spill] sm:$0xff]  ;;  %6455 = vmatprep.subr.mxu1 %v10697_v36 }
 0x2ca   :  { %v3222_v55 = vpop.f32.mrf.mxu0  ;;  %v3604_v49 = vpop.f32.mrf.mxu1 }
 0x2cb   :  { %v3223_v60 = vadd.f32 %v3222_v55, %v14163_v29 }
 0x2cc   :  { %v3224_v21 = vpop.f32.mrf.mxu0  ;;  %v3607_v25 = vpop.f32.mrf.mxu1 }
 0x2cd   :  { %v10846_v33 = vadd.f32 %v3607_v25, %v3223_v60  ;;  %v14167_v25 = vld [vmem:[#allocation17_spill] sm:$0xff] }
 0x2ce   :  { %v3227_v35 = vpop.f32.mrf.mxu0  ;;  %v3609_v63 = vpop.f32.mrf.mxu1 }
 0x2cf   :  { %v3228_v58 = vadd.f32 %v3227_v35, %v14164_v5 }
 0x2d0   :  { %v3229_v52 = vpop.f32.mrf.mxu0  ;;  %v3612_v54 = vpop.f32.mrf.mxu1 }
 0x2d1   :  { %v10853_v57 = vadd.f32 %v3612_v54, %v3228_v58  ;;  %v6298_v58 = vld [vmem:[%s14049_s2 + $0xd8] sm:$0xff] }
 0x2d2   :  { %v3232_v14 = vpop.f32.mrf.mxu0  ;;  %v3614_v13 = vpop.f32.mrf.mxu1  ;;  %6456 = vmatpush2.msra.mxu1 %v6298_v58 }
 0x2d3   :  { %v3233_v24 = vadd.f32 %v3232_v14, %v14165_v6  ;;  %v14168_v14 = vld [vmem:[#allocation18_spill] sm:$0xff]  ;;  %6457 = vmatprep.subr.mxu1 %v10697_v36 }
 0x2d4   :  { %v3234_v17 = vpop.f32.mrf.mxu0  ;;  %v3617_v9 = vpop.f32.mrf.mxu1 }
 0x2d5   :  { %v10856_v43 = vadd.f32 %v3617_v9, %v3233_v24 }
 0x2d6   :  { %v3237_v53 = vpop.f32.mrf.mxu0  ;;  %v3619_v37 = vpop.f32.mrf.mxu1 }
 0x2d7   :  { %v3238_v51 = vadd.f32 %v3237_v53, %v14166_v23  ;;  %v14169_v53 = vld [vmem:[#allocation19_spill] sm:$0xff] }
 0x2d8   :  { %v3239_v55 = vpop.f32.mrf.mxu0  ;;  %v3622_v49 = vpop.f32.mrf.mxu1 }
 0x2d9   :  { %v10863_v29 = vadd.f32 %v3622_v49, %v3238_v51  ;;  %v6297_v49 = vld [vmem:[%s14049_s2 + $0xd0] sm:$0xff] }
 0x2da   :  { %v3242_v60 = vpop.f32.mrf.mxu0  ;;  %v3624_v21 = vpop.f32.mrf.mxu1  ;;  %6458 = vmatpush2.msra.mxu1 %v6297_v49 }
 0x2db   :  { %v3243_v22 = vadd.f32 %v3242_v60, %v14167_v25  ;;  %v14171_v25 = vld [vmem:[#allocation20_spill] sm:$0xff]  ;;  %6459 = vmatprep.subr.mxu1 %v10697_v36 }
 0x2dc   :  { %v3244_v35 = vpop.f32.mrf.mxu0  ;;  %v3627_v63 = vpop.f32.mrf.mxu1 }
 0x2dd   :  { %v10866_v5 = vadd.f32 %v3627_v63, %v3243_v22 }
 0x2de   :  { %v3247_v52 = vpop.f32.mrf.mxu0  ;;  %v3629_v54 = vpop.f32.mrf.mxu1 }
 0x2df   :  { %v3248_v13 = vadd.f32 %v3247_v52, %v14168_v14  ;;  %v14172_v14 = vld [vmem:[#allocation21_spill] sm:$0xff] }
 0x2e0   :  { %v3249_v6 = vpop.f32.mrf.mxu0  ;;  %v3632_v24 = vpop.f32.mrf.mxu1 }
 0x2e1   :  { %v10873_v17 = vadd.f32 %v3632_v24, %v3248_v13 }
 0x2e2   :  { %v3252_v9 = vpop.f32.mrf.mxu0  ;;  %v3634_v50 = vpop.f32.mrf.mxu1 }
 0x2e3   :  { %v3253_v37 = vadd.f32 %v3252_v9, %v14169_v53  ;;  %v6296_v50 = vld [vmem:[%s14049_s2 + $0xc8] sm:$0xff] }
 0x2e4   :  { %v3254_v23 = vpop.f32.mrf.mxu0  ;;  %v3637_v51 = vpop.f32.mrf.mxu1  ;;  %6460 = vmatpush2.msra.mxu1 %v6296_v50  ;;  %v14178_v50 = vld [vmem:[#allocation24_spill] sm:$0xff] }
 0x2e5   :  { %v10876_v55 = vadd.f32 %v3637_v51, %v3253_v37  ;;  %v14174_v23 = vld [vmem:[#allocation22_spill] sm:$0xff]  ;;  %6461 = vmatprep.subr.mxu1 %v10697_v36 }
 0x2e6   :  { %v3257_v60 = vpop.f32.mrf.mxu0  ;;  %v3639_v21 = vpop.f32.mrf.mxu1 }
 0x2e7   :  { %14170 = vst [vmem:[#allocation4_spill] sm:$0xff] %v10876_v55  ;;  %v3258_v22 = vadd.f32 %v3257_v60, %v14171_v25 }
 0x2e8   :  { %v3259_v35 = vpop.f32.mrf.mxu0  ;;  %v3642_v63 = vpop.f32.mrf.mxu1 }
 0x2e9   :  { %v10883_v58 = vadd.f32 %v3642_v63, %v3258_v22  ;;  %v14176_v35 = vld [vmem:[#allocation23_spill] sm:$0xff] }
 0x2ea   :  { %v3262_v52 = vpop.f32.mrf.mxu0  ;;  %v3644_v54 = vpop.f32.mrf.mxu1 }
 0x2eb   :  { %v3263_v13 = vadd.f32 %v3262_v52, %v14172_v14 }
 0x2ec   :  { %v3264_v6 = vpop.f32.mrf.mxu0  ;;  %v3647_v24 = vpop.f32.mrf.mxu1 }
 0x2ed   :  { %v10886_v9 = vadd.f32 %v3647_v24, %v3263_v13  ;;  %v6295_v13 = vld [vmem:[%s14049_s2 + $0xc0] sm:$0xff] }
 0x2ee   :  { %v3267_v53 = vpop.f32.mrf.mxu0  ;;  %v3649_v37 = vpop.f32.mrf.mxu1  ;;  %6462 = vmatpush2.msra.mxu1 %v6295_v13 }
 0x2ef   :  { %14173 = vst [vmem:[#allocation5_spill] sm:$0xff] %v10886_v9  ;;  %v3268_v51 = vadd.f32 %v3267_v53, %v14174_v23  ;;  %6463 = vmatprep.subr.mxu1 %v10697_v36 }
 0x2f0   :  { %v3269_v49 = vpop.f32.mrf.mxu0  ;;  %v3652_v60 = vpop.f32.mrf.mxu1 }
 0x2f1   :  { %v10893_v21 = vadd.f32 %v3652_v60, %v3268_v51 }
 0x2f2   :  { %v3272_v25 = vpop.f32.mrf.mxu0  ;;  %v3654_v22 = vpop.f32.mrf.mxu1 }
 0x2f3   :  { %14175 = vst [vmem:[#allocation6_spill] sm:$0xff] %v10893_v21  ;;  %v3273_v63 = vadd.f32 %v3272_v25, %v14176_v35  ;;  %v14180_v25 = vld [vmem:[#allocation25_spill] sm:$0xff]  ;;  %v14196_v21 = vld [vmem:[#allocation34_spill] sm:$0xff] }
 0x2f4   :  { %v3274_v52 = vpop.f32.mrf.mxu0  ;;  %v3657_v54 = vpop.f32.mrf.mxu1 }
 0x2f5   :  { %v10896_v14 = vadd.f32 %v3657_v54, %v3273_v63  ;;  %v6294_v54 = vld [vmem:[%s14049_s2 + $0xb8] sm:$0xff] }
 0x2f6   :  { %v3277_v6 = vpop.f32.mrf.mxu0  ;;  %v3659_v24 = vpop.f32.mrf.mxu1  ;;  %6464 = vmatpush2.msra.mxu1 %v6294_v54 }
 0x2f7   :  { %14177 = vst [vmem:[#allocation7_spill] sm:$0xff] %v10896_v14  ;;  %v3278_v53 = vadd.f32 %v3277_v6, %v14178_v50  ;;  %v14182_v24 = vld [vmem:[#allocation26_spill] sm:$0xff]  ;;  %6465 = vmatprep.subr.mxu1 %v10697_v36 }
 0x2f8   :  { %v3279_v37 = vpop.f32.mrf.mxu0  ;;  %v3662_v23 = vpop.f32.mrf.mxu1 }
 0x2f9   :  { %v10903_v51 = vadd.f32 %v3662_v23, %v3278_v53 }
 0x2fa   :  { %v3282_v49 = vpop.f32.mrf.mxu0  ;;  %v3664_v60 = vpop.f32.mrf.mxu1 }
 0x2fb   :  { %14179 = vst [vmem:[#allocation8_spill] sm:$0xff] %v10903_v51  ;;  %v3283_v22 = vadd.f32 %v3282_v49, %v14180_v25 }
 0x2fc   :  { %v3284_v35 = vpop.f32.mrf.mxu0  ;;  %v3667_v63 = vpop.f32.mrf.mxu1 }
 0x2fd   :  { %v10906_v52 = vadd.f32 %v3667_v63, %v3283_v22  ;;  %v14184_v22 = vld [vmem:[#allocation28_spill] sm:$0xff]  ;;  %v14186_v63 = vld [vmem:[#allocation27_spill] sm:$0xff] }
 0x2fe   :  { %v3287_v13 = vpop.f32.mrf.mxu0  ;;  %v3669_v6 = vpop.f32.mrf.mxu1 }
 0x2ff   :  { %14181 = vst [vmem:[#allocation9_spill] sm:$0xff] %v10906_v52  ;;  %v3288_v50 = vadd.f32 %v3287_v13, %v14182_v24 }
 0x300   :  { %v3289_v53 = vpop.f32.mrf.mxu0  ;;  %v3672_v37 = vpop.f32.mrf.mxu1 }
 0x301   :  { %v10913_v23 = vadd.f32 %v3672_v37, %v3288_v50  ;;  %v14188_v50 = vld [vmem:[#allocation30_spill] sm:$0xff]  ;;  %v14190_v37 = vld [vmem:[#allocation29_spill] sm:$0xff] }
 0x302   :  { %v9020_v49 = vpop.f32.mrf.mxu0  ;;  %v3674_v60 = vpop.f32.mrf.mxu1 }
 0x303   :  { %14183 = vst [vmem:[#allocation10_spill] sm:$0xff] %v10913_v23  ;;  %v10916_v35 = vadd.f32 %v9020_v49, %v14184_v22  ;;  %v14192_v23 = vld [vmem:[#allocation32_spill] sm:$0xff] }
 0x304   :  { %v3742_v25 = vpop.f32.mrf.mxu0 }
 0x305   :  { %14185 = vst [vmem:[#allocation11_spill] sm:$0xff] %v10916_v35  ;;  %v10919_v52 = vadd.f32 %v3742_v25, %v14186_v63  ;;  %v4131_v6 = vmul.f32 %v10916_v35, %v10916_v35 }
 0x306   :  { %v9023_v14 = vpop.f32.mrf.mxu0 }
 0x307   :  { %14187 = vst [vmem:[#allocation12_spill] sm:$0xff] %v10919_v52  ;;  %v4130_v54 = vmul.f32 %v10919_v52, %v10919_v52  ;;  %v4061_v24 = vadd.f32 %v10916_v35, %v10919_v52  ;;  %v10928_v53 = vadd.f32 %v9023_v14, %v14188_v50  ;;  %v14194_v52 = vld [vmem:[#allocation31_spill] sm:$0xff] }
 0x308   :  { %v3752_v13 = vpop.f32.mrf.mxu0 }
 0x309   :  { %14189 = vst [vmem:[#allocation13_spill] sm:$0xff] %v10928_v53  ;;  %v10931_v49 = vadd.f32 %v3752_v13, %v14190_v37  ;;  %v4194_v25 = vadd.f32 %v4131_v6, %v4130_v54  ;;  %v4133_v35 = vmul.f32 %v10928_v53, %v10928_v53 }
 0x30a   :  { %v9026_v60 = vpop.f32.mrf.mxu0 }
 0x30b   :  { %14191 = vst [vmem:[#allocation14_spill] sm:$0xff] %v10931_v49  ;;  %v4062_v22 = vadd.f32 %v4061_v24, %v10931_v49  ;;  %v4132_v63 = vmul.f32 %v10931_v49, %v10931_v49  ;;  %v10937_v51 = vadd.f32 %v9026_v60, %v14192_v23 }
 0x30c   :  { %v3762_v9 = vpop.f32.mrf.mxu0 }
 0x30d   :  { %14193 = vst [vmem:[#allocation15_spill] sm:$0xff] %v10937_v51  ;;  %v4063_v14 = vadd.f32 %v4062_v22, %v10928_v53  ;;  %v4195_v50 = vadd.f32 %v4194_v25, %v4132_v63  ;;  %v10943_v13 = vadd.f32 %v3762_v9, %v14194_v52  ;;  %v4135_v23 = vmul.f32 %v10937_v51, %v10937_v51  ;;  %v14197_v22 = vld [vmem:[#allocation33_spill] sm:$0xff] }
 0x30e   :  { %v9029_v37 = vpop.f32.mrf.mxu0 }
 0x30f   :  { %14195 = vst [vmem:[#allocation16_spill] sm:$0xff] %v10943_v13  ;;  %v4196_v54 = vadd.f32 %v4195_v50, %v4133_v35  ;;  %v4064_v6 = vadd.f32 %v4063_v14, %v10943_v13  ;;  %v4134_v24 = vmul.f32 %v10943_v13, %v10943_v13  ;;  %v10951_v55 = vadd.f32 %v9029_v37, %v14196_v21  ;;  %v14199_v50 = vld [vmem:[#allocation36_spill] sm:$0xff] }
 0x310   :  { %v3772_v60 = vpop.f32.mrf.mxu0 }
 0x311   :  { %v4197_v49 = vadd.f32 %v4196_v54, %v4134_v24  ;;  %v10954_v25 = vadd.f32 %v3772_v60, %v14197_v22  ;;  %v4065_v9 = vadd.f32 %v4064_v6, %v10937_v51  ;;  %v4137_v21 = vmul.f32 %v10951_v55, %v10951_v55  ;;  %v14200_v54 = vld [vmem:[#allocation35_spill] sm:$0xff] }
 0x312   :  { %v9032_v52 = vpop.f32.mrf.mxu0 }
 0x313   :  { %14198 = vst [vmem:[#allocation17_spill] sm:$0xff] %v10954_v25  ;;  %v4066_v35 = vadd.f32 %v4065_v9, %v10954_v25  ;;  %v4136_v63 = vmul.f32 %v10954_v25, %v10954_v25  ;;  %v4198_v14 = vadd.f32 %v4197_v49, %v4135_v23  ;;  %v10961_v13 = vadd.f32 %v9032_v52, %v14199_v50  ;;  %v14202_v25 = vld [vmem:[#allocation38_spill] sm:$0xff] }
 0x314   :  { %v3782_v53 = vpop.f32.mrf.mxu0 }
 0x315   :  { %v4199_v37 = vadd.f32 %v4198_v14, %v4136_v63  ;;  %v10966_v24 = vadd.f32 %v3782_v53, %v14200_v54  ;;  %v4067_v6 = vadd.f32 %v4066_v35, %v10951_v55  ;;  %v4139_v23 = vmul.f32 %v10961_v13, %v10961_v13  ;;  %v14203_v63 = vld [vmem:[#allocation37_spill] sm:$0xff] }
 0x316   :  { %v9035_v60 = vpop.f32.mrf.mxu0 }
 0x317   :  { %14201 = vst [vmem:[#allocation18_spill] sm:$0xff] %v10966_v24  ;;  %v4068_v22 = vadd.f32 %v4067_v6, %v10966_v24  ;;  %v4138_v9 = vmul.f32 %v10966_v24, %v10966_v24  ;;  %v4200_v49 = vadd.f32 %v4199_v37, %v4137_v21  ;;  %v10975_v51 = vadd.f32 %v9035_v60, %v14202_v25 }
 0x318   :  { %v3792_v52 = vpop.f32.mrf.mxu0 }
 0x319   :  { %v4201_v50 = vadd.f32 %v4200_v49, %v4138_v9  ;;  %v10978_v53 = vadd.f32 %v3792_v52, %v14203_v63  ;;  %v4069_v35 = vadd.f32 %v4068_v22, %v10961_v13  ;;  %v4141_v25 = vmul.f32 %v10975_v51, %v10975_v51 }
 0x31a   :  { %v9038_v14 = vpop.f32.mrf.mxu0 }
 0x31b   :  { %v4070_v54 = vadd.f32 %v4069_v35, %v10978_v53  ;;  %v4140_v6 = vmul.f32 %v10978_v53, %v10978_v53  ;;  %v4202_v21 = vadd.f32 %v4201_v50, %v4139_v23  ;;  %v10985_v37 = vadd.f32 %v9038_v14, %v10638_v19 }
 0x31c   :  { %v3802_v24 = vpop.f32.mrf.mxu0 }
 0x31d   :  { %v4203_v60 = vadd.f32 %v4202_v21, %v4140_v6  ;;  %v10990_v9 = vadd.f32 %v3802_v24, %v10632_v46  ;;  %v4071_v22 = vadd.f32 %v4070_v54, %v10975_v51  ;;  %v4143_v19 = vmul.f32 %v10985_v37, %v10985_v37  ;;  %v14205_v6 = vld [vmem:[#allocation39_spill] sm:$0xff] }
 0x31e   :  { %v9041_v49 = vpop.f32.mrf.mxu0 }
 0x31f   :  { %14204 = vst [vmem:[#allocation19_spill] sm:$0xff] %v10990_v9  ;;  %v4072_v52 = vadd.f32 %v4071_v22, %v10990_v9  ;;  %v4142_v63 = vmul.f32 %v10990_v9, %v10990_v9  ;;  %v4204_v23 = vadd.f32 %v4203_v60, %v4141_v25  ;;  %v10999_v14 = vadd.f32 %v9041_v49, %v10651_v11 }
 0x320   :  { %v3812_v50 = vpop.f32.mrf.mxu0 }
 0x321   :  { %v4205_v35 = vadd.f32 %v4204_v23, %v4142_v63  ;;  %v11002_v46 = vadd.f32 %v3812_v50, %v14205_v6  ;;  %v4073_v24 = vadd.f32 %v4072_v52, %v10985_v37  ;;  %v4145_v11 = vmul.f32 %v10999_v14, %v10999_v14 }
 0x322   :  { %v9044_v54 = vpop.f32.mrf.mxu0 }
 0x323   :  { %v4074_v21 = vadd.f32 %v4073_v24, %v11002_v46  ;;  %v4144_v22 = vmul.f32 %v11002_v46, %v11002_v46  ;;  %v4206_v25 = vadd.f32 %v4205_v35, %v4143_v19  ;;  %v11009_v60 = vadd.f32 %v9044_v54, %v10661_v20 }
 0x324   :  { %v3822_v9 = vpop.f32.mrf.mxu0 }
 0x325   :  { %v4207_v49 = vadd.f32 %v4206_v25, %v4144_v22  ;;  %v11014_v63 = vadd.f32 %v3822_v9, %v10658_v42  ;;  %v4075_v52 = vadd.f32 %v4074_v21, %v10999_v14  ;;  %v4147_v20 = vmul.f32 %v11009_v60, %v11009_v60  ;;  %v6318_v22 = vld [vmem:[%s14049_s2 + $0x178] sm:$0xff] }
 0x326   :  { %v9047_v23 = vpop.f32.mrf.mxu0  ;;  %6801 = vmatpush1.msra.mxu0 %v6318_v22  ;;  %v6315_v22 = vld [vmem:[%s14049_s2 + $0x160] sm:$0xff] }
 0x327   :  { %v4076_v50 = vadd.f32 %v4075_v52, %v11014_v63  ;;  %v4146_v6 = vmul.f32 %v11014_v63, %v11014_v63  ;;  %v4208_v19 = vadd.f32 %v4207_v49, %v4145_v11  ;;  %v11023_v54 = vadd.f32 %v9047_v23, %v10671_v18  ;;  %6802 = vmatprep.subr.mxu0 %v10697_v36 }
 0x328   :  { %v3832_v35 = vpop.f32.mrf.mxu0 }
 0x329   :  { %v4209_v24 = vadd.f32 %v4208_v19, %v4146_v6  ;;  %v11026_v42 = vadd.f32 %v3832_v35, %v10668_v40  ;;  %v4077_v9 = vadd.f32 %v4076_v50, %v11009_v60  ;;  %v6317_v40 = vld [vmem:[%s14049_s2 + $0x170] sm:$0xff]  ;;  %v4149_v23 = vmul.f32 %v11023_v54, %v11023_v54 }
 0x32a   :  { %v9050_v21 = vpop.f32.mrf.mxu0  ;;  %6803 = vmatpush1.msra.mxu0 %v6317_v40 }
 0x32b   :  { %v4078_v25 = vadd.f32 %v4077_v9, %v11026_v42  ;;  %v4148_v11 = vmul.f32 %v11026_v42, %v11026_v42  ;;  %v4210_v49 = vadd.f32 %v4209_v24, %v4147_v20  ;;  %v11036_v18 = vadd.f32 %v9050_v21, %v10681_v26  ;;  %6804 = vmatprep.subr.mxu0 %v10697_v36  ;;  %v6316_v26 = vld [vmem:[%s14049_s2 + $0x168] sm:$0xff] }
 0x32c   :  { %v3842_v52 = vpop.f32.mrf.mxu0  ;;  %6805 = vmatpush1.msra.mxu0 %v6316_v26  ;;  %v6313_v26 = vld [vmem:[%s14049_s2 + $0x150] sm:$0xff] }
 0x32d   :  { %v4211_v50 = vadd.f32 %v4210_v49, %v4148_v11  ;;  %v11045_v6 = vadd.f32 %v3842_v52, %v10678_v10  ;;  %v4079_v19 = vadd.f32 %v4078_v25, %v11023_v54  ;;  %v4151_v10 = vmul.f32 %v11036_v18, %v11036_v18  ;;  %6806 = vmatprep.subr.mxu0 %v10697_v36 }
 0x32e   :  { %v9053_v20 = vpop.f32.mrf.mxu0  ;;  %6807 = vmatpush1.msra.mxu0 %v6315_v22 }
 0x32f   :  { %v4080_v35 = vadd.f32 %v4079_v19, %v11045_v6  ;;  %v4150_v24 = vmul.f32 %v11045_v6, %v11045_v6  ;;  %v4212_v9 = vadd.f32 %v4211_v50, %v4149_v23  ;;  %v11062_v11 = vadd.f32 %v9053_v20, %v10691_v62  ;;  %6808 = vmatprep.subr.mxu0 %v10697_v36  ;;  %v6314_v23 = vld [vmem:[%s14049_s2 + $0x158] sm:$0xff] }
 0x330   :  { %v3852_v21 = vpop.f32.mrf.mxu0  ;;  %6809 = vmatpush1.msra.mxu0 %v6314_v23  ;;  %v6311_v23 = vld [vmem:[%s14049_s2 + $0x140] sm:$0xff] }
 0x331   :  { %v4213_v25 = vadd.f32 %v4212_v9, %v4150_v24  ;;  %v11065_v49 = vadd.f32 %v3852_v21, %v10688_v34  ;;  %v4081_v52 = vadd.f32 %v4080_v35, %v11036_v18  ;;  %6810 = vmatprep.subr.mxu0 %v10697_v36  ;;  %v4153_v35 = vmul.f32 %v11062_v11, %v11062_v11 }
 0x332   :  { %v9056_v40 = vpop.f32.mrf.mxu0  ;;  %6811 = vmatpush1.msra.mxu0 %v6313_v26 }
 0x333   :  { %v4082_v50 = vadd.f32 %v4081_v52, %v11065_v49  ;;  %v4152_v19 = vmul.f32 %v11065_v49, %v11065_v49  ;;  %v4214_v62 = vadd.f32 %v4213_v25, %v4151_v10  ;;  %v11076_v34 = vadd.f32 %v9056_v40, %v10703_v27  ;;  %6812 = vmatprep.subr.mxu0 %v10697_v36  ;;  %v6312_v27 = vld [vmem:[%s14049_s2 + $0x148] sm:$0xff] }
 0x334   :  { %v3862_v20 = vpop.f32.mrf.mxu0  ;;  %6813 = vmatpush1.msra.mxu0 %v6312_v27  ;;  %v6309_v27 = vld [vmem:[%s14049_s2 + $0x130] sm:$0xff] }
 0x335   :  { %v4215_v24 = vadd.f32 %v4214_v62, %v4152_v19  ;;  %v11085_v9 = vadd.f32 %v3862_v20, %v10700_v56  ;;  %v4083_v10 = vadd.f32 %v4082_v50, %v11062_v11  ;;  %v4155_v56 = vmul.f32 %v11076_v34, %v11076_v34  ;;  %6814 = vmatprep.subr.mxu0 %v10697_v36  ;;  %v6310_v36 = vld [vmem:[%s14049_s2 + $0x138] sm:$0xff] }
 0x336   :  { %v9059_v21 = vpop.f32.mrf.mxu0  ;;  %6815 = vmatpush1.msra.mxu0 %v6311_v23 }
 0x337   :  { %v4084_v22 = vadd.f32 %v4083_v10, %v11085_v9  ;;  %v4154_v25 = vmul.f32 %v11085_v9, %v11085_v9  ;;  %v4216_v52 = vadd.f32 %v4215_v24, %v4153_v35  ;;  %v11102_v19 = vadd.f32 %v9059_v21, %v10713_v48  ;;  %v11108_v35 = vld [vmem:[#allocation2] sm:$0xff] }
 0x338   :  { %v3872_v40 = vpop.f32.mrf.mxu0  ;;  %6816 = vmatprep.subr.mxu0 %v11108_v35 }
 0x339   :  { %v4217_v50 = vadd.f32 %v4216_v52, %v4154_v25  ;;  %v11105_v62 = vadd.f32 %v3872_v40, %v10710_v47  ;;  %v4085_v20 = vadd.f32 %v4084_v22, %v11076_v34  ;;  %6817 = vmatpush1.msra.mxu0 %v6310_v36  ;;  %v4157_v22 = vmul.f32 %v11102_v19, %v11102_v19  ;;  %v6307_v36 = vld [vmem:[%s14049_s2 + $0x120] sm:$0xff] }
 0x33a   :  { %v9062_v26 = vpop.f32.mrf.mxu0  ;;  %6818 = vmatprep.subr.mxu0 %v11108_v35 }
 0x33b   :  { %v4086_v24 = vadd.f32 %v4085_v20, %v11105_v62  ;;  %v4156_v48 = vmul.f32 %v11105_v62, %v11105_v62  ;;  %v4218_v10 = vadd.f32 %v4217_v50, %v4155_v56  ;;  %v11118_v47 = vadd.f32 %v9062_v26, %v10723_v4  ;;  %6819 = vmatpush1.msra.mxu0 %v6309_v27  ;;  %v6308_v4 = vld [vmem:[%s14049_s2 + $0x128] sm:$0xff] }
 0x33c   :  { %v3882_v21 = vpop.f32.mrf.mxu0  ;;  %6820 = vmatprep.subr.mxu0 %v11108_v35 }
 0x33d   :  { %v4219_v25 = vadd.f32 %v4218_v10, %v4156_v48  ;;  %v11127_v52 = vadd.f32 %v3882_v21, %v10720_v44  ;;  %v4087_v56 = vadd.f32 %v4086_v24, %v11102_v19  ;;  %6821 = vmatpush1.msra.mxu0 %v6308_v4  ;;  %v4159_v44 = vmul.f32 %v11118_v47, %v11118_v47  ;;  %v6305_v4 = vld [vmem:[%s14049_s2 + $0x110] sm:$0xff] }
 0x33e   :  { %v9065_v40 = vpop.f32.mrf.mxu0  ;;  %6822 = vmatprep.subr.mxu0 %v11108_v35 }
 0x33f   :  { %v4088_v23 = vadd.f32 %v4087_v56, %v11127_v52  ;;  %v4158_v50 = vmul.f32 %v11127_v52, %v11127_v52  ;;  %v4220_v20 = vadd.f32 %v4219_v25, %v4157_v22  ;;  %v11144_v48 = vadd.f32 %v9065_v40, %v10733_v31  ;;  %6823 = vmatpush1.msra.mxu0 %v6307_v36  ;;  %v6306_v22 = vld [vmem:[%s14049_s2 + $0x118] sm:$0xff] }
 0x340   :  { %v3892_v26 = vpop.f32.mrf.mxu0  ;;  %6824 = vmatprep.subr.mxu0 %v11108_v35 }
 0x341   :  { %v4221_v24 = vadd.f32 %v4220_v20, %v4158_v50  ;;  %v11147_v10 = vadd.f32 %v3892_v26, %v10730_v2  ;;  %v4089_v21 = vadd.f32 %v4088_v23, %v11118_v47  ;;  %6825 = vmatpush1.msra.mxu0 %v6306_v22  ;;  %v4161_v23 = vmul.f32 %v11144_v48, %v11144_v48  ;;  %v14206_v20 = vld [vmem:[#allocation40_spill] sm:$0xff] }
 0x342   :  { %v9068_v27 = vpop.f32.mrf.mxu0  ;;  %6826 = vmatprep.subr.mxu0 %v11108_v35 }
 0x343   :  { %v4090_v25 = vadd.f32 %v4089_v21, %v11147_v10  ;;  %v4160_v56 = vmul.f32 %v11147_v10, %v11147_v10  ;;  %v4222_v31 = vadd.f32 %v4221_v24, %v4159_v44  ;;  %v11158_v2 = vadd.f32 %v9068_v27, %v10743_v32  ;;  %6827 = vmatpush1.msra.mxu0 %v6305_v4  ;;  %v6304_v32 = vld [vmem:[%s14049_s2 + $0x108] sm:$0xff] }
 0x344   :  { %v3902_v40 = vpop.f32.mrf.mxu0  ;;  %6828 = vmatprep.subr.mxu0 %v11108_v35 }
 0x345   :  { %v4223_v50 = vadd.f32 %v4222_v31, %v4160_v56  ;;  %v11167_v26 = vadd.f32 %v3902_v40, %v14206_v20  ;;  %v4091_v44 = vadd.f32 %v4090_v25, %v11144_v48  ;;  %6829 = vmatpush1.msra.mxu0 %v6304_v32  ;;  %v4163_v22 = vmul.f32 %v11158_v2, %v11158_v2  ;;  %v6303_v25 = vld [vmem:[%s14049_s2 + $0x100] sm:$0xff]  ;;  %v6334_v20 = vld [vmem:[%s14049_s2 + $0x1f8] sm:$0xff] }
 0x346   :  { %v9071_v36 = vpop.f32.mrf.mxu0  ;;  %6830 = vmatprep.subr.mxu0 %v11108_v35 }
 0x347   :  { %v4092_v24 = vadd.f32 %v4091_v44, %v11167_v26  ;;  %v4162_v21 = vmul.f32 %v11167_v26, %v11167_v26  ;;  %v4224_v27 = vadd.f32 %v4223_v50, %v4161_v23  ;;  %v11184_v40 = vadd.f32 %v9071_v36, %v10752_v30  ;;  %6831 = vmatpush1.msra.mxu0 %v6303_v25 }
 0x348   :  { %v3912_v56 = vpop.f32.mrf.mxu0  ;;  %6832 = vmatprep.subr.mxu0 %v11108_v35 }
 0x349   :  { %v4225_v31 = vadd.f32 %v4224_v27, %v4162_v21  ;;  %v11187_v4 = vadd.f32 %v3912_v56, %v10746_v59  ;;  %v4093_v23 = vadd.f32 %v4092_v24, %v11158_v2  ;;  %6833 = vmatpush2.msra.mxu0 %v6334_v20  ;;  %v6333_v24 = vld [vmem:[%s14049_s2 + $0x1f0] sm:$0xff]  ;;  %v4165_v21 = vmul.f32 %v11184_v40, %v11184_v40 }
 0x34a   :  { %v9074_v50 = vpop.f32.mrf.mxu0  ;;  %6834 = vmatprep.subr.mxu0 %v11108_v35 }
 0x34b   :  { %v4094_v44 = vadd.f32 %v4093_v23, %v11187_v4  ;;  %v4164_v32 = vmul.f32 %v11187_v4, %v11187_v4  ;;  %v4226_v30 = vadd.f32 %v4225_v31, %v4163_v22  ;;  %v11198_v59 = vadd.f32 %v9074_v50, %v10766_v8  ;;  %6835 = vmatpush2.msra.mxu0 %v6333_v24  ;;  %v6293_v8 = vld [vmem:[%s14049_s2 + $0xb0] sm:$0xff]  ;;  %v6332_v31 = vld [vmem:[%s14049_s2 + $0x1e8] sm:$0xff] }
 0x34c   :  { %v3922_v36 = vpop.f32.mrf.mxu0  ;;  %6836 = vmatprep.subr.mxu0 %v11108_v35  ;;  %6466 = vmatpush2.msra.mxu1 %v6293_v8  ;;  %v6291_v8 = vld [vmem:[%s14049_s2 + $0xa0] sm:$0xff] }
 0x34d   :  { %v4227_v27 = vadd.f32 %v4226_v30, %v4164_v32  ;;  %v11207_v56 = vadd.f32 %v3922_v36, %v10757_v61  ;;  %v4095_v22 = vadd.f32 %v4094_v44, %v11184_v40  ;;  %v4167_v20 = vmul.f32 %v11198_v59, %v11198_v59  ;;  %6467 = vmatprep.subr.mxu1 %v11108_v35  ;;  %v6292_v32 = vld [vmem:[%s14049_s2 + $0xa8] sm:$0xff] }
 0x34e   :  { %v9077_v25 = vpop.f32.mrf.mxu0  ;;  %6837 = vmatpush2.msra.mxu0 %v6332_v31  ;;  %6468 = vmatpush2.msra.mxu1 %v6292_v32 }
 0x34f   :  { %v4096_v23 = vadd.f32 %v4095_v22, %v11207_v56  ;;  %v4166_v61 = vmul.f32 %v11207_v56, %v11207_v56  ;;  %v4228_v50 = vadd.f32 %v4227_v27, %v4165_v21  ;;  %v11227_v36 = vadd.f32 %v9077_v25, %v10780_v1  ;;  %v6331_v27 = vld [vmem:[%s14049_s2 + $0x1e0] sm:$0xff]  ;;  %6469 = vmatprep.subr.mxu1 %v11108_v35 }
 0x350   :  { %v3932_v44 = vpop.f32.mrf.mxu0  ;;  %6838 = vmatprep.subr.mxu0 %v11108_v35  ;;  %6470 = vmatpush2.msra.mxu1 %v6291_v8 }
 0x351   :  { %v4229_v30 = vadd.f32 %v4228_v50, %v4166_v61  ;;  %v11230_v24 = vadd.f32 %v3932_v44, %v10771_v0  ;;  %v4097_v21 = vadd.f32 %v4096_v23, %v11198_v59  ;;  %6471 = vmatprep.subr.mxu1 %v11108_v35  ;;  %v6290_v61 = vld [vmem:[%s14049_s2 + $0x98] sm:$0xff]  ;;  %6839 = vmatpush2.msra.mxu0 %v6331_v27 }
 0x352   :  { %v9080_v22 = vpop.f32.mrf.mxu0  ;;  %v4169_v50 = vmul.f32 %v11227_v36, %v11227_v36  ;;  %6472 = vmatpush2.msra.mxu1 %v6290_v61  ;;  %6840 = vmatprep.subr.mxu0 %v11108_v35 }
 0x353   :  { %v4098_v1 = vadd.f32 %v4097_v21, %v11230_v24  ;;  %v4168_v0 = vmul.f32 %v11230_v24, %v11230_v24  ;;  %v4230_v25 = vadd.f32 %v4229_v30, %v4167_v20  ;;  %v11245_v31 = vadd.f32 %v9080_v22, %v10794_v41  ;;  %v6330_v41 = vld [vmem:[%s14049_s2 + $0x1d8] sm:$0xff]  ;;  %6473 = vmatprep.subr.mxu1 %v11108_v35  ;;  %v6289_v21 = vld [vmem:[%s14049_s2 + $0x90] sm:$0xff] }
 0x354   :  { %v3942_v23 = vpop.f32.mrf.mxu0  ;;  %6474 = vmatpush2.msra.mxu1 %v6289_v21  ;;  %6841 = vmatpush2.msra.mxu0 %v6330_v41  ;;  %v6328_v41 = vld [vmem:[%s14049_s2 + $0x1c8] sm:$0xff] }
 0x355   :  { %v4231_v44 = vadd.f32 %v4230_v25, %v4168_v0  ;;  %v11254_v32 = vadd.f32 %v3942_v23, %v10785_v12  ;;  %v4099_v20 = vadd.f32 %v4098_v1, %v11227_v36  ;;  %v4171_v8 = vmul.f32 %v11245_v31, %v11245_v31  ;;  %6475 = vmatprep.subr.mxu1 %v11108_v35  ;;  %v6288_v0 = vld [vmem:[%s14049_s2 + $0x88] sm:$0xff]  ;;  %v6329_v25 = vld [vmem:[%s14049_s2 + $0x1d0] sm:$0xff] }
 0x356   :  { %v9083_v30 = vpop.f32.mrf.mxu0  ;;  %6476 = vmatpush2.msra.mxu1 %v6288_v0  ;;  %6842 = vmatprep.subr.mxu0 %v11108_v35 }
 0x357   :  { %v4100_v27 = vadd.f32 %v4099_v20, %v11254_v32  ;;  %v4170_v12 = vmul.f32 %v11254_v32, %v11254_v32  ;;  %v4232_v22 = vadd.f32 %v4231_v44, %v4169_v50  ;;  %v11278_v61 = vadd.f32 %v9083_v30, %v10808_v45  ;;  %6477 = vmatprep.subr.mxu1 %v11108_v35  ;;  %v6287_v45 = vld [vmem:[%s14049_s2 + $0x80] sm:$0xff] }
 0x358   :  { %v3952_v1 = vpop.f32.mrf.mxu0  ;;  %6843 = vmatpush2.msra.mxu0 %v6329_v25  ;;  %6478 = vmatpush2.msra.mxu1 %v6287_v45  ;;  %v6326_v25 = vld [vmem:[%s14049_s2 + $0x1b8] sm:$0xff] }
 0x359   :  { %v4233_v23 = vadd.f32 %v4232_v22, %v4170_v12  ;;  %v11281_v50 = vadd.f32 %v3952_v1, %v10799_v39  ;;  %v4101_v44 = vadd.f32 %v4100_v27, %v11245_v31  ;;  %v4671_v27 = vld [vmem:[#allocation2 + $0x1] sm:$0xff]  ;;  %6844 = vmatprep.subr.mxu0 %v11108_v35  ;;  %v4173_v0 = vmul.f32 %v11278_v61, %v11278_v61 }
 0x35a   :  { %v9086_v20 = vpop.f32.mrf.mxu0  ;;  %v6327_v1 = vld [vmem:[%s14049_s2 + $0x1c0] sm:$0xff]  ;;  %6845 = vmatpush2.msra.mxu0 %v6328_v41  ;;  %6479 = vmatprep.mubr.f32.mxu1 %v4671_v27  ;;  %v6325_v41 = vld [vmem:[%s14049_s2 + $0x1b0] sm:$0xff] }
 0x35b   :  { %14207 = vst [vmem:[#allocation20_spill] sm:$0xff] %v11281_v50  ;;  %v4102_v30 = vadd.f32 %v4101_v44, %v11281_v50  ;;  %v4172_v39 = vmul.f32 %v11281_v50, %v11281_v50  ;;  %v4234_v21 = vadd.f32 %v4233_v23, %v4171_v8  ;;  %v11296_v12 = vadd.f32 %v9086_v20, %v10822_v16 }
 0x35c   :  { %v3962_v22 = vpop.f32.mrf.mxu0  ;;  %6846 = vmatprep.subr.mxu0 %v11108_v35  ;;  %6480 = vmatmul.mubr.f32.vlgmr.msra.gmra.mxu1 %v11108_v35 }
 0x35d   :  { %v4235_v44 = vadd.f32 %v4234_v21, %v4172_v39  ;;  %v11305_v50 = vadd.f32 %v3962_v22, %v10813_v7  ;;  %v4103_v8 = vadd.f32 %v4102_v30, %v11278_v61  ;;  %6847 = vmatpush2.msra.mxu0 %v6327_v1  ;;  %v4175_v7 = vmul.f32 %v11296_v12, %v11296_v12  ;;  %v6350_v1 = vld [vmem:[%s14049_s2 + $0x278] sm:$0xff] }
 0x35e   :  { %v9089_v16 = vpop.f32.mrf.mxu0  ;;  %6848 = vmatprep.subr.mxu0 %v11108_v35  ;;  %7185 = vmatprep.subr.mxu1 %v11108_v35 }
 0x35f   :  { %v4104_v23 = vadd.f32 %v4103_v8, %v11305_v50  ;;  %v4174_v20 = vmul.f32 %v11305_v50, %v11305_v50  ;;  %v4236_v45 = vadd.f32 %v4235_v44, %v4173_v0  ;;  %v11323_v21 = vadd.f32 %v9089_v16, %v10833_v15  ;;  %6849 = vmatpush2.msra.mxu0 %v6326_v25  ;;  %v6324_v44 = vld [vmem:[%s14049_s2 + $0x1a8] sm:$0xff] }
 0x360   :  { %v3972_v30 = vpop.f32.mrf.mxu0  ;;  %6850 = vmatprep.subr.mxu0 %v11108_v35  ;;  %v4672_v16 = vld [vmem:[#allocation2 + $0x9] sm:$0xff]  ;;  %7186 = vmatpush1.msra.mxu1 %v6350_v1 }
 0x361   :  { %v4237_v39 = vadd.f32 %v4236_v45, %v4174_v20  ;;  %v11326_v27 = vadd.f32 %v3972_v30, %v10826_v38  ;;  %v4105_v22 = vadd.f32 %v4104_v23, %v11296_v12  ;;  %6851 = vmatpush2.msra.mxu0 %v6325_v41  ;;  %v6323_v20 = vld [vmem:[%s14049_s2 + $0x1a0] sm:$0xff]  ;;  %v4177_v45 = vmul.f32 %v11323_v21, %v11323_v21  ;;  %v6322_v41 = vld [vmem:[%s14049_s2 + $0x198] sm:$0xff] }
 0x362   :  { %v9092_v0 = vpop.f32.mrf.mxu0  ;;  %6852 = vmatprep.subr.mxu0 %v11108_v35  ;;  %6484 = vmatprep.mubr.f32.mxu1 %v4672_v16 }
 0x363   :  { %v4106_v15 = vadd.f32 %v4105_v22, %v11326_v27  ;;  %v4176_v38 = vmul.f32 %v11326_v27, %v11326_v27  ;;  %v4238_v8 = vadd.f32 %v4237_v39, %v4175_v7  ;;  %v11341_v25 = vadd.f32 %v9092_v0, %v10843_v3  ;;  %6853 = vmatpush2.msra.mxu0 %v6324_v44  ;;  %v6321_v44 = vld [vmem:[%s14049_s2 + $0x190] sm:$0xff] }
 0x364   :  { %v3982_v23 = vpop.f32.mrf.mxu0  ;;  %6854 = vmatprep.subr.mxu0 %v11108_v35  ;;  %6485 = vmatmul.mubr.f32.gmra.mxu1 %v11108_v35 }
 0x365   :  { %v4239_v30 = vadd.f32 %v4238_v8, %v4176_v38  ;;  %v11350_v22 = vadd.f32 %v3982_v23, %v10836_v28  ;;  %v4107_v7 = vadd.f32 %v4106_v15, %v11323_v21  ;;  %6855 = vmatpush2.msra.mxu0 %v6323_v20  ;;  %v4179_v28 = vmul.f32 %v11341_v25, %v11341_v25  ;;  %v6349_v20 = vld [vmem:[%s14049_s2 + $0x270] sm:$0xff] }
 0x366   :  { %v9095_v3 = vpop.f32.mrf.mxu0  ;;  %6856 = vmatprep.subr.mxu0 %v11108_v35  ;;  %7187 = vmatprep.subr.mxu1 %v11108_v35 }
 0x367   :  { %v4108_v39 = vadd.f32 %v4107_v7, %v11350_v22  ;;  %v4178_v1 = vmul.f32 %v11350_v22, %v11350_v22  ;;  %v4240_v0 = vadd.f32 %v4239_v30, %v4177_v45  ;;  %v11368_v8 = vadd.f32 %v9095_v3, %v10853_v57  ;;  %6857 = vmatpush2.msra.mxu0 %v6322_v41  ;;  %v6320_v30 = vld [vmem:[%s14049_s2 + $0x188] sm:$0xff] }
 0x368   :  { %v3992_v15 = vpop.f32.mrf.mxu0  ;;  %6858 = vmatprep.subr.mxu0 %v11108_v35  ;;  %7188 = vmatpush1.msra.mxu1 %v6349_v20 }
 0x369   :  { %v4241_v38 = vadd.f32 %v4240_v0, %v4178_v1  ;;  %v11371_v16 = vadd.f32 %v3992_v15, %v10846_v33  ;;  %v4109_v23 = vadd.f32 %v4108_v39, %v11341_v25  ;;  %6859 = vmatpush2.msra.mxu0 %v6321_v44  ;;  %v6319_v39 = vld [vmem:[%s14049_s2 + $0x180] sm:$0xff]  ;;  %v4181_v1 = vmul.f32 %v11368_v8, %v11368_v8 }
 0x36a   :  { %v9098_v45 = vpop.f32.mrf.mxu0  ;;  %6860 = vmatprep.subr.mxu0 %v11108_v35  ;;  %7189 = vmatprep.subr.mxu1 %v11108_v35 }
 0x36b   :  { %v4110_v57 = vadd.f32 %v4109_v23, %v11371_v16  ;;  %v4180_v33 = vmul.f32 %v11371_v16, %v11371_v16  ;;  %v4242_v7 = vadd.f32 %v4241_v38, %v4179_v28  ;;  %v11386_v3 = vadd.f32 %v9098_v45, %v10863_v29  ;;  %6861 = vmatpush2.msra.mxu0 %v6320_v30  ;;  %v6348_v29 = vld [vmem:[%s14049_s2 + $0x268] sm:$0xff] }
 0x36c   :  { %v4002_v41 = vpop.f32.mrf.mxu0  ;;  %6862 = vmatprep.subr.mxu0 %v11108_v35  ;;  %7190 = vmatpush1.msra.mxu1 %v6348_v29 }
 0x36d   :  { %14208 = vst [vmem:[#allocation21_spill] sm:$0xff] %v11386_v3  ;;  %v4243_v0 = vadd.f32 %v4242_v7, %v4180_v33  ;;  %v11395_v15 = vadd.f32 %v4002_v41, %v10856_v43  ;;  %v4111_v28 = vadd.f32 %v4110_v57, %v11368_v8  ;;  %6863 = vmatpush2.msra.mxu0 %v6319_v39  ;;  %v6347_v43 = vld [vmem:[%s14049_s2 + $0x260] sm:$0xff] }
 0x36e   :  { %v9101_v44 = vpop.f32.mrf.mxu0  ;;  %v4183_v45 = vmul.f32 %v11386_v3, %v11386_v3  ;;  %7570 = vmatprep.subr.mxu0 %v11108_v35  ;;  %7191 = vmatprep.subr.mxu1 %v11108_v35 }
 0x36f   :  { %v4112_v38 = vadd.f32 %v4111_v28, %v11395_v15  ;;  %v4182_v23 = vmul.f32 %v11395_v15, %v11395_v15  ;;  %v4244_v20 = vadd.f32 %v4243_v0, %v4181_v1  ;;  %v11413_v33 = vadd.f32 %v9101_v44, %v10873_v17  ;;  %7192 = vmatpush1.msra.mxu1 %v6347_v43  ;;  %v6346_v17 = vld [vmem:[%s14049_s2 + $0x258] sm:$0xff] }
 0x370   :  { %v4012_v30 = vpop.f32.mrf.mxu0  ;;  %7193 = vmatprep.subr.mxu1 %v11108_v35 }
 0x371   :  { %v4245_v57 = vadd.f32 %v4244_v20, %v4182_v23  ;;  %14209 = vst [vmem:[#allocation22_spill] sm:$0xff] %v11413_v33  ;;  %v11416_v7 = vadd.f32 %v4012_v30, %v10866_v5  ;;  %v4113_v41 = vadd.f32 %v4112_v38, %v11386_v3  ;;  %7194 = vmatpush1.msra.mxu1 %v6346_v17  ;;  %v14212_v23 = vld [vmem:[#allocation4_spill] sm:$0xff] }
 0x372   :  { %v9104_v39 = vpop.f32.mrf.mxu0  ;;  %v4185_v44 = vmul.f32 %v11413_v33, %v11413_v33  ;;  %7195 = vmatprep.subr.mxu1 %v11108_v35 }
 0x373   :  { %14210 = vst [vmem:[#allocation23_spill] sm:$0xff] %v11416_v7  ;;  %v4114_v1 = vadd.f32 %v4113_v41, %v11416_v7  ;;  %v4184_v0 = vmul.f32 %v11416_v7, %v11416_v7  ;;  %v4246_v28 = vadd.f32 %v4245_v57, %v4183_v45  ;;  %v11428_v5 = vadd.f32 %v9104_v39, %v10883_v58 }
 0x374   :  { %v4022_v29 = vpop.f32.mrf.mxu0 }
 0x375   :  { %14211 = vst [vmem:[#allocation24_spill] sm:$0xff] %v11428_v5  ;;  %v4247_v38 = vadd.f32 %v4246_v28, %v4184_v0  ;;  %v11433_v20 = vadd.f32 %v4022_v29, %v14212_v23  ;;  %v4115_v43 = vadd.f32 %v4114_v1, %v11413_v33  ;;  %v4187_v41 = vmul.f32 %v11428_v5, %v11428_v5  ;;  %v14214_v0 = vld [vmem:[#allocation6_spill] sm:$0xff]  ;;  %v14216_v29 = vld [vmem:[#allocation5_spill] sm:$0xff] }
 0x376   :  { %v9107_v45 = vpop.f32.mrf.mxu0 }
 0x377   :  { %14213 = vst [vmem:[#allocation25_spill] sm:$0xff] %v11433_v20  ;;  %v4116_v30 = vadd.f32 %v4115_v43, %v11433_v20  ;;  %v4186_v58 = vmul.f32 %v11433_v20, %v11433_v20  ;;  %v4248_v57 = vadd.f32 %v4247_v38, %v4185_v44  ;;  %v11443_v28 = vadd.f32 %v9107_v45, %v14214_v0  ;;  %v6345_v38 = vld [vmem:[%s14049_s2 + $0x250] sm:$0xff]  ;;  %v14220_v0 = vld [vmem:[#allocation7_spill] sm:$0xff] }
 0x378   :  { %v4032_v39 = vpop.f32.mrf.mxu0  ;;  %7196 = vmatpush1.msra.mxu1 %v6345_v38 }
 0x379   :  { %v4249_v17 = vadd.f32 %v4248_v57, %v4186_v58  ;;  %14215 = vst [vmem:[#allocation26_spill] sm:$0xff] %v11443_v28  ;;  %v11446_v23 = vadd.f32 %v4032_v39, %v14216_v29  ;;  %v4117_v1 = vadd.f32 %v4116_v30, %v11428_v5  ;;  %v14218_v58 = vld [vmem:[#allocation8_spill] sm:$0xff]  ;;  %v4189_v39 = vmul.f32 %v11443_v28, %v11443_v28 }
 0x37a   :  { %v9110_v33 = vpop.f32.mrf.mxu0  ;;  %7197 = vmatprep.subr.mxu1 %v11108_v35 }
 0x37b   :  { %14217 = vst [vmem:[#allocation28_spill] sm:$0xff] %v11446_v23  ;;  %v4118_v43 = vadd.f32 %v4117_v1, %v11446_v23  ;;  %v4188_v20 = vmul.f32 %v11446_v23, %v11446_v23  ;;  %v4250_v44 = vadd.f32 %v4249_v17, %v4187_v41  ;;  %v11456_v57 = vadd.f32 %v9110_v33, %v14218_v58 }
 0x37c   :  { %v4042_v45 = vpop.f32.mrf.mxu0 }
 0x37d   :  { %14219 = vst [vmem:[#allocation27_spill] sm:$0xff] %v11456_v57  ;;  %v4251_v30 = vadd.f32 %v4250_v44, %v4188_v20  ;;  %v11461_v29 = vadd.f32 %v4042_v45, %v14220_v0  ;;  %v4119_v1 = vadd.f32 %v4118_v43, %v11443_v28  ;;  %v4191_v38 = vmul.f32 %v11456_v57, %v11456_v57  ;;  %v14221_v20 = vld [vmem:[#allocation10_spill] sm:$0xff]  ;;  %v14223_v45 = vld [vmem:[#allocation9_spill] sm:$0xff] }
 0x37e   :  { %v9113_v41 = vpop.f32.mrf.mxu0 }
 0x37f   :  { %v4120_v17 = vadd.f32 %v4119_v1, %v11461_v29  ;;  %v4190_v33 = vmul.f32 %v11461_v29, %v11461_v29  ;;  %v4252_v58 = vadd.f32 %v4251_v30, %v4189_v39  ;;  %v11471_v44 = vadd.f32 %v9113_v41, %v14221_v20  ;;  %v6344_v1 = vld [vmem:[%s14049_s2 + $0x248] sm:$0xff] }
 0x380   :  { %v4052_v23 = vpop.f32.mrf.mxu0  ;;  %7198 = vmatpush1.msra.mxu1 %v6344_v1 }
 0x381   :  { %v4253_v5 = vadd.f32 %v4252_v58, %v4190_v33  ;;  %14222 = vst [vmem:[#allocation30_spill] sm:$0xff] %v11471_v44  ;;  %v4053_v0 = vadd.f32 %v4052_v23, %v14223_v45  ;;  %v4121_v43 = vadd.f32 %v4120_v17, %v11456_v57  ;;  %v4193_v39 = vmul.f32 %v11471_v44, %v11471_v44 }
 0x382   :  { %7199 = vmatprep.subr.mxu1 %v11108_v35 }
 0x383   :  { %v4122_v28 = vadd.f32 %v4121_v43, %v4053_v0  ;;  %v4192_v7 = vmul.f32 %v4053_v0, %v4053_v0  ;;  %v4254_v3 = vadd.f32 %v4253_v5, %v4191_v38  ;;  %v6343_v5 = vld [vmem:[%s14049_s2 + $0x240] sm:$0xff] }
 0x384   :  { %7200 = vmatpush1.msra.mxu1 %v6343_v5  ;;  %v4268_v5 = vld [vmem:[%s14050_s3] sm:$0x1] }
 0x385   :  { %v4123_v30 = vadd.f32 %v4122_v28, %v11471_v44  ;;  %v4255_v33 = vadd.f32 %v4254_v3, %v4192_v7  ;;  %7201 = vmatprep.subr.mxu1 %v11108_v35 }
 0x387   :  { %v4124_v41 = vrot.slane %v4123_v30, 4  ;;  %v4256_v23 = vadd.f32 %v4255_v33, %v4193_v39  ;;  %v6342_v39 = vld [vmem:[%s14049_s2 + $0x238] sm:$0xff] }
 0x388   :  { %7202 = vmatpush1.msra.mxu1 %v6342_v39 }
 0x389   :  { %v4125_v58 = vadd.f32 %v4124_v41, %v4123_v30  ;;  %v4257_v17 = vrot.slane %v4256_v23, 4  ;;  %7203 = vmatprep.subr.mxu1 %v11108_v35 }
 0x38b   :  { %v4126_v20 = vrot.slane %v4125_v58, 2  ;;  %v4258_v45 = vadd.f32 %v4257_v17, %v4256_v23  ;;  %v6341_v17 = vld [vmem:[%s14049_s2 + $0x230] sm:$0xff] }
 0x38c   :  { %7204 = vmatpush1.msra.mxu1 %v6341_v17 }
 0x38d   :  { %v4127_v38 = vadd.f32 %v4126_v20, %v4125_v58  ;;  %v4259_v43 = vrot.slane %v4258_v45, 2  ;;  %7205 = vmatprep.subr.mxu1 %v11108_v35  ;;  %v4276_v20 = vlaneseq }
 0x38f   :  { %v4128_v1 = vrot.slane %v4127_v38, 1  ;;  %v4260_v28 = vadd.f32 %v4259_v43, %v4258_v45  ;;  %v6340_v45 = vld [vmem:[%s14049_s2 + $0x228] sm:$0xff] }
 0x390   :  { %7206 = vmatpush1.msra.mxu1 %v6340_v45 }
 0x391   :  { %v4129_v3 = vadd.f32 %v4128_v1, %v4127_v38  ;;  %v4261_v7 = vrot.slane %v4260_v28, 1  ;;  %7207 = vmatprep.subr.mxu1 %v11108_v35 }
 0x393   :  { %v4262_v44 = vadd.f32 %v4261_v7, %v4260_v28  ;;  %v4263_v57 = vmul.f32 0.001953125, %v4129_v3  ;;  %v6339_v28 = vld [vmem:[%s14049_s2 + $0x220] sm:$0xff] }
 0x394   :  { %v4272_v3 = vld [vmem:[%s14051_s4] sm:$0x1]  ;;  %7208 = vmatpush1.msra.mxu1 %v6339_v28 }
 0x395   :  { %v4264_v30 = vmul.f32 0.001953125, %v4262_v44  ;;  %v4265_v33 = vmul.f32 %v4263_v57, %v4263_v57  ;;  %v4277_v44 = vshrl.u32 %v4276_v20, 7  ;;  %7209 = vmatprep.subr.mxu1 %v11108_v35  ;;  %v14227_v20 = vld [vmem:[#allocation14_spill] sm:$0xff] }
 0x397   :  { %v4266_v41 = vsub.f32 %v4264_v30, %v4265_v33  ;;  %v11501_v38 = vsub.s32 0, %v4277_v44 }
 0x399   :  { %v4267_v23 = vmax.f32 %v4266_v41, 0.0  ;;  %14224 = vst [vmem:[#allocation29_spill] sm:$0xff] %v11501_v38  ;;  %v14225_v41 = vld [vmem:[#allocation12_spill] sm:$0xff] }
 0x39b   :  { %v4269_v58 = vadd.f32 1e-05, %v4267_v23 }
 0x39d   :  { %9243 = vrsqrt.f32 %v4269_v58  ;;  %v14226_v58 = vld [vmem:[#allocation11_spill] sm:$0xff] }
 0x3aa   :  { %v9244_v43 = vpop.eup %9243 }
 0x3ab   :  { %v4271_v1 = vmul.f32 %v9244_v43, %v4268_v5  ;;  %v14229_v5 = vld [vmem:[#allocation16_spill] sm:$0xff] }
 0x3ad   :  { %v4273_v7 = vmul.f32 %v4271_v1, %v4263_v57  ;;  %v11510_v39 = vrot.slane %v4271_v1, %v11501_v38  ;;  %v14228_v57 = vld [vmem:[#allocation13_spill] sm:$0xff] }
 0x3af   :  { %v4274_v30 = vsub.f32 %v4272_v3, %v4273_v7  ;;  %v4343_v33 = vmul.f32 %v11510_v39, %v4053_v0  ;;  %v11516_v23 = vmul.f32 %v11510_v39, %v14225_v41  ;;  %v11520_v17 = vmul.f32 %v11510_v39, %v14226_v58  ;;  %v14230_v0 = vld [vmem:[#allocation15_spill] sm:$0xff]  ;;  %v14231_v3 = vld [vmem:[#allocation17_spill] sm:$0xff]  ;;  %v14232_v58 = vld [vmem:[#allocation18_spill] sm:$0xff] }
 0x3b0   :  { %v11524_v45 = vmul.f32 %v11510_v39, %v14227_v20  ;;  %v11528_v44 = vmul.f32 %v11510_v39, %v14228_v57  ;;  %v11532_v43 = vmul.f32 %v11510_v39, %v14229_v5  ;;  %v11536_v1 = vmul.f32 %v11510_v39, %v14230_v0  ;;  %v14233_v0 = vld [vmem:[#allocation19_spill] sm:$0xff] }
 0x3b1   :  { %v11539_v28 = vrot.slane %v4274_v30, %v11501_v38  ;;  %v11543_v7 = vmul.f32 %v11510_v39, %v14231_v3  ;;  %v11547_v41 = vmul.f32 %v11510_v39, %v10951_v55  ;;  %v11551_v20 = vmul.f32 %v11510_v39, %v14232_v58 }
 0x3b2   :  { %v11555_v57 = vmul.f32 %v11510_v39, %v10961_v13  ;;  %v11559_v30 = vmul.f32 %v11510_v39, %v10978_v53  ;;  %v11563_v5 = vmul.f32 %v11510_v39, %v10975_v51  ;;  %v11567_v55 = vmul.f32 %v11510_v39, %v14233_v0  ;;  %v6338_v51 = vld [vmem:[%s14049_s2 + $0x218] sm:$0xff] }
 0x3b3   :  { %v4413_v3 = vadd.f32 %v11539_v28, %v4343_v33  ;;  %v11572_v58 = vmul.f32 %v11510_v39, %v10985_v37  ;;  %v11576_v13 = vmul.f32 %v11510_v39, %v11002_v46  ;;  %v11580_v53 = vmul.f32 %v11510_v39, %v10999_v14  ;;  %7210 = vmatpush1.msra.mxu1 %v6338_v51  ;;  %v6337_v51 = vld [vmem:[%s14049_s2 + $0x210] sm:$0xff] }
 0x3b4   :  { %v11587_v0 = vmul.f32 %v11510_v39, %v11014_v63  ;;  %v11591_v37 = vmul.f32 %v11510_v39, %v11009_v60  ;;  %v11595_v46 = vmul.f32 %v11510_v39, %v11026_v42  ;;  %v11599_v14 = vmul.f32 %v11510_v39, %v11023_v54  ;;  %7211 = vmatprep.subr.mxu1 %v11108_v35 }
 0x3b5   :  { %v4477_v33 = vmax.f32 %v4413_v3, 0.0  ;;  %v11603_v38 = vmul.f32 %v11510_v39, %v11045_v6  ;;  %v11607_v63 = vmul.f32 %v11510_v39, %v11036_v18  ;;  %v11611_v60 = vmul.f32 %v11510_v39, %v11065_v49  ;;  %v14234_v3 = vld [vmem:[#allocation20_spill] sm:$0xff]  ;;  %7212 = vmatpush1.msra.mxu1 %v6337_v51 }
 0x3b6   :  { %v11616_v54 = vmul.f32 %v11510_v39, %v11062_v11  ;;  %v11620_v42 = vmul.f32 %v11510_v39, %v11085_v9  ;;  %v11624_v6 = vmul.f32 %v11510_v39, %v11076_v34  ;;  %v11628_v18 = vmul.f32 %v11510_v39, %v11105_v62  ;;  %7213 = vmatprep.subr.mxu1 %v11108_v35 }
 0x3b7   :  { %v11632_v49 = vmul.f32 %v11510_v39, %v11102_v19  ;;  %v11636_v11 = vmul.f32 %v11510_v39, %v11127_v52  ;;  %v11640_v9 = vmul.f32 %v11510_v39, %v11118_v47  ;;  %v11644_v34 = vmul.f32 %v11510_v39, %v11147_v10  ;;  %4541 = vst [vmem:[#allocation2 + $0x331] sm:$0xff] %v4477_v33 }
 0x3b8   :  { %v11648_v62 = vmul.f32 %v11510_v39, %v11144_v48  ;;  %v11652_v19 = vmul.f32 %v11510_v39, %v11167_v26  ;;  %v11656_v52 = vmul.f32 %v11510_v39, %v11158_v2  ;;  %v11660_v47 = vmul.f32 %v11510_v39, %v11187_v4 }
 0x3b9   :  { %v11664_v10 = vmul.f32 %v11510_v39, %v11184_v40  ;;  %v11668_v48 = vmul.f32 %v11510_v39, %v11207_v56  ;;  %v11672_v26 = vmul.f32 %v11510_v39, %v11198_v59  ;;  %v11676_v2 = vmul.f32 %v11510_v39, %v11230_v24 }
 0x3ba   :  { %v11680_v4 = vmul.f32 %v11510_v39, %v11227_v36  ;;  %v11684_v40 = vmul.f32 %v11510_v39, %v11254_v32  ;;  %v11688_v56 = vmul.f32 %v11510_v39, %v11245_v31  ;;  %v11692_v59 = vmul.f32 %v11510_v39, %v14234_v3  ;;  %v14238_v3 = vld [vmem:[#allocation21_spill] sm:$0xff] }
 0x3bb   :  { %v11696_v24 = vmul.f32 %v11510_v39, %v11278_v61  ;;  %v11700_v36 = vmul.f32 %v11510_v39, %v11305_v50  ;;  %v11704_v32 = vmul.f32 %v11510_v39, %v11296_v12  ;;  %v11708_v31 = vmul.f32 %v11510_v39, %v11326_v27 }
 0x3bc   :  { %v11715_v61 = vmul.f32 %v11510_v39, %v11323_v21  ;;  %v11719_v50 = vmul.f32 %v11510_v39, %v11350_v22  ;;  %v11723_v12 = vmul.f32 %v11510_v39, %v11341_v25  ;;  %v11727_v27 = vmul.f32 %v11510_v39, %v11371_v16  ;;  %v14242_v16 = vld [vmem:[#allocation22_spill] sm:$0xff] }
 0x3bd   :  { %v11731_v33 = vmul.f32 %v11510_v39, %v11368_v8  ;;  %v11735_v21 = vmul.f32 %v11510_v39, %v11395_v15  ;;  %v11739_v22 = vmul.f32 %v11510_v39, %v14238_v3  ;;  %v11748_v51 = vmul.f32 %v11510_v39, %v14242_v16  ;;  %v14244_v8 = vld [vmem:[#allocation25_spill] sm:$0xff]  ;;  %v14246_v15 = vld [vmem:[#allocation24_spill] sm:$0xff] }
 0x3be   :  { %14235 = vst [vmem:[#allocation32_spill] sm:$0xff] %v11719_v50  ;;  %v14240_v50 = vld [vmem:[#allocation23_spill] sm:$0xff]  ;;  %v14247_v3 = vld [vmem:[#allocation28_spill] sm:$0xff]  ;;  %v11768_v16 = vmul.f32 %v11510_v39, %v11461_v29  ;;  %v11788_v29 = vadd.f32 %v11539_v28, %v11524_v45  ;;  %v11808_v45 = vadd.f32 %v11539_v28, %v11547_v41  ;;  %v11828_v41 = vadd.f32 %v11539_v28, %v11567_v55 }
 0x3bf   :  { %14236 = vst [vmem:[#allocation31_spill] sm:$0xff] %v11731_v33  ;;  %14237 = vst [vmem:[#allocation34_spill] sm:$0xff] %v11735_v21  ;;  %v11743_v25 = vmul.f32 %v11510_v39, %v14240_v50  ;;  %v11752_v33 = vmul.f32 %v11510_v39, %v14244_v8  ;;  %v11756_v21 = vmul.f32 %v11510_v39, %v14246_v15  ;;  %v14248_v50 = vld [vmem:[#allocation26_spill] sm:$0xff] }
 0x3c0   :  { %14239 = vst [vmem:[#allocation33_spill] sm:$0xff] %v11739_v22  ;;  %14243 = vst [vmem:[#allocation35_spill] sm:$0xff] %v11748_v51  ;;  %v11760_v22 = vmul.f32 %v11510_v39, %v14247_v3  ;;  %v14249_v51 = vld [vmem:[#allocation27_spill] sm:$0xff]  ;;  %v11780_v3 = vadd.f32 %v11539_v28, %v11516_v23  ;;  %v11800_v23 = vadd.f32 %v11539_v28, %v11536_v1 }
 0x3c1   :  { %14241 = vst [vmem:[#allocation36_spill] sm:$0xff] %v11743_v25  ;;  %14245 = vst [vmem:[#allocation38_spill] sm:$0xff] %v11752_v33  ;;  %v11764_v25 = vmul.f32 %v11510_v39, %v14248_v50  ;;  %v11772_v8 = vmul.f32 %v11510_v39, %v14249_v51  ;;  %v14250_v33 = vld [vmem:[#allocation30_spill] sm:$0xff]  ;;  %v11784_v50 = vadd.f32 %v11539_v28, %v11520_v17 }
 0x3c2   :  { %v11776_v15 = vmul.f32 %v11510_v39, %v14250_v33  ;;  %v11792_v51 = vadd.f32 %v11539_v28, %v11528_v44  ;;  %v11796_v39 = vadd.f32 %v11539_v28, %v11532_v43  ;;  %v11804_v17 = vadd.f32 %v11539_v28, %v11543_v7 }
 0x3c3   :  { %v11812_v44 = vadd.f32 %v11539_v28, %v11551_v20  ;;  %v11816_v43 = vadd.f32 %v11539_v28, %v11555_v57  ;;  %v11820_v1 = vadd.f32 %v11539_v28, %v11559_v30  ;;  %v11824_v7 = vadd.f32 %v11539_v28, %v11563_v5  ;;  %v6336_v5 = vld [vmem:[%s14049_s2 + $0x208] sm:$0xff] }
 0x3c4   :  { %v11832_v20 = vadd.f32 %v11539_v28, %v11572_v58  ;;  %v11836_v57 = vadd.f32 %v11539_v28, %v11576_v13  ;;  %v11840_v30 = vadd.f32 %v11539_v28, %v11580_v53  ;;  %v11847_v55 = vadd.f32 %v11539_v28, %v11587_v0  ;;  %7214 = vmatpush1.msra.mxu1 %v6336_v5 }
 0x3c5   :  { %v11851_v58 = vadd.f32 %v11539_v28, %v11591_v37  ;;  %v11855_v13 = vadd.f32 %v11539_v28, %v11595_v46  ;;  %v11859_v53 = vadd.f32 %v11539_v28, %v11599_v14  ;;  %v11863_v33 = vadd.f32 %v11539_v28, %v11603_v38  ;;  %7215 = vmatprep.subr.mxu1 %v11108_v35  ;;  %v14258_v5 = vld [vmem:[#allocation32_spill] sm:$0xff] }
 0x3c6   :  { %v11867_v0 = vadd.f32 %v11539_v28, %v11607_v63  ;;  %v11871_v37 = vadd.f32 %v11539_v28, %v11611_v60  ;;  %v11875_v46 = vadd.f32 %v11539_v28, %v11616_v54  ;;  %v11880_v14 = vadd.f32 %v11539_v28, %v11620_v42 }
 0x3c7   :  { %v11884_v38 = vadd.f32 %v11539_v28, %v11624_v6  ;;  %v11888_v63 = vadd.f32 %v11539_v28, %v11628_v18  ;;  %v11892_v60 = vadd.f32 %v11539_v28, %v11632_v49  ;;  %v11896_v54 = vadd.f32 %v11539_v28, %v11636_v11 }
 0x3c8   :  { %v11900_v42 = vadd.f32 %v11539_v28, %v11640_v9  ;;  %v11904_v6 = vadd.f32 %v11539_v28, %v11644_v34  ;;  %v11908_v18 = vadd.f32 %v11539_v28, %v11648_v62  ;;  %v11912_v49 = vadd.f32 %v11539_v28, %v11652_v19 }
 0x3c9   :  { %v11916_v11 = vadd.f32 %v11539_v28, %v11656_v52  ;;  %v11920_v9 = vadd.f32 %v11539_v28, %v11660_v47  ;;  %v11924_v34 = vadd.f32 %v11539_v28, %v11664_v10  ;;  %v11928_v62 = vadd.f32 %v11539_v28, %v11668_v48 }
 0x3ca   :  { %14251 = vst [vmem:[#allocation37_spill] sm:$0xff] %v11912_v49  ;;  %v11932_v19 = vadd.f32 %v11539_v28, %v11672_v26  ;;  %v11936_v52 = vadd.f32 %v11539_v28, %v11676_v2  ;;  %v11940_v47 = vadd.f32 %v11539_v28, %v11680_v4  ;;  %v11944_v10 = vadd.f32 %v11539_v28, %v11684_v40 }
 0x3cb   :  { %14252 = vst [vmem:[#allocation39_spill] sm:$0xff] %v11916_v11  ;;  %14253 = vst [vmem:[#allocation40_spill] sm:$0xff] %v11920_v9  ;;  %v11948_v48 = vadd.f32 %v11539_v28, %v11688_v56  ;;  %v11952_v26 = vadd.f32 %v11539_v28, %v11692_v59  ;;  %v11956_v2 = vadd.f32 %v11539_v28, %v11696_v24  ;;  %v6335_v24 = vld [vmem:[%s14049_s2 + $0x200] sm:$0xff] }
 0x3cc   :  { %v11960_v4 = vadd.f32 %v11539_v28, %v11700_v36  ;;  %v11964_v40 = vadd.f32 %v11539_v28, %v11704_v32  ;;  %v11968_v56 = vadd.f32 %v11539_v28, %v11708_v31  ;;  %v11972_v59 = vadd.f32 %v11539_v28, %v11715_v61  ;;  %7216 = vmatpush1.msra.mxu1 %v6335_v24 }
 0x3cd   :  { %v11979_v36 = vadd.f32 %v11539_v28, %v14258_v5  ;;  %v11983_v32 = vadd.f32 %v11539_v28, %v11723_v12  ;;  %v11987_v31 = vadd.f32 %v11539_v28, %v11727_v27  ;;  %7217 = vmatprep.subr.mxu1 %v11108_v35  ;;  %v12032_v35 = vadd.f32 %v11539_v28, %v11772_v8 }
 0x3ce   :  { %14254 = vst [vmem:[#allocation4_spill] sm:$0xff] %v11960_v4  ;;  %14255 = vst [vmem:[#allocation6_spill] sm:$0xff] %v11964_v40  ;;  %v14263_v4 = vld [vmem:[#allocation33_spill] sm:$0xff]  ;;  %v14271_v8 = vmax.f32 %v11792_v51, 0.0 }
 0x3cf   :  { %14256 = vst [vmem:[#allocation5_spill] sm:$0xff] %v11968_v56  ;;  %14257 = vst [vmem:[#allocation8_spill] sm:$0xff] %v11972_v59  ;;  %v14261_v56 = vld [vmem:[#allocation31_spill] sm:$0xff]  ;;  %v14262_v59 = vld [vmem:[#allocation34_spill] sm:$0xff]  ;;  %v11999_v5 = vadd.f32 %v11539_v28, %v14263_v4  ;;  %v12020_v4 = vadd.f32 %v11539_v28, %v11760_v22  ;;  %v14078_v22 = vmax.f32 %v11784_v50, 0.0 }
 0x3d0   :  { %14259 = vst [vmem:[#allocation7_spill] sm:$0xff] %v11979_v36  ;;  %14260 = vst [vmem:[#allocation10_spill] sm:$0xff] %v11983_v32  ;;  %v11991_v61 = vadd.f32 %v11539_v28, %v14261_v56  ;;  %v11995_v40 = vadd.f32 %v11539_v28, %v14262_v59  ;;  %v14264_v36 = vld [vmem:[#allocation36_spill] sm:$0xff]  ;;  %v14265_v32 = vld [vmem:[#allocation35_spill] sm:$0xff]  ;;  %v12016_v59 = vadd.f32 %v11539_v28, %v11756_v21 }
 0x3d1   :  { %v12003_v12 = vadd.f32 %v11539_v28, %v14264_v36  ;;  %v12007_v27 = vadd.f32 %v11539_v28, %v14265_v32  ;;  %v14266_v56 = vld [vmem:[#allocation38_spill] sm:$0xff]  ;;  %14267 = vst [vmem:[#allocation9_spill] sm:$0xff] %v12020_v4  ;;  %v12024_v36 = vadd.f32 %v11539_v28, %v11764_v25  ;;  %v12028_v32 = vadd.f32 %v11539_v28, %v11768_v16 }
 0x3d2   :  { %v12012_v24 = vadd.f32 %v11539_v28, %v14266_v56  ;;  %14270 = vst [vmem:[#allocation14_spill] sm:$0xff] %v12032_v35  ;;  %v12036_v21 = vadd.f32 %v11539_v28, %v11776_v15  ;;  %v4415_v56 = vmax.f32 %v11780_v3, 0.0  ;;  %v14076_v4 = vmax.f32 %v11788_v29, 0.0  ;;  %4480 = vst [vmem:[#allocation2 + $0x21] sm:$0xff] %v14078_v22 }
 0x3d3   :  { %14268 = vst [vmem:[#allocation12_spill] sm:$0xff] %v12024_v36  ;;  %14269 = vst [vmem:[#allocation11_spill] sm:$0xff] %v12028_v32  ;;  %v14077_v36 = vmax.f32 %v11796_v39, 0.0  ;;  %v14079_v16 = vmax.f32 %v11800_v23, 0.0  ;;  %v14081_v32 = vmax.f32 %v11804_v17, 0.0  ;;  %v14080_v35 = vmax.f32 %v11812_v44, 0.0 }
 0x3d4   :  { %4479 = vst [vmem:[#allocation2 + $0x19] sm:$0xff] %v4415_v56  ;;  %6489 = vmatprep.mubr.f32.mxu1 %v4415_v56  ;;  %v14082_v28 = vmax.f32 %v11816_v43, 0.0  ;;  %4481 = vst [vmem:[#allocation2 + $0x31] sm:$0xff] %v14076_v4  ;;  %v14083_v56 = vmax.f32 %v11832_v20, 0.0  ;;  %v14084_v15 = vmax.f32 %v11836_v57, 0.0  ;;  %v14085_v3 = vmax.f32 %v11840_v30, 0.0 }
 0x3d5   :  { %4482 = vst [vmem:[#allocation2 + $0x39] sm:$0xff] %v14271_v8  ;;  %4483 = vst [vmem:[#allocation2 + $0x49] sm:$0xff] %v14077_v36  ;;  %v14272_v4 = vmax.f32 %v11808_v45, 0.0  ;;  %v6366_v8 = vld [vmem:[%s14049_s2 + $0x2f8] sm:$0xff]  ;;  %v14086_v36 = vmax.f32 %v11867_v0, 0.0  ;;  %v14087_v22 = vmax.f32 %v11871_v37, 0.0 }
 0x3d6   :  { %4484 = vst [vmem:[#allocation2 + $0x51] sm:$0xff] %v14079_v16  ;;  %4485 = vst [vmem:[#allocation2 + $0x61] sm:$0xff] %v14081_v32  ;;  %v14275_v32 = vmax.f32 %v11828_v41, 0.0  ;;  %7218 = vmatpush2.msra.mxu1 %v6366_v8  ;;  %v14088_v25 = vmax.f32 %v11875_v46, 0.0  ;;  %v14280_v16 = vmax.f32 %v11863_v33, 0.0  ;;  %v14089_v8 = vmax.f32 %v11900_v42, 0.0 }
 0x3d7   :  { %4486 = vst [vmem:[#allocation2 + $0x69] sm:$0xff] %v14272_v4  ;;  %4487 = vst [vmem:[#allocation2 + $0x79] sm:$0xff] %v14080_v35  ;;  %v14273_v4 = vmax.f32 %v11820_v1, 0.0  ;;  %v14274_v35 = vmax.f32 %v11824_v7, 0.0 }
 0x3d8   :  { %4488 = vst [vmem:[#allocation2 + $0x81] sm:$0xff] %v14082_v28  ;;  %4491 = vst [vmem:[#allocation2 + $0xa9] sm:$0xff] %v14275_v32  ;;  %v14276_v32 = vmax.f32 %v11847_v55, 0.0  ;;  %v4446_v28 = vmax.f32 %v11908_v18, 0.0  ;;  %v4452_v18 = vmax.f32 %v11932_v19, 0.0  ;;  %v4457_v19 = vmax.f32 %v11952_v26, 0.0 }
 0x3d9   :  { %4489 = vst [vmem:[#allocation2 + $0x91] sm:$0xff] %v14273_v4  ;;  %4490 = vst [vmem:[#allocation2 + $0x99] sm:$0xff] %v14274_v35  ;;  %v12098_v35 = vld [vmem:[#allocation2] sm:$0xff]  ;;  %v4445_v4 = vmax.f32 %v11904_v6, 0.0  ;;  %v6382_v6 = vld [vmem:[%s14049_s2 + $0x378] sm:$0xff] }
 0x3da   :  { %4492 = vst [vmem:[#allocation2 + $0xb1] sm:$0xff] %v14083_v56  ;;  %4493 = vst [vmem:[#allocation2 + $0xc1] sm:$0xff] %v14084_v15  ;;  %7219 = vmatprep.subr.mxu1 %v12098_v35  ;;  %v14277_v15 = vmax.f32 %v11851_v58, 0.0 }
 0x3db   :  { %4494 = vst [vmem:[#allocation2 + $0xc9] sm:$0xff] %v14085_v3  ;;  %4495 = vst [vmem:[#allocation2 + $0xd9] sm:$0xff] %v14276_v32  ;;  %v14278_v3 = vmax.f32 %v11855_v13, 0.0  ;;  %v14279_v32 = vmax.f32 %v11859_v53, 0.0  ;;  %v4927_v56 = vld [vmem:[#allocation2 + $0x18] sm:$0xff]  ;;  %v4928_v26 = vld [vmem:[#allocation2 + $0x20] sm:$0xff] }
 0x3dc   :  { %4496 = vst [vmem:[#allocation2 + $0xe1] sm:$0xff] %v14277_v15  ;;  %4499 = vst [vmem:[#allocation2 + $0x109] sm:$0xff] %v14280_v16  ;;  %v14281_v15 = vmax.f32 %v11880_v14, 0.0  ;;  %v4799_v16 = vld [vmem:[#allocation2 + $0x2] sm:$0xff]  ;;  %6864 = vmatprep.mubr.f32.mxu0 %v4927_v56  ;;  %6490 = vmatmul.mubr.f32.gmra.mxu1 %v4927_v56 }
 0x3dd   :  { %4497 = vst [vmem:[#allocation2 + $0xf1] sm:$0xff] %v14278_v3  ;;  %4498 = vst [vmem:[#allocation2 + $0xf9] sm:$0xff] %v14279_v32  ;;  %v4453_v32 = vmax.f32 %v11936_v52, 0.0  ;;  %v4455_v3 = vmax.f32 %v11944_v10, 0.0  ;;  %v4458_v52 = vmax.f32 %v11956_v2, 0.0  ;;  %v14288_v10 = vmax.f32 %v11916_v11, 0.0  ;;  %6865 = vmatmul.mubr.f32.vlgmr.msra.gmra.mxu0 %v4799_v16 }
 0x3de   :  { %4500 = vst [vmem:[#allocation2 + $0x111] sm:$0xff] %v14086_v36  ;;  %4501 = vst [vmem:[#allocation2 + $0x121] sm:$0xff] %v14087_v22  ;;  %v14282_v36 = vmax.f32 %v11884_v38, 0.0  ;;  %v14283_v22 = vmax.f32 %v11888_v63, 0.0  ;;  %v14293_v2 = vld [vmem:[#allocation6_spill] sm:$0xff]  ;;  %v14295_v11 = vld [vmem:[#allocation8_spill] sm:$0xff]  ;;  %6869 = vmatprep.mubr.f32.mxu0 %v4928_v26  ;;  %7571 = vmatpush1.msra.mxu0 %v6382_v6 }
 0x3df   :  { %4502 = vst [vmem:[#allocation2 + $0x129] sm:$0xff] %v14088_v25  ;;  %4503 = vst [vmem:[#allocation2 + $0x139] sm:$0xff] %v14281_v15  ;;  %v14284_v25 = vmax.f32 %v11892_v60, 0.0  ;;  %v14285_v15 = vmax.f32 %v11896_v54, 0.0  ;;  %v4460_v56 = vmax.f32 %v14293_v2, 0.0  ;;  %v14297_v16 = vld [vmem:[#allocation10_spill] sm:$0xff]  ;;  %7572 = vmatprep.subr.mxu0 %v12098_v35 }
 0x3e0   :  { %4504 = vst [vmem:[#allocation2 + $0x141] sm:$0xff] %v14282_v36  ;;  %4505 = vst [vmem:[#allocation2 + $0x151] sm:$0xff] %v14283_v22  ;;  %v4454_v36 = vmax.f32 %v11940_v47, 0.0  ;;  %v14286_v22 = vmax.f32 %v11912_v49, 0.0  ;;  %v14296_v49 = vld [vmem:[#allocation7_spill] sm:$0xff]  ;;  %v4471_v6 = vmax.f32 %v12012_v24, 0.0 }
 0x3e1   :  { %4506 = vst [vmem:[#allocation2 + $0x159] sm:$0xff] %v14284_v25  ;;  %4507 = vst [vmem:[#allocation2 + $0x169] sm:$0xff] %v14285_v15  ;;  %v4456_v25 = vmax.f32 %v11948_v48, 0.0  ;;  %v14287_v15 = vld [vmem:[#allocation4_spill] sm:$0xff]  ;;  %v14292_v48 = vmax.f32 %v11784_v50, 0.0  ;;  %v4465_v50 = vmax.f32 %v11987_v31, 0.0 }
 0x3e2   :  { %4508 = vst [vmem:[#allocation2 + $0x171] sm:$0xff] %v14089_v8  ;;  %4509 = vst [vmem:[#allocation2 + $0x181] sm:$0xff] %v4445_v4  ;;  %v4459_v47 = vmax.f32 %v14287_v15, 0.0  ;;  %v14289_v8 = vmax.f32 %v11920_v9, 0.0  ;;  %v14291_v4 = vmax.f32 %v11928_v62, 0.0  ;;  %v4463_v9 = vmax.f32 %v14296_v49, 0.0 }
 0x3e3   :  { %4510 = vst [vmem:[#allocation2 + $0x189] sm:$0xff] %v4446_v28  ;;  %4511 = vst [vmem:[#allocation2 + $0x1c9] sm:$0xff] %v14286_v22  ;;  %v14290_v28 = vmax.f32 %v11924_v34, 0.0  ;;  %6494 = vmatprep.mubr.f32.mxu1 %v14292_v48  ;;  %v14294_v22 = vld [vmem:[#allocation5_spill] sm:$0xff]  ;;  %v4467_v48 = vmax.f32 %v11995_v40, 0.0  ;;  %v4468_v49 = vmax.f32 %v11999_v5, 0.0 }
 0x3e4   :  { %4512 = vst [vmem:[#allocation2 + $0x1d1] sm:$0xff] %v14288_v10  ;;  %4513 = vst [vmem:[#allocation2 + $0x1e1] sm:$0xff] %v14289_v8  ;;  %v4461_v15 = vmax.f32 %v14294_v22, 0.0  ;;  %v4462_v10 = vmax.f32 %v14295_v11, 0.0  ;;  %v4800_v8 = vld [vmem:[#allocation2 + $0xa] sm:$0xff]  ;;  %v4469_v11 = vmax.f32 %v12003_v12, 0.0  ;;  %6495 = vmatmul.mubr.f32.gmra.mxu1 %v4928_v26 }
 0x3e5   :  { %4514 = vst [vmem:[#allocation2 + $0x1e9] sm:$0xff] %v14290_v28  ;;  %4515 = vst [vmem:[#allocation2 + $0x1f9] sm:$0xff] %v14291_v4  ;;  %v4464_v28 = vmax.f32 %v14297_v16, 0.0  ;;  %v4466_v4 = vmax.f32 %v11991_v61, 0.0  ;;  %v4472_v40 = vmax.f32 %v12016_v59, 0.0  ;;  %v14298_v31 = vld [vmem:[#allocation9_spill] sm:$0xff]  ;;  %6870 = vmatmul.mubr.f32.gmra.mxu0 %v4800_v8 }
 0x3e6   :  { %4516 = vst [vmem:[#allocation2 + $0x201] sm:$0xff] %v4452_v18  ;;  %4517 = vst [vmem:[#allocation2 + $0x211] sm:$0xff] %v4453_v32  ;;  %v4473_v61 = vmax.f32 %v14298_v31, 0.0  ;;  %v14299_v18 = vld [vmem:[#allocation12_spill] sm:$0xff]  ;;  %v14301_v5 = vmax.f32 %v11788_v29, 0.0  ;;  %v4929_v12 = vld [vmem:[#allocation2 + $0x30] sm:$0xff] }
 0x3e7   :  { %4518 = vst [vmem:[#allocation2 + $0x219] sm:$0xff] %v4454_v36  ;;  %4519 = vst [vmem:[#allocation2 + $0x229] sm:$0xff] %v4455_v3  ;;  %v4470_v3 = vmax.f32 %v12007_v27, 0.0  ;;  %v4474_v32 = vmax.f32 %v14299_v18, 0.0  ;;  %v14300_v36 = vld [vmem:[#allocation11_spill] sm:$0xff]  ;;  %v14302_v27 = vld [vmem:[#allocation14_spill] sm:$0xff]  ;;  %6874 = vmatprep.mubr.f32.mxu0 %v4929_v12 }
 0x3e8   :  { %4520 = vst [vmem:[#allocation2 + $0x231] sm:$0xff] %v4456_v25  ;;  %4521 = vst [vmem:[#allocation2 + $0x241] sm:$0xff] %v4457_v19  ;;  %v4475_v25 = vmax.f32 %v14300_v36, 0.0  ;;  %6499 = vmatprep.mubr.f32.mxu1 %v14301_v5  ;;  %v4478_v24 = vmax.f32 %v12036_v21, 0.0  ;;  %v4801_v59 = vld [vmem:[#allocation2 + $0x1a] sm:$0xff]  ;;  %v14303_v29 = vmax.f32 %v11792_v51, 0.0 }
 0x3e9   :  { %4522 = vst [vmem:[#allocation2 + $0x249] sm:$0xff] %v4458_v52  ;;  %4523 = vst [vmem:[#allocation2 + $0x259] sm:$0xff] %v4459_v47  ;;  %6500 = vmatmul.mubr.f32.gmra.mxu1 %v4929_v12  ;;  %6875 = vmatmul.mubr.f32.gmra.mxu0 %v4801_v59  ;;  %v4930_v19 = vld [vmem:[#allocation2 + $0x38] sm:$0xff]  ;;  %v4802_v21 = vld [vmem:[#allocation2 + $0x22] sm:$0xff]  ;;  %v14304_v52 = vmax.f32 %v11796_v39, 0.0  ;;  %v14305_v2 = vmax.f32 %v11800_v23, 0.0 }
 0x3ea   :  { %4524 = vst [vmem:[#allocation2 + $0x261] sm:$0xff] %v4460_v56  ;;  %4525 = vst [vmem:[#allocation2 + $0x271] sm:$0xff] %v4461_v15  ;;  %6504 = vmatprep.mubr.f32.mxu1 %v14303_v29  ;;  %6879 = vmatprep.mubr.f32.mxu0 %v4930_v19  ;;  %v4931_v47 = vld [vmem:[#allocation2 + $0x48] sm:$0xff]  ;;  %v4803_v26 = vld [vmem:[#allocation2 + $0x32] sm:$0xff]  ;;  %v14306_v22 = vmax.f32 %v11804_v17, 0.0  ;;  %v14307_v8 = vmax.f32 %v11808_v45, 0.0 }
 0x3eb   :  { %4526 = vst [vmem:[#allocation2 + $0x279] sm:$0xff] %v4462_v10  ;;  %4527 = vst [vmem:[#allocation2 + $0x289] sm:$0xff] %v4463_v9  ;;  %v4476_v9 = vmax.f32 %v14302_v27, 0.0  ;;  %v4932_v56 = vld [vmem:[#allocation2 + $0x50] sm:$0xff]  ;;  %v4804_v51 = vld [vmem:[#allocation2 + $0x3a] sm:$0xff]  ;;  %v14308_v45 = vmax.f32 %v11812_v44, 0.0 }
 0x3ec   :  { %4528 = vst [vmem:[#allocation2 + $0x291] sm:$0xff] %v4464_v28  ;;  %4529 = vst [vmem:[#allocation2 + $0x2a1] sm:$0xff] %v4465_v50  ;;  %v4933_v15 = vld [vmem:[#allocation2 + $0x60] sm:$0xff]  ;;  %v6365_v39 = vld [vmem:[%s14049_s2 + $0x2f0] sm:$0xff]  ;;  %v14309_v44 = vmax.f32 %v11816_v43, 0.0  ;;  %v14310_v43 = vmax.f32 %v11820_v1, 0.0 }
 0x3ed   :  { %4530 = vst [vmem:[#allocation2 + $0x2a9] sm:$0xff] %v4466_v4  ;;  %4531 = vst [vmem:[#allocation2 + $0x2b9] sm:$0xff] %v4467_v48  ;;  %6505 = vmatmul.mubr.f32.gmra.mxu1 %v4930_v19  ;;  %6880 = vmatmul.mubr.f32.gmra.mxu0 %v4802_v21  ;;  %v6381_v10 = vld [vmem:[%s14049_s2 + $0x370] sm:$0xff]  ;;  %v4934_v16 = vld [vmem:[#allocation2 + $0x68] sm:$0xff]  ;;  %v14311_v1 = vmax.f32 %v11824_v7, 0.0  ;;  %v14312_v7 = vmax.f32 %v11828_v41, 0.0 }
 0x3ee   :  { %4532 = vst [vmem:[#allocation2 + $0x2c1] sm:$0xff] %v4468_v49  ;;  %4533 = vst [vmem:[#allocation2 + $0x2d1] sm:$0xff] %v4469_v11  ;;  %6509 = vmatprep.mubr.f32.mxu1 %v14304_v52  ;;  %6884 = vmatprep.mubr.f32.mxu0 %v4931_v47  ;;  %v4805_v23 = vld [vmem:[#allocation2 + $0x4a] sm:$0xff]  ;;  %v4806_v50 = vld [vmem:[#allocation2 + $0x52] sm:$0xff]  ;;  %v14313_v59 = vmax.f32 %v11832_v20, 0.0  ;;  %v14314_v20 = vmax.f32 %v11836_v57, 0.0 }
 0x3ef   :  { %4534 = vst [vmem:[#allocation2 + $0x2d9] sm:$0xff] %v4470_v3  ;;  %4535 = vst [vmem:[#allocation2 + $0x2e9] sm:$0xff] %v4471_v6  ;;  %7573 = vmatpush1.msra.mxu0 %v6381_v10  ;;  %v6380_v17 = vld [vmem:[%s14049_s2 + $0x368] sm:$0xff]  ;;  %7220 = vmatpush2.msra.mxu1 %v6365_v39  ;;  %v4935_v4 = vld [vmem:[#allocation2 + $0x78] sm:$0xff]  ;;  %v14317_v39 = vmax.f32 %v11851_v58, 0.0 }
 0x3f0   :  { %4536 = vst [vmem:[#allocation2 + $0x2f1] sm:$0xff] %v4472_v40  ;;  %4537 = vst [vmem:[#allocation2 + $0x301] sm:$0xff] %v4473_v61  ;;  %7221 = vmatprep.subr.mxu1 %v12098_v35  ;;  %v6364_v28 = vld [vmem:[%s14049_s2 + $0x2e8] sm:$0xff]  ;;  %7574 = vmatprep.subr.mxu0 %v12098_v35  ;;  %v6379_v48 = vld [vmem:[%s14049_s2 + $0x360] sm:$0xff] }
 0x3f1   :  { %4538 = vst [vmem:[#allocation2 + $0x309] sm:$0xff] %v4474_v32  ;;  %4539 = vst [vmem:[#allocation2 + $0x319] sm:$0xff] %v4475_v25  ;;  %6510 = vmatmul.mubr.f32.gmra.mxu1 %v4931_v47  ;;  %6885 = vmatmul.mubr.f32.gmra.mxu0 %v4803_v26  ;;  %v6363_v49 = vld [vmem:[%s14049_s2 + $0x2e0] sm:$0xff]  ;;  %v6378_v6 = vld [vmem:[%s14049_s2 + $0x358] sm:$0xff]  ;;  %v14315_v26 = vmax.f32 %v11840_v30, 0.0  ;;  %v14316_v30 = vmax.f32 %v11847_v55, 0.0 }
 0x3f2   :  { %4540 = vst [vmem:[#allocation2 + $0x321] sm:$0xff] %v4476_v9  ;;  %4542 = vst [vmem:[#allocation2 + $0x339] sm:$0xff] %v4478_v24  ;;  %6514 = vmatprep.mubr.f32.mxu1 %v14305_v2  ;;  %6889 = vmatprep.mubr.f32.mxu0 %v4932_v56  ;;  %v4807_v11 = vld [vmem:[#allocation2 + $0x62] sm:$0xff]  ;;  %v6362_v40 = vld [vmem:[%s14049_s2 + $0x2d8] sm:$0xff] }
 0x3f3   :  { %7575 = vmatpush1.msra.mxu0 %v6380_v17  ;;  %7222 = vmatpush2.msra.mxu1 %v6364_v28  ;;  %v4936_v3 = vld [vmem:[#allocation2 + $0x80] sm:$0xff]  ;;  %v4808_v31 = vld [vmem:[#allocation2 + $0x6a] sm:$0xff]  ;;  %v4938_v25 = vld [vmem:[#allocation2 + $0x98] sm:$0xff] }
 0x3f4   :  { %7223 = vmatprep.subr.mxu1 %v12098_v35  ;;  %7576 = vmatprep.subr.mxu0 %v12098_v35  ;;  %v4937_v61 = vld [vmem:[#allocation2 + $0x90] sm:$0xff]  ;;  %v4809_v36 = vld [vmem:[#allocation2 + $0x7a] sm:$0xff]  ;;  %v6376_v5 = vld [vmem:[%s14049_s2 + $0x348] sm:$0xff] }
 0x3f5   :  { %6515 = vmatmul.mubr.f32.gmra.mxu1 %v4932_v56  ;;  %6890 = vmatmul.mubr.f32.gmra.mxu0 %v4804_v51  ;;  %v6377_v18 = vld [vmem:[%s14049_s2 + $0x350] sm:$0xff]  ;;  %v6360_v12 = vld [vmem:[%s14049_s2 + $0x2c8] sm:$0xff]  ;;  %v6359_v41 = vld [vmem:[%s14049_s2 + $0x2c0] sm:$0xff] }
 0x3f6   :  { %6519 = vmatprep.mubr.f32.mxu1 %v14306_v22  ;;  %6894 = vmatprep.mubr.f32.mxu0 %v4933_v15  ;;  %v6361_v32 = vld [vmem:[%s14049_s2 + $0x2d0] sm:$0xff]  ;;  %v4810_v27 = vld [vmem:[#allocation2 + $0x82] sm:$0xff]  ;;  %v4812_v21 = vld [vmem:[#allocation2 + $0x9a] sm:$0xff] }
 0x3f7   :  { %7577 = vmatpush1.msra.mxu0 %v6379_v48  ;;  %7224 = vmatpush2.msra.mxu1 %v6363_v49  ;;  %v4939_v9 = vld [vmem:[#allocation2 + $0xa8] sm:$0xff]  ;;  %v4811_v24 = vld [vmem:[#allocation2 + $0x92] sm:$0xff]  ;;  %v6375_v19 = vld [vmem:[%s14049_s2 + $0x340] sm:$0xff] }
 0x3f8   :  { %7225 = vmatprep.subr.mxu1 %v12098_v35  ;;  %7578 = vmatprep.subr.mxu0 %v12098_v35  ;;  %v4940_v29 = vld [vmem:[#allocation2 + $0xb0] sm:$0xff]  ;;  %v4941_v52 = vld [vmem:[#allocation2 + $0xc0] sm:$0xff]  ;;  %v4942_v2 = vld [vmem:[#allocation2 + $0xc8] sm:$0xff] }
 0x3f9   :  { %6520 = vmatmul.mubr.f32.gmra.mxu1 %v4933_v15  ;;  %6895 = vmatmul.mubr.f32.gmra.mxu0 %v4805_v23  ;;  %v4813_v47 = vld [vmem:[#allocation2 + $0xaa] sm:$0xff]  ;;  %v6358_v56 = vld [vmem:[%s14049_s2 + $0x2b8] sm:$0xff]  ;;  %v4815_v15 = vld [vmem:[#allocation2 + $0xc2] sm:$0xff] }
 0x3fa   :  { %6524 = vmatprep.mubr.f32.mxu1 %v14307_v8  ;;  %6899 = vmatprep.mubr.f32.mxu0 %v4934_v16  ;;  %v6374_v57 = vld [vmem:[%s14049_s2 + $0x338] sm:$0xff]  ;;  %v4944_v10 = vld [vmem:[#allocation2 + $0xe0] sm:$0xff]  ;;  %v6357_v23 = vld [vmem:[%s14049_s2 + $0x2b0] sm:$0xff] }
 0x3fb   :  { %7579 = vmatpush1.msra.mxu0 %v6378_v6  ;;  %7226 = vmatpush2.msra.mxu1 %v6362_v40  ;;  %v4814_v51 = vld [vmem:[#allocation2 + $0xb2] sm:$0xff]  ;;  %v4816_v8 = vld [vmem:[#allocation2 + $0xca] sm:$0xff]  ;;  %v4817_v28 = vld [vmem:[#allocation2 + $0xda] sm:$0xff]  ;;  %v14321_v6 = vmax.f32 %v11867_v0, 0.0 }
 0x3fc   :  { %7227 = vmatprep.subr.mxu1 %v12098_v35  ;;  %7580 = vmatprep.subr.mxu0 %v12098_v35  ;;  %v4943_v22 = vld [vmem:[#allocation2 + $0xd8] sm:$0xff]  ;;  %v6373_v55 = vld [vmem:[%s14049_s2 + $0x330] sm:$0xff]  ;;  %v6372_v48 = vld [vmem:[%s14049_s2 + $0x328] sm:$0xff] }
 0x3fd   :  { %6525 = vmatmul.mubr.f32.gmra.mxu1 %v4934_v16  ;;  %6900 = vmatmul.mubr.f32.gmra.mxu0 %v4806_v50  ;;  %v14318_v16 = vmax.f32 %v11855_v13, 0.0  ;;  %v4945_v58 = vld [vmem:[#allocation2 + $0xf0] sm:$0xff]  ;;  %v14319_v50 = vmax.f32 %v11859_v53, 0.0  ;;  %v6356_v13 = vld [vmem:[%s14049_s2 + $0x2a8] sm:$0xff]  ;;  %v4949_v0 = vld [vmem:[#allocation2 + $0x120] sm:$0xff] }
 0x3fe   :  { %6529 = vmatprep.mubr.f32.mxu1 %v14308_v45  ;;  %6904 = vmatprep.mubr.f32.mxu0 %v4935_v4  ;;  %v4946_v45 = vld [vmem:[#allocation2 + $0xf8] sm:$0xff]  ;;  %v4818_v49 = vld [vmem:[#allocation2 + $0xe2] sm:$0xff]  ;;  %v4948_v40 = vld [vmem:[#allocation2 + $0x110] sm:$0xff] }
 0x3ff   :  { %7581 = vmatpush1.msra.mxu0 %v6377_v18  ;;  %7228 = vmatpush2.msra.mxu1 %v6361_v32  ;;  %v4947_v53 = vld [vmem:[#allocation2 + $0x108] sm:$0xff]  ;;  %v14322_v18 = vmax.f32 %v11871_v37, 0.0  ;;  %v6370_v37 = vld [vmem:[%s14049_s2 + $0x318] sm:$0xff] }
 0x400   :  { %7229 = vmatprep.subr.mxu1 %v12098_v35  ;;  %7582 = vmatprep.subr.mxu0 %v12098_v35  ;;  %v4821_v32 = vld [vmem:[#allocation2 + $0x10a] sm:$0xff] }
 0x401   :  { %6530 = vmatmul.mubr.f32.gmra.mxu1 %v4935_v4  ;;  %6905 = vmatmul.mubr.f32.gmra.mxu0 %v4807_v11  ;;  %v14320_v11 = vmax.f32 %v11863_v33, 0.0  ;;  %v6355_v33 = vld [vmem:[%s14049_s2 + $0x2a0] sm:$0xff] }
 0x402   :  { %6534 = vmatprep.mubr.f32.mxu1 %v14309_v44  ;;  %6909 = vmatprep.mubr.f32.mxu0 %v4936_v3 }
 0x403   :  { %7583 = vmatpush1.msra.mxu0 %v6376_v5  ;;  %7230 = vmatpush2.msra.mxu1 %v6360_v12  ;;  %v6369_v5 = vld [vmem:[%s14049_s2 + $0x310] sm:$0xff] }
 0x404   :  { %7231 = vmatprep.subr.mxu1 %v12098_v35  ;;  %7584 = vmatprep.subr.mxu0 %v12098_v35  ;;  %v4822_v12 = vld [vmem:[#allocation2 + $0x112] sm:$0xff] }
 0x405   :  { %6535 = vmatmul.mubr.f32.gmra.mxu1 %v4936_v3  ;;  %6910 = vmatmul.mubr.f32.gmra.mxu0 %v4808_v31  ;;  %v4819_v3 = vld [vmem:[#allocation2 + $0xf2] sm:$0xff] }
 0x406   :  { %6539 = vmatprep.mubr.f32.mxu1 %v14310_v43  ;;  %6914 = vmatprep.mubr.f32.mxu0 %v4937_v61  ;;  %v6371_v43 = vld [vmem:[%s14049_s2 + $0x320] sm:$0xff] }
 0x407   :  { %7232 = vmatpush2.msra.mxu1 %v6359_v41  ;;  %7585 = vmatpush1.msra.mxu0 %v6375_v19  ;;  %v6398_v41 = vld [vmem:[%s14049_s2 + $0x3f8] sm:$0xff]  ;;  %v4824_v19 = vld [vmem:[#allocation2 + $0x12a] sm:$0xff] }
 0x408   :  { %7233 = vmatprep.subr.mxu1 %v12098_v35  ;;  %7586 = vmatprep.subr.mxu0 %v12098_v35 }
 0x409   :  { %6540 = vmatmul.mubr.f32.gmra.mxu1 %v4937_v61  ;;  %6915 = vmatmul.mubr.f32.gmra.mxu0 %v4809_v36  ;;  %v4820_v61 = vld [vmem:[#allocation2 + $0xfa] sm:$0xff]  ;;  %v14323_v36 = vmax.f32 %v11875_v46, 0.0  ;;  %v14324_v46 = vmax.f32 %v11880_v14, 0.0  ;;  %v14325_v14 = vmax.f32 %v11884_v38, 0.0  ;;  %v14326_v38 = vmax.f32 %v11888_v63, 0.0 }
 0x40a   :  { %6544 = vmatprep.mubr.f32.mxu1 %v14311_v1  ;;  %6919 = vmatprep.mubr.f32.mxu0 %v4938_v25  ;;  %v4950_v1 = vld [vmem:[#allocation2 + $0x128] sm:$0xff]  ;;  %v14327_v63 = vmax.f32 %v11892_v60, 0.0  ;;  %v14328_v60 = vmax.f32 %v11896_v54, 0.0  ;;  %v14329_v54 = vmax.f32 %v11900_v42, 0.0  ;;  %v4957_v42 = vld [vmem:[#allocation2 + $0x180] sm:$0xff] }
 0x40b   :  { %7234 = vmatpush2.msra.mxu1 %v6358_v56  ;;  %7587 = vmatpush1.msra.mxu0 %v6374_v57  ;;  %v6395_v56 = vld [vmem:[%s14049_s2 + $0x3e0] sm:$0xff] }
 0x40c   :  { %7235 = vmatprep.subr.mxu1 %v12098_v35  ;;  %7588 = vmatprep.subr.mxu0 %v12098_v35  ;;  %v4826_v57 = vld [vmem:[#allocation2 + $0x142] sm:$0xff] }
 0x40d   :  { %6545 = vmatmul.mubr.f32.gmra.mxu1 %v4938_v25  ;;  %6920 = vmatmul.mubr.f32.gmra.mxu0 %v4810_v27  ;;  %v6354_v25 = vld [vmem:[%s14049_s2 + $0x298] sm:$0xff] }
 0x40e   :  { %6549 = vmatprep.mubr.f32.mxu1 %v14312_v7  ;;  %6924 = vmatprep.mubr.f32.mxu0 %v4939_v9  ;;  %v4951_v27 = vld [vmem:[#allocation2 + $0x138] sm:$0xff]  ;;  %v6368_v7 = vld [vmem:[%s14049_s2 + $0x308] sm:$0xff] }
 0x40f   :  { %7236 = vmatpush2.msra.mxu1 %v6357_v23  ;;  %7589 = vmatpush1.msra.mxu0 %v6373_v55  ;;  %v6351_v23 = vld [vmem:[%s14049_s2 + $0x280] sm:$0xff]  ;;  %v6392_v55 = vld [vmem:[%s14049_s2 + $0x3c8] sm:$0xff] }
 0x410   :  { %7237 = vmatprep.subr.mxu1 %v12098_v35  ;;  %7590 = vmatprep.subr.mxu0 %v12098_v35 }
 0x411   :  { %6550 = vmatmul.mubr.f32.gmra.mxu1 %v4939_v9  ;;  %6925 = vmatmul.mubr.f32.gmra.mxu0 %v4811_v24  ;;  %v4823_v9 = vld [vmem:[#allocation2 + $0x122] sm:$0xff] }
 0x412   :  { %6554 = vmatprep.mubr.f32.mxu1 %v14313_v59  ;;  %6929 = vmatprep.mubr.f32.mxu0 %v4940_v29  ;;  %v6367_v24 = vld [vmem:[%s14049_s2 + $0x300] sm:$0xff] }
 0x413   :  { %7238 = vmatpush2.msra.mxu1 %v6356_v13  ;;  %7591 = vmatpush1.msra.mxu0 %v6372_v48  ;;  %v4952_v59 = vld [vmem:[#allocation2 + $0x140] sm:$0xff]  ;;  %v6389_v13 = vld [vmem:[%s14049_s2 + $0x3b0] sm:$0xff] }
 0x414   :  { %7239 = vmatprep.subr.mxu1 %v12098_v35  ;;  %7592 = vmatprep.subr.mxu0 %v12098_v35  ;;  %v4830_v48 = vld [vmem:[#allocation2 + $0x172] sm:$0xff] }
 0x415   :  { %6555 = vmatmul.mubr.f32.gmra.mxu1 %v4940_v29  ;;  %6930 = vmatmul.mubr.f32.gmra.mxu0 %v4812_v21  ;;  %v6353_v29 = vld [vmem:[%s14049_s2 + $0x290] sm:$0xff] }
 0x416   :  { %6559 = vmatprep.mubr.f32.mxu1 %v14314_v20  ;;  %6934 = vmatprep.mubr.f32.mxu0 %v4941_v52  ;;  %v4953_v21 = vld [vmem:[#allocation2 + $0x150] sm:$0xff] }
 0x417   :  { %7240 = vmatpush2.msra.mxu1 %v6355_v33  ;;  %7593 = vmatpush1.msra.mxu0 %v6371_v43  ;;  %v6397_v20 = vld [vmem:[%s14049_s2 + $0x3f0] sm:$0xff] }
 0x418   :  { %7241 = vmatprep.subr.mxu1 %v12098_v35  ;;  %7594 = vmatprep.subr.mxu0 %v12098_v35  ;;  %v4960_v43 = vld [vmem:[#allocation2 + $0x1d0] sm:$0xff] }
 0x419   :  { %6560 = vmatmul.mubr.f32.gmra.mxu1 %v4941_v52  ;;  %6935 = vmatmul.mubr.f32.gmra.mxu0 %v4813_v47  ;;  %v4825_v52 = vld [vmem:[#allocation2 + $0x13a] sm:$0xff]  ;;  %v6396_v47 = vld [vmem:[%s14049_s2 + $0x3e8] sm:$0xff] }
 0x41a   :  { %6564 = vmatprep.mubr.f32.mxu1 %v14315_v26  ;;  %6939 = vmatprep.mubr.f32.mxu0 %v4942_v2  ;;  %v4954_v26 = vld [vmem:[#allocation2 + $0x158] sm:$0xff] }
 0x41b   :  { %7242 = vmatpush2.msra.mxu1 %v6354_v25  ;;  %7595 = vmatpush1.msra.mxu0 %v6370_v37  ;;  %v4833_v25 = vld [vmem:[#allocation2 + $0x1ca] sm:$0xff] }
 0x41c   :  { %v12286_v17 = vpop.f32.mrf.mxu1  ;;  %7596 = vmatprep.subr.mxu0 %v12098_v35  ;;  %7243 = vmatprep.subr.mxu1 %v12098_v35  ;;  %v6384_v37 = vld [vmem:[%s14049_s2 + $0x388] sm:$0xff] }
 0x41d   :  { %6565 = vmatmul.mubr.f32.gmra.mxu1 %v4942_v2  ;;  %6940 = vmatmul.mubr.f32.gmra.mxu0 %v4814_v51  ;;  %v6352_v2 = vld [vmem:[%s14049_s2 + $0x288] sm:$0xff] }
 0x41e   :  { %6569 = vmatprep.mubr.f32.mxu1 %v14316_v30  ;;  %6944 = vmatprep.mubr.f32.mxu0 %v4943_v22  ;;  %v6483_v4 = vpop.f32.mrf.mxu1  ;;  %v4955_v51 = vld [vmem:[#allocation2 + $0x168] sm:$0xff]  ;;  %v6394_v30 = vld [vmem:[%s14049_s2 + $0x3d8] sm:$0xff] }
 0x41f   :  { %7597 = vmatpush1.msra.mxu0 %v6369_v5  ;;  %7244 = vmatpush2.msra.mxu1 %v6353_v29  ;;  %v12399_v4 = vld [vmem:[%s14049_s2 + $0x478] sm:$0xff]  ;;  %v14336_v5 = vmax.f32 %v11924_v34, 0.0  ;;  %v4835_v34 = vld [vmem:[#allocation2 + $0x1e2] sm:$0xff] }
 0x420   :  { %7598 = vmatprep.subr.mxu0 %v12098_v35  ;;  %7245 = vmatprep.subr.mxu1 %v12098_v35  ;;  %v4711_v29 = vld [vmem:[#allocation2 + $0x211] sm:$0xff] }
 0x421   :  { %6570 = vmatmul.mubr.f32.gmra.mxu1 %v4943_v22  ;;  %6945 = vmatmul.mubr.f32.gmra.mxu0 %v4815_v15  ;;  %v4827_v22 = vld [vmem:[#allocation2 + $0x152] sm:$0xff] }
 0x422   :  { %6574 = vmatprep.mubr.f32.mxu1 %v14317_v39  ;;  %6949 = vmatprep.mubr.f32.mxu0 %v4944_v10  ;;  %v6393_v15 = vld [vmem:[%s14049_s2 + $0x3d0] sm:$0xff] }
 0x423   :  { %7599 = vmatpush1.msra.mxu0 %v6368_v7  ;;  %7246 = vmatpush2.msra.mxu1 %v6352_v2  ;;  %v4956_v39 = vld [vmem:[#allocation2 + $0x170] sm:$0xff]  ;;  %v14337_v7 = vmax.f32 %v11928_v62, 0.0  ;;  %v4837_v62 = vld [vmem:[#allocation2 + $0x1fa] sm:$0xff] }
 0x424   :  { %v12300_v44 = vpop.f32.mrf.mxu1  ;;  %7600 = vmatprep.subr.mxu0 %v12098_v35  ;;  %7247 = vmatprep.subr.mxu1 %v12098_v35  ;;  %v4715_v2 = vld [vmem:[#allocation2 + $0x241] sm:$0xff] }
 0x425   :  { %6575 = vmatmul.mubr.f32.gmra.mxu1 %v4944_v10  ;;  %6950 = vmatmul.mubr.f32.gmra.mxu0 %v4816_v8  ;;  %v4703_v10 = vld [vmem:[#allocation2 + $0x1b1] sm:$0xff]  ;;  %v4828_v8 = vld [vmem:[#allocation2 + $0x15a] sm:$0xff] }
 0x426   :  { %6579 = vmatprep.mubr.f32.mxu1 %v14318_v16  ;;  %6954 = vmatprep.mubr.f32.mxu0 %v4945_v58  ;;  %v6488_v31 = vpop.f32.mrf.mxu1  ;;  %v6391_v16 = vld [vmem:[%s14049_s2 + $0x3c0] sm:$0xff] }
 0x427   :  { %7601 = vmatpush1.msra.mxu0 %v6367_v24  ;;  %7248 = vmatpush2.msra.mxu1 %v6351_v23  ;;  %v14332_v31 = vld [vmem:[#allocation39_spill] sm:$0xff]  ;;  %v4710_v24 = vld [vmem:[#allocation2 + $0x201] sm:$0xff]  ;;  %v4844_v23 = vld [vmem:[#allocation2 + $0x24a] sm:$0xff] }
 0x428   :  { %7602 = vmatprep.subr.mxu0 %v12098_v35  ;;  %9114 = vmatprep.subr.mxu1 %v12399_v4  ;;  %v14333_v33 = vmax.f32 %v14332_v31, 0.0  ;;  %v4848_v31 = vld [vmem:[#allocation2 + $0x27a] sm:$0xff] }
 0x429   :  { %6580 = vmatmul.mubr.f32.gmra.mxu1 %v4945_v58  ;;  %6955 = vmatmul.mubr.f32.gmra.mxu0 %v4817_v28  ;;  %v4704_v58 = vld [vmem:[#allocation2 + $0x1b9] sm:$0xff]  ;;  %v4829_v28 = vld [vmem:[#allocation2 + $0x16a] sm:$0xff] }
 0x42a   :  { %6584 = vmatprep.mubr.f32.mxu1 %v14319_v50  ;;  %6959 = vmatprep.mubr.f32.mxu0 %v4946_v45  ;;  %v6390_v50 = vld [vmem:[%s14049_s2 + $0x3b8] sm:$0xff] }
 0x42b   :  { %7603 = vmatpush2.msra.mxu0 %v6398_v41  ;;  %v4712_v41 = vld [vmem:[#allocation2 + $0x219] sm:$0xff] }
 0x42c   :  { %7604 = vmatprep.subr.mxu0 %v12098_v35 }
 0x42d   :  { %6585 = vmatmul.mubr.f32.gmra.mxu1 %v4946_v45  ;;  %6960 = vmatmul.mubr.f32.gmra.mxu0 %v4818_v49  ;;  %v4958_v45 = vld [vmem:[#allocation2 + $0x188] sm:$0xff] }
 0x42e   :  { %6589 = vmatprep.mubr.f32.mxu1 %v14320_v11  ;;  %6964 = vmatprep.mubr.f32.mxu0 %v4947_v53  ;;  %v14330_v49 = vld [vmem:[#allocation37_spill] sm:$0xff] }
 0x42f   :  { %7605 = vmatpush2.msra.mxu0 %v6397_v20  ;;  %v14331_v11 = vmax.f32 %v14330_v49, 0.0  ;;  %v4967_v20 = vld [vmem:[#allocation2 + $0x228] sm:$0xff]  ;;  %v4722_v49 = vld [vmem:[#allocation2 + $0x291] sm:$0xff] }
 0x430   :  { %7606 = vmatprep.subr.mxu0 %v12098_v35 }
 0x431   :  { %6590 = vmatmul.mubr.f32.gmra.mxu1 %v4947_v53  ;;  %6965 = vmatmul.mubr.f32.gmra.mxu0 %v4819_v3  ;;  %v4959_v53 = vld [vmem:[#allocation2 + $0x1c8] sm:$0xff] }
 0x432   :  { %6594 = vmatprep.mubr.f32.mxu1 %v14321_v6  ;;  %6969 = vmatprep.mubr.f32.mxu0 %v4948_v40  ;;  %v6388_v3 = vld [vmem:[%s14049_s2 + $0x3a8] sm:$0xff]  ;;  %v4831_v6 = vld [vmem:[#allocation2 + $0x1b2] sm:$0xff] }
 0x433   :  { %7607 = vmatpush2.msra.mxu0 %v6396_v47  ;;  %v4714_v47 = vld [vmem:[#allocation2 + $0x231] sm:$0xff] }
 0x434   :  { %7608 = vmatprep.subr.mxu0 %v12098_v35 }
 0x435   :  { %6595 = vmatmul.mubr.f32.gmra.mxu1 %v4948_v40  ;;  %6970 = vmatmul.mubr.f32.gmra.mxu0 %v4820_v61  ;;  %v6387_v40 = vld [vmem:[%s14049_s2 + $0x3a0] sm:$0xff] }
 0x436   :  { %6599 = vmatprep.mubr.f32.mxu1 %v14322_v18  ;;  %6974 = vmatprep.mubr.f32.mxu0 %v4949_v0  ;;  %v4832_v61 = vld [vmem:[#allocation2 + $0x1ba] sm:$0xff] }
 0x437   :  { %7609 = vmatpush2.msra.mxu0 %v6395_v56  ;;  %v6386_v18 = vld [vmem:[%s14049_s2 + $0x398] sm:$0xff]  ;;  %v4969_v56 = vld [vmem:[#allocation2 + $0x240] sm:$0xff] }
 0x438   :  { %7610 = vmatprep.subr.mxu0 %v12098_v35 }
 0x439   :  { %6600 = vmatmul.mubr.f32.gmra.mxu1 %v4949_v0  ;;  %6975 = vmatmul.mubr.f32.gmra.mxu0 %v4821_v32  ;;  %v14334_v0 = vld [vmem:[#allocation40_spill] sm:$0xff] }
 0x43a   :  { %6604 = vmatprep.mubr.f32.mxu1 %v14323_v36  ;;  %6979 = vmatprep.mubr.f32.mxu0 %v4950_v1  ;;  %v14335_v32 = vmax.f32 %v14334_v0, 0.0  ;;  %v4961_v36 = vld [vmem:[#allocation2 + $0x1e0] sm:$0xff] }
 0x43b   :  { %7611 = vmatpush2.msra.mxu0 %v6394_v30  ;;  %v4842_v30 = vld [vmem:[#allocation2 + $0x232] sm:$0xff] }
 0x43c   :  { %7612 = vmatprep.subr.mxu0 %v12098_v35 }
 0x43d   :  { %6605 = vmatmul.mubr.f32.gmra.mxu1 %v4950_v1  ;;  %6980 = vmatmul.mubr.f32.gmra.mxu0 %v4822_v12  ;;  %v6385_v1 = vld [vmem:[%s14049_s2 + $0x390] sm:$0xff]  ;;  %v4962_v12 = vld [vmem:[#allocation2 + $0x1e8] sm:$0xff] }
 0x43e   :  { %6609 = vmatprep.mubr.f32.mxu1 %v14324_v46  ;;  %6984 = vmatprep.mubr.f32.mxu0 %v4951_v27  ;;  %v6383_v46 = vld [vmem:[%s14049_s2 + $0x380] sm:$0xff] }
 0x43f   :  { %7613 = vmatpush2.msra.mxu0 %v6393_v15  ;;  %v4971_v15 = vld [vmem:[#allocation2 + $0x258] sm:$0xff] }
 0x440   :  { %7614 = vmatprep.subr.mxu0 %v12098_v35 }
 0x441   :  { %6610 = vmatmul.mubr.f32.gmra.mxu1 %v4951_v27  ;;  %6985 = vmatmul.mubr.f32.gmra.mxu0 %v4823_v9  ;;  %v4834_v27 = vld [vmem:[#allocation2 + $0x1d2] sm:$0xff] }
 0x442   :  { %6614 = vmatprep.mubr.f32.mxu1 %v14325_v14  ;;  %6989 = vmatprep.mubr.f32.mxu0 %v4952_v59  ;;  %v4963_v9 = vld [vmem:[#allocation2 + $0x1f8] sm:$0xff]  ;;  %v4964_v14 = vld [vmem:[#allocation2 + $0x200] sm:$0xff] }
 0x443   :  { %7615 = vmatpush2.msra.mxu0 %v6392_v55  ;;  %v4719_v55 = vld [vmem:[#allocation2 + $0x271] sm:$0xff] }
 0x444   :  { %7616 = vmatprep.subr.mxu0 %v12098_v35 }
 0x445   :  { %6615 = vmatmul.mubr.f32.gmra.mxu1 %v4952_v59  ;;  %6990 = vmatmul.mubr.f32.gmra.mxu0 %v4824_v19  ;;  %v4836_v59 = vld [vmem:[#allocation2 + $0x1ea] sm:$0xff]  ;;  %v4966_v19 = vld [vmem:[#allocation2 + $0x218] sm:$0xff] }
 0x446   :  { %6619 = vmatprep.mubr.f32.mxu1 %v14326_v38  ;;  %6994 = vmatprep.mubr.f32.mxu0 %v4953_v21  ;;  %v4838_v38 = vld [vmem:[#allocation2 + $0x202] sm:$0xff] }
 0x447   :  { %7617 = vmatpush2.msra.mxu0 %v6391_v16  ;;  %v4720_v16 = vld [vmem:[#allocation2 + $0x279] sm:$0xff] }
 0x448   :  { %7618 = vmatprep.subr.mxu0 %v12098_v35 }
 0x449   :  { %6620 = vmatmul.mubr.f32.gmra.mxu1 %v4953_v21  ;;  %6995 = vmatmul.mubr.f32.gmra.mxu0 %v4825_v52  ;;  %v4713_v21 = vld [vmem:[#allocation2 + $0x229] sm:$0xff]  ;;  %v4839_v52 = vld [vmem:[#allocation2 + $0x212] sm:$0xff] }
 0x44a   :  { %6624 = vmatprep.mubr.f32.mxu1 %v14327_v63  ;;  %6999 = vmatprep.mubr.f32.mxu0 %v4954_v26  ;;  %v4968_v63 = vld [vmem:[#allocation2 + $0x230] sm:$0xff] }
 0x44b   :  { %7619 = vmatpush2.msra.mxu0 %v6390_v50  ;;  %v4721_v50 = vld [vmem:[#allocation2 + $0x289] sm:$0xff] }
 0x44c   :  { %7620 = vmatprep.subr.mxu0 %v12098_v35 }
 0x44d   :  { %6625 = vmatmul.mubr.f32.gmra.mxu1 %v4954_v26  ;;  %7000 = vmatmul.mubr.f32.gmra.mxu0 %v4826_v57  ;;  %v4840_v26 = vld [vmem:[#allocation2 + $0x21a] sm:$0xff]  ;;  %v4841_v57 = vld [vmem:[#allocation2 + $0x22a] sm:$0xff] }
 0x44e   :  { %6629 = vmatprep.mubr.f32.mxu1 %v14328_v60  ;;  %7004 = vmatprep.mubr.f32.mxu0 %v4955_v51  ;;  %v4716_v60 = vld [vmem:[#allocation2 + $0x249] sm:$0xff] }
 0x44f   :  { %7621 = vmatpush2.msra.mxu0 %v6389_v13 }
 0x450   :  { %7622 = vmatprep.subr.mxu0 %v12098_v35 }
 0x451   :  { %6630 = vmatmul.mubr.f32.gmra.mxu1 %v4955_v51  ;;  %7005 = vmatmul.mubr.f32.gmra.mxu0 %v4827_v22  ;;  %v4970_v51 = vld [vmem:[#allocation2 + $0x248] sm:$0xff]  ;;  %v4717_v22 = vld [vmem:[#allocation2 + $0x259] sm:$0xff] }
 0x452   :  { %6634 = vmatprep.mubr.f32.mxu1 %v14329_v54  ;;  %7009 = vmatprep.mubr.f32.mxu0 %v4956_v39  ;;  %v4843_v54 = vld [vmem:[#allocation2 + $0x242] sm:$0xff] }
 0x453   :  { %7623 = vmatpush2.msra.mxu0 %v6388_v3 }
 0x454   :  { %7624 = vmatprep.subr.mxu0 %v12098_v35 }
 0x455   :  { %6635 = vmatmul.mubr.f32.gmra.mxu1 %v4956_v39  ;;  %7010 = vmatmul.mubr.f32.gmra.mxu0 %v4828_v8  ;;  %v4718_v39 = vld [vmem:[#allocation2 + $0x261] sm:$0xff]  ;;  %v4973_v8 = vld [vmem:[#allocation2 + $0x270] sm:$0xff] }
 0x456   :  { %6639 = vmatprep.mubr.f32.mxu1 %v4703_v10  ;;  %7014 = vmatprep.mubr.f32.mxu0 %v4957_v42  ;;  %v4972_v10 = vld [vmem:[#allocation2 + $0x260] sm:$0xff] }
 0x457   :  { %7625 = vmatpush2.msra.mxu0 %v6387_v40  ;;  %v4845_v42 = vld [vmem:[#allocation2 + $0x25a] sm:$0xff] }
 0x458   :  { %7626 = vmatprep.subr.mxu0 %v12098_v35 }
 0x459   :  { %6640 = vmatmul.mubr.f32.gmra.mxu1 %v12098_v35  ;;  %7015 = vmatmul.mubr.f32.gmra.mxu0 %v4829_v28  ;;  %v4846_v28 = vld [vmem:[#allocation2 + $0x262] sm:$0xff] }
 0x45a   :  { %6644 = vmatprep.mubr.f32.mxu1 %v4704_v58  ;;  %7019 = vmatprep.mubr.f32.mxu0 %v4958_v45  ;;  %v4974_v58 = vld [vmem:[#allocation2 + $0x278] sm:$0xff]  ;;  %v4975_v45 = vld [vmem:[#allocation2 + $0x288] sm:$0xff] }
 0x45b   :  { %7627 = vmatpush2.msra.mxu0 %v6386_v18 }
 0x45c   :  { %7628 = vmatprep.subr.mxu0 %v12098_v35 }
 0x45d   :  { %6645 = vmatmul.mubr.f32.gmra.mxu1 %v12098_v35  ;;  %7020 = vmatmul.mubr.f32.gmra.mxu0 %v4830_v48  ;;  %v4847_v48 = vld [vmem:[#allocation2 + $0x272] sm:$0xff] }
 0x45e   :  { %6649 = vmatprep.mubr.f32.mxu1 %v14331_v11  ;;  %7024 = vmatprep.mubr.f32.mxu0 %v4959_v53 }
 0x45f   :  { %7629 = vmatpush2.msra.mxu0 %v6385_v1  ;;  %v4724_v1 = vld [vmem:[#allocation2 + $0x2a9] sm:$0xff] }
 0x460   :  { %7630 = vmatprep.subr.mxu0 %v12098_v35 }
 0x461   :  { %6650 = vmatmul.mubr.f32.gmra.mxu1 %v4959_v53  ;;  %7025 = vmatmul.mubr.f32.gmra.mxu0 %v4831_v6  ;;  %v4976_v53 = vld [vmem:[#allocation2 + $0x290] sm:$0xff] }
 0x462   :  { %6654 = vmatprep.mubr.f32.mxu1 %v14333_v33  ;;  %7029 = vmatprep.mubr.f32.mxu0 %v4960_v43  ;;  %v4723_v33 = vld [vmem:[#allocation2 + $0x2a1] sm:$0xff] }
 0x463   :  { %7631 = vmatpush2.msra.mxu0 %v6384_v37  ;;  %v4978_v37 = vld [vmem:[#allocation2 + $0x2a8] sm:$0xff] }
 0x464   :  { %7632 = vmatprep.subr.mxu0 %v12098_v35  ;;  %v4965_v35 = vld [vmem:[#allocation2 + $0x210] sm:$0xff] }
 0x465   :  { %6655 = vmatmul.mubr.f32.gmra.mxu1 %v4960_v43  ;;  %7030 = vmatmul.mubr.f32.gmra.mxu0 %v4832_v61  ;;  %v4977_v61 = vld [vmem:[#allocation2 + $0x2a0] sm:$0xff] }
 0x466   :  { %6659 = vmatprep.mubr.f32.mxu1 %v14335_v32  ;;  %7034 = vmatprep.mubr.f32.mxu0 %v4961_v36 }
 0x467   :  { %7633 = vmatpush2.msra.mxu0 %v6383_v46 }
 0x469   :  { %6660 = vmatmul.mubr.f32.gmra.mxu1 %v4961_v36  ;;  %7035 = vmatmul.mubr.f32.gmra.mxu0 %v4833_v25  ;;  %v4849_v36 = vld [vmem:[#allocation2 + $0x28a] sm:$0xff] }
 0x46a   :  { %6664 = vmatprep.mubr.f32.mxu1 %v14336_v5  ;;  %7039 = vmatprep.mubr.f32.mxu0 %v4962_v12 }
 0x46d   :  { %6665 = vmatmul.mubr.f32.gmra.mxu1 %v4962_v12  ;;  %7040 = vmatmul.mubr.f32.gmra.mxu0 %v4834_v27 }
 0x46e   :  { %6669 = vmatprep.mubr.f32.mxu1 %v14337_v7  ;;  %7044 = vmatprep.mubr.f32.mxu0 %v4963_v9  ;;  %v4850_v7 = vld [vmem:[#allocation2 + $0x292] sm:$0xff] }
 0x471   :  { %6670 = vmatmul.mubr.f32.gmra.mxu1 %v4963_v9  ;;  %7045 = vmatmul.mubr.f32.gmra.mxu0 %v4835_v34  ;;  %v4725_v9 = vld [vmem:[#allocation2 + $0x2b9] sm:$0xff] }
 0x472   :  { %6674 = vmatprep.mubr.f32.mxu1 %v4710_v24  ;;  %7049 = vmatprep.mubr.f32.mxu0 %v4964_v14  ;;  %v4979_v24 = vld [vmem:[#allocation2 + $0x2b8] sm:$0xff] }
 0x475   :  { %6675 = vmatmul.mubr.f32.gmra.mxu1 %v4964_v14  ;;  %7050 = vmatmul.mubr.f32.gmra.mxu0 %v4836_v59 }
 0x476   :  { %6679 = vmatprep.mubr.f32.mxu1 %v4711_v29  ;;  %7054 = vmatprep.mubr.f32.mxu0 %v4965_v35 }
 0x479   :  { %6680 = vmatmul.mubr.f32.gmra.mxu1 %v4965_v35  ;;  %7055 = vmatmul.mubr.f32.gmra.mxu0 %v4837_v62  ;;  %v4851_v62 = vld [vmem:[#allocation2 + $0x2a2] sm:$0xff] }
 0x47a   :  { %6684 = vmatprep.mubr.f32.mxu1 %v4712_v41  ;;  %7059 = vmatprep.mubr.f32.mxu0 %v4966_v19  ;;  %v4726_v41 = vld [vmem:[#allocation2 + $0x2c1] sm:$0xff] }
 0x47d   :  { %6685 = vmatmul.mubr.f32.gmra.mxu1 %v4966_v19  ;;  %7060 = vmatmul.mubr.f32.gmra.mxu0 %v4838_v38  ;;  %v4980_v38 = vld [vmem:[#allocation2 + $0x2c0] sm:$0xff] }
 0x47e   :  { %6689 = vmatprep.mubr.f32.mxu1 %v4713_v21  ;;  %7064 = vmatprep.mubr.f32.mxu0 %v4967_v20 }
 0x481   :  { %6690 = vmatmul.mubr.f32.gmra.mxu1 %v4967_v20  ;;  %7065 = vmatmul.mubr.f32.gmra.mxu0 %v4839_v52 }
 0x482   :  { %6694 = vmatprep.mubr.f32.mxu1 %v4714_v47  ;;  %7069 = vmatprep.mubr.f32.mxu0 %v4968_v63 }
 0x485   :  { %6695 = vmatmul.mubr.f32.gmra.mxu1 %v4968_v63  ;;  %7070 = vmatmul.mubr.f32.gmra.mxu0 %v4840_v26  ;;  %v4852_v63 = vld [vmem:[#allocation2 + $0x2aa] sm:$0xff] }
 0x486   :  { %6699 = vmatprep.mubr.f32.mxu1 %v4715_v2  ;;  %7074 = vmatprep.mubr.f32.mxu0 %v4969_v56  ;;  %v4727_v26 = vld [vmem:[#allocation2 + $0x2d1] sm:$0xff] }
 0x489   :  { %6700 = vmatmul.mubr.f32.gmra.mxu1 %v4969_v56  ;;  %7075 = vmatmul.mubr.f32.gmra.mxu0 %v4841_v57  ;;  %v4981_v56 = vld [vmem:[#allocation2 + $0x2d0] sm:$0xff] }
 0x48a   :  { %6704 = vmatprep.mubr.f32.mxu1 %v4716_v60  ;;  %7079 = vmatprep.mubr.f32.mxu0 %v4970_v51 }
 0x48d   :  { %6705 = vmatmul.mubr.f32.gmra.mxu1 %v4970_v51  ;;  %7080 = vmatmul.mubr.f32.gmra.mxu0 %v4842_v30 }
 0x48e   :  { %6709 = vmatprep.mubr.f32.mxu1 %v4717_v22  ;;  %7084 = vmatprep.mubr.f32.mxu0 %v4971_v15  ;;  %v4853_v22 = vld [vmem:[#allocation2 + $0x2ba] sm:$0xff] }
 0x491   :  { %6710 = vmatmul.mubr.f32.gmra.mxu1 %v4971_v15  ;;  %7085 = vmatmul.mubr.f32.gmra.mxu0 %v4843_v54  ;;  %v4728_v15 = vld [vmem:[#allocation2 + $0x2d9] sm:$0xff] }
 0x492   :  { %6714 = vmatprep.mubr.f32.mxu1 %v4718_v39  ;;  %7089 = vmatprep.mubr.f32.mxu0 %v4972_v10  ;;  %v4982_v39 = vld [vmem:[#allocation2 + $0x2d8] sm:$0xff] }
 0x495   :  { %6715 = vmatmul.mubr.f32.gmra.mxu1 %v4972_v10  ;;  %7090 = vmatmul.mubr.f32.gmra.mxu0 %v4844_v23 }
 0x496   :  { %6719 = vmatprep.mubr.f32.mxu1 %v4719_v55  ;;  %7094 = vmatprep.mubr.f32.mxu0 %v4973_v8 }
 0x499   :  { %6720 = vmatmul.mubr.f32.gmra.mxu1 %v4973_v8  ;;  %7095 = vmatmul.mubr.f32.gmra.mxu0 %v4845_v42  ;;  %v4854_v42 = vld [vmem:[#allocation2 + $0x2c2] sm:$0xff] }
 0x49a   :  { %6724 = vmatprep.mubr.f32.mxu1 %v4720_v16  ;;  %7099 = vmatprep.mubr.f32.mxu0 %v4974_v58  ;;  %v4729_v16 = vld [vmem:[#allocation2 + $0x2e9] sm:$0xff] }
 0x49c   :  { %v6491_v13 = vpop.f32.mrf.mxu1 }
 0x49d   :  { %6725 = vmatmul.mubr.f32.gmra.mxu1 %v4974_v58  ;;  %7100 = vmatmul.mubr.f32.gmra.mxu0 %v4846_v28  ;;  %v12441_v11 = vpop.f32.mrf.mxu0  ;;  %v4983_v28 = vld [vmem:[#allocation2 + $0x2e8] sm:$0xff] }
 0x49e   :  { %6729 = vmatprep.mubr.f32.mxu1 %v4721_v50  ;;  %7104 = vmatprep.mubr.f32.mxu0 %v4975_v45  ;;  %v6493_v3 = vpop.f32.mrf.mxu1 }
 0x49f   :  { %v6868_v6 = vpop.f32.mrf.mxu0 }
 0x4a0   :  { %v4984_v6 = vld [vmem:[#allocation2 + $0x2f0] sm:$0xff] }
 0x4a1   :  { %6730 = vmatmul.mubr.f32.gmra.mxu1 %v4975_v45  ;;  %7105 = vmatmul.mubr.f32.gmra.mxu0 %v4847_v48 }
 0x4a2   :  { %6734 = vmatprep.mubr.f32.mxu1 %v4722_v49  ;;  %7109 = vmatprep.mubr.f32.mxu0 %v4976_v53  ;;  %v4855_v49 = vld [vmem:[#allocation2 + $0x2d2] sm:$0xff] }
 0x4a4   :  { %v6496_v40 = vpop.f32.mrf.mxu1 }
 0x4a5   :  { %6735 = vmatmul.mubr.f32.gmra.mxu1 %v4976_v53  ;;  %v12443_v43 = vpop.f32.mrf.mxu0  ;;  %7110 = vmatmul.mubr.f32.gmra.mxu0 %v4848_v31  ;;  %v4730_v53 = vld [vmem:[#allocation2 + $0x2f1] sm:$0xff] }
 0x4a6   :  { %6739 = vmatprep.mubr.f32.mxu1 %v4723_v33  ;;  %7114 = vmatprep.mubr.f32.mxu0 %v4977_v61  ;;  %v6498_v18 = vpop.f32.mrf.mxu1 }
 0x4a7   :  { %v6873_v0 = vpop.f32.mrf.mxu0  ;;  %v4856_v18 = vld [vmem:[#allocation2 + $0x2da] sm:$0xff] }
 0x4a8   :  { %v4731_v0 = vld [vmem:[#allocation2 + $0x301] sm:$0xff] }
 0x4a9   :  { %v6501_v32 = vpop.f32.mrf.mxu1  ;;  %6740 = vmatmul.mubr.f32.gmra.mxu1 %v4977_v61  ;;  %v6876_v25 = vpop.f32.mrf.mxu0  ;;  %7115 = vmatmul.mubr.f32.gmra.mxu0 %v4849_v36  ;;  %v4985_v36 = vld [vmem:[#allocation2 + $0x300] sm:$0xff] }
 0x4aa   :  { %6744 = vmatprep.mubr.f32.mxu1 %v4724_v1  ;;  %v12445_v5 = vadd.f32 %v6876_v25, %v6491_v13  ;;  %7119 = vmatprep.mubr.f32.mxu0 %v4978_v37 }
 0x4ab   :  { %v6503_v12 = vpop.f32.mrf.mxu1  ;;  %v6878_v46 = vpop.f32.mrf.mxu0 }
 0x4ac   :  { %v4857_v46 = vld [vmem:[#allocation2 + $0x2ea] sm:$0xff] }
 0x4ad   :  { %v6506_v27 = vpop.f32.mrf.mxu1  ;;  %6745 = vmatmul.mubr.f32.gmra.mxu1 %v4978_v37  ;;  %v6881_v34 = vpop.f32.mrf.mxu0  ;;  %7120 = vmatmul.mubr.f32.gmra.mxu0 %v4850_v7 }
 0x4ae   :  { %6749 = vmatprep.mubr.f32.mxu1 %v4725_v9  ;;  %v12447_v14 = vadd.f32 %v6881_v34, %v6496_v40  ;;  %7124 = vmatprep.mubr.f32.mxu0 %v4979_v24  ;;  %v4986_v9 = vld [vmem:[#allocation2 + $0x308] sm:$0xff] }
 0x4af   :  { %v6508_v59 = vpop.f32.mrf.mxu1  ;;  %v6883_v29 = vpop.f32.mrf.mxu0 }
 0x4b1   :  { %v6511_v35 = vpop.f32.mrf.mxu1  ;;  %6750 = vmatmul.mubr.f32.gmra.mxu1 %v4979_v24  ;;  %v6886_v19 = vpop.f32.mrf.mxu0  ;;  %7125 = vmatmul.mubr.f32.gmra.mxu0 %v4851_v62  ;;  %v4733_v62 = vld [vmem:[#allocation2 + $0x319] sm:$0xff] }
 0x4b2   :  { %6754 = vmatprep.mubr.f32.mxu1 %v4726_v41  ;;  %v12449_v21 = vadd.f32 %v6886_v19, %v6501_v32  ;;  %7129 = vmatprep.mubr.f32.mxu0 %v4980_v38  ;;  %v4987_v19 = vld [vmem:[#allocation2 + $0x318] sm:$0xff] }
 0x4b3   :  { %v6513_v20 = vpop.f32.mrf.mxu1  ;;  %v6888_v52 = vpop.f32.mrf.mxu0 }
 0x4b5   :  { %v6516_v47 = vpop.f32.mrf.mxu1  ;;  %6755 = vmatmul.mubr.f32.gmra.mxu1 %v4980_v38  ;;  %v6891_v2 = vpop.f32.mrf.mxu0  ;;  %7130 = vmatmul.mubr.f32.gmra.mxu0 %v4852_v63  ;;  %v4859_v63 = vld [vmem:[#allocation2 + $0x302] sm:$0xff] }
 0x4b6   :  { %6759 = vmatprep.mubr.f32.mxu1 %v4727_v26  ;;  %v12451_v57 = vadd.f32 %v6891_v2, %v6506_v27  ;;  %7134 = vmatprep.mubr.f32.mxu0 %v4981_v56  ;;  %v4732_v27 = vld [vmem:[#allocation2 + $0x309] sm:$0xff]  ;;  %v4734_v26 = vld [vmem:[#allocation2 + $0x321] sm:$0xff] }
 0x4b7   :  { %v6518_v60 = vpop.f32.mrf.mxu1  ;;  %v6893_v51 = vpop.f32.mrf.mxu0 }
 0x4b9   :  { %v6521_v30 = vpop.f32.mrf.mxu1  ;;  %6760 = vmatmul.mubr.f32.gmra.mxu1 %v4981_v56  ;;  %v6896_v54 = vpop.f32.mrf.mxu0  ;;  %7135 = vmatmul.mubr.f32.gmra.mxu0 %v4853_v22  ;;  %v4988_v56 = vld [vmem:[#allocation2 + $0x320] sm:$0xff] }
 0x4ba   :  { %6764 = vmatprep.mubr.f32.mxu1 %v4728_v15  ;;  %v12453_v10 = vadd.f32 %v6896_v54, %v6511_v35  ;;  %7139 = vmatprep.mubr.f32.mxu0 %v4982_v39  ;;  %v4858_v35 = vld [vmem:[#allocation2 + $0x2f2] sm:$0xff]  ;;  %v4860_v15 = vld [vmem:[#allocation2 + $0x30a] sm:$0xff]  ;;  %v5183_v54 = vld [vmem:[#allocation2 + $0x1a] sm:$0xff] }
 0x4bb   :  { %v6523_v23 = vpop.f32.mrf.mxu1  ;;  %v6898_v55 = vpop.f32.mrf.mxu0 }
 0x4bc   :  { %v4989_v23 = vld [vmem:[#allocation2 + $0x330] sm:$0xff] }
 0x4bd   :  { %v6526_v8 = vpop.f32.mrf.mxu1  ;;  %6765 = vmatmul.mubr.f32.gmra.mxu1 %v4982_v39  ;;  %v6901_v58 = vpop.f32.mrf.mxu0  ;;  %7140 = vmatmul.mubr.f32.gmra.mxu0 %v4854_v42 }
 0x4be   :  { %6769 = vmatprep.mubr.f32.mxu1 %v4729_v16  ;;  %v12455_v50 = vadd.f32 %v6901_v58, %v6516_v47  ;;  %7144 = vmatprep.mubr.f32.mxu0 %v4983_v28  ;;  %v5055_v16 = vld [vmem:[#allocation2 + $0x19] sm:$0xff] }
 0x4bf   :  { %v6528_v45 = vpop.f32.mrf.mxu1  ;;  %v6903_v13 = vpop.f32.mrf.mxu0 }
 0x4c0   :  { %v5184_v45 = vld [vmem:[#allocation2 + $0x22] sm:$0xff]  ;;  %v6413_v13 = vld [vmem:[%s14049_s2 + $0x470] sm:$0xff] }
 0x4c1   :  { %v6531_v48 = vpop.f32.mrf.mxu1  ;;  %6770 = vmatmul.mubr.f32.gmra.mxu1 %v4983_v28  ;;  %v6906_v3 = vpop.f32.mrf.mxu0  ;;  %7145 = vmatmul.mubr.f32.gmra.mxu0 %v4855_v49  ;;  %v4861_v28 = vld [vmem:[#allocation2 + $0x31a] sm:$0xff] }
 0x4c2   :  { %6774 = vmatprep.mubr.f32.mxu1 %v4730_v53  ;;  %v12457_v40 = vadd.f32 %v6906_v3, %v6521_v30  ;;  %7149 = vmatprep.mubr.f32.mxu0 %v4984_v6  ;;  %v4990_v49 = vld [vmem:[#allocation2 + $0x338] sm:$0xff] }
 0x4c3   :  { %v6533_v31 = vpop.f32.mrf.mxu1  ;;  %v6908_v33 = vpop.f32.mrf.mxu0 }
 0x4c4   :  { %v5056_v31 = vld [vmem:[#allocation2 + $0x21] sm:$0xff] }
 0x4c5   :  { %v6536_v61 = vpop.f32.mrf.mxu1  ;;  %6775 = vmatmul.mubr.f32.gmra.mxu1 %v4984_v6  ;;  %v6911_v32 = vpop.f32.mrf.mxu0  ;;  %7150 = vmatmul.mubr.f32.gmra.mxu0 %v4856_v18  ;;  %v5185_v18 = vld [vmem:[#allocation2 + $0x32] sm:$0xff] }
 0x4c6   :  { %6779 = vmatprep.mubr.f32.mxu1 %v4731_v0  ;;  %v12459_v1 = vadd.f32 %v6911_v32, %v6526_v8  ;;  %7154 = vmatprep.mubr.f32.mxu0 %v4985_v36  ;;  %v6412_v0 = vld [vmem:[%s14049_s2 + $0x468] sm:$0xff] }
 0x4c7   :  { %v6538_v25 = vpop.f32.mrf.mxu1  ;;  %v6913_v37 = vpop.f32.mrf.mxu0 }
 0x4c9   :  { %v6541_v12 = vpop.f32.mrf.mxu1  ;;  %6780 = vmatmul.mubr.f32.gmra.mxu1 %v4985_v36  ;;  %v6916_v7 = vpop.f32.mrf.mxu0  ;;  %7155 = vmatmul.mubr.f32.gmra.mxu0 %v4857_v46  ;;  %v5439_v36 = vld [vmem:[#allocation2 + $0x31] sm:$0xff] }
 0x4ca   :  { %6784 = vmatprep.mubr.f32.mxu1 %v4732_v27  ;;  %v12461_v34 = vadd.f32 %v6916_v7, %v6531_v48  ;;  %7159 = vmatprep.mubr.f32.mxu0 %v4986_v9  ;;  %v5311_v46 = vld [vmem:[#allocation2 + $0x30] sm:$0xff]  ;;  %v5186_v27 = vld [vmem:[#allocation2 + $0x3a] sm:$0xff] }
 0x4cb   :  { %v6543_v24 = vpop.f32.mrf.mxu1  ;;  %v6918_v59 = vpop.f32.mrf.mxu0  ;;  %v6411_v7 = vld [vmem:[%s14049_s2 + $0x460] sm:$0xff] }
 0x4cc   :  { %v5440_v24 = vld [vmem:[#allocation2 + $0x39] sm:$0xff] }
 0x4cd   :  { %v6546_v29 = vpop.f32.mrf.mxu1  ;;  %6785 = vmatmul.mubr.f32.gmra.mxu1 %v4986_v9  ;;  %v6921_v41 = vpop.f32.mrf.mxu0  ;;  %7160 = vmatmul.mubr.f32.gmra.mxu0 %v4858_v35 }
 0x4ce   :  { %6789 = vmatprep.mubr.f32.mxu1 %v4733_v62  ;;  %v12463_v38 = vadd.f32 %v6921_v41, %v6536_v61  ;;  %7164 = vmatprep.mubr.f32.mxu0 %v4987_v19  ;;  %v4862_v61 = vld [vmem:[#allocation2 + $0x322] sm:$0xff]  ;;  %v5312_v41 = vld [vmem:[#allocation2 + $0x38] sm:$0xff] }
 0x4cf   :  { %v6548_v20 = vpop.f32.mrf.mxu1  ;;  %v6923_v52 = vpop.f32.mrf.mxu0 }
 0x4d0   :  { %v6410_v20 = vld [vmem:[%s14049_s2 + $0x458] sm:$0xff] }
 0x4d1   :  { %v6551_v47 = vpop.f32.mrf.mxu1  ;;  %6790 = vmatmul.mubr.f32.gmra.mxu1 %v4987_v19  ;;  %v6926_v2 = vpop.f32.mrf.mxu0  ;;  %7165 = vmatmul.mubr.f32.gmra.mxu0 %v4859_v63  ;;  %v5187_v19 = vld [vmem:[#allocation2 + $0x4a] sm:$0xff] }
 0x4d2   :  { %6794 = vmatprep.mubr.f32.mxu1 %v4734_v26  ;;  %v12465_v60 = vadd.f32 %v6926_v2, %v6541_v12  ;;  %7169 = vmatprep.mubr.f32.mxu0 %v4988_v56 }
 0x4d3   :  { %v6553_v51 = vpop.f32.mrf.mxu1  ;;  %v6928_v30 = vpop.f32.mrf.mxu0 }
 0x4d4   :  { %v5313_v51 = vld [vmem:[#allocation2 + $0x48] sm:$0xff]  ;;  %v5188_v30 = vld [vmem:[#allocation2 + $0x52] sm:$0xff] }
 0x4d5   :  { %v6556_v22 = vpop.f32.mrf.mxu1  ;;  %6795 = vmatmul.mubr.f32.gmra.mxu1 %v4988_v56  ;;  %v6931_v39 = vpop.f32.mrf.mxu0  ;;  %7170 = vmatmul.mubr.f32.gmra.mxu0 %v4860_v15 }
 0x4d6   :  { %7249 = vmatprep.mubr.f32.mxu1 %v5183_v54  ;;  %v12467_v55 = vadd.f32 %v6931_v39, %v6546_v29  ;;  %7174 = vmatprep.mubr.f32.mxu0 %v4989_v23  ;;  %v5442_v54 = vld [vmem:[#allocation2 + $0x51] sm:$0xff] }
 0x4d7   :  { %v6558_v8 = vpop.f32.mrf.mxu1  ;;  %v6933_v42 = vpop.f32.mrf.mxu0 }
 0x4d9   :  { %v6561_v58 = vpop.f32.mrf.mxu1  ;;  %7250 = vmatmul.mubr.f32.vlgmr.msra.gmra.mxu1 %v5055_v16  ;;  %v6936_v48 = vpop.f32.mrf.mxu0  ;;  %7175 = vmatmul.mubr.f32.gmra.mxu0 %v4861_v28  ;;  %v5314_v16 = vld [vmem:[#allocation2 + $0x50] sm:$0xff]  ;;  %v6408_v28 = vld [vmem:[%s14049_s2 + $0x448] sm:$0xff] }
 0x4da   :  { %7254 = vmatprep.mubr.f32.mxu1 %v5184_v45  ;;  %v12472_v53 = vadd.f32 %v6936_v48, %v6551_v47  ;;  %7179 = vmatprep.mubr.f32.mxu0 %v4990_v49  ;;  %v5441_v47 = vld [vmem:[#allocation2 + $0x49] sm:$0xff] }
 0x4db   :  { %9115 = vmatpush3.msra.mxu1 %v12399_v4  ;;  %v6563_v3 = vpop.f32.mrf.mxu1  ;;  %v6938_v6 = vpop.f32.mrf.mxu0 }
 0x4dc   :  { %9116 = vmatprep.subr.mxu1 %v6413_v13 }
 0x4dd   :  { %v6566_v33 = vpop.f32.mrf.mxu1  ;;  %7255 = vmatmul.mubr.f32.gmra.mxu1 %v5056_v31  ;;  %v6941_v32 = vpop.f32.mrf.mxu0  ;;  %7180 = vmatmul.mubr.f32.gmra.mxu0 %v4862_v61  ;;  %v5315_v31 = vld [vmem:[#allocation2 + $0x60] sm:$0xff] }
 0x4de   :  { %7259 = vmatprep.mubr.f32.mxu1 %v5185_v18  ;;  %v12478_v25 = vadd.f32 %v6941_v32, %v6556_v22  ;;  %7634 = vmatprep.mubr.f32.mxu0 %v5439_v36  ;;  %v6409_v22 = vld [vmem:[%s14049_s2 + $0x450] sm:$0xff]  ;;  %v6407_v61 = vld [vmem:[%s14049_s2 + $0x440] sm:$0xff] }
 0x4df   :  { %v6568_v4 = vpop.f32.mrf.mxu1  ;;  %9117 = vmatpush3.msra.mxu1 %v6413_v13  ;;  %v6943_v37 = vpop.f32.mrf.mxu0  ;;  %v5443_v13 = vld [vmem:[#allocation2 + $0x61] sm:$0xff] }
 0x4e0   :  { %9118 = vmatprep.subr.mxu1 %v6412_v0 }
 0x4e1   :  { %v6571_v12 = vpop.f32.mrf.mxu1  ;;  %7260 = vmatmul.mubr.f32.gmra.mxu1 %v5439_v36  ;;  %v6946_v9 = vpop.f32.mrf.mxu0  ;;  %7635 = vmatmul.mubr.f32.vlgmr.msra.gmra.mxu0 %v5311_v46  ;;  %v5191_v46 = vld [vmem:[#allocation2 + $0x7a] sm:$0xff] }
 0x4e2   :  { %7264 = vmatprep.mubr.f32.mxu1 %v5186_v27  ;;  %v12483_v59 = vadd.f32 %v6946_v9, %v6561_v58  ;;  %7639 = vmatprep.mubr.f32.mxu0 %v5440_v24  ;;  %v5189_v58 = vld [vmem:[#allocation2 + $0x62] sm:$0xff]  ;;  %v6406_v27 = vld [vmem:[%s14049_s2 + $0x438] sm:$0xff] }
 0x4e3   :  { %v6573_v29 = vpop.f32.mrf.mxu1  ;;  %9119 = vmatpush3.msra.mxu1 %v6412_v0  ;;  %v6948_v35 = vpop.f32.mrf.mxu0  ;;  %v5444_v0 = vld [vmem:[#allocation2 + $0x69] sm:$0xff]  ;;  %v5445_v9 = vld [vmem:[#allocation2 + $0x79] sm:$0xff] }
 0x4e4   :  { %9120 = vmatprep.subr.mxu1 %v6411_v7 }
 0x4e5   :  { %v6576_v62 = vpop.f32.mrf.mxu1  ;;  %7265 = vmatmul.mubr.f32.gmra.mxu1 %v5440_v24  ;;  %v6951_v52 = vpop.f32.mrf.mxu0  ;;  %7640 = vmatmul.mubr.f32.gmra.mxu0 %v5312_v41  ;;  %v5317_v41 = vld [vmem:[#allocation2 + $0x78] sm:$0xff] }
 0x4e6   :  { %7269 = vmatprep.mubr.f32.mxu1 %v5187_v19  ;;  %v12488_v63 = vadd.f32 %v6951_v52, %v6566_v33  ;;  %7644 = vmatprep.mubr.f32.mxu0 %v5441_v47  ;;  %v5190_v33 = vld [vmem:[#allocation2 + $0x6a] sm:$0xff]  ;;  %v5192_v19 = vld [vmem:[#allocation2 + $0x82] sm:$0xff] }
 0x4e7   :  { %v6578_v26 = vpop.f32.mrf.mxu1  ;;  %9121 = vmatpush3.msra.mxu1 %v6411_v7  ;;  %v6953_v2 = vpop.f32.mrf.mxu0 }
 0x4e8   :  { %9122 = vmatprep.subr.mxu1 %v6410_v20 }
 0x4e9   :  { %v6581_v56 = vpop.f32.mrf.mxu1  ;;  %7270 = vmatmul.mubr.f32.gmra.mxu1 %v5441_v47  ;;  %v6956_v15 = vpop.f32.mrf.mxu0  ;;  %7645 = vmatmul.mubr.f32.gmra.mxu0 %v5313_v51  ;;  %v5446_v47 = vld [vmem:[#allocation2 + $0x81] sm:$0xff] }
 0x4ea   :  { %7274 = vmatprep.mubr.f32.mxu1 %v5188_v30  ;;  %v12493_v39 = vadd.f32 %v6956_v15, %v6571_v12  ;;  %7649 = vmatprep.mubr.f32.mxu0 %v5442_v54  ;;  %v5316_v12 = vld [vmem:[#allocation2 + $0x68] sm:$0xff]  ;;  %v5318_v30 = vld [vmem:[#allocation2 + $0x80] sm:$0xff] }
 0x4eb   :  { %v6583_v23 = vpop.f32.mrf.mxu1  ;;  %9123 = vmatpush3.msra.mxu1 %v6410_v20  ;;  %v6958_v8 = vpop.f32.mrf.mxu0  ;;  %v6405_v20 = vld [vmem:[%s14049_s2 + $0x430] sm:$0xff]  ;;  %v6404_v15 = vld [vmem:[%s14049_s2 + $0x428] sm:$0xff] }
 0x4ec   :  { %9124 = vmatprep.subr.mxu1 %v6409_v22  ;;  %v5447_v23 = vld [vmem:[#allocation2 + $0x91] sm:$0xff] }
 0x4ed   :  { %v6586_v42 = vpop.f32.mrf.mxu1  ;;  %7275 = vmatmul.mubr.f32.gmra.mxu1 %v5442_v54  ;;  %v6961_v45 = vpop.f32.mrf.mxu0  ;;  %7650 = vmatmul.mubr.f32.gmra.mxu0 %v5314_v16 }
 0x4ee   :  { %7279 = vmatprep.mubr.f32.mxu1 %v5189_v58  ;;  %v12498_v48 = vadd.f32 %v6961_v45, %v6576_v62  ;;  %7654 = vmatprep.mubr.f32.mxu0 %v5443_v13  ;;  %v5194_v45 = vld [vmem:[#allocation2 + $0x9a] sm:$0xff] }
 0x4ef   :  { %v6588_v49 = vpop.f32.mrf.mxu1  ;;  %9125 = vmatpush3.msra.mxu1 %v6409_v22  ;;  %v6963_v3 = vpop.f32.mrf.mxu0  ;;  %v5193_v22 = vld [vmem:[#allocation2 + $0x92] sm:$0xff] }
 0x4f0   :  { %9126 = vmatprep.subr.mxu1 %v6408_v28  ;;  %v5448_v49 = vld [vmem:[#allocation2 + $0x99] sm:$0xff] }
 0x4f1   :  { %v6591_v6 = vpop.f32.mrf.mxu1  ;;  %7280 = vmatmul.mubr.f32.gmra.mxu1 %v5443_v13  ;;  %v6966_v18 = vpop.f32.mrf.mxu0  ;;  %7655 = vmatmul.mubr.f32.gmra.mxu0 %v5315_v31 }
 0x4f2   :  { %7284 = vmatprep.mubr.f32.mxu1 %v5190_v33  ;;  %v12503_v32 = vadd.f32 %v6966_v18, %v6581_v56  ;;  %7659 = vmatprep.mubr.f32.mxu0 %v5444_v0  ;;  %v5195_v18 = vld [vmem:[#allocation2 + $0xaa] sm:$0xff] }
 0x4f3   :  { %v6593_v36 = vpop.f32.mrf.mxu1  ;;  %9127 = vmatpush3.msra.mxu1 %v6408_v28  ;;  %v6968_v4 = vpop.f32.mrf.mxu0  ;;  %v5319_v28 = vld [vmem:[#allocation2 + $0x90] sm:$0xff] }
 0x4f4   :  { %9128 = vmatprep.subr.mxu1 %v6407_v61  ;;  %v5449_v36 = vld [vmem:[#allocation2 + $0xa9] sm:$0xff] }
 0x4f5   :  { %v6596_v37 = vpop.f32.mrf.mxu1  ;;  %7285 = vmatmul.mubr.f32.gmra.mxu1 %v5444_v0  ;;  %v6971_v7 = vpop.f32.mrf.mxu0  ;;  %7660 = vmatmul.mubr.f32.gmra.mxu0 %v5316_v12 }
 0x4f6   :  { %7289 = vmatprep.mubr.f32.mxu1 %v5191_v46  ;;  %v12508_v24 = vadd.f32 %v6971_v7, %v6586_v42  ;;  %7664 = vmatprep.mubr.f32.mxu0 %v5445_v9  ;;  %v5196_v7 = vld [vmem:[#allocation2 + $0xb2] sm:$0xff] }
 0x4f7   :  { %v6598_v29 = vpop.f32.mrf.mxu1  ;;  %9129 = vmatpush3.msra.mxu1 %v6407_v61  ;;  %v6973_v35 = vpop.f32.mrf.mxu0  ;;  %v5320_v61 = vld [vmem:[#allocation2 + $0x98] sm:$0xff] }
 0x4f8   :  { %9130 = vmatprep.subr.mxu1 %v6406_v27  ;;  %v5450_v29 = vld [vmem:[#allocation2 + $0xb1] sm:$0xff] }
 0x4f9   :  { %v6601_v62 = vpop.f32.mrf.mxu1  ;;  %7290 = vmatmul.mubr.f32.gmra.mxu1 %v5445_v9  ;;  %v6976_v52 = vpop.f32.mrf.mxu0  ;;  %7665 = vmatmul.mubr.f32.gmra.mxu0 %v5317_v41  ;;  %v6403_v41 = vld [vmem:[%s14049_s2 + $0x420] sm:$0xff] }
 0x4fa   :  { %7294 = vmatprep.mubr.f32.mxu1 %v5192_v19  ;;  %v12513_v26 = vadd.f32 %v6976_v52, %v6591_v6  ;;  %7669 = vmatprep.mubr.f32.mxu0 %v5446_v47  ;;  %v5322_v52 = vld [vmem:[#allocation2 + $0xb0] sm:$0xff] }
 0x4fb   :  { %v6603_v2 = vpop.f32.mrf.mxu1  ;;  %9131 = vmatpush3.msra.mxu1 %v6406_v27  ;;  %v6978_v56 = vpop.f32.mrf.mxu0  ;;  %v5321_v27 = vld [vmem:[#allocation2 + $0xa8] sm:$0xff] }
 0x4fc   :  { %9132 = vmatprep.subr.mxu1 %v6405_v20  ;;  %v5451_v56 = vld [vmem:[#allocation2 + $0xc1] sm:$0xff] }
 0x4fd   :  { %v6606_v51 = vpop.f32.mrf.mxu1  ;;  %7295 = vmatmul.mubr.f32.gmra.mxu1 %v5446_v47  ;;  %v6981_v54 = vpop.f32.mrf.mxu0  ;;  %7670 = vmatmul.mubr.f32.gmra.mxu0 %v5318_v30  ;;  %v5197_v47 = vld [vmem:[#allocation2 + $0xc2] sm:$0xff] }
 0x4fe   :  { %7299 = vmatprep.mubr.f32.mxu1 %v5193_v22  ;;  %v12518_v8 = vadd.f32 %v6981_v54, %v6596_v37  ;;  %7674 = vmatprep.mubr.f32.mxu0 %v5447_v23  ;;  %v5323_v54 = vld [vmem:[#allocation2 + $0xc0] sm:$0xff] }
 0x4ff   :  { %v6608_v42 = vpop.f32.mrf.mxu1  ;;  %9133 = vmatpush3.msra.mxu1 %v6405_v20  ;;  %v6983_v16 = vpop.f32.mrf.mxu0 }
 0x500   :  { %9134 = vmatprep.subr.mxu1 %v6404_v15  ;;  %v5452_v16 = vld [vmem:[#allocation2 + $0xc9] sm:$0xff] }
 0x501   :  { %v6611_v58 = vpop.f32.mrf.mxu1  ;;  %7300 = vmatmul.mubr.f32.gmra.mxu1 %v5447_v23  ;;  %v6986_v13 = vpop.f32.mrf.mxu0  ;;  %7675 = vmatmul.mubr.f32.gmra.mxu0 %v5319_v28  ;;  %v5198_v23 = vld [vmem:[#allocation2 + $0xca] sm:$0xff] }
 0x502   :  { %7304 = vmatprep.mubr.f32.mxu1 %v5194_v45  ;;  %v12520_v3 = vadd.f32 %v6986_v13, %v6601_v62  ;;  %7679 = vmatprep.mubr.f32.mxu0 %v5448_v49 }
 0x503   :  { %v6613_v6 = vpop.f32.mrf.mxu1  ;;  %9135 = vmatpush3.msra.mxu1 %v6404_v15  ;;  %v6988_v31 = vpop.f32.mrf.mxu0 }
 0x504   :  { %9136 = vmatprep.subr.mxu1 %v6403_v41  ;;  %v5199_v6 = vld [vmem:[#allocation2 + $0xda] sm:$0xff] }
 0x505   :  { %v6616_v33 = vpop.f32.mrf.mxu1  ;;  %7305 = vmatmul.mubr.f32.gmra.mxu1 %v5448_v49  ;;  %v6991_v0 = vpop.f32.mrf.mxu0  ;;  %7680 = vmatmul.mubr.f32.gmra.mxu0 %v5320_v61  ;;  %v5324_v49 = vld [vmem:[#allocation2 + $0xc8] sm:$0xff] }
 0x506   :  { %7309 = vmatprep.mubr.f32.mxu1 %v5195_v18  ;;  %v12522_v4 = vadd.f32 %v6991_v0, %v6606_v51  ;;  %7684 = vmatprep.mubr.f32.mxu0 %v5449_v36 }
 0x507   :  { %v6618_v37 = vpop.f32.mrf.mxu1  ;;  %v6993_v12 = vpop.f32.mrf.mxu0  ;;  %9137 = vmatpush3.msra.mxu1 %v6403_v41 }
 0x508   :  { %v5325_v37 = vld [vmem:[#allocation2 + $0xd8] sm:$0xff]  ;;  %v5200_v12 = vld [vmem:[#allocation2 + $0xe2] sm:$0xff] }
 0x509   :  { %v6621_v46 = vpop.f32.mrf.mxu1  ;;  %7310 = vmatmul.mubr.f32.gmra.mxu1 %v5449_v36  ;;  %v6996_v9 = vpop.f32.mrf.mxu0  ;;  %7685 = vmatmul.mubr.f32.gmra.mxu0 %v5321_v27  ;;  %v5454_v27 = vld [vmem:[#allocation2 + $0xe1] sm:$0xff] }
 0x50a   :  { %7314 = vmatprep.mubr.f32.mxu1 %v5196_v7  ;;  %v12524_v35 = vadd.f32 %v6996_v9, %v6611_v58  ;;  %7689 = vmatprep.mubr.f32.mxu0 %v5450_v29 }
 0x50b   :  { %v6623_v62 = vpop.f32.mrf.mxu1  ;;  %v6998_v19 = vpop.f32.mrf.mxu0 }
 0x50c   :  { %v5326_v19 = vld [vmem:[#allocation2 + $0xe0] sm:$0xff] }
 0x50d   :  { %v6626_v20 = vpop.f32.mrf.mxu1  ;;  %7315 = vmatmul.mubr.f32.gmra.mxu1 %v5450_v29  ;;  %v7001_v2 = vpop.f32.mrf.mxu0  ;;  %7690 = vmatmul.mubr.f32.gmra.mxu0 %v5322_v52  ;;  %v6402_v29 = vld [vmem:[%s14049_s2 + $0x418] sm:$0xff] }
 0x50e   :  { %7319 = vmatprep.mubr.f32.mxu1 %v5197_v47  ;;  %v12529_v51 = vadd.f32 %v7001_v2, %v6616_v33  ;;  %7694 = vmatprep.mubr.f32.mxu0 %v5451_v56  ;;  %v5453_v33 = vld [vmem:[#allocation2 + $0xd9] sm:$0xff]  ;;  %v5455_v47 = vld [vmem:[#allocation2 + $0xf1] sm:$0xff] }
 0x50f   :  { %v6628_v30 = vpop.f32.mrf.mxu1  ;;  %v7003_v22 = vpop.f32.mrf.mxu0  ;;  %9138 = vmatprep.subr.mxu1 %v6402_v29 }
 0x510   :  { %9139 = vmatpush3.msra.mxu1 %v6402_v29 }
 0x511   :  { %v6631_v15 = vpop.f32.mrf.mxu1  ;;  %7320 = vmatmul.mubr.f32.gmra.mxu1 %v5451_v56  ;;  %v7006_v42 = vpop.f32.mrf.mxu0  ;;  %7695 = vmatmul.mubr.f32.gmra.mxu0 %v5323_v54  ;;  %v5202_v54 = vld [vmem:[#allocation2 + $0xfa] sm:$0xff] }
 0x512   :  { %7324 = vmatprep.mubr.f32.mxu1 %v5198_v23  ;;  %v12531_v58 = vadd.f32 %v7006_v42, %v6621_v46  ;;  %7699 = vmatprep.mubr.f32.mxu0 %v5452_v16  ;;  %v5456_v42 = vld [vmem:[#allocation2 + $0xf9] sm:$0xff] }
 0x513   :  { %v6633_v28 = vpop.f32.mrf.mxu1  ;;  %v7008_v45 = vpop.f32.mrf.mxu0 }
 0x515   :  { %v6636_v13 = vpop.f32.mrf.mxu1  ;;  %7325 = vmatmul.mubr.f32.gmra.mxu1 %v5452_v16  ;;  %v7011_v31 = vpop.f32.mrf.mxu0  ;;  %7700 = vmatmul.mubr.f32.gmra.mxu0 %v5324_v49 }
 0x516   :  { %7329 = vmatprep.mubr.f32.mxu1 %v5199_v6  ;;  %v12533_v61 = vadd.f32 %v7011_v31, %v6626_v20  ;;  %7704 = vmatprep.mubr.f32.mxu0 %v5453_v33  ;;  %v5201_v20 = vld [vmem:[#allocation2 + $0xf2] sm:$0xff]  ;;  %v5203_v6 = vld [vmem:[#allocation2 + $0x10a] sm:$0xff] }
 0x517   :  { %v6638_v18 = vpop.f32.mrf.mxu1  ;;  %v7013_v0 = vpop.f32.mrf.mxu0 }
 0x519   :  { %v6641_v36 = vpop.f32.mrf.mxu1  ;;  %7330 = vmatmul.mubr.f32.gmra.mxu1 %v5453_v33  ;;  %v7016_v46 = vpop.f32.mrf.mxu0  ;;  %7705 = vmatmul.mubr.f32.gmra.mxu0 %v5325_v37  ;;  %v5457_v33 = vld [vmem:[#allocation2 + $0x109] sm:$0xff] }
 0x51a   :  { %7334 = vmatprep.mubr.f32.mxu1 %v5200_v12  ;;  %v12535_v7 = vadd.f32 %v7016_v46, %v6631_v15  ;;  %7709 = vmatprep.mubr.f32.mxu0 %v5454_v27  ;;  %v5327_v15 = vld [vmem:[#allocation2 + $0xf0] sm:$0xff] }
 0x51b   :  { %v6643_v9 = vpop.f32.mrf.mxu1  ;;  %v7018_v62 = vpop.f32.mrf.mxu0  ;;  %v5204_v46 = vld [vmem:[#allocation2 + $0x112] sm:$0xff] }
 0x51c   :  { %v5458_v9 = vld [vmem:[#allocation2 + $0x111] sm:$0xff] }
 0x51d   :  { %v6646_v41 = vpop.f32.mrf.mxu1  ;;  %7335 = vmatmul.mubr.f32.gmra.mxu1 %v5454_v27  ;;  %v7021_v52 = vpop.f32.mrf.mxu0  ;;  %7710 = vmatmul.mubr.f32.gmra.mxu0 %v5326_v19 }
 0x51e   :  { %7339 = vmatprep.mubr.f32.mxu1 %v5201_v20  ;;  %v12540_v2 = vadd.f32 %v7021_v52, %v6636_v13  ;;  %7714 = vmatprep.mubr.f32.mxu0 %v5455_v47  ;;  %v5328_v13 = vld [vmem:[#allocation2 + $0xf8] sm:$0xff]  ;;  %v5330_v52 = vld [vmem:[#allocation2 + $0x110] sm:$0xff] }
 0x51f   :  { %v6648_v56 = vpop.f32.mrf.mxu1  ;;  %v7023_v30 = vpop.f32.mrf.mxu0 }
 0x520   :  { %v5459_v30 = vld [vmem:[#allocation2 + $0x121] sm:$0xff] }
 0x521   :  { %v6651_v22 = vpop.f32.mrf.mxu1  ;;  %7340 = vmatmul.mubr.f32.gmra.mxu1 %v5455_v47  ;;  %v7026_v23 = vpop.f32.mrf.mxu0  ;;  %7715 = vmatmul.mubr.f32.gmra.mxu0 %v5327_v15  ;;  %v5205_v47 = vld [vmem:[#allocation2 + $0x122] sm:$0xff] }
 0x522   :  { %7344 = vmatprep.mubr.f32.mxu1 %v5202_v54  ;;  %v12542_v16 = vadd.f32 %v7026_v23, %v6641_v36  ;;  %7719 = vmatprep.mubr.f32.mxu0 %v5456_v42  ;;  %v5329_v36 = vld [vmem:[#allocation2 + $0x108] sm:$0xff] }
 0x523   :  { %v6653_v28 = vpop.f32.mrf.mxu1  ;;  %v7028_v45 = vpop.f32.mrf.mxu0 }
 0x524   :  { %v5206_v28 = vld [vmem:[#allocation2 + $0x12a] sm:$0xff] }
 0x525   :  { %v6656_v49 = vpop.f32.mrf.mxu1  ;;  %7345 = vmatmul.mubr.f32.gmra.mxu1 %v5456_v42  ;;  %v7031_v31 = vpop.f32.mrf.mxu0  ;;  %7720 = vmatmul.mubr.f32.gmra.mxu0 %v5328_v13  ;;  %v5331_v42 = vld [vmem:[#allocation2 + $0x120] sm:$0xff]  ;;  %v5460_v13 = vld [vmem:[#allocation2 + $0x129] sm:$0xff] }
 0x526   :  { %7349 = vmatprep.mubr.f32.mxu1 %v5203_v6  ;;  %v12544_v18 = vadd.f32 %v7031_v31, %v6646_v41  ;;  %7724 = vmatprep.mubr.f32.mxu0 %v5457_v33  ;;  %v6401_v41 = vld [vmem:[%s14049_s2 + $0x410] sm:$0xff] }
 0x527   :  { %v6658_v0 = vpop.f32.mrf.mxu1  ;;  %v7033_v37 = vpop.f32.mrf.mxu0  ;;  %9140 = vmatprep.subr.mxu1 %v6401_v41 }
 0x528   :  { %9141 = vmatpush3.msra.mxu1 %v6401_v41  ;;  %v5207_v37 = vld [vmem:[#allocation2 + $0x13a] sm:$0xff] }
 0x529   :  { %v6661_v12 = vpop.f32.mrf.mxu1  ;;  %7350 = vmatmul.mubr.f32.gmra.mxu1 %v5457_v33  ;;  %v7036_v27 = vpop.f32.mrf.mxu0  ;;  %7725 = vmatmul.mubr.f32.gmra.mxu0 %v5329_v36 }
 0x52a   :  { %7354 = vmatprep.mubr.f32.mxu1 %v5204_v46  ;;  %v12546_v29 = vadd.f32 %v7036_v27, %v6651_v22  ;;  %7729 = vmatprep.mubr.f32.mxu0 %v5458_v9  ;;  %v5461_v46 = vld [vmem:[#allocation2 + $0x139] sm:$0xff] }
 0x52b   :  { %v6663_v62 = vpop.f32.mrf.mxu1  ;;  %v7038_v19 = vpop.f32.mrf.mxu0 }
 0x52c   :  { %v5208_v19 = vld [vmem:[#allocation2 + $0x142] sm:$0xff] }
 0x52d   :  { %v6666_v20 = vpop.f32.mrf.mxu1  ;;  %7355 = vmatmul.mubr.f32.gmra.mxu1 %v5458_v9  ;;  %v7041_v56 = vpop.f32.mrf.mxu0  ;;  %7730 = vmatmul.mubr.f32.gmra.mxu0 %v5330_v52 }
 0x52e   :  { %7359 = vmatprep.mubr.f32.mxu1 %v5205_v47  ;;  %v12551_v15 = vadd.f32 %v7041_v56, %v6656_v49  ;;  %7734 = vmatprep.mubr.f32.mxu0 %v5459_v30  ;;  %v5332_v49 = vld [vmem:[#allocation2 + $0x128] sm:$0xff] }
 0x52f   :  { %v6668_v22 = vpop.f32.mrf.mxu1  ;;  %v7043_v54 = vpop.f32.mrf.mxu0  ;;  %v5462_v47 = vld [vmem:[#allocation2 + $0x141] sm:$0xff] }
 0x531   :  { %v6671_v23 = vpop.f32.mrf.mxu1  ;;  %7360 = vmatmul.mubr.f32.gmra.mxu1 %v5459_v30  ;;  %v7046_v45 = vpop.f32.mrf.mxu0  ;;  %7735 = vmatmul.mubr.f32.gmra.mxu0 %v5331_v42  ;;  %v5334_v42 = vld [vmem:[#allocation2 + $0x140] sm:$0xff] }
 0x532   :  { %7364 = vmatprep.mubr.f32.mxu1 %v5206_v28  ;;  %v12553_v6 = vadd.f32 %v7046_v45, %v6661_v12  ;;  %7739 = vmatprep.mubr.f32.mxu0 %v5460_v13  ;;  %v5333_v12 = vld [vmem:[#allocation2 + $0x138] sm:$0xff] }
 0x533   :  { %v6673_v31 = vpop.f32.mrf.mxu1  ;;  %v7048_v33 = vpop.f32.mrf.mxu0  ;;  %v5209_v28 = vld [vmem:[#allocation2 + $0x152] sm:$0xff] }
 0x535   :  { %v6676_v0 = vpop.f32.mrf.mxu1  ;;  %7365 = vmatmul.mubr.f32.gmra.mxu1 %v5460_v13  ;;  %v7051_v36 = vpop.f32.mrf.mxu0  ;;  %7740 = vmatmul.mubr.f32.gmra.mxu0 %v5332_v49  ;;  %v5463_v13 = vld [vmem:[#allocation2 + $0x151] sm:$0xff] }
 0x536   :  { %7369 = vmatprep.mubr.f32.mxu1 %v5207_v37  ;;  %v12555_v27 = vadd.f32 %v7051_v36, %v6666_v20  ;;  %7744 = vmatprep.mubr.f32.mxu0 %v5461_v46  ;;  %v6400_v20 = vld [vmem:[%s14049_s2 + $0x408] sm:$0xff]  ;;  %v5335_v37 = vld [vmem:[#allocation2 + $0x150] sm:$0xff]  ;;  %v5210_v36 = vld [vmem:[#allocation2 + $0x15a] sm:$0xff] }
 0x537   :  { %v6678_v9 = vpop.f32.mrf.mxu1  ;;  %v7053_v62 = vpop.f32.mrf.mxu0  ;;  %9142 = vmatprep.subr.mxu1 %v6400_v20 }
 0x538   :  { %9143 = vmatpush3.msra.mxu1 %v6400_v20  ;;  %v5464_v9 = vld [vmem:[#allocation2 + $0x159] sm:$0xff]  ;;  %v5465_v20 = vld [vmem:[#allocation2 + $0x169] sm:$0xff] }
 0x539   :  { %v6681_v41 = vpop.f32.mrf.mxu1  ;;  %7370 = vmatmul.mubr.f32.gmra.mxu1 %v5461_v46  ;;  %v7056_v52 = vpop.f32.mrf.mxu0  ;;  %7745 = vmatmul.mubr.f32.gmra.mxu0 %v5333_v12 }
 0x53a   :  { %7374 = vmatprep.mubr.f32.mxu1 %v5208_v19  ;;  %v12557_v56 = vadd.f32 %v7056_v52, %v6671_v23  ;;  %7749 = vmatprep.mubr.f32.mxu0 %v5462_v47 }
 0x53b   :  { %v6683_v30 = vpop.f32.mrf.mxu1  ;;  %v7058_v22 = vpop.f32.mrf.mxu0 }
 0x53d   :  { %v6686_v54 = vpop.f32.mrf.mxu1  ;;  %7375 = vmatmul.mubr.f32.gmra.mxu1 %v5462_v47  ;;  %v7061_v45 = vpop.f32.mrf.mxu0  ;;  %7750 = vmatmul.mubr.f32.gmra.mxu0 %v5334_v42  ;;  %v5211_v47 = vld [vmem:[#allocation2 + $0x16a] sm:$0xff] }
 0x53e   :  { %7379 = vmatprep.mubr.f32.mxu1 %v5209_v28  ;;  %v12562_v31 = vadd.f32 %v7061_v45, %v6676_v0  ;;  %7754 = vmatprep.mubr.f32.mxu0 %v5463_v13  ;;  %v5336_v0 = vld [vmem:[#allocation2 + $0x158] sm:$0xff] }
 0x53f   :  { %v6688_v23 = vpop.f32.mrf.mxu1  ;;  %v7063_v33 = vpop.f32.mrf.mxu0 }
 0x540   :  { %v5466_v33 = vld [vmem:[#allocation2 + $0x171] sm:$0xff] }
 0x541   :  { %v6691_v49 = vpop.f32.mrf.mxu1  ;;  %7380 = vmatmul.mubr.f32.gmra.mxu1 %v5463_v13  ;;  %v7066_v46 = vpop.f32.mrf.mxu0  ;;  %7755 = vmatmul.mubr.f32.gmra.mxu0 %v5335_v37  ;;  %v5212_v13 = vld [vmem:[#allocation2 + $0x172] sm:$0xff] }
 0x542   :  { %7384 = vmatprep.mubr.f32.mxu1 %v5210_v36  ;;  %v12564_v62 = vadd.f32 %v7066_v46, %v6681_v41  ;;  %7759 = vmatprep.mubr.f32.mxu0 %v5464_v9  ;;  %v5337_v41 = vld [vmem:[#allocation2 + $0x168] sm:$0xff] }
 0x543   :  { %v6693_v12 = vpop.f32.mrf.mxu1  ;;  %v7068_v19 = vpop.f32.mrf.mxu0 }
 0x544   :  { %14338 = vst [vmem:[#allocation13_spill] sm:$0xff] %v12564_v62  ;;  %v5338_v12 = vld [vmem:[#allocation2 + $0x170] sm:$0xff]  ;;  %v5213_v19 = vld [vmem:[#allocation2 + $0x182] sm:$0xff] }
 0x545   :  { %v6696_v52 = vpop.f32.mrf.mxu1  ;;  %7385 = vmatmul.mubr.f32.gmra.mxu1 %v5464_v9  ;;  %v7071_v30 = vpop.f32.mrf.mxu0  ;;  %7760 = vmatmul.mubr.f32.gmra.mxu0 %v5336_v0 }
 0x546   :  { %7389 = vmatprep.mubr.f32.mxu1 %v5211_v47  ;;  %v12566_v22 = vadd.f32 %v7071_v30, %v6686_v54  ;;  %7764 = vmatprep.mubr.f32.mxu0 %v5465_v20  ;;  %v6399_v54 = vld [vmem:[%s14049_s2 + $0x400] sm:$0xff] }
 0x547   :  { %v6698_v42 = vpop.f32.mrf.mxu1  ;;  %v7073_v28 = vpop.f32.mrf.mxu0  ;;  %9144 = vmatprep.subr.mxu1 %v6399_v54  ;;  %v5467_v47 = vld [vmem:[#allocation2 + $0x181] sm:$0xff] }
 0x548   :  { %14339 = vst [vmem:[#allocation16_spill] sm:$0xff] %v12566_v22  ;;  %9145 = vmatpush3.msra.mxu1 %v6399_v54  ;;  %v5339_v28 = vld [vmem:[#allocation2 + $0x180] sm:$0xff] }
 0x549   :  { %v6701_v45 = vpop.f32.mrf.mxu1  ;;  %7390 = vmatmul.mubr.f32.gmra.mxu1 %v5465_v20  ;;  %v7076_v23 = vpop.f32.mrf.mxu0  ;;  %7765 = vmatmul.mubr.f32.gmra.mxu0 %v5337_v41  ;;  %v5214_v41 = vld [vmem:[#allocation2 + $0x18a] sm:$0xff] }
 0x54a   :  { %7394 = vmatprep.mubr.f32.mxu1 %v5212_v13  ;;  %v12568_v37 = vadd.f32 %v7076_v23, %v6691_v49  ;;  %7769 = vmatprep.mubr.f32.mxu0 %v5466_v33  ;;  %v5468_v23 = vld [vmem:[#allocation2 + $0x189] sm:$0xff] }
 0x54b   :  { %v6703_v36 = vpop.f32.mrf.mxu1  ;;  %v7078_v46 = vpop.f32.mrf.mxu0 }
 0x54c   :  { %14340 = vst [vmem:[#allocation15_spill] sm:$0xff] %v12568_v37 }
 0x54d   :  { %v6706_v9 = vpop.f32.mrf.mxu1  ;;  %7395 = vmatmul.mubr.f32.gmra.mxu1 %v5466_v33  ;;  %v7081_v0 = vpop.f32.mrf.mxu0  ;;  %7770 = vmatmul.mubr.f32.gmra.mxu0 %v5338_v12  ;;  %v5469_v12 = vld [vmem:[#allocation2 + $0x199] sm:$0xff] }
 0x54e   :  { %7399 = vmatprep.mubr.f32.mxu1 %v5213_v19  ;;  %v12573_v30 = vadd.f32 %v7081_v0, %v6696_v52  ;;  %7774 = vmatprep.mubr.f32.mxu0 %v5467_v47  ;;  %v5340_v19 = vld [vmem:[#allocation2 + $0x188] sm:$0xff] }
 0x54f   :  { %v6708_v49 = vpop.f32.mrf.mxu1  ;;  %v7083_v20 = vpop.f32.mrf.mxu0  ;;  %v5215_v0 = vld [vmem:[#allocation2 + $0x1ca] sm:$0xff] }
 0x550   :  { %14341 = vst [vmem:[#allocation17_spill] sm:$0xff] %v12573_v30 }
 0x551   :  { %v6711_v42 = vpop.f32.mrf.mxu1  ;;  %7400 = vmatmul.mubr.f32.gmra.mxu1 %v5467_v47  ;;  %v7086_v13 = vpop.f32.mrf.mxu0  ;;  %7775 = vmatmul.mubr.f32.gmra.mxu0 %v5339_v28  ;;  %v5087_v28 = vld [vmem:[#allocation2 + $0x1c9] sm:$0xff] }
 0x552   :  { %7404 = vmatprep.mubr.f32.mxu1 %v5214_v41  ;;  %v12575_v33 = vadd.f32 %v7086_v13, %v6701_v45  ;;  %7779 = vmatprep.mubr.f32.mxu0 %v5468_v23  ;;  %v5470_v41 = vld [vmem:[#allocation2 + $0x1a1] sm:$0xff]  ;;  %v5216_v13 = vld [vmem:[#allocation2 + $0x1d2] sm:$0xff] }
 0x553   :  { %v6713_v36 = vpop.f32.mrf.mxu1  ;;  %v7088_v46 = vpop.f32.mrf.mxu0 }
 0x554   :  { %14342 = vst [vmem:[#allocation18_spill] sm:$0xff] %v12575_v33  ;;  %v12579_v46 = vld [vmem:[#allocation2] sm:$0xff] }
 0x555   :  { %v6716_v52 = vpop.f32.mrf.mxu1  ;;  %7405 = vmatmul.mubr.f32.gmra.mxu1 %v5468_v23  ;;  %v7091_v54 = vpop.f32.mrf.mxu0  ;;  %7780 = vmatmul.mubr.f32.gmra.mxu0 %v5340_v19 }
 0x556   :  { %7409 = vmatprep.mubr.f32.mxu1 %v5215_v0  ;;  %v12577_v47 = vadd.f32 %v7091_v54, %v6706_v9  ;;  %7784 = vmatprep.mubr.f32.mxu0 %v5469_v12  ;;  %v5088_v0 = vld [vmem:[#allocation2 + $0x1d1] sm:$0xff]  ;;  %v5217_v12 = vld [vmem:[#allocation2 + $0x1e2] sm:$0xff] }
 0x557   :  { %v6718_v49 = vpop.f32.mrf.mxu1  ;;  %v7093_v20 = vpop.f32.mrf.mxu0 }
 0x558   :  { %14343 = vst [vmem:[#allocation19_spill] sm:$0xff] %v12577_v47  ;;  %v5471_v20 = vld [vmem:[#allocation2 + $0x1e1] sm:$0xff] }
 0x559   :  { %v6721_v45 = vpop.f32.mrf.mxu1  ;;  %7410 = vmatmul.mubr.f32.gmra.mxu1 %v5087_v28  ;;  %v7096_v36 = vpop.f32.mrf.mxu0  ;;  %7785 = vmatmul.mubr.f32.gmra.mxu0 %v12579_v46 }
 0x55a   :  { %7414 = vmatprep.mubr.f32.mxu1 %v5216_v13  ;;  %v12582_v23 = vadd.f32 %v7096_v36, %v6711_v42  ;;  %7789 = vmatprep.mubr.f32.mxu0 %v5470_v41  ;;  %v5343_v42 = vld [vmem:[#allocation2 + $0x1e0] sm:$0xff]  ;;  %v5218_v36 = vld [vmem:[#allocation2 + $0x1ea] sm:$0xff] }
 0x55b   :  { %v6723_v19 = vpop.f32.mrf.mxu1  ;;  %v7098_v9 = vpop.f32.mrf.mxu0 }
 0x55c   :  { %14344 = vst [vmem:[#allocation20_spill] sm:$0xff] %v12582_v23  ;;  %v5472_v19 = vld [vmem:[#allocation2 + $0x1e9] sm:$0xff] }
 0x55d   :  { %v6726_v54 = vpop.f32.mrf.mxu1  ;;  %7415 = vmatmul.mubr.f32.gmra.mxu1 %v5088_v0  ;;  %v7101_v49 = vpop.f32.mrf.mxu0  ;;  %7790 = vmatmul.mubr.f32.gmra.mxu0 %v12579_v46 }
 0x55e   :  { %7419 = vmatprep.mubr.f32.mxu1 %v5217_v12  ;;  %v12585_v28 = vadd.f32 %v7101_v49, %v6716_v52  ;;  %7794 = vmatprep.mubr.f32.mxu0 %v5471_v20  ;;  %v5344_v52 = vld [vmem:[#allocation2 + $0x1e8] sm:$0xff]  ;;  %v5219_v49 = vld [vmem:[#allocation2 + $0x1fa] sm:$0xff] }
 0x55f   :  { %v6728_v47 = vpop.f32.mrf.mxu1  ;;  %v7103_v33 = vpop.f32.mrf.mxu0 }
 0x560   :  { %14345 = vst [vmem:[#allocation21_spill] sm:$0xff] %v12585_v28  ;;  %v5473_v33 = vld [vmem:[#allocation2 + $0x1f9] sm:$0xff] }
 0x561   :  { %v6731_v13 = vpop.f32.mrf.mxu1  ;;  %7420 = vmatmul.mubr.f32.gmra.mxu1 %v5471_v20  ;;  %v7106_v41 = vpop.f32.mrf.mxu0  ;;  %7795 = vmatmul.mubr.f32.gmra.mxu0 %v5343_v42 }
 0x562   :  { %7424 = vmatprep.mubr.f32.mxu1 %v5218_v36  ;;  %v12587_v9 = vadd.f32 %v7106_v41, %v6721_v45  ;;  %7799 = vmatprep.mubr.f32.mxu0 %v5472_v19  ;;  %v5345_v45 = vld [vmem:[#allocation2 + $0x1f8] sm:$0xff]  ;;  %v5220_v41 = vld [vmem:[#allocation2 + $0x202] sm:$0xff] }
 0x563   :  { %v6733_v0 = vpop.f32.mrf.mxu1  ;;  %v7108_v23 = vpop.f32.mrf.mxu0 }
 0x564   :  { %14346 = vst [vmem:[#allocation23_spill] sm:$0xff] %v12587_v9  ;;  %v5474_v23 = vld [vmem:[#allocation2 + $0x201] sm:$0xff] }
 0x565   :  { %v6736_v12 = vpop.f32.mrf.mxu1  ;;  %7425 = vmatmul.mubr.f32.gmra.mxu1 %v5472_v19  ;;  %v7111_v28 = vpop.f32.mrf.mxu0  ;;  %7800 = vmatmul.mubr.f32.gmra.mxu0 %v5344_v52 }
 0x566   :  { %7429 = vmatprep.mubr.f32.mxu1 %v5219_v49  ;;  %v12589_v47 = vadd.f32 %v7111_v28, %v6726_v54  ;;  %7804 = vmatprep.mubr.f32.mxu0 %v5473_v33  ;;  %v5346_v54 = vld [vmem:[#allocation2 + $0x200] sm:$0xff]  ;;  %v5221_v28 = vld [vmem:[#allocation2 + $0x212] sm:$0xff] }
 0x567   :  { %v6738_v20 = vpop.f32.mrf.mxu1  ;;  %v7113_v42 = vpop.f32.mrf.mxu0 }
 0x568   :  { %14347 = vst [vmem:[#allocation22_spill] sm:$0xff] %v12589_v47  ;;  %v5475_v20 = vld [vmem:[#allocation2 + $0x211] sm:$0xff] }
 0x569   :  { %v6741_v36 = vpop.f32.mrf.mxu1  ;;  %7430 = vmatmul.mubr.f32.gmra.mxu1 %v5473_v33  ;;  %v7116_v9 = vpop.f32.mrf.mxu0  ;;  %7805 = vmatmul.mubr.f32.gmra.mxu0 %v5345_v45 }
 0x56a   :  { %7434 = vmatprep.mubr.f32.mxu1 %v5220_v41  ;;  %v12591_v19 = vadd.f32 %v7116_v9, %v6731_v13  ;;  %7809 = vmatprep.mubr.f32.mxu0 %v5474_v23  ;;  %v5347_v13 = vld [vmem:[#allocation2 + $0x210] sm:$0xff]  ;;  %v5222_v9 = vld [vmem:[#allocation2 + $0x21a] sm:$0xff] }
 0x56b   :  { %v6743_v0 = vpop.f32.mrf.mxu1  ;;  %v7118_v52 = vpop.f32.mrf.mxu0 }
 0x56c   :  { %14348 = vst [vmem:[#allocation25_spill] sm:$0xff] %v12591_v19  ;;  %v5476_v0 = vld [vmem:[#allocation2 + $0x219] sm:$0xff] }
 0x56d   :  { %v6746_v49 = vpop.f32.mrf.mxu1  ;;  %7435 = vmatmul.mubr.f32.gmra.mxu1 %v5474_v23  ;;  %v7121_v47 = vpop.f32.mrf.mxu0  ;;  %7810 = vmatmul.mubr.f32.gmra.mxu0 %v5346_v54 }
 0x56e   :  { %7439 = vmatprep.mubr.f32.mxu1 %v5221_v28  ;;  %v12593_v33 = vadd.f32 %v7121_v47, %v6736_v12  ;;  %7814 = vmatprep.mubr.f32.mxu0 %v5475_v20  ;;  %v5348_v12 = vld [vmem:[#allocation2 + $0x218] sm:$0xff]  ;;  %v5223_v47 = vld [vmem:[#allocation2 + $0x22a] sm:$0xff] }
 0x56f   :  { %v6748_v42 = vpop.f32.mrf.mxu1  ;;  %v7123_v45 = vpop.f32.mrf.mxu0 }
 0x570   :  { %14349 = vst [vmem:[#allocation24_spill] sm:$0xff] %v12593_v33  ;;  %v5477_v42 = vld [vmem:[#allocation2 + $0x229] sm:$0xff] }
 0x571   :  { %v6751_v41 = vpop.f32.mrf.mxu1  ;;  %7440 = vmatmul.mubr.f32.gmra.mxu1 %v5475_v20  ;;  %v7126_v19 = vpop.f32.mrf.mxu0  ;;  %7815 = vmatmul.mubr.f32.gmra.mxu0 %v5347_v13 }
 0x572   :  { %7444 = vmatprep.mubr.f32.mxu1 %v5222_v9  ;;  %v12595_v23 = vadd.f32 %v7126_v19, %v6741_v36  ;;  %7819 = vmatprep.mubr.f32.mxu0 %v5476_v0  ;;  %v5349_v36 = vld [vmem:[#allocation2 + $0x228] sm:$0xff]  ;;  %v5224_v19 = vld [vmem:[#allocation2 + $0x232] sm:$0xff] }
 0x573   :  { %v6753_v52 = vpop.f32.mrf.mxu1  ;;  %v7128_v54 = vpop.f32.mrf.mxu0 }
 0x574   :  { %14350 = vst [vmem:[#allocation28_spill] sm:$0xff] %v12595_v23  ;;  %v5478_v52 = vld [vmem:[#allocation2 + $0x231] sm:$0xff] }
 0x575   :  { %v6756_v28 = vpop.f32.mrf.mxu1  ;;  %7445 = vmatmul.mubr.f32.gmra.mxu1 %v5476_v0  ;;  %v7131_v33 = vpop.f32.mrf.mxu0  ;;  %7820 = vmatmul.mubr.f32.gmra.mxu0 %v5348_v12 }
 0x576   :  { %7449 = vmatprep.mubr.f32.mxu1 %v5223_v47  ;;  %v12597_v20 = vadd.f32 %v7131_v33, %v6746_v49  ;;  %7824 = vmatprep.mubr.f32.mxu0 %v5477_v42  ;;  %v5350_v49 = vld [vmem:[#allocation2 + $0x230] sm:$0xff]  ;;  %v5225_v33 = vld [vmem:[#allocation2 + $0x242] sm:$0xff] }
 0x577   :  { %v6758_v45 = vpop.f32.mrf.mxu1  ;;  %v7133_v13 = vpop.f32.mrf.mxu0 }
 0x578   :  { %14351 = vst [vmem:[#allocation26_spill] sm:$0xff] %v12597_v20  ;;  %v5479_v45 = vld [vmem:[#allocation2 + $0x241] sm:$0xff] }
 0x579   :  { %v6761_v9 = vpop.f32.mrf.mxu1  ;;  %7450 = vmatmul.mubr.f32.gmra.mxu1 %v5477_v42  ;;  %v7136_v23 = vpop.f32.mrf.mxu0  ;;  %7825 = vmatmul.mubr.f32.gmra.mxu0 %v5349_v36 }
 0x57a   :  { %7454 = vmatprep.mubr.f32.mxu1 %v5224_v19  ;;  %v12599_v0 = vadd.f32 %v7136_v23, %v6751_v41  ;;  %7829 = vmatprep.mubr.f32.mxu0 %v5478_v52  ;;  %v5351_v41 = vld [vmem:[#allocation2 + $0x240] sm:$0xff]  ;;  %v5226_v23 = vld [vmem:[#allocation2 + $0x24a] sm:$0xff] }
 0x57b   :  { %v6763_v54 = vpop.f32.mrf.mxu1  ;;  %v7138_v12 = vpop.f32.mrf.mxu0 }
 0x57c   :  { %14352 = vst [vmem:[#allocation27_spill] sm:$0xff] %v12599_v0  ;;  %v5480_v54 = vld [vmem:[#allocation2 + $0x249] sm:$0xff] }
 0x57d   :  { %v6766_v47 = vpop.f32.mrf.mxu1  ;;  %7455 = vmatmul.mubr.f32.gmra.mxu1 %v5478_v52  ;;  %v7141_v20 = vpop.f32.mrf.mxu0  ;;  %7830 = vmatmul.mubr.f32.gmra.mxu0 %v5350_v49 }
 0x57e   :  { %7459 = vmatprep.mubr.f32.mxu1 %v5225_v33  ;;  %v12601_v42 = vadd.f32 %v7141_v20, %v6756_v28  ;;  %7834 = vmatprep.mubr.f32.mxu0 %v5479_v45  ;;  %v5352_v28 = vld [vmem:[#allocation2 + $0x248] sm:$0xff]  ;;  %v12605_v20 = vld [vmem:[#allocation2 + $0x25a] sm:$0xff] }
 0x57f   :  { %v6768_v13 = vpop.f32.mrf.mxu1  ;;  %v7143_v36 = vpop.f32.mrf.mxu0 }
 0x580   :  { %14353 = vst [vmem:[#allocation30_spill] sm:$0xff] %v12601_v42 }
 0x581   :  { %v6771_v19 = vpop.f32.mrf.mxu1  ;;  %7460 = vmatmul.mubr.f32.gmra.mxu1 %v5479_v45  ;;  %v7146_v0 = vpop.f32.mrf.mxu0  ;;  %7835 = vmatmul.mubr.f32.gmra.mxu0 %v5351_v41  ;;  %v5481_v45 = vld [vmem:[#allocation2 + $0x259] sm:$0xff] }
 0x582   :  { %7464 = vmatprep.mubr.f32.mxu1 %v5226_v23  ;;  %v12603_v52 = vadd.f32 %v7146_v0, %v6761_v9  ;;  %7839 = vmatprep.mubr.f32.mxu0 %v5480_v54  ;;  %v5353_v0 = vld [vmem:[#allocation2 + $0x258] sm:$0xff] }
 0x583   :  { %v6773_v12 = vpop.f32.mrf.mxu1  ;;  %v7148_v49 = vpop.f32.mrf.mxu0 }
 0x584   :  { %14354 = vst [vmem:[#allocation32_spill] sm:$0xff] %v12603_v52  ;;  %v12610_v12 = vld [vmem:[#allocation2 + $0x262] sm:$0xff] }
 0x585   :  { %v6776_v33 = vpop.f32.mrf.mxu1  ;;  %7465 = vmatmul.mubr.f32.gmra.mxu1 %v5480_v54  ;;  %v7151_v13 = vpop.f32.mrf.mxu0  ;;  %7840 = vmatmul.mubr.f32.gmra.mxu0 %v5352_v28  ;;  %v5482_v54 = vld [vmem:[#allocation2 + $0x261] sm:$0xff] }
 0x586   :  { %7469 = vmatprep.mubr.f32.mxu1 %v12605_v20  ;;  %v12608_v36 = vadd.f32 %v7151_v13, %v6766_v47  ;;  %7844 = vmatprep.mubr.f32.mxu0 %v5481_v45  ;;  %v5354_v13 = vld [vmem:[#allocation2 + $0x260] sm:$0xff] }
 0x587   :  { %v6778_v41 = vpop.f32.mrf.mxu1  ;;  %v7153_v23 = vpop.f32.mrf.mxu0 }
 0x588   :  { %14355 = vst [vmem:[#allocation31_spill] sm:$0xff] %v12608_v36  ;;  %v12615_v41 = vld [vmem:[#allocation2 + $0x272] sm:$0xff] }
 0x589   :  { %v6781_v9 = vpop.f32.mrf.mxu1  ;;  %7470 = vmatmul.mubr.f32.gmra.mxu1 %v5481_v45  ;;  %v7156_v49 = vpop.f32.mrf.mxu0  ;;  %7845 = vmatmul.mubr.f32.gmra.mxu0 %v5353_v0  ;;  %v5483_v45 = vld [vmem:[#allocation2 + $0x271] sm:$0xff] }
 0x58a   :  { %7474 = vmatprep.mubr.f32.mxu1 %v12610_v12  ;;  %v12613_v52 = vadd.f32 %v7156_v49, %v6771_v19  ;;  %7849 = vmatprep.mubr.f32.mxu0 %v5482_v54  ;;  %v5355_v49 = vld [vmem:[#allocation2 + $0x270] sm:$0xff] }
 0x58b   :  { %v6783_v28 = vpop.f32.mrf.mxu1  ;;  %v7158_v42 = vpop.f32.mrf.mxu0 }
 0x58c   :  { %14356 = vst [vmem:[#allocation34_spill] sm:$0xff] %v12613_v52  ;;  %v12620_v28 = vld [vmem:[#allocation2 + $0x27a] sm:$0xff] }
 0x58d   :  { %v6786_v47 = vpop.f32.mrf.mxu1  ;;  %7475 = vmatmul.mubr.f32.gmra.mxu1 %v5482_v54  ;;  %v7161_v23 = vpop.f32.mrf.mxu0  ;;  %7850 = vmatmul.mubr.f32.gmra.mxu0 %v5354_v13  ;;  %v5484_v54 = vld [vmem:[#allocation2 + $0x279] sm:$0xff] }
 0x58e   :  { %7479 = vmatprep.mubr.f32.mxu1 %v12615_v41  ;;  %v12618_v36 = vadd.f32 %v7161_v23, %v6776_v33  ;;  %7854 = vmatprep.mubr.f32.mxu0 %v5483_v45  ;;  %v5356_v23 = vld [vmem:[#allocation2 + $0x278] sm:$0xff] }
 0x58f   :  { %v6788_v0 = vpop.f32.mrf.mxu1  ;;  %v7163_v30 = vpop.f32.mrf.mxu0 }
 0x590   :  { %14357 = vst [vmem:[#allocation33_spill] sm:$0xff] %v12618_v36  ;;  %v12625_v0 = vld [vmem:[#allocation2 + $0x28a] sm:$0xff] }
 0x591   :  { %v6791_v19 = vpop.f32.mrf.mxu1  ;;  %7480 = vmatmul.mubr.f32.gmra.mxu1 %v5483_v45  ;;  %v7166_v42 = vpop.f32.mrf.mxu0  ;;  %7855 = vmatmul.mubr.f32.gmra.mxu0 %v5355_v49  ;;  %v5485_v45 = vld [vmem:[#allocation2 + $0x289] sm:$0xff] }
 0x592   :  { %7484 = vmatprep.mubr.f32.mxu1 %v12620_v28  ;;  %v12623_v52 = vadd.f32 %v7166_v42, %v6781_v9  ;;  %7859 = vmatprep.mubr.f32.mxu0 %v5484_v54  ;;  %v6867_v9 = vadd.f32 %v12441_v11, %v12286_v17 }
 0x593   :  { %v6793_v13 = vpop.f32.mrf.mxu1  ;;  %v7168_v37 = vpop.f32.mrf.mxu0 }
 0x594   :  { %14358 = vst [vmem:[#allocation36_spill] sm:$0xff] %v12623_v52  ;;  %v5357_v37 = vld [vmem:[#allocation2 + $0x288] sm:$0xff] }
 0x595   :  { %v6796_v33 = vpop.f32.mrf.mxu1  ;;  %7485 = vmatmul.mubr.f32.gmra.mxu1 %v5484_v54  ;;  %v7171_v30 = vpop.f32.mrf.mxu0  ;;  %7860 = vmatmul.mubr.f32.gmra.mxu0 %v5356_v23  ;;  %v12632_v54 = vld [vmem:[#allocation2 + $0x292] sm:$0xff] }
 0x596   :  { %7489 = vmatprep.mubr.f32.mxu1 %v12625_v0  ;;  %v12628_v36 = vadd.f32 %v7171_v30, %v6786_v47  ;;  %7864 = vmatprep.mubr.f32.mxu0 %v5485_v45  ;;  %v5486_v23 = vld [vmem:[#allocation2 + $0x291] sm:$0xff]  ;;  %v6872_v30 = vadd.f32 %v12443_v43, %v12300_v44  ;;  %v5359_v44 = vld [vmem:[#allocation2 + $0x2a0] sm:$0xff] }
 0x597   :  { %v6798_v49 = vpop.f32.mrf.mxu1  ;;  %v7173_v42 = vpop.f32.mrf.mxu0  ;;  %v12644_v43 = vld [vmem:[#allocation2 + $0x2aa] sm:$0xff] }
 0x598   :  { %14359 = vst [vmem:[#allocation35_spill] sm:$0xff] %v12628_v36  ;;  %v12639_v49 = vld [vmem:[#allocation2 + $0x2a2] sm:$0xff] }
 0x599   :  { %v7251_v13 = vpop.f32.mrf.mxu1  ;;  %7490 = vmatmul.mubr.f32.gmra.mxu1 %v5485_v45  ;;  %v7176_v52 = vpop.f32.mrf.mxu0  ;;  %7865 = vmatmul.mubr.f32.gmra.mxu0 %v5357_v37  ;;  %v5358_v45 = vld [vmem:[#allocation2 + $0x290] sm:$0xff] }
 0x59a   :  { %v7252_v22 = vadd.f32 %v7251_v13, %v6867_v9  ;;  %7494 = vmatprep.mubr.f32.mxu1 %v12632_v54  ;;  %v12635_v62 = vadd.f32 %v7176_v52, %v6791_v19  ;;  %7869 = vmatprep.mubr.f32.mxu0 %v5486_v23  ;;  %v5487_v9 = vld [vmem:[#allocation2 + $0x2a1] sm:$0xff] }
 0x59b   :  { %v7253_v47 = vpop.f32.mrf.mxu1  ;;  %v7178_v17 = vpop.f32.mrf.mxu0 }
 0x59d   :  { %v7256_v11 = vpop.f32.mrf.mxu1  ;;  %7495 = vmatmul.mubr.f32.gmra.mxu1 %v5486_v23  ;;  %v7181_v42 = vpop.f32.mrf.mxu0  ;;  %7870 = vmatmul.mubr.f32.gmra.mxu0 %v5358_v45 }
 0x59e   :  { %v7257_v36 = vadd.f32 %v7256_v11, %v6872_v30  ;;  %7499 = vmatprep.mubr.f32.mxu1 %v12639_v49  ;;  %v12642_v13 = vadd.f32 %v7181_v42, %v6796_v33  ;;  %7874 = vmatprep.mubr.f32.mxu0 %v5487_v9  ;;  %v5488_v30 = vld [vmem:[#allocation2 + $0x2a9] sm:$0xff] }
 0x59f   :  { %v7258_v52 = vpop.f32.mrf.mxu1  ;;  %v7183_v19 = vpop.f32.mrf.mxu0  ;;  %v5360_v42 = vld [vmem:[#allocation2 + $0x2a8] sm:$0xff] }
 0x5a0   :  { %14360 = vst [vmem:[#allocation38_spill] sm:$0xff] %v12642_v13  ;;  %v12650_v52 = vld [vmem:[#allocation2 + $0x2ba] sm:$0xff] }
 0x5a1   :  { %v7261_v37 = vpop.f32.mrf.mxu1  ;;  %7500 = vmatmul.mubr.f32.gmra.mxu1 %v5487_v9  ;;  %v7636_v47 = vpop.f32.mrf.mxu0  ;;  %7875 = vmatmul.mubr.f32.gmra.mxu0 %v5359_v44 }
 0x5a2   :  { %v7262_v23 = vadd.f32 %v7261_v37, %v12445_v5  ;;  %7504 = vmatprep.mubr.f32.mxu1 %v12644_v43  ;;  %v12648_v17 = vadd.f32 %v7636_v47, %v7252_v22  ;;  %7879 = vmatprep.mubr.f32.mxu0 %v5488_v30  ;;  %v5489_v5 = vld [vmem:[#allocation2 + $0x2b9] sm:$0xff] }
 0x5a3   :  { %v7263_v33 = vpop.f32.mrf.mxu1  ;;  %v7638_v11 = vpop.f32.mrf.mxu0 }
 0x5a4   :  { %14361 = vst [vmem:[#allocation4_spill] sm:$0xff] %v12648_v17  ;;  %v5361_v33 = vld [vmem:[#allocation2 + $0x2b8] sm:$0xff]  ;;  %v12656_v11 = vld [vmem:[#allocation2 + $0x2c2] sm:$0xff] }
 0x5a5   :  { %v7266_v45 = vpop.f32.mrf.mxu1  ;;  %7505 = vmatmul.mubr.f32.gmra.mxu1 %v5488_v30  ;;  %v7641_v19 = vpop.f32.mrf.mxu0  ;;  %7880 = vmatmul.mubr.f32.gmra.mxu0 %v5360_v42 }
 0x5a6   :  { %v7267_v9 = vadd.f32 %v7266_v45, %v12447_v14  ;;  %7509 = vmatprep.mubr.f32.mxu1 %v12650_v52  ;;  %v12654_v37 = vadd.f32 %v7641_v19, %v7257_v36  ;;  %7884 = vmatprep.mubr.f32.mxu0 %v5489_v5  ;;  %v5490_v14 = vld [vmem:[#allocation2 + $0x2c1] sm:$0xff] }
 0x5a7   :  { %v7268_v22 = vpop.f32.mrf.mxu1  ;;  %v7643_v44 = vpop.f32.mrf.mxu0 }
 0x5a8   :  { %14362 = vst [vmem:[#allocation6_spill] sm:$0xff] %v12654_v37  ;;  %v5362_v22 = vld [vmem:[#allocation2 + $0x2c0] sm:$0xff]  ;;  %v12662_v44 = vld [vmem:[#allocation2 + $0x2d2] sm:$0xff] }
 0x5a9   :  { %v7271_v47 = vpop.f32.mrf.mxu1  ;;  %7510 = vmatmul.mubr.f32.gmra.mxu1 %v5489_v5  ;;  %v7646_v17 = vpop.f32.mrf.mxu0  ;;  %7885 = vmatmul.mubr.f32.gmra.mxu0 %v5361_v33 }
 0x5aa   :  { %v7272_v30 = vadd.f32 %v7271_v47, %v12449_v21  ;;  %7514 = vmatprep.mubr.f32.mxu1 %v12656_v11  ;;  %v12660_v45 = vadd.f32 %v7646_v17, %v7262_v23  ;;  %7889 = vmatprep.mubr.f32.mxu0 %v5490_v14  ;;  %v5491_v21 = vld [vmem:[#allocation2 + $0x2d1] sm:$0xff] }
 0x5ab   :  { %v7273_v36 = vpop.f32.mrf.mxu1  ;;  %v7648_v42 = vpop.f32.mrf.mxu0 }
 0x5ac   :  { %14363 = vst [vmem:[#allocation5_spill] sm:$0xff] %v12660_v45  ;;  %v5363_v36 = vld [vmem:[#allocation2 + $0x2d0] sm:$0xff]  ;;  %v12668_v42 = vld [vmem:[#allocation2 + $0x2da] sm:$0xff] }
 0x5ad   :  { %v7276_v19 = vpop.f32.mrf.mxu1  ;;  %7515 = vmatmul.mubr.f32.gmra.mxu1 %v5490_v14  ;;  %v7651_v37 = vpop.f32.mrf.mxu0  ;;  %7890 = vmatmul.mubr.f32.gmra.mxu0 %v5362_v22 }
 0x5ae   :  { %v7277_v5 = vadd.f32 %v7276_v19, %v12451_v57  ;;  %7519 = vmatprep.mubr.f32.mxu1 %v12662_v44  ;;  %v12666_v47 = vadd.f32 %v7651_v37, %v7267_v9  ;;  %7894 = vmatprep.mubr.f32.mxu0 %v5491_v21  ;;  %v5492_v57 = vld [vmem:[#allocation2 + $0x2d9] sm:$0xff] }
 0x5af   :  { %v7278_v23 = vpop.f32.mrf.mxu1  ;;  %v7653_v17 = vpop.f32.mrf.mxu0 }
 0x5b0   :  { %14364 = vst [vmem:[#allocation8_spill] sm:$0xff] %v12666_v47  ;;  %v5364_v23 = vld [vmem:[#allocation2 + $0x2d8] sm:$0xff]  ;;  %v12674_v17 = vld [vmem:[#allocation2 + $0x2ea] sm:$0xff] }
 0x5b1   :  { %v7281_v33 = vpop.f32.mrf.mxu1  ;;  %7520 = vmatmul.mubr.f32.gmra.mxu1 %v5491_v21  ;;  %v7656_v45 = vpop.f32.mrf.mxu0  ;;  %7895 = vmatmul.mubr.f32.gmra.mxu0 %v5363_v36 }
 0x5b2   :  { %v7282_v14 = vadd.f32 %v7281_v33, %v12453_v10  ;;  %7524 = vmatprep.mubr.f32.mxu1 %v12668_v42  ;;  %v12672_v19 = vadd.f32 %v7656_v45, %v7272_v30  ;;  %7899 = vmatprep.mubr.f32.mxu0 %v5492_v57  ;;  %v5493_v10 = vld [vmem:[#allocation2 + $0x2e9] sm:$0xff] }
 0x5b3   :  { %v7283_v9 = vpop.f32.mrf.mxu1  ;;  %v7658_v37 = vpop.f32.mrf.mxu0 }
 0x5b4   :  { %14365 = vst [vmem:[#allocation7_spill] sm:$0xff] %v12672_v19  ;;  %v5365_v9 = vld [vmem:[#allocation2 + $0x2e8] sm:$0xff]  ;;  %v12680_v37 = vld [vmem:[#allocation2 + $0x2f2] sm:$0xff] }
 0x5b5   :  { %v7286_v22 = vpop.f32.mrf.mxu1  ;;  %7525 = vmatmul.mubr.f32.gmra.mxu1 %v5492_v57  ;;  %v7661_v47 = vpop.f32.mrf.mxu0  ;;  %7900 = vmatmul.mubr.f32.gmra.mxu0 %v5364_v23 }
 0x5b6   :  { %v7287_v21 = vadd.f32 %v7286_v22, %v12455_v50  ;;  %7529 = vmatprep.mubr.f32.mxu1 %v12674_v17  ;;  %v12678_v33 = vadd.f32 %v7661_v47, %v7277_v5  ;;  %7904 = vmatprep.mubr.f32.mxu0 %v5493_v10  ;;  %v5494_v50 = vld [vmem:[#allocation2 + $0x2f1] sm:$0xff] }
 0x5b7   :  { %v7288_v30 = vpop.f32.mrf.mxu1  ;;  %v7663_v45 = vpop.f32.mrf.mxu0 }
 0x5b8   :  { %14366 = vst [vmem:[#allocation10_spill] sm:$0xff] %v12678_v33  ;;  %v5366_v30 = vld [vmem:[#allocation2 + $0x2f0] sm:$0xff]  ;;  %v12686_v45 = vld [vmem:[#allocation2 + $0x302] sm:$0xff] }
 0x5b9   :  { %v7291_v36 = vpop.f32.mrf.mxu1  ;;  %7530 = vmatmul.mubr.f32.gmra.mxu1 %v5493_v10  ;;  %v7666_v19 = vpop.f32.mrf.mxu0  ;;  %7905 = vmatmul.mubr.f32.gmra.mxu0 %v5365_v9 }
 0x5ba   :  { %v7292_v57 = vadd.f32 %v7291_v36, %v12457_v40  ;;  %7534 = vmatprep.mubr.f32.mxu1 %v12680_v37  ;;  %v12684_v22 = vadd.f32 %v7666_v19, %v7282_v14  ;;  %7909 = vmatprep.mubr.f32.mxu0 %v5494_v50  ;;  %v5495_v40 = vld [vmem:[#allocation2 + $0x301] sm:$0xff] }
 0x5bb   :  { %v7293_v5 = vpop.f32.mrf.mxu1  ;;  %v7668_v47 = vpop.f32.mrf.mxu0 }
 0x5bc   :  { %14367 = vst [vmem:[#allocation9_spill] sm:$0xff] %v12684_v22  ;;  %v5367_v5 = vld [vmem:[#allocation2 + $0x300] sm:$0xff]  ;;  %v12692_v47 = vld [vmem:[#allocation2 + $0x30a] sm:$0xff] }
 0x5bd   :  { %v7296_v23 = vpop.f32.mrf.mxu1  ;;  %7535 = vmatmul.mubr.f32.gmra.mxu1 %v5494_v50  ;;  %v7671_v33 = vpop.f32.mrf.mxu0  ;;  %7910 = vmatmul.mubr.f32.gmra.mxu0 %v5366_v30 }
 0x5be   :  { %v7297_v10 = vadd.f32 %v7296_v23, %v12459_v1  ;;  %7539 = vmatprep.mubr.f32.mxu1 %v12686_v45  ;;  %v12690_v36 = vadd.f32 %v7671_v33, %v7287_v21  ;;  %7914 = vmatprep.mubr.f32.mxu0 %v5495_v40  ;;  %v5496_v1 = vld [vmem:[#allocation2 + $0x309] sm:$0xff] }
 0x5bf   :  { %v7298_v14 = vpop.f32.mrf.mxu1  ;;  %v7673_v19 = vpop.f32.mrf.mxu0 }
 0x5c0   :  { %14368 = vst [vmem:[#allocation12_spill] sm:$0xff] %v12690_v36  ;;  %v5368_v14 = vld [vmem:[#allocation2 + $0x308] sm:$0xff]  ;;  %v12698_v19 = vld [vmem:[#allocation2 + $0x31a] sm:$0xff] }
 0x5c1   :  { %v7301_v9 = vpop.f32.mrf.mxu1  ;;  %7540 = vmatmul.mubr.f32.gmra.mxu1 %v5495_v40  ;;  %v7676_v22 = vpop.f32.mrf.mxu0  ;;  %7915 = vmatmul.mubr.f32.gmra.mxu0 %v5367_v5 }
 0x5c2   :  { %v7302_v50 = vadd.f32 %v7301_v9, %v12461_v34  ;;  %7544 = vmatprep.mubr.f32.mxu1 %v12692_v47  ;;  %v12696_v23 = vadd.f32 %v7676_v22, %v7292_v57  ;;  %7919 = vmatprep.mubr.f32.mxu0 %v5496_v1  ;;  %v5497_v34 = vld [vmem:[#allocation2 + $0x319] sm:$0xff] }
 0x5c3   :  { %v7303_v21 = vpop.f32.mrf.mxu1  ;;  %v7678_v33 = vpop.f32.mrf.mxu0 }
 0x5c4   :  { %14369 = vst [vmem:[#allocation11_spill] sm:$0xff] %v12696_v23  ;;  %v5369_v21 = vld [vmem:[#allocation2 + $0x318] sm:$0xff]  ;;  %v12704_v33 = vld [vmem:[#allocation2 + $0x322] sm:$0xff] }
 0x5c5   :  { %v7306_v30 = vpop.f32.mrf.mxu1  ;;  %7545 = vmatmul.mubr.f32.gmra.mxu1 %v5496_v1  ;;  %v7681_v36 = vpop.f32.mrf.mxu0  ;;  %7920 = vmatmul.mubr.f32.gmra.mxu0 %v5368_v14 }
 0x5c6   :  { %v7307_v40 = vadd.f32 %v7306_v30, %v12463_v38  ;;  %7549 = vmatprep.mubr.f32.mxu1 %v12698_v19  ;;  %v12702_v9 = vadd.f32 %v7681_v36, %v7297_v10  ;;  %7924 = vmatprep.mubr.f32.mxu0 %v5497_v34  ;;  %v5498_v38 = vld [vmem:[#allocation2 + $0x321] sm:$0xff] }
 0x5c7   :  { %v7308_v57 = vpop.f32.mrf.mxu1  ;;  %v7683_v22 = vpop.f32.mrf.mxu0 }
 0x5c8   :  { %14370 = vst [vmem:[#allocation14_spill] sm:$0xff] %v12702_v9  ;;  %v5370_v57 = vld [vmem:[#allocation2 + $0x320] sm:$0xff]  ;;  %v12710_v22 = vld [vmem:[#allocation2 + $0x332] sm:$0xff] }
 0x5c9   :  { %v7311_v5 = vpop.f32.mrf.mxu1  ;;  %7550 = vmatmul.mubr.f32.gmra.mxu1 %v5497_v34  ;;  %v7686_v23 = vpop.f32.mrf.mxu0  ;;  %7925 = vmatmul.mubr.f32.gmra.mxu0 %v5369_v21 }
 0x5ca   :  { %v7312_v1 = vadd.f32 %v7311_v5, %v12465_v60  ;;  %7554 = vmatprep.mubr.f32.mxu1 %v12704_v33  ;;  %v12708_v30 = vadd.f32 %v7686_v23, %v7302_v50  ;;  %7929 = vmatprep.mubr.f32.mxu0 %v5498_v38  ;;  %v5499_v60 = vld [vmem:[#allocation2 + $0x331] sm:$0xff] }
 0x5cb   :  { %v7313_v10 = vpop.f32.mrf.mxu1  ;;  %v7688_v36 = vpop.f32.mrf.mxu0 }
 0x5cc   :  { %14371 = vst [vmem:[#allocation37_spill] sm:$0xff] %v12708_v30  ;;  %v5371_v10 = vld [vmem:[#allocation2 + $0x330] sm:$0xff]  ;;  %v12716_v36 = vld [vmem:[#allocation2 + $0x33a] sm:$0xff] }
 0x5cd   :  { %v7316_v14 = vpop.f32.mrf.mxu1  ;;  %7555 = vmatmul.mubr.f32.gmra.mxu1 %v5498_v38  ;;  %v7691_v9 = vpop.f32.mrf.mxu0  ;;  %7930 = vmatmul.mubr.f32.gmra.mxu0 %v5370_v57  ;;  %v5501_v57 = vld [vmem:[#allocation2 + $0x349] sm:$0xff] }
 0x5ce   :  { %v7317_v34 = vadd.f32 %v7316_v14, %v12467_v55  ;;  %7559 = vmatprep.mubr.f32.mxu1 %v12710_v22  ;;  %v12714_v5 = vadd.f32 %v7691_v9, %v7307_v40  ;;  %7934 = vmatprep.mubr.f32.mxu0 %v5499_v60  ;;  %v5500_v55 = vld [vmem:[#allocation2 + $0x339] sm:$0xff] }
 0x5cf   :  { %v7318_v50 = vpop.f32.mrf.mxu1  ;;  %v7693_v23 = vpop.f32.mrf.mxu0 }
 0x5d0   :  { %14372 = vst [vmem:[#allocation39_spill] sm:$0xff] %v12714_v5  ;;  %v5372_v23 = vld [vmem:[#allocation2 + $0x338] sm:$0xff] }
 0x5d1   :  { %v7321_v21 = vpop.f32.mrf.mxu1  ;;  %7560 = vmatmul.mubr.f32.gmra.mxu1 %v5499_v60  ;;  %v7696_v30 = vpop.f32.mrf.mxu0  ;;  %7935 = vmatmul.mubr.f32.gmra.mxu0 %v5371_v10  ;;  %v5567_v60 = vld [vmem:[#allocation2 + $0x32] sm:$0xff] }
 0x5d2   :  { %v7322_v38 = vadd.f32 %v7321_v21, %v12472_v53  ;;  %7564 = vmatprep.mubr.f32.mxu1 %v12716_v36  ;;  %v12720_v14 = vadd.f32 %v7696_v30, %v7312_v1  ;;  %7939 = vmatprep.mubr.f32.mxu0 %v5500_v55  ;;  %v5568_v1 = vld [vmem:[#allocation2 + $0x3a] sm:$0xff]  ;;  %v5502_v30 = vld [vmem:[#allocation2 + $0x351] sm:$0xff] }
 0x5d3   :  { %v7323_v40 = vpop.f32.mrf.mxu1  ;;  %v7698_v9 = vpop.f32.mrf.mxu0 }
 0x5d4   :  { %14373 = vst [vmem:[#allocation40_spill] sm:$0xff] %v12720_v14  ;;  %v5569_v40 = vld [vmem:[#allocation2 + $0x4a] sm:$0xff] }
 0x5d5   :  { %v7326_v50 = vpop.f32.mrf.mxu1  ;;  %7565 = vmatmul.mubr.f32.gmra.mxu1 %v5500_v55  ;;  %v7701_v13 = vpop.f32.mrf.mxu0  ;;  %7940 = vmatmul.mubr.f32.gmra.mxu0 %v5372_v23 }
 0x5d6   :  { %v7327_v5 = vadd.f32 %v7326_v50, %v12478_v25  ;;  %9146 = vmatprep.mubr.f32.mxu1 %v5567_v60  ;;  %v12723_v53 = vadd.f32 %v7701_v13, %v7317_v34  ;;  %7944 = vmatprep.mubr.f32.mxu0 %v5501_v57  ;;  %v5570_v34 = vld [vmem:[#allocation2 + $0x52] sm:$0xff]  ;;  %v5571_v57 = vld [vmem:[#allocation2 + $0x62] sm:$0xff] }
 0x5d7   :  { %v7328_v21 = vpop.f32.mrf.mxu1  ;;  %v7703_v10 = vpop.f32.mrf.mxu0 }
 0x5d9   :  { %v7331_v14 = vpop.f32.mrf.mxu1  ;;  %9147 = vmatmul.mubr.f32.vlgmr.msra.gmra.mxu1 %v5568_v1  ;;  %v7706_v55 = vpop.f32.mrf.mxu0  ;;  %7945 = vmatmul.mubr.f32.gmra.mxu0 %v12579_v46  ;;  %v5572_v1 = vld [vmem:[#allocation2 + $0x6a] sm:$0xff] }
 0x5da   :  { %v7332_v9 = vadd.f32 %v7331_v14, %v12483_v59  ;;  %9149 = vmatprep.mubr.f32.mxu1 %v5569_v40  ;;  %v12727_v25 = vadd.f32 %v7706_v55, %v7322_v38  ;;  %7949 = vmatprep.mubr.f32.mxu0 %v5502_v30  ;;  %v5573_v40 = vld [vmem:[#allocation2 + $0x7a] sm:$0xff] }
 0x5db   :  { %v7333_v50 = vpop.f32.mrf.mxu1  ;;  %v7708_v13 = vpop.f32.mrf.mxu0 }
 0x5dd   :  { %v7336_v23 = vpop.f32.mrf.mxu1  ;;  %9150 = vmatmul.mubr.f32.gmra.mxu1 %v5570_v34  ;;  %v7711_v21 = vpop.f32.mrf.mxu0  ;;  %7950 = vmatmul.mubr.f32.gmra.mxu0 %v12579_v46  ;;  %v5574_v34 = vld [vmem:[#allocation2 + $0x82] sm:$0xff]  ;;  %v5575_v46 = vld [vmem:[#allocation2 + $0x92] sm:$0xff] }
 0x5de   :  { %v7337_v60 = vadd.f32 %v7336_v23, %v12488_v63  ;;  %9152 = vmatprep.mubr.f32.mxu1 %v5571_v57  ;;  %v12731_v59 = vadd.f32 %v7711_v21, %v7327_v5 }
 0x5df   :  { %v7338_v14 = vpop.f32.mrf.mxu1  ;;  %v7713_v10 = vpop.f32.mrf.mxu0 }
 0x5e1   :  { %v7341_v38 = vpop.f32.mrf.mxu1  ;;  %9153 = vmatmul.mubr.f32.gmra.mxu1 %v5572_v1  ;;  %v7716_v55 = vpop.f32.mrf.mxu0  ;;  %v5576_v1 = vld [vmem:[#allocation2 + $0x9a] sm:$0xff] }
 0x5e2   :  { %v7342_v30 = vadd.f32 %v7341_v38, %v12493_v39  ;;  %9155 = vmatprep.mubr.f32.mxu1 %v5573_v40  ;;  %v12734_v50 = vadd.f32 %v7716_v55, %v7332_v9  ;;  %v5577_v38 = vld [vmem:[#allocation2 + $0xaa] sm:$0xff] }
 0x5e3   :  { %v7343_v13 = vpop.f32.mrf.mxu1  ;;  %v7718_v63 = vpop.f32.mrf.mxu0 }
 0x5e5   :  { %v7346_v23 = vpop.f32.mrf.mxu1  ;;  %9156 = vmatmul.mubr.f32.gmra.mxu1 %v5574_v34  ;;  %v7721_v57 = vpop.f32.mrf.mxu0  ;;  %v5578_v34 = vld [vmem:[#allocation2 + $0xb2] sm:$0xff] }
 0x5e6   :  { %v7347_v5 = vadd.f32 %v7346_v23, %v12498_v48  ;;  %9158 = vmatprep.mubr.f32.mxu1 %v5575_v46  ;;  %v12737_v21 = vadd.f32 %v7721_v57, %v7337_v60  ;;  %v5579_v23 = vld [vmem:[#allocation2 + $0xc2] sm:$0xff] }
 0x5e7   :  { %v7348_v14 = vpop.f32.mrf.mxu1  ;;  %v7723_v10 = vpop.f32.mrf.mxu0 }
 0x5e9   :  { %v7351_v39 = vpop.f32.mrf.mxu1  ;;  %9159 = vmatmul.mubr.f32.gmra.mxu1 %v5576_v1  ;;  %v7726_v40 = vpop.f32.mrf.mxu0  ;;  %v5580_v1 = vld [vmem:[#allocation2 + $0xca] sm:$0xff] }
 0x5ea   :  { %v7352_v9 = vadd.f32 %v7351_v39, %v12503_v32  ;;  %9161 = vmatprep.mubr.f32.mxu1 %v5577_v38  ;;  %v12740_v55 = vadd.f32 %v7726_v40, %v7342_v30  ;;  %v5581_v39 = vld [vmem:[#allocation2 + $0xda] sm:$0xff] }
 0x5eb   :  { %v7353_v13 = vpop.f32.mrf.mxu1  ;;  %v7728_v63 = vpop.f32.mrf.mxu0 }
 0x5ed   :  { %v7356_v48 = vpop.f32.mrf.mxu1  ;;  %9162 = vmatmul.mubr.f32.gmra.mxu1 %v5578_v34  ;;  %v7731_v46 = vpop.f32.mrf.mxu0  ;;  %v5582_v34 = vld [vmem:[#allocation2 + $0xe2] sm:$0xff] }
 0x5ee   :  { %v7357_v60 = vadd.f32 %v7356_v48, %v12508_v24  ;;  %9164 = vmatprep.mubr.f32.mxu1 %v5579_v23  ;;  %v12743_v57 = vadd.f32 %v7731_v46, %v7347_v5  ;;  %v5583_v48 = vld [vmem:[#allocation2 + $0xf2] sm:$0xff] }
 0x5ef   :  { %v7358_v14 = vpop.f32.mrf.mxu1  ;;  %v7733_v10 = vpop.f32.mrf.mxu0 }
 0x5f1   :  { %v7361_v32 = vpop.f32.mrf.mxu1  ;;  %9165 = vmatmul.mubr.f32.gmra.mxu1 %v5580_v1  ;;  %v7736_v38 = vpop.f32.mrf.mxu0  ;;  %v5584_v1 = vld [vmem:[#allocation2 + $0xfa] sm:$0xff] }
 0x5f2   :  { %v7362_v30 = vadd.f32 %v7361_v32, %v12513_v26  ;;  %9167 = vmatprep.mubr.f32.mxu1 %v5581_v39  ;;  %v12746_v40 = vadd.f32 %v7736_v38, %v7352_v9  ;;  %v5585_v32 = vld [vmem:[#allocation2 + $0x10a] sm:$0xff] }
 0x5f3   :  { %v7363_v13 = vpop.f32.mrf.mxu1  ;;  %v7738_v63 = vpop.f32.mrf.mxu0 }
 0x5f5   :  { %v7366_v24 = vpop.f32.mrf.mxu1  ;;  %9168 = vmatmul.mubr.f32.gmra.mxu1 %v5582_v34  ;;  %v7741_v23 = vpop.f32.mrf.mxu0  ;;  %v5586_v34 = vld [vmem:[#allocation2 + $0x112] sm:$0xff] }
 0x5f6   :  { %v7367_v5 = vadd.f32 %v7366_v24, %v12518_v8  ;;  %9170 = vmatprep.mubr.f32.mxu1 %v5583_v48  ;;  %v12749_v46 = vadd.f32 %v7741_v23, %v7357_v60  ;;  %v5587_v24 = vld [vmem:[#allocation2 + $0x122] sm:$0xff] }
 0x5f7   :  { %v7368_v14 = vpop.f32.mrf.mxu1  ;;  %v7743_v10 = vpop.f32.mrf.mxu0 }
 0x5f9   :  { %v7371_v26 = vpop.f32.mrf.mxu1  ;;  %9171 = vmatmul.mubr.f32.gmra.mxu1 %v5584_v1  ;;  %v7746_v39 = vpop.f32.mrf.mxu0  ;;  %v5588_v1 = vld [vmem:[#allocation2 + $0x12a] sm:$0xff] }
 0x5fa   :  { %v7372_v9 = vadd.f32 %v7371_v26, %v12520_v3  ;;  %9173 = vmatprep.mubr.f32.mxu1 %v5585_v32  ;;  %v12752_v38 = vadd.f32 %v7746_v39, %v7362_v30  ;;  %v5589_v26 = vld [vmem:[#allocation2 + $0x13a] sm:$0xff] }
 0x5fb   :  { %v7373_v13 = vpop.f32.mrf.mxu1  ;;  %v7748_v63 = vpop.f32.mrf.mxu0 }
 0x5fd   :  { %v7376_v8 = vpop.f32.mrf.mxu1  ;;  %9174 = vmatmul.mubr.f32.gmra.mxu1 %v5586_v34  ;;  %v7751_v48 = vpop.f32.mrf.mxu0  ;;  %v5590_v34 = vld [vmem:[#allocation2 + $0x142] sm:$0xff] }
 0x5fe   :  { %v7377_v60 = vadd.f32 %v7376_v8, %v12522_v4  ;;  %9176 = vmatprep.mubr.f32.mxu1 %v5587_v24  ;;  %v12755_v23 = vadd.f32 %v7751_v48, %v7367_v5  ;;  %v5591_v8 = vld [vmem:[#allocation2 + $0x152] sm:$0xff] }
 0x5ff   :  { %v7378_v14 = vpop.f32.mrf.mxu1  ;;  %v7753_v10 = vpop.f32.mrf.mxu0 }
 0x601   :  { %v7381_v3 = vpop.f32.mrf.mxu1  ;;  %9177 = vmatmul.mubr.f32.gmra.mxu1 %v5588_v1  ;;  %v7756_v32 = vpop.f32.mrf.mxu0  ;;  %v5592_v1 = vld [vmem:[#allocation2 + $0x15a] sm:$0xff] }
 0x602   :  { %v7382_v30 = vadd.f32 %v7381_v3, %v12524_v35  ;;  %9179 = vmatprep.mubr.f32.mxu1 %v5589_v26  ;;  %v12758_v39 = vadd.f32 %v7756_v32, %v7372_v9  ;;  %v5593_v3 = vld [vmem:[#allocation2 + $0x16a] sm:$0xff] }
 0x603   :  { %v7383_v13 = vpop.f32.mrf.mxu1  ;;  %v7758_v63 = vpop.f32.mrf.mxu0 }
 0x605   :  { %v7386_v4 = vpop.f32.mrf.mxu1  ;;  %9180 = vmatmul.mubr.f32.gmra.mxu1 %v5590_v34  ;;  %v7761_v24 = vpop.f32.mrf.mxu0  ;;  %v5594_v34 = vld [vmem:[#allocation2 + $0x172] sm:$0xff] }
 0x606   :  { %v7387_v5 = vadd.f32 %v7386_v4, %v12529_v51  ;;  %9182 = vmatprep.mubr.f32.mxu1 %v5591_v8  ;;  %v12761_v48 = vadd.f32 %v7761_v24, %v7377_v60  ;;  %v5595_v4 = vld [vmem:[#allocation2 + $0x182] sm:$0xff] }
 0x607   :  { %v7388_v14 = vpop.f32.mrf.mxu1  ;;  %v7763_v10 = vpop.f32.mrf.mxu0 }
 0x608   :  { %v5597_v10 = vld [vmem:[#allocation2 + $0x19a] sm:$0xff] }
 0x609   :  { %v7391_v35 = vpop.f32.mrf.mxu1  ;;  %9183 = vmatmul.mubr.f32.gmra.mxu1 %v5592_v1  ;;  %v7766_v26 = vpop.f32.mrf.mxu0 }
 0x60a   :  { %v7392_v9 = vadd.f32 %v7391_v35, %v12531_v58  ;;  %9185 = vmatprep.mubr.f32.mxu1 %v5593_v3  ;;  %v12764_v32 = vadd.f32 %v7766_v26, %v7382_v30  ;;  %v5596_v58 = vld [vmem:[#allocation2 + $0x18a] sm:$0xff]  ;;  %v5598_v26 = vld [vmem:[#allocation2 + $0x1a2] sm:$0xff] }
 0x60b   :  { %v7393_v13 = vpop.f32.mrf.mxu1  ;;  %v7768_v63 = vpop.f32.mrf.mxu0 }
 0x60d   :  { %v7396_v51 = vpop.f32.mrf.mxu1  ;;  %9186 = vmatmul.mubr.f32.gmra.mxu1 %v5594_v34  ;;  %v7771_v8 = vpop.f32.mrf.mxu0 }
 0x60e   :  { %v7397_v60 = vadd.f32 %v7396_v51, %v12533_v61  ;;  %9188 = vmatprep.mubr.f32.mxu1 %v5595_v4  ;;  %v12767_v24 = vadd.f32 %v7771_v8, %v7387_v5  ;;  %v5599_v51 = vld [vmem:[#allocation2 + $0x1e2] sm:$0xff] }
 0x60f   :  { %v7398_v14 = vpop.f32.mrf.mxu1  ;;  %v7773_v1 = vpop.f32.mrf.mxu0 }
 0x611   :  { %v7401_v35 = vpop.f32.mrf.mxu1  ;;  %9189 = vmatmul.mubr.f32.gmra.mxu1 %v5596_v58  ;;  %v7776_v3 = vpop.f32.mrf.mxu0  ;;  %v5600_v58 = vld [vmem:[#allocation2 + $0x1ea] sm:$0xff] }
 0x612   :  { %v7402_v30 = vadd.f32 %v7401_v35, %v12535_v7  ;;  %9191 = vmatprep.mubr.f32.mxu1 %v5597_v10  ;;  %v12770_v13 = vadd.f32 %v7776_v3, %v7392_v9  ;;  %v5601_v10 = vld [vmem:[#allocation2 + $0x1fa] sm:$0xff] }
 0x613   :  { %v7403_v63 = vpop.f32.mrf.mxu1  ;;  %v7778_v34 = vpop.f32.mrf.mxu0 }
 0x614   :  { %v5602_v34 = vld [vmem:[#allocation2 + $0x202] sm:$0xff] }
 0x615   :  { %v7406_v61 = vpop.f32.mrf.mxu1  ;;  %9192 = vmatmul.mubr.f32.gmra.mxu1 %v5598_v26  ;;  %v7781_v4 = vpop.f32.mrf.mxu0 }
 0x616   :  { %v7407_v5 = vadd.f32 %v7406_v61, %v12540_v2  ;;  %9194 = vmatprep.mubr.f32.mxu1 %v5599_v51  ;;  %v12773_v8 = vadd.f32 %v7781_v4, %v7397_v60  ;;  %v5603_v61 = vld [vmem:[#allocation2 + $0x212] sm:$0xff] }
 0x617   :  { %v7408_v14 = vpop.f32.mrf.mxu1  ;;  %v7783_v1 = vpop.f32.mrf.mxu0 }
 0x619   :  { %v7411_v7 = vpop.f32.mrf.mxu1  ;;  %9195 = vmatmul.mubr.f32.gmra.mxu1 %v5600_v58  ;;  %v7786_v35 = vpop.f32.mrf.mxu0  ;;  %v5604_v58 = vld [vmem:[#allocation2 + $0x21a] sm:$0xff] }
 0x61a   :  { %v7412_v9 = vadd.f32 %v7411_v7, %v12542_v16  ;;  %9197 = vmatprep.mubr.f32.mxu1 %v5601_v10  ;;  %v12776_v3 = vadd.f32 %v7786_v35, %v7402_v30  ;;  %v5605_v7 = vld [vmem:[#allocation2 + $0x22a] sm:$0xff] }
 0x61b   :  { %v7413_v26 = vpop.f32.mrf.mxu1  ;;  %v7788_v63 = vpop.f32.mrf.mxu0 }
 0x61d   :  { %v7416_v2 = vpop.f32.mrf.mxu1  ;;  %9198 = vmatmul.mubr.f32.gmra.mxu1 %v5602_v34  ;;  %v7791_v51 = vpop.f32.mrf.mxu0  ;;  %v5606_v34 = vld [vmem:[#allocation2 + $0x232] sm:$0xff] }
 0x61e   :  { %v7417_v60 = vadd.f32 %v7416_v2, %v12544_v18  ;;  %9200 = vmatprep.mubr.f32.mxu1 %v5603_v61  ;;  %v12779_v4 = vadd.f32 %v7791_v51, %v7407_v5  ;;  %v5607_v2 = vld [vmem:[#allocation2 + $0x242] sm:$0xff] }
 0x61f   :  { %v7418_v14 = vpop.f32.mrf.mxu1  ;;  %v7793_v1 = vpop.f32.mrf.mxu0 }
 0x621   :  { %v7421_v16 = vpop.f32.mrf.mxu1  ;;  %9201 = vmatmul.mubr.f32.gmra.mxu1 %v5604_v58  ;;  %v7796_v10 = vpop.f32.mrf.mxu0  ;;  %v5608_v58 = vld [vmem:[#allocation2 + $0x24a] sm:$0xff] }
 0x622   :  { %v7422_v30 = vadd.f32 %v7421_v16, %v12546_v29  ;;  %9203 = vmatprep.mubr.f32.mxu1 %v5605_v7  ;;  %v12782_v35 = vadd.f32 %v7796_v10, %v7412_v9 }
 0x623   :  { %v7423_v26 = vpop.f32.mrf.mxu1  ;;  %v7798_v63 = vpop.f32.mrf.mxu0 }
 0x625   :  { %v7426_v18 = vpop.f32.mrf.mxu1  ;;  %9204 = vmatmul.mubr.f32.gmra.mxu1 %v5606_v34  ;;  %v7801_v61 = vpop.f32.mrf.mxu0 }
 0x626   :  { %v7427_v5 = vadd.f32 %v7426_v18, %v12551_v15  ;;  %9206 = vmatprep.mubr.f32.mxu1 %v5607_v2  ;;  %v12785_v51 = vadd.f32 %v7801_v61, %v7417_v60 }
 0x627   :  { %v7428_v14 = vpop.f32.mrf.mxu1  ;;  %v7803_v1 = vpop.f32.mrf.mxu0 }
 0x629   :  { %v7431_v29 = vpop.f32.mrf.mxu1  ;;  %9207 = vmatmul.mubr.f32.gmra.mxu1 %v5608_v58  ;;  %v7806_v16 = vpop.f32.mrf.mxu0 }
 0x62a   :  { %v7432_v9 = vadd.f32 %v7431_v29, %v12553_v6  ;;  %9209 = vmatprep.mubr.f32.mxu1 %v12605_v20  ;;  %v12789_v7 = vadd.f32 %v7806_v16, %v7422_v30 }
 0x62b   :  { %v7433_v10 = vpop.f32.mrf.mxu1  ;;  %v7808_v26 = vpop.f32.mrf.mxu0 }
 0x62d   :  { %v7436_v63 = vpop.f32.mrf.mxu1  ;;  %9210 = vmatmul.mubr.f32.gmra.mxu1 %v12610_v12  ;;  %v7811_v60 = vpop.f32.mrf.mxu0 }
 0x62e   :  { %v7437_v15 = vadd.f32 %v7436_v63, %v12555_v27  ;;  %9212 = vmatprep.mubr.f32.mxu1 %v12615_v41  ;;  %v12794_v34 = vadd.f32 %v7811_v60, %v7427_v5 }
 0x62f   :  { %v7438_v18 = vpop.f32.mrf.mxu1  ;;  %v7813_v2 = vpop.f32.mrf.mxu0 }
 0x631   :  { %v7441_v6 = vpop.f32.mrf.mxu1  ;;  %9213 = vmatmul.mubr.f32.gmra.mxu1 %v12620_v28  ;;  %v7816_v30 = vpop.f32.mrf.mxu0 }
 0x632   :  { %v7442_v20 = vadd.f32 %v7441_v6, %v12557_v56  ;;  %9215 = vmatprep.mubr.f32.mxu1 %v12625_v0  ;;  %v12799_v61 = vadd.f32 %v7816_v30, %v7432_v9  ;;  %v14374_v0 = vld [vmem:[#allocation13_spill] sm:$0xff] }
 0x633   :  { %v7443_v12 = vpop.f32.mrf.mxu1  ;;  %v7818_v14 = vpop.f32.mrf.mxu0 }
 0x635   :  { %v7446_v27 = vpop.f32.mrf.mxu1  ;;  %9216 = vmatmul.mubr.f32.gmra.mxu1 %v12632_v54  ;;  %v7821_v5 = vpop.f32.mrf.mxu0 }
 0x636   :  { %v7447_v41 = vadd.f32 %v7446_v27, %v12562_v31  ;;  %9218 = vmatprep.mubr.f32.mxu1 %v12639_v49  ;;  %v12804_v1 = vadd.f32 %v7821_v5, %v7437_v15  ;;  %v14375_v49 = vld [vmem:[#allocation16_spill] sm:$0xff] }
 0x637   :  { %v7448_v28 = vpop.f32.mrf.mxu1  ;;  %v7823_v58 = vpop.f32.mrf.mxu0 }
 0x639   :  { %v7451_v56 = vpop.f32.mrf.mxu1  ;;  %9219 = vmatmul.mubr.f32.gmra.mxu1 %v12644_v43  ;;  %v7826_v9 = vpop.f32.mrf.mxu0 }
 0x63a   :  { %v7452_v29 = vadd.f32 %v7451_v56, %v14374_v0  ;;  %9221 = vmatprep.mubr.f32.mxu1 %v12650_v52  ;;  %v12809_v16 = vadd.f32 %v7826_v9, %v7442_v20  ;;  %v14376_v52 = vld [vmem:[#allocation15_spill] sm:$0xff] }
 0x63b   :  { %v7453_v54 = vpop.f32.mrf.mxu1  ;;  %v7828_v10 = vpop.f32.mrf.mxu0 }
 0x63d   :  { %v7456_v31 = vpop.f32.mrf.mxu1  ;;  %9222 = vmatmul.mubr.f32.gmra.mxu1 %v12656_v11  ;;  %v7831_v63 = vpop.f32.mrf.mxu0 }
 0x63e   :  { %v7457_v26 = vadd.f32 %v7456_v31, %v14375_v49  ;;  %9224 = vmatprep.mubr.f32.mxu1 %v12662_v44  ;;  %v12814_v15 = vadd.f32 %v7831_v63, %v7447_v41  ;;  %v14377_v44 = vld [vmem:[#allocation17_spill] sm:$0xff] }
 0x63f   :  { %v7458_v43 = vpop.f32.mrf.mxu1  ;;  %v7833_v60 = vpop.f32.mrf.mxu0  ;;  %v5629_v49 = vld [vmem:[#allocation2 + $0x34a] sm:$0xff] }
 0x641   :  { %v7461_v18 = vpop.f32.mrf.mxu1  ;;  %9225 = vmatmul.mubr.f32.gmra.mxu1 %v12668_v42  ;;  %v7836_v6 = vpop.f32.mrf.mxu0 }
 0x642   :  { %v7462_v2 = vadd.f32 %v7461_v18, %v14376_v52  ;;  %9227 = vmatprep.mubr.f32.mxu1 %v12674_v17  ;;  %v12819_v20 = vadd.f32 %v7836_v6, %v7452_v29  ;;  %v14378_v17 = vld [vmem:[#allocation18_spill] sm:$0xff] }
 0x643   :  { %v7463_v11 = vpop.f32.mrf.mxu1  ;;  %v7838_v30 = vpop.f32.mrf.mxu0  ;;  %v5630_v18 = vld [vmem:[#allocation2 + $0x352] sm:$0xff] }
 0x645   :  { %v7466_v12 = vpop.f32.mrf.mxu1  ;;  %9228 = vmatmul.mubr.f32.gmra.mxu1 %v12680_v37  ;;  %v7841_v27 = vpop.f32.mrf.mxu0 }
 0x646   :  { %v7467_v14 = vadd.f32 %v7466_v12, %v14377_v44  ;;  %9230 = vmatprep.mubr.f32.mxu1 %v12686_v45  ;;  %v12824_v41 = vadd.f32 %v7841_v27, %v7457_v26  ;;  %v14379_v45 = vld [vmem:[#allocation19_spill] sm:$0xff] }
 0x647   :  { %v7468_v42 = vpop.f32.mrf.mxu1  ;;  %v7843_v5 = vpop.f32.mrf.mxu0 }
 0x649   :  { %v7471_v28 = vpop.f32.mrf.mxu1  ;;  %9231 = vmatmul.mubr.f32.gmra.mxu1 %v12692_v47  ;;  %v7846_v56 = vpop.f32.mrf.mxu0 }
 0x64a   :  { %v7472_v58 = vadd.f32 %v7471_v28, %v14378_v17  ;;  %9233 = vmatprep.mubr.f32.mxu1 %v12698_v19  ;;  %v12829_v0 = vadd.f32 %v7846_v56, %v7462_v2  ;;  %v14380_v19 = vld [vmem:[#allocation20_spill] sm:$0xff] }
 0x64b   :  { %v7473_v37 = vpop.f32.mrf.mxu1  ;;  %v7848_v29 = vpop.f32.mrf.mxu0 }
 0x64c   :  { %v14383_v37 = vld [vmem:[#allocation22_spill] sm:$0xff] }
 0x64d   :  { %v7476_v9 = vpop.f32.mrf.mxu1  ;;  %9234 = vmatmul.mubr.f32.gmra.mxu1 %v12704_v33  ;;  %v7851_v10 = vpop.f32.mrf.mxu0 }
 0x64e   :  { %v7477_v54 = vadd.f32 %v7476_v9, %v14379_v45  ;;  %9236 = vmatprep.mubr.f32.mxu1 %v12710_v22  ;;  %v12834_v31 = vadd.f32 %v7851_v10, %v7467_v14  ;;  %v14381_v22 = vld [vmem:[#allocation21_spill] sm:$0xff] }
 0x64f   :  { %v7478_v47 = vpop.f32.mrf.mxu1  ;;  %v7853_v26 = vpop.f32.mrf.mxu0 }
 0x651   :  { %v7481_v63 = vpop.f32.mrf.mxu1  ;;  %9237 = vmatmul.mubr.f32.gmra.mxu1 %v12716_v36  ;;  %v7856_v60 = vpop.f32.mrf.mxu0  ;;  %v14382_v36 = vld [vmem:[#allocation23_spill] sm:$0xff] }
 0x652   :  { %v7482_v43 = vadd.f32 %v7481_v63, %v14380_v19  ;;  %9239 = vmatprep.mubr.f32.mxu1 %v5629_v49  ;;  %v12838_v52 = vadd.f32 %v7856_v60, %v7472_v58  ;;  %v14384_v49 = vld [vmem:[#allocation25_spill] sm:$0xff] }
 0x653   :  { %v7483_v33 = vpop.f32.mrf.mxu1  ;;  %v7858_v2 = vpop.f32.mrf.mxu0 }
 0x654   :  { %v14385_v33 = vld [vmem:[#allocation24_spill] sm:$0xff] }
 0x655   :  { %v7486_v6 = vpop.f32.mrf.mxu1  ;;  %9240 = vmatmul.mubr.f32.gmra.mxu1 %v5630_v18  ;;  %v7861_v30 = vpop.f32.mrf.mxu0 }
 0x656   :  { %v7487_v11 = vadd.f32 %v7486_v6, %v14381_v22  ;;  %v12841_v12 = vadd.f32 %v7861_v30, %v7477_v54 }
 0x657   :  { %v7488_v44 = vpop.f32.mrf.mxu1  ;;  %v7863_v14 = vpop.f32.mrf.mxu0 }
 0x658   :  { %v14386_v14 = vld [vmem:[#allocation28_spill] sm:$0xff] }
 0x659   :  { %v7491_v27 = vpop.f32.mrf.mxu1  ;;  %v7866_v5 = vpop.f32.mrf.mxu0 }
 0x65a   :  { %v7492_v42 = vadd.f32 %v7491_v27, %v14382_v36  ;;  %v12844_v28 = vadd.f32 %v7866_v5, %v7482_v43 }
 0x65b   :  { %v7493_v17 = vpop.f32.mrf.mxu1  ;;  %v7868_v58 = vpop.f32.mrf.mxu0 }
 0x65d   :  { %v7496_v56 = vpop.f32.mrf.mxu1  ;;  %v7871_v9 = vpop.f32.mrf.mxu0 }
 0x65e   :  { %v7497_v29 = vadd.f32 %v7496_v56, %v14383_v37  ;;  %v12847_v45 = vadd.f32 %v7871_v9, %v7487_v11  ;;  %v14387_v56 = vld [vmem:[#allocation26_spill] sm:$0xff] }
 0x65f   :  { %v7498_v10 = vpop.f32.mrf.mxu1  ;;  %v7873_v47 = vpop.f32.mrf.mxu0 }
 0x661   :  { %v7501_v54 = vpop.f32.mrf.mxu1  ;;  %v7876_v63 = vpop.f32.mrf.mxu0 }
 0x662   :  { %v7502_v26 = vadd.f32 %v7501_v54, %v14384_v49  ;;  %v12850_v19 = vadd.f32 %v7876_v63, %v7492_v42  ;;  %v14388_v49 = vld [vmem:[#allocation27_spill] sm:$0xff] }
 0x663   :  { %v7503_v60 = vpop.f32.mrf.mxu1  ;;  %v7878_v18 = vpop.f32.mrf.mxu0 }
 0x665   :  { %v7506_v43 = vpop.f32.mrf.mxu1  ;;  %v7881_v6 = vpop.f32.mrf.mxu0 }
 0x666   :  { %v7507_v2 = vadd.f32 %v7506_v43, %v14385_v33  ;;  %v12853_v22 = vadd.f32 %v7881_v6, %v7497_v29  ;;  %v14389_v6 = vld [vmem:[#allocation30_spill] sm:$0xff] }
 0x667   :  { %v7508_v30 = vpop.f32.mrf.mxu1  ;;  %v7883_v44 = vpop.f32.mrf.mxu0 }
 0x669   :  { %v7511_v11 = vpop.f32.mrf.mxu1  ;;  %v7886_v36 = vpop.f32.mrf.mxu0 }
 0x66a   :  { %v7512_v27 = vadd.f32 %v7511_v11, %v14386_v14  ;;  %v12856_v5 = vadd.f32 %v7886_v36, %v7502_v26 }
 0x66b   :  { %v7513_v17 = vpop.f32.mrf.mxu1  ;;  %v7888_v58 = vpop.f32.mrf.mxu0 }
 0x66c   :  { %v14390_v17 = vld [vmem:[#allocation32_spill] sm:$0xff] }
 0x66d   :  { %v7516_v42 = vpop.f32.mrf.mxu1  ;;  %v7891_v9 = vpop.f32.mrf.mxu0 }
 0x66e   :  { %v7517_v37 = vadd.f32 %v7516_v42, %v14387_v56  ;;  %v12859_v10 = vadd.f32 %v7891_v9, %v7507_v2 }
 0x66f   :  { %v7518_v47 = vpop.f32.mrf.mxu1  ;;  %v7893_v54 = vpop.f32.mrf.mxu0 }
 0x670   :  { %v14392_v54 = vld [vmem:[#allocation31_spill] sm:$0xff] }
 0x671   :  { %v7521_v29 = vpop.f32.mrf.mxu1  ;;  %v7896_v60 = vpop.f32.mrf.mxu0 }
 0x672   :  { %v7522_v63 = vadd.f32 %v7521_v29, %v14388_v49  ;;  %v12862_v18 = vadd.f32 %v7896_v60, %v7512_v27 }
 0x673   :  { %v7523_v43 = vpop.f32.mrf.mxu1  ;;  %v7898_v33 = vpop.f32.mrf.mxu0 }
 0x675   :  { %v7526_v26 = vpop.f32.mrf.mxu1  ;;  %v7901_v44 = vpop.f32.mrf.mxu0 }
 0x676   :  { %v7527_v30 = vadd.f32 %v7526_v26, %v14389_v6  ;;  %v12865_v11 = vadd.f32 %v7901_v44, %v7517_v37  ;;  %v14393_v26 = vld [vmem:[#allocation34_spill] sm:$0xff] }
 0x677   :  { %v7528_v14 = vpop.f32.mrf.mxu1  ;;  %v7903_v36 = vpop.f32.mrf.mxu0 }
 0x679   :  { %v7531_v2 = vpop.f32.mrf.mxu1  ;;  %v7906_v42 = vpop.f32.mrf.mxu0 }
 0x67a   :  { %v7532_v58 = vadd.f32 %v7531_v2, %v14390_v17  ;;  %v12868_v56 = vadd.f32 %v7906_v42, %v7522_v63  ;;  %v14395_v17 = vld [vmem:[#allocation33_spill] sm:$0xff] }
 0x67b   :  { %v7533_v9 = vpop.f32.mrf.mxu1  ;;  %v7908_v47 = vpop.f32.mrf.mxu0 }
 0x67c   :  { %14391 = vst [vmem:[#allocation13_spill] sm:$0xff] %v12868_v56 }
 0x67d   :  { %v7536_v27 = vpop.f32.mrf.mxu1  ;;  %v7911_v49 = vpop.f32.mrf.mxu0 }
 0x67e   :  { %v7537_v29 = vadd.f32 %v7536_v27, %v14392_v54  ;;  %v12871_v60 = vadd.f32 %v7911_v49, %v7527_v30  ;;  %v14396_v49 = vld [vmem:[#allocation36_spill] sm:$0xff] }
 0x67f   :  { %v7538_v43 = vpop.f32.mrf.mxu1  ;;  %v7913_v33 = vpop.f32.mrf.mxu0 }
 0x681   :  { %v7541_v37 = vpop.f32.mrf.mxu1  ;;  %v7916_v44 = vpop.f32.mrf.mxu0 }
 0x682   :  { %v7542_v6 = vadd.f32 %v7541_v37, %v14393_v26  ;;  %v12874_v14 = vadd.f32 %v7916_v44, %v7532_v58  ;;  %v14398_v44 = vld [vmem:[#allocation35_spill] sm:$0xff] }
 0x683   :  { %v7543_v36 = vpop.f32.mrf.mxu1  ;;  %v7918_v2 = vpop.f32.mrf.mxu0 }
 0x684   :  { %14394 = vst [vmem:[#allocation16_spill] sm:$0xff] %v12874_v14 }
 0x685   :  { %v7546_v63 = vpop.f32.mrf.mxu1  ;;  %v7921_v9 = vpop.f32.mrf.mxu0 }
 0x686   :  { %v7547_v42 = vadd.f32 %v7546_v63, %v14395_v17  ;;  %v12877_v47 = vadd.f32 %v7921_v9, %v7537_v29 }
 0x687   :  { %v7548_v27 = vpop.f32.mrf.mxu1  ;;  %v7923_v54 = vpop.f32.mrf.mxu0 }
 0x689   :  { %v7551_v30 = vpop.f32.mrf.mxu1  ;;  %v7926_v33 = vpop.f32.mrf.mxu0 }
 0x68a   :  { %v7552_v43 = vadd.f32 %v7551_v30, %v14396_v49  ;;  %v12880_v56 = vadd.f32 %v7926_v33, %v7542_v6  ;;  %v14401_v33 = vld [vmem:[#allocation38_spill] sm:$0xff] }
 0x68b   :  { %v7553_v37 = vpop.f32.mrf.mxu1  ;;  %v7928_v26 = vpop.f32.mrf.mxu0 }
 0x68c   :  { %14397 = vst [vmem:[#allocation15_spill] sm:$0xff] %v12880_v56 }
 0x68d   :  { %v7556_v58 = vpop.f32.mrf.mxu1  ;;  %v7931_v2 = vpop.f32.mrf.mxu0 }
 0x68e   :  { %v7557_v36 = vadd.f32 %v7556_v58, %v14398_v44  ;;  %v12883_v14 = vadd.f32 %v7931_v2, %v7547_v42 }
 0x68f   :  { %v7558_v63 = vpop.f32.mrf.mxu1  ;;  %v7933_v17 = vpop.f32.mrf.mxu0 }
 0x690   :  { %14399 = vst [vmem:[#allocation17_spill] sm:$0xff] %v12883_v14  ;;  %v14403_v14 = vld [vmem:[#allocation6_spill] sm:$0xff] }
 0x691   :  { %v7561_v29 = vpop.f32.mrf.mxu1  ;;  %v7936_v27 = vpop.f32.mrf.mxu0 }
 0x692   :  { %v7562_v9 = vadd.f32 %v7561_v29, %v12635_v62  ;;  %v12886_v54 = vadd.f32 %v7936_v27, %v7552_v43  ;;  %v14405_v29 = vld [vmem:[#allocation4_spill] sm:$0xff] }
 0x693   :  { %v7563_v30 = vpop.f32.mrf.mxu1  ;;  %v7938_v49 = vpop.f32.mrf.mxu0 }
 0x694   :  { %14400 = vst [vmem:[#allocation18_spill] sm:$0xff] %v12886_v54 }
 0x695   :  { %v7566_v6 = vpop.f32.mrf.mxu1  ;;  %v7941_v26 = vpop.f32.mrf.mxu0 }
 0x696   :  { %v7567_v37 = vadd.f32 %v7566_v6, %v14401_v33  ;;  %v12889_v56 = vadd.f32 %v7941_v26, %v7557_v36 }
 0x697   :  { %v7568_v58 = vpop.f32.mrf.mxu1  ;;  %v7943_v44 = vpop.f32.mrf.mxu0 }
 0x698   :  { %v14410_v44 = vld [vmem:[#allocation5_spill] sm:$0xff] }
 0x699   :  { %v9148_v42 = vpop.f32.mrf.mxu1  ;;  %v7946_v2 = vpop.f32.mrf.mxu0 }
 0x69a   :  { %v12891_v63 = vadd.f32 %v7946_v2, %v7562_v9  ;;  %v12894_v62 = vadd.f32 %v9148_v42, %v14403_v14  ;;  %v14408_v14 = vld [vmem:[#allocation8_spill] sm:$0xff] }
 0x69b   :  { %v8021_v17 = vpop.f32.mrf.mxu1  ;;  %v7948_v43 = vpop.f32.mrf.mxu0 }
 0x69c   :  { %14402 = vst [vmem:[#allocation19_spill] sm:$0xff] %v12891_v63  ;;  %14404 = vst [vmem:[#allocation20_spill] sm:$0xff] %v12894_v62  ;;  %v12897_v27 = vadd.f32 %v8021_v17, %v14405_v29  ;;  %v8410_v9 = vmul.f32 %v12894_v62, %v12894_v62 }
 0x69d   :  { %v9151_v30 = vpop.f32.mrf.mxu1  ;;  %v7951_v36 = vpop.f32.mrf.mxu0 }
 0x69e   :  { %14406 = vst [vmem:[#allocation21_spill] sm:$0xff] %v12897_v27  ;;  %v8409_v49 = vmul.f32 %v12897_v27, %v12897_v27  ;;  %v12901_v6 = vadd.f32 %v7951_v36, %v7567_v37  ;;  %v8340_v26 = vadd.f32 %v12894_v62, %v12897_v27  ;;  %v12908_v58 = vadd.f32 %v9151_v30, %v14408_v14  ;;  %v14412_v36 = vld [vmem:[#allocation10_spill] sm:$0xff]  ;;  %v14416_v27 = vld [vmem:[#allocation12_spill] sm:$0xff] }
 0x69f   :  { %v8031_v33 = vpop.f32.mrf.mxu1  ;;  %v7953_v2 = vpop.f32.mrf.mxu0 }
 0x6a0   :  { %14407 = vst [vmem:[#allocation23_spill] sm:$0xff] %v12901_v6  ;;  %14409 = vst [vmem:[#allocation22_spill] sm:$0xff] %v12908_v58  ;;  %v12911_v42 = vadd.f32 %v8031_v33, %v14410_v44  ;;  %v8473_v43 = vadd.f32 %v8410_v9, %v8409_v49  ;;  %v8412_v62 = vmul.f32 %v12908_v58, %v12908_v58  ;;  %v14414_v33 = vld [vmem:[#allocation7_spill] sm:$0xff] }
 0x6a1   :  { %v9154_v17 = vpop.f32.mrf.mxu1 }
 0x6a2   :  { %14411 = vst [vmem:[#allocation25_spill] sm:$0xff] %v12911_v42  ;;  %v8341_v29 = vadd.f32 %v8340_v26, %v12911_v42  ;;  %v8411_v37 = vmul.f32 %v12911_v42, %v12911_v42  ;;  %v12917_v63 = vadd.f32 %v9154_v17, %v14412_v36 }
 0x6a3   :  { %v8041_v6 = vpop.f32.mrf.mxu1 }
 0x6a4   :  { %14413 = vst [vmem:[#allocation24_spill] sm:$0xff] %v12917_v63  ;;  %v8342_v30 = vadd.f32 %v8341_v29, %v12908_v58  ;;  %v8474_v14 = vadd.f32 %v8473_v43, %v8411_v37  ;;  %v12923_v44 = vadd.f32 %v8041_v6, %v14414_v33  ;;  %v8414_v17 = vmul.f32 %v12917_v63, %v12917_v63  ;;  %v14417_v29 = vld [vmem:[#allocation9_spill] sm:$0xff]  ;;  %v14419_v33 = vld [vmem:[#allocation14_spill] sm:$0xff] }
 0x6a5   :  { %v9157_v2 = vpop.f32.mrf.mxu1 }
 0x6a6   :  { %14415 = vst [vmem:[#allocation28_spill] sm:$0xff] %v12923_v44  ;;  %v8475_v49 = vadd.f32 %v8474_v14, %v8412_v62  ;;  %v8343_v9 = vadd.f32 %v8342_v30, %v12923_v44  ;;  %v8413_v26 = vmul.f32 %v12923_v44, %v12923_v44  ;;  %v12931_v54 = vadd.f32 %v9157_v2, %v14416_v27 }
 0x6a7   :  { %v8051_v36 = vpop.f32.mrf.mxu1 }
 0x6a8   :  { %v8476_v42 = vadd.f32 %v8475_v49, %v8413_v26  ;;  %v12934_v43 = vadd.f32 %v8051_v36, %v14417_v29  ;;  %v8344_v6 = vadd.f32 %v8343_v9, %v12917_v63  ;;  %v8416_v27 = vmul.f32 %v12931_v54, %v12931_v54  ;;  %v14420_v49 = vld [vmem:[#allocation11_spill] sm:$0xff] }
 0x6a9   :  { %v9160_v37 = vpop.f32.mrf.mxu1 }
 0x6aa   :  { %14418 = vst [vmem:[#allocation26_spill] sm:$0xff] %v12934_v43  ;;  %v8345_v62 = vadd.f32 %v8344_v6, %v12934_v43  ;;  %v8415_v30 = vmul.f32 %v12934_v43, %v12934_v43  ;;  %v8477_v14 = vadd.f32 %v8476_v42, %v8414_v17  ;;  %v12941_v44 = vadd.f32 %v9160_v37, %v14419_v33  ;;  %v14422_v43 = vld [vmem:[#allocation39_spill] sm:$0xff] }
 0x6ab   :  { %v8061_v58 = vpop.f32.mrf.mxu1 }
 0x6ac   :  { %v8478_v2 = vadd.f32 %v8477_v14, %v8415_v30  ;;  %v12946_v26 = vadd.f32 %v8061_v58, %v14420_v49  ;;  %v8346_v9 = vadd.f32 %v8345_v62, %v12931_v54  ;;  %v8418_v17 = vmul.f32 %v12941_v44, %v12941_v44  ;;  %v14423_v30 = vld [vmem:[#allocation37_spill] sm:$0xff] }
 0x6ad   :  { %v9163_v36 = vpop.f32.mrf.mxu1 }
 0x6ae   :  { %14421 = vst [vmem:[#allocation27_spill] sm:$0xff] %v12946_v26  ;;  %v8347_v29 = vadd.f32 %v8346_v9, %v12946_v26  ;;  %v8417_v6 = vmul.f32 %v12946_v26, %v12946_v26  ;;  %v8479_v42 = vadd.f32 %v8478_v2, %v8416_v27  ;;  %v12955_v63 = vadd.f32 %v9163_v36, %v14422_v43 }
 0x6af   :  { %v8071_v37 = vpop.f32.mrf.mxu1 }
 0x6b0   :  { %v8480_v33 = vadd.f32 %v8479_v42, %v8417_v6  ;;  %v12958_v58 = vadd.f32 %v8071_v37, %v14423_v30  ;;  %v8348_v62 = vadd.f32 %v8347_v29, %v12941_v44  ;;  %v8420_v43 = vmul.f32 %v12955_v63, %v12955_v63  ;;  %v14425_v6 = vld [vmem:[#allocation40_spill] sm:$0xff] }
 0x6b1   :  { %v9166_v14 = vpop.f32.mrf.mxu1 }
 0x6b2   :  { %14424 = vst [vmem:[#allocation30_spill] sm:$0xff] %v12958_v58  ;;  %v8349_v49 = vadd.f32 %v8348_v62, %v12958_v58  ;;  %v8419_v9 = vmul.f32 %v12958_v58, %v12958_v58  ;;  %v8481_v27 = vadd.f32 %v8480_v33, %v8418_v17  ;;  %v12965_v2 = vadd.f32 %v9166_v14, %v12723_v53 }
 0x6b3   :  { %v8081_v26 = vpop.f32.mrf.mxu1 }
 0x6b4   :  { %v8482_v36 = vadd.f32 %v8481_v27, %v8419_v9  ;;  %v12970_v42 = vadd.f32 %v8081_v26, %v14425_v6  ;;  %v8350_v29 = vadd.f32 %v8349_v49, %v12955_v63  ;;  %v8422_v53 = vmul.f32 %v12965_v2, %v12965_v2 }
 0x6b5   :  { %v9169_v37 = vpop.f32.mrf.mxu1 }
 0x6b6   :  { %v8351_v30 = vadd.f32 %v8350_v29, %v12970_v42  ;;  %v8421_v62 = vmul.f32 %v12970_v42, %v12970_v42  ;;  %v8483_v17 = vadd.f32 %v8482_v36, %v8420_v43  ;;  %v12979_v58 = vadd.f32 %v9169_v37, %v12731_v59 }
 0x6b7   :  { %v8091_v33 = vpop.f32.mrf.mxu1 }
 0x6b8   :  { %v8484_v14 = vadd.f32 %v8483_v17, %v8421_v62  ;;  %v12982_v26 = vadd.f32 %v8091_v33, %v12727_v25  ;;  %v8352_v49 = vadd.f32 %v8351_v30, %v12965_v2  ;;  %v8424_v59 = vmul.f32 %v12979_v58, %v12979_v58 }
 0x6b9   :  { %v9172_v9 = vpop.f32.mrf.mxu1 }
 0x6ba   :  { %v8353_v27 = vadd.f32 %v8352_v49, %v12982_v26  ;;  %v8423_v6 = vmul.f32 %v12982_v26, %v12982_v26  ;;  %v8485_v43 = vadd.f32 %v8484_v14, %v8422_v53  ;;  %v12989_v36 = vadd.f32 %v9172_v9, %v12737_v21 }
 0x6bb   :  { %v8101_v29 = vpop.f32.mrf.mxu1 }
 0x6bc   :  { %v8486_v37 = vadd.f32 %v8485_v43, %v8423_v6  ;;  %v12994_v25 = vadd.f32 %v8101_v29, %v12734_v50  ;;  %v8354_v30 = vadd.f32 %v8353_v27, %v12979_v58  ;;  %v8426_v21 = vmul.f32 %v12989_v36, %v12989_v36 }
 0x6bd   :  { %v9175_v62 = vpop.f32.mrf.mxu1 }
 0x6be   :  { %v8355_v17 = vadd.f32 %v8354_v30, %v12994_v25  ;;  %v8425_v33 = vmul.f32 %v12994_v25, %v12994_v25  ;;  %v8487_v53 = vadd.f32 %v8486_v37, %v8424_v59  ;;  %v13003_v9 = vadd.f32 %v9175_v62, %v12743_v57 }
 0x6bf   :  { %v8111_v14 = vpop.f32.mrf.mxu1 }
 0x6c0   :  { %v8488_v49 = vadd.f32 %v8487_v53, %v8425_v33  ;;  %v13006_v50 = vadd.f32 %v8111_v14, %v12740_v55  ;;  %v8356_v27 = vadd.f32 %v8355_v17, %v12989_v36  ;;  %v8428_v57 = vmul.f32 %v13003_v9, %v13003_v9 }
 0x6c1   :  { %v9178_v6 = vpop.f32.mrf.mxu1 }
 0x6c2   :  { %v8357_v43 = vadd.f32 %v8356_v27, %v13006_v50  ;;  %v8427_v29 = vmul.f32 %v13006_v50, %v13006_v50  ;;  %v8489_v59 = vadd.f32 %v8488_v49, %v8426_v21  ;;  %v13013_v37 = vadd.f32 %v9178_v6, %v12749_v46 }
 0x6c3   :  { %v8121_v30 = vpop.f32.mrf.mxu1 }
 0x6c4   :  { %v8490_v62 = vadd.f32 %v8489_v59, %v8427_v29  ;;  %v13018_v55 = vadd.f32 %v8121_v30, %v12746_v40  ;;  %v8358_v17 = vadd.f32 %v8357_v43, %v13003_v9  ;;  %v8430_v46 = vmul.f32 %v13013_v37, %v13013_v37 }
 0x6c5   :  { %v9181_v33 = vpop.f32.mrf.mxu1 }
 0x6c6   :  { %v8359_v53 = vadd.f32 %v8358_v17, %v13018_v55  ;;  %v8429_v14 = vmul.f32 %v13018_v55, %v13018_v55  ;;  %v8491_v21 = vadd.f32 %v8490_v62, %v8428_v57  ;;  %v13027_v6 = vadd.f32 %v9181_v33, %v12755_v23 }
 0x6c7   :  { %v8131_v49 = vpop.f32.mrf.mxu1 }
 0x6c8   :  { %v8492_v27 = vadd.f32 %v8491_v21, %v8429_v14  ;;  %v13030_v40 = vadd.f32 %v8131_v49, %v12752_v38  ;;  %v8360_v43 = vadd.f32 %v8359_v53, %v13013_v37  ;;  %v8432_v23 = vmul.f32 %v13027_v6, %v13027_v6 }
 0x6c9   :  { %v9184_v29 = vpop.f32.mrf.mxu1 }
 0x6ca   :  { %v8361_v59 = vadd.f32 %v8360_v43, %v13030_v40  ;;  %v8431_v30 = vmul.f32 %v13030_v40, %v13030_v40  ;;  %v8493_v57 = vadd.f32 %v8492_v27, %v8430_v46  ;;  %v13037_v62 = vadd.f32 %v9184_v29, %v12761_v48 }
 0x6cb   :  { %v8141_v17 = vpop.f32.mrf.mxu1 }
 0x6cc   :  { %v8494_v33 = vadd.f32 %v8493_v57, %v8431_v30  ;;  %v13042_v38 = vadd.f32 %v8141_v17, %v12758_v39  ;;  %v8362_v53 = vadd.f32 %v8361_v59, %v13027_v6  ;;  %v8434_v48 = vmul.f32 %v13037_v62, %v13037_v62 }
 0x6cd   :  { %v9187_v14 = vpop.f32.mrf.mxu1 }
 0x6ce   :  { %v8363_v21 = vadd.f32 %v8362_v53, %v13042_v38  ;;  %v8433_v49 = vmul.f32 %v13042_v38, %v13042_v38  ;;  %v8495_v46 = vadd.f32 %v8494_v33, %v8432_v23  ;;  %v13051_v29 = vadd.f32 %v9187_v14, %v12767_v24 }
 0x6cf   :  { %v8151_v27 = vpop.f32.mrf.mxu1 }
 0x6d0   :  { %v8496_v43 = vadd.f32 %v8495_v46, %v8433_v49  ;;  %v13054_v39 = vadd.f32 %v8151_v27, %v12764_v32  ;;  %v8364_v59 = vadd.f32 %v8363_v21, %v13037_v62  ;;  %v8436_v24 = vmul.f32 %v13051_v29, %v13051_v29 }
 0x6d1   :  { %v9190_v30 = vpop.f32.mrf.mxu1 }
 0x6d2   :  { %v8365_v57 = vadd.f32 %v8364_v59, %v13054_v39  ;;  %v8435_v17 = vmul.f32 %v13054_v39, %v13054_v39  ;;  %v8497_v23 = vadd.f32 %v8496_v43, %v8434_v48  ;;  %v13061_v33 = vadd.f32 %v9190_v30, %v12773_v8 }
 0x6d3   :  { %v8161_v53 = vpop.f32.mrf.mxu1 }
 0x6d4   :  { %v8498_v14 = vadd.f32 %v8497_v23, %v8435_v17  ;;  %v13066_v32 = vadd.f32 %v8161_v53, %v12770_v13  ;;  %v8366_v21 = vadd.f32 %v8365_v57, %v13051_v29  ;;  %v8438_v8 = vmul.f32 %v13061_v33, %v13061_v33 }
 0x6d5   :  { %v9193_v49 = vpop.f32.mrf.mxu1 }
 0x6d6   :  { %v8367_v46 = vadd.f32 %v8366_v21, %v13066_v32  ;;  %v8437_v27 = vmul.f32 %v13066_v32, %v13066_v32  ;;  %v8499_v48 = vadd.f32 %v8498_v14, %v8436_v24  ;;  %v13075_v30 = vadd.f32 %v9193_v49, %v12779_v4 }
 0x6d7   :  { %v8171_v43 = vpop.f32.mrf.mxu1 }
 0x6d8   :  { %v8500_v59 = vadd.f32 %v8499_v48, %v8437_v27  ;;  %v13078_v13 = vadd.f32 %v8171_v43, %v12776_v3  ;;  %v8368_v57 = vadd.f32 %v8367_v46, %v13061_v33  ;;  %v8440_v4 = vmul.f32 %v13075_v30, %v13075_v30 }
 0x6d9   :  { %v9196_v17 = vpop.f32.mrf.mxu1 }
 0x6da   :  { %v8369_v23 = vadd.f32 %v8368_v57, %v13078_v13  ;;  %v8439_v53 = vmul.f32 %v13078_v13, %v13078_v13  ;;  %v8501_v24 = vadd.f32 %v8500_v59, %v8438_v8  ;;  %v13085_v14 = vadd.f32 %v9196_v17, %v12785_v51 }
 0x6db   :  { %v8181_v21 = vpop.f32.mrf.mxu1 }
 0x6dc   :  { %v8502_v49 = vadd.f32 %v8501_v24, %v8439_v53  ;;  %v13090_v3 = vadd.f32 %v8181_v21, %v12782_v35  ;;  %v8370_v46 = vadd.f32 %v8369_v23, %v13075_v30  ;;  %v8442_v51 = vmul.f32 %v13085_v14, %v13085_v14 }
 0x6dd   :  { %v9199_v27 = vpop.f32.mrf.mxu1 }
 0x6de   :  { %v8371_v48 = vadd.f32 %v8370_v46, %v13090_v3  ;;  %v8441_v43 = vmul.f32 %v13090_v3, %v13090_v3  ;;  %v8503_v8 = vadd.f32 %v8502_v49, %v8440_v4  ;;  %v13099_v17 = vadd.f32 %v9199_v27, %v12794_v34 }
 0x6df   :  { %v8191_v59 = vpop.f32.mrf.mxu1 }
 0x6e0   :  { %v8504_v57 = vadd.f32 %v8503_v8, %v8441_v43  ;;  %v13102_v35 = vadd.f32 %v8191_v59, %v12789_v7  ;;  %v8372_v23 = vadd.f32 %v8371_v48, %v13085_v14  ;;  %v8444_v34 = vmul.f32 %v13099_v17, %v13099_v17 }
 0x6e1   :  { %v9202_v53 = vpop.f32.mrf.mxu1 }
 0x6e2   :  { %v8373_v24 = vadd.f32 %v8372_v23, %v13102_v35  ;;  %v8443_v21 = vmul.f32 %v13102_v35, %v13102_v35  ;;  %v8505_v4 = vadd.f32 %v8504_v57, %v8442_v51  ;;  %v13109_v49 = vadd.f32 %v9202_v53, %v12804_v1 }
 0x6e3   :  { %v8201_v46 = vpop.f32.mrf.mxu1 }
 0x6e4   :  { %v8506_v27 = vadd.f32 %v8505_v4, %v8443_v21  ;;  %v13114_v7 = vadd.f32 %v8201_v46, %v12799_v61  ;;  %v8374_v48 = vadd.f32 %v8373_v24, %v13099_v17  ;;  %v8446_v1 = vmul.f32 %v13109_v49, %v13109_v49 }
 0x6e5   :  { %v9205_v43 = vpop.f32.mrf.mxu1 }
 0x6e6   :  { %v8375_v8 = vadd.f32 %v8374_v48, %v13114_v7  ;;  %v8445_v59 = vmul.f32 %v13114_v7, %v13114_v7  ;;  %v8507_v51 = vadd.f32 %v8506_v27, %v8444_v34  ;;  %v13123_v53 = vadd.f32 %v9205_v43, %v12814_v15 }
 0x6e7   :  { %v8211_v57 = vpop.f32.mrf.mxu1 }
 0x6e8   :  { %v8508_v23 = vadd.f32 %v8507_v51, %v8445_v59  ;;  %v13126_v61 = vadd.f32 %v8211_v57, %v12809_v16  ;;  %v8376_v24 = vadd.f32 %v8375_v8, %v13109_v49  ;;  %v8448_v15 = vmul.f32 %v13123_v53, %v13123_v53 }
 0x6e9   :  { %v9208_v21 = vpop.f32.mrf.mxu1 }
 0x6ea   :  { %v8377_v4 = vadd.f32 %v8376_v24, %v13126_v61  ;;  %v8447_v46 = vmul.f32 %v13126_v61, %v13126_v61  ;;  %v8509_v34 = vadd.f32 %v8508_v23, %v8446_v1  ;;  %v13133_v27 = vadd.f32 %v9208_v21, %v12824_v41 }
 0x6eb   :  { %v8221_v48 = vpop.f32.mrf.mxu1 }
 0x6ec   :  { %v8510_v43 = vadd.f32 %v8509_v34, %v8447_v46  ;;  %v13138_v16 = vadd.f32 %v8221_v48, %v12819_v20  ;;  %v8378_v8 = vadd.f32 %v8377_v4, %v13123_v53  ;;  %v8450_v41 = vmul.f32 %v13133_v27, %v13133_v27 }
 0x6ed   :  { %v9211_v59 = vpop.f32.mrf.mxu1 }
 0x6ee   :  { %v8379_v51 = vadd.f32 %v8378_v8, %v13138_v16  ;;  %v8449_v57 = vmul.f32 %v13138_v16, %v13138_v16  ;;  %v8511_v1 = vadd.f32 %v8510_v43, %v8448_v15  ;;  %v13147_v21 = vadd.f32 %v9211_v59, %v12834_v31 }
 0x6ef   :  { %v8231_v23 = vpop.f32.mrf.mxu1 }
 0x6f0   :  { %v8512_v24 = vadd.f32 %v8511_v1, %v8449_v57  ;;  %v13150_v20 = vadd.f32 %v8231_v23, %v12829_v0  ;;  %v8380_v4 = vadd.f32 %v8379_v51, %v13133_v27  ;;  %v8452_v31 = vmul.f32 %v13147_v21, %v13147_v21 }
 0x6f1   :  { %v9214_v46 = vpop.f32.mrf.mxu1 }
 0x6f2   :  { %v8381_v34 = vadd.f32 %v8380_v4, %v13150_v20  ;;  %v8451_v48 = vmul.f32 %v13150_v20, %v13150_v20  ;;  %v8513_v15 = vadd.f32 %v8512_v24, %v8450_v41  ;;  %v13157_v43 = vadd.f32 %v9214_v46, %v12841_v12 }
 0x6f3   :  { %v8241_v8 = vpop.f32.mrf.mxu1 }
 0x6f4   :  { %v8514_v59 = vadd.f32 %v8513_v15, %v8451_v48  ;;  %v13162_v0 = vadd.f32 %v8241_v8, %v12838_v52  ;;  %v8382_v51 = vadd.f32 %v8381_v34, %v13147_v21  ;;  %v8454_v12 = vmul.f32 %v13157_v43, %v13157_v43 }
 0x6f5   :  { %v9217_v57 = vpop.f32.mrf.mxu1 }
 0x6f6   :  { %v8383_v1 = vadd.f32 %v8382_v51, %v13162_v0  ;;  %v8453_v23 = vmul.f32 %v13162_v0, %v13162_v0  ;;  %v8515_v41 = vadd.f32 %v8514_v59, %v8452_v31  ;;  %v13171_v46 = vadd.f32 %v9217_v57, %v12847_v45 }
 0x6f7   :  { %v8251_v24 = vpop.f32.mrf.mxu1 }
 0x6f8   :  { %v8516_v4 = vadd.f32 %v8515_v41, %v8453_v23  ;;  %v13174_v52 = vadd.f32 %v8251_v24, %v12844_v28  ;;  %v8384_v34 = vadd.f32 %v8383_v1, %v13157_v43  ;;  %v8456_v45 = vmul.f32 %v13171_v46, %v13171_v46 }
 0x6f9   :  { %v9220_v48 = vpop.f32.mrf.mxu1 }
 0x6fa   :  { %v8385_v15 = vadd.f32 %v8384_v34, %v13174_v52  ;;  %v8455_v8 = vmul.f32 %v13174_v52, %v13174_v52  ;;  %v8517_v31 = vadd.f32 %v8516_v4, %v8454_v12  ;;  %v13181_v59 = vadd.f32 %v9220_v48, %v12853_v22 }
 0x6fb   :  { %v8261_v51 = vpop.f32.mrf.mxu1 }
 0x6fc   :  { %14426 = vst [vmem:[#allocation32_spill] sm:$0xff] %v13181_v59  ;;  %v8518_v57 = vadd.f32 %v8517_v31, %v8455_v8  ;;  %v13186_v28 = vadd.f32 %v8261_v51, %v12850_v19  ;;  %v8386_v1 = vadd.f32 %v8385_v15, %v13171_v46  ;;  %v8458_v22 = vmul.f32 %v13181_v59, %v13181_v59 }
 0x6fd   :  { %v9223_v23 = vpop.f32.mrf.mxu1 }
 0x6fe   :  { %14427 = vst [vmem:[#allocation31_spill] sm:$0xff] %v13186_v28  ;;  %v8387_v41 = vadd.f32 %v8386_v1, %v13186_v28  ;;  %v8457_v24 = vmul.f32 %v13186_v28, %v13186_v28  ;;  %v8519_v12 = vadd.f32 %v8518_v57, %v8456_v45  ;;  %v13195_v48 = vadd.f32 %v9223_v23, %v12859_v10 }
 0x6ff   :  { %v8271_v4 = vpop.f32.mrf.mxu1 }
 0x700   :  { %v8520_v34 = vadd.f32 %v8519_v12, %v8457_v24  ;;  %14428 = vst [vmem:[#allocation34_spill] sm:$0xff] %v13195_v48  ;;  %v13198_v19 = vadd.f32 %v8271_v4, %v12856_v5  ;;  %v8388_v15 = vadd.f32 %v8387_v41, %v13181_v59  ;;  %v8460_v10 = vmul.f32 %v13195_v48, %v13195_v48 }
 0x701   :  { %v9226_v8 = vpop.f32.mrf.mxu1 }
 0x702   :  { %14429 = vst [vmem:[#allocation33_spill] sm:$0xff] %v13198_v19  ;;  %v8389_v31 = vadd.f32 %v8388_v15, %v13198_v19  ;;  %v8459_v51 = vmul.f32 %v13198_v19, %v13198_v19  ;;  %v8521_v45 = vadd.f32 %v8520_v34, %v8458_v22  ;;  %v13205_v57 = vadd.f32 %v9226_v8, %v12865_v11 }
 0x703   :  { %v8281_v1 = vpop.f32.mrf.mxu1 }
 0x704   :  { %14430 = vst [vmem:[#allocation36_spill] sm:$0xff] %v13205_v57  ;;  %v8522_v23 = vadd.f32 %v8521_v45, %v8459_v51  ;;  %v13210_v5 = vadd.f32 %v8281_v1, %v12862_v18  ;;  %v8390_v41 = vadd.f32 %v8389_v31, %v13195_v48  ;;  %v8462_v11 = vmul.f32 %v13205_v57, %v13205_v57  ;;  %v14433_v51 = vld [vmem:[#allocation13_spill] sm:$0xff] }
 0x705   :  { %v9229_v24 = vpop.f32.mrf.mxu1 }
 0x706   :  { %14431 = vst [vmem:[#allocation35_spill] sm:$0xff] %v13210_v5  ;;  %v8391_v12 = vadd.f32 %v8390_v41, %v13210_v5  ;;  %v8461_v4 = vmul.f32 %v13210_v5, %v13210_v5  ;;  %v8523_v22 = vadd.f32 %v8522_v23, %v8460_v10  ;;  %v13219_v8 = vadd.f32 %v9229_v24, %v12871_v60 }
 0x707   :  { %v8291_v34 = vpop.f32.mrf.mxu1 }
 0x708   :  { %v8524_v15 = vadd.f32 %v8523_v22, %v8461_v4  ;;  %14432 = vst [vmem:[#allocation38_spill] sm:$0xff] %v13219_v8  ;;  %v13222_v18 = vadd.f32 %v8291_v34, %v14433_v51  ;;  %v8392_v31 = vadd.f32 %v8391_v12, %v13205_v57  ;;  %v8464_v60 = vmul.f32 %v13219_v8, %v13219_v8  ;;  %v14436_v4 = vld [vmem:[#allocation16_spill] sm:$0xff] }
 0x709   :  { %v9232_v45 = vpop.f32.mrf.mxu1 }
 0x70a   :  { %14434 = vst [vmem:[#allocation6_spill] sm:$0xff] %v13222_v18  ;;  %v8393_v1 = vadd.f32 %v8392_v31, %v13222_v18  ;;  %v8463_v41 = vmul.f32 %v13222_v18, %v13222_v18  ;;  %v8525_v10 = vadd.f32 %v8524_v15, %v8462_v11  ;;  %v13229_v23 = vadd.f32 %v9232_v45, %v12877_v47  ;;  %v14438_v18 = vld [vmem:[#allocation17_spill] sm:$0xff] }
 0x70b   :  { %v8301_v5 = vpop.f32.mrf.mxu1 }
 0x70c   :  { %14435 = vst [vmem:[#allocation4_spill] sm:$0xff] %v13229_v23  ;;  %v8526_v24 = vadd.f32 %v8525_v10, %v8463_v41  ;;  %v13234_v22 = vadd.f32 %v8301_v5, %v14436_v4  ;;  %v8394_v12 = vadd.f32 %v8393_v1, %v13219_v8  ;;  %v8466_v47 = vmul.f32 %v13229_v23, %v13229_v23  ;;  %v14440_v41 = vld [vmem:[#allocation15_spill] sm:$0xff] }
 0x70d   :  { %v9235_v34 = vpop.f32.mrf.mxu1 }
 0x70e   :  { %14437 = vst [vmem:[#allocation8_spill] sm:$0xff] %v13234_v22  ;;  %v8395_v51 = vadd.f32 %v8394_v12, %v13234_v22  ;;  %v8465_v31 = vmul.f32 %v13234_v22, %v13234_v22  ;;  %v8527_v11 = vadd.f32 %v8526_v24, %v8464_v60  ;;  %v13243_v57 = vadd.f32 %v9235_v34, %v14438_v18 }
 0x70f   :  { %v8311_v15 = vpop.f32.mrf.mxu1 }
 0x710   :  { %v8528_v45 = vadd.f32 %v8527_v11, %v8465_v31  ;;  %14439 = vst [vmem:[#allocation5_spill] sm:$0xff] %v13243_v57  ;;  %v13246_v5 = vadd.f32 %v8311_v15, %v14440_v41  ;;  %v8396_v1 = vadd.f32 %v8395_v51, %v13229_v23  ;;  %v8468_v18 = vmul.f32 %v13243_v57, %v13243_v57  ;;  %v14443_v31 = vld [vmem:[#allocation18_spill] sm:$0xff] }
 0x711   :  { %v9238_v10 = vpop.f32.mrf.mxu1 }
 0x712   :  { %14441 = vst [vmem:[#allocation10_spill] sm:$0xff] %v13246_v5  ;;  %v8397_v4 = vadd.f32 %v8396_v1, %v13246_v5  ;;  %v8467_v12 = vmul.f32 %v13246_v5, %v13246_v5  ;;  %v8529_v60 = vadd.f32 %v8528_v45, %v8466_v47  ;;  %v13253_v24 = vadd.f32 %v9238_v10, %v12889_v56  ;;  %v14445_v5 = vld [vmem:[#allocation23_spill] sm:$0xff] }
 0x713   :  { %v8321_v22 = vpop.f32.mrf.mxu1 }
 0x714   :  { %14442 = vst [vmem:[#allocation7_spill] sm:$0xff] %v13253_v24  ;;  %v8530_v34 = vadd.f32 %v8529_v60, %v8467_v12  ;;  %v13258_v11 = vadd.f32 %v8321_v22, %v14443_v31  ;;  %v8398_v51 = vadd.f32 %v8397_v4, %v13243_v57  ;;  %v8470_v56 = vmul.f32 %v13253_v24, %v13253_v24  ;;  %v14446_v12 = vld [vmem:[#allocation19_spill] sm:$0xff] }
 0x715   :  { %v9241_v15 = vpop.f32.mrf.mxu1 }
 0x716   :  { %14444 = vst [vmem:[#allocation12_spill] sm:$0xff] %v13258_v11  ;;  %v8399_v41 = vadd.f32 %v8398_v51, %v13258_v11  ;;  %v8469_v1 = vmul.f32 %v13258_v11, %v13258_v11  ;;  %v8531_v47 = vadd.f32 %v8530_v34, %v8468_v18  ;;  %v13267_v23 = vadd.f32 %v9241_v15, %v14445_v5 }
 0x717   :  { %v8331_v45 = vpop.f32.mrf.mxu1 }
 0x718   :  { %v8532_v10 = vadd.f32 %v8531_v47, %v8469_v1  ;;  %v13270_v22 = vadd.f32 %v8331_v45, %v14446_v12  ;;  %v8400_v4 = vadd.f32 %v8399_v41, %v13253_v24  ;;  %v8472_v18 = vmul.f32 %v13267_v23, %v13267_v23 }
 0x71a   :  { %14447 = vst [vmem:[#allocation9_spill] sm:$0xff] %v13270_v22  ;;  %v8401_v60 = vadd.f32 %v8400_v4, %v13270_v22  ;;  %v8471_v31 = vmul.f32 %v13270_v22, %v13270_v22  ;;  %v8533_v51 = vadd.f32 %v8532_v10, %v8470_v56 }
 0x71c   :  { %v8402_v34 = vadd.f32 %v8401_v60, %v13267_v23  ;;  %v8534_v1 = vadd.f32 %v8533_v51, %v8471_v31  ;;  %v8547_v31 = vld [vmem:[%s14052_s5] sm:$0x1] }
 0x71e   :  { %v8403_v47 = vrot.slane %v8402_v34, 4  ;;  %v8535_v5 = vadd.f32 %v8534_v1, %v8472_v18  ;;  %v13285_v18 = vld [vmem:[%s14053_s6] sm:$0x1] }
 0x720   :  { %v8404_v15 = vadd.f32 %v8403_v47, %v8402_v34  ;;  %v8536_v57 = vrot.slane %v8535_v5, 4  ;;  %v14451_v34 = vld [vmem:[#allocation25_spill] sm:$0xff]  ;;  %v14452_v47 = vld [vmem:[#allocation22_spill] sm:$0xff] }
 0x722   :  { %v8405_v45 = vrot.slane %v8404_v15, 2  ;;  %v8537_v12 = vadd.f32 %v8536_v57, %v8535_v5 }
 0x724   :  { %v8406_v8 = vadd.f32 %v8405_v45, %v8404_v15  ;;  %v8538_v41 = vrot.slane %v8537_v12, 2  ;;  %v14453_v15 = vld [vmem:[#allocation28_spill] sm:$0xff] }
 0x726   :  { %v8407_v24 = vrot.slane %v8406_v8, 1  ;;  %v8539_v4 = vadd.f32 %v8538_v41, %v8537_v12  ;;  %v14454_v12 = vld [vmem:[#allocation24_spill] sm:$0xff] }
 0x728   :  { %v8408_v11 = vadd.f32 %v8407_v24, %v8406_v8  ;;  %v8540_v48 = vrot.slane %v8539_v4, 1 }
 0x72a   :  { %v8541_v22 = vadd.f32 %v8540_v48, %v8539_v4  ;;  %v8542_v56 = vmul.f32 0.001953125, %v8408_v11  ;;  %v14448_v48 = vld [vmem:[#allocation29_spill] sm:$0xff]  ;;  %v14450_v11 = vld [vmem:[#allocation20_spill] sm:$0xff]  ;;  %v14455_v4 = vld [vmem:[#allocation26_spill] sm:$0xff] }
 0x72c   :  { %v8543_v10 = vmul.f32 0.001953125, %v8541_v22  ;;  %v8544_v19 = vmul.f32 %v8542_v56, %v8542_v56 }
 0x72e   :  { %v8545_v59 = vsub.f32 %v8543_v10, %v8544_v19 }
 0x730   :  { %v8546_v28 = vmax.f32 %v8545_v59, 0.0 }
 0x732   :  { %v8548_v60 = vadd.f32 1e-05, %v8546_v28  ;;  %v14449_v28 = vld [vmem:[#allocation21_spill] sm:$0xff] }
 0x734   :  { %9245 = vrsqrt.f32 %v8548_v60  ;;  %v14456_v60 = vld [vmem:[#allocation27_spill] sm:$0xff] }
 0x741   :  { %v9246_v51 = vpop.eup %9245 }
 0x742   :  { %v8550_v57 = vmul.f32 %v9246_v51, %v8547_v31 }
 0x744   :  { %v13287_v8 = vmul.f32 %v8550_v57, %v8542_v56  ;;  %v13290_v24 = vrot.slane %v8550_v57, %v14448_v48  ;;  %v14457_v57 = vld [vmem:[#allocation30_spill] sm:$0xff] }
 0x746   :  { %v8553_v59 = vsub.f32 %v13285_v18, %v13287_v8  ;;  %v13296_v19 = vmul.f32 %v13290_v24, %v14449_v28  ;;  %v13300_v22 = vmul.f32 %v13290_v24, %v14450_v11  ;;  %v13304_v1 = vmul.f32 %v13290_v24, %v14451_v34  ;;  %v14459_v34 = vld [vmem:[#allocation31_spill] sm:$0xff] }
 0x747   :  { %v13308_v5 = vmul.f32 %v13290_v24, %v14452_v47  ;;  %v13312_v45 = vmul.f32 %v13290_v24, %v14453_v15  ;;  %v13316_v41 = vmul.f32 %v13290_v24, %v14454_v12  ;;  %v13320_v56 = vmul.f32 %v13290_v24, %v14455_v4  ;;  %v14461_v47 = vld [vmem:[#allocation32_spill] sm:$0xff]  ;;  %v14463_v15 = vld [vmem:[#allocation33_spill] sm:$0xff]  ;;  %v14465_v12 = vld [vmem:[#allocation34_spill] sm:$0xff] }
 0x748   :  { %v13324_v10 = vmul.f32 %v13290_v24, %v12931_v54  ;;  %v13328_v31 = vmul.f32 %v13290_v24, %v14456_v60  ;;  %v13332_v51 = vmul.f32 %v13290_v24, %v12941_v44  ;;  %v13336_v18 = vmul.f32 %v13290_v24, %v14457_v57  ;;  %v14467_v4 = vld [vmem:[#allocation35_spill] sm:$0xff]  ;;  %v14469_v60 = vld [vmem:[#allocation36_spill] sm:$0xff] }
 0x749   :  { %v13340_v8 = vmul.f32 %v13290_v24, %v12955_v63  ;;  %v13344_v54 = vmul.f32 %v13290_v24, %v12970_v42  ;;  %v13348_v28 = vmul.f32 %v13290_v24, %v12965_v2  ;;  %v13352_v44 = vmul.f32 %v13290_v24, %v12982_v26 }
 0x74a   :  { %v13356_v11 = vmul.f32 %v13290_v24, %v12979_v58  ;;  %v13360_v63 = vmul.f32 %v13290_v24, %v12994_v25  ;;  %v13364_v42 = vmul.f32 %v13290_v24, %v12989_v36  ;;  %v13368_v2 = vmul.f32 %v13290_v24, %v13006_v50 }
 0x74b   :  { %v13372_v26 = vmul.f32 %v13290_v24, %v13003_v9  ;;  %v13376_v58 = vmul.f32 %v13290_v24, %v13018_v55  ;;  %v13380_v25 = vmul.f32 %v13290_v24, %v13013_v37  ;;  %v13384_v36 = vmul.f32 %v13290_v24, %v13030_v40 }
 0x74c   :  { %v13388_v50 = vmul.f32 %v13290_v24, %v13027_v6  ;;  %v13392_v9 = vmul.f32 %v13290_v24, %v13042_v38  ;;  %v13396_v55 = vmul.f32 %v13290_v24, %v13037_v62  ;;  %v13400_v37 = vmul.f32 %v13290_v24, %v13054_v39 }
 0x74d   :  { %v13404_v40 = vmul.f32 %v13290_v24, %v13051_v29  ;;  %v13408_v6 = vmul.f32 %v13290_v24, %v13066_v32  ;;  %v13412_v38 = vmul.f32 %v13290_v24, %v13061_v33  ;;  %v13416_v62 = vmul.f32 %v13290_v24, %v13078_v13 }
 0x74e   :  { %v13420_v39 = vmul.f32 %v13290_v24, %v13075_v30  ;;  %v13424_v29 = vmul.f32 %v13290_v24, %v13090_v3  ;;  %v13428_v32 = vmul.f32 %v13290_v24, %v13085_v14  ;;  %v13432_v33 = vmul.f32 %v13290_v24, %v13102_v35 }
 0x74f   :  { %v13436_v13 = vmul.f32 %v13290_v24, %v13099_v17  ;;  %v13440_v30 = vmul.f32 %v13290_v24, %v13114_v7  ;;  %v13444_v3 = vmul.f32 %v13290_v24, %v13109_v49  ;;  %v13448_v14 = vmul.f32 %v13290_v24, %v13126_v61 }
 0x750   :  { %v13452_v35 = vmul.f32 %v13290_v24, %v13123_v53  ;;  %v13456_v17 = vmul.f32 %v13290_v24, %v13138_v16  ;;  %v13460_v7 = vmul.f32 %v13290_v24, %v13133_v27  ;;  %v13464_v49 = vmul.f32 %v13290_v24, %v13150_v20 }
 0x751   :  { %v13468_v61 = vmul.f32 %v13290_v24, %v13147_v21  ;;  %v13472_v53 = vmul.f32 %v13290_v24, %v13162_v0  ;;  %v13476_v16 = vmul.f32 %v13290_v24, %v13157_v43  ;;  %v13480_v27 = vmul.f32 %v13290_v24, %v13174_v52 }
 0x752   :  { %v13484_v20 = vmul.f32 %v13290_v24, %v13171_v46  ;;  %v13488_v21 = vmul.f32 %v13290_v24, %v14459_v34  ;;  %v13492_v0 = vmul.f32 %v13290_v24, %v14461_v47  ;;  %v13496_v43 = vmul.f32 %v13290_v24, %v14463_v15  ;;  %v14471_v34 = vld [vmem:[#allocation12_spill] sm:$0xff] }
 0x753   :  { %v13500_v52 = vmul.f32 %v13290_v24, %v14465_v12  ;;  %v13504_v46 = vmul.f32 %v13290_v24, %v14467_v4  ;;  %v13508_v57 = vmul.f32 %v13290_v24, %v14469_v60  ;;  %v13512_v47 = vmul.f32 %v13290_v24, %v14471_v34 }
 0x754   :  { %14458 = vst [vmem:[#allocation14_spill] sm:$0xff] %v13484_v20  ;;  %14460 = vst [vmem:[#allocation11_spill] sm:$0xff] %v13488_v21  ;;  %v13528_v60 = vmul.f32 %v13290_v24, %v13267_v23  ;;  %v13531_v34 = vrot.slane %v8553_v59, %v14448_v48 }
 0x755   :  { %14462 = vst [vmem:[#allocation39_spill] sm:$0xff] %v13492_v0  ;;  %14464 = vst [vmem:[#allocation37_spill] sm:$0xff] %v13496_v43  ;;  %v14473_v0 = vld [vmem:[#allocation7_spill] sm:$0xff]  ;;  %v14475_v43 = vld [vmem:[#allocation9_spill] sm:$0xff] }
 0x756   :  { %14466 = vst [vmem:[#allocation40_spill] sm:$0xff] %v13500_v52  ;;  %14468 = vst [vmem:[#allocation13_spill] sm:$0xff] %v13504_v46  ;;  %v13516_v15 = vmul.f32 %v13290_v24, %v14473_v0  ;;  %v13520_v12 = vmul.f32 %v13290_v24, %v14475_v43  ;;  %v14477_v52 = vld [vmem:[#allocation6_spill] sm:$0xff]  ;;  %v13547_v23 = vadd.f32 %v13531_v34, %v13300_v22 }
 0x757   :  { %14470 = vst [vmem:[#allocation16_spill] sm:$0xff] %v13508_v57  ;;  %14472 = vst [vmem:[#allocation17_spill] sm:$0xff] %v13512_v47  ;;  %v8614_v4 = vmul.f32 %v13290_v24, %v14477_v52  ;;  %v14478_v46 = vld [vmem:[#allocation38_spill] sm:$0xff]  ;;  %v14479_v47 = vld [vmem:[#allocation8_spill] sm:$0xff]  ;;  %v13551_v48 = vadd.f32 %v13531_v34, %v13304_v1  ;;  %v13555_v59 = vadd.f32 %v13531_v34, %v13308_v5 }
 0x758   :  { %14474 = vst [vmem:[#allocation15_spill] sm:$0xff] %v13516_v15  ;;  %14476 = vst [vmem:[#allocation18_spill] sm:$0xff] %v13520_v12  ;;  %v8615_v21 = vmul.f32 %v13290_v24, %v14478_v46  ;;  %v8616_v0 = vmul.f32 %v13290_v24, %v14479_v47  ;;  %v14480_v15 = vld [vmem:[#allocation4_spill] sm:$0xff]  ;;  %v14481_v12 = vld [vmem:[#allocation10_spill] sm:$0xff]  ;;  %v13543_v46 = vadd.f32 %v13531_v34, %v13296_v19 }
 0x759   :  { %v8617_v43 = vmul.f32 %v13290_v24, %v14480_v15  ;;  %v8618_v57 = vmul.f32 %v13290_v24, %v14481_v12  ;;  %v14482_v52 = vld [vmem:[#allocation5_spill] sm:$0xff]  ;;  %v13559_v47 = vadd.f32 %v13531_v34, %v13312_v45  ;;  %v13567_v19 = vadd.f32 %v13531_v34, %v13320_v56 }
 0x75a   :  { %v8619_v20 = vmul.f32 %v13290_v24, %v14482_v52  ;;  %v13563_v24 = vadd.f32 %v13531_v34, %v13316_v41  ;;  %v13571_v22 = vadd.f32 %v13531_v34, %v13324_v10  ;;  %v13575_v1 = vadd.f32 %v13531_v34, %v13328_v31 }
 0x75b   :  { %v13579_v5 = vadd.f32 %v13531_v34, %v13332_v51  ;;  %v13583_v45 = vadd.f32 %v13531_v34, %v13336_v18  ;;  %v13587_v41 = vadd.f32 %v13531_v34, %v13340_v8  ;;  %v13591_v56 = vadd.f32 %v13531_v34, %v13344_v54  ;;  %v14487_v15 = vld [vmem:[#allocation11_spill] sm:$0xff] }
 0x75c   :  { %v13595_v10 = vadd.f32 %v13531_v34, %v13348_v28  ;;  %v13599_v31 = vadd.f32 %v13531_v34, %v13352_v44  ;;  %v13603_v51 = vadd.f32 %v13531_v34, %v13356_v11  ;;  %v13607_v18 = vadd.f32 %v13531_v34, %v13360_v63  ;;  %v14489_v12 = vld [vmem:[#allocation39_spill] sm:$0xff]  ;;  %v14490_v52 = vld [vmem:[#allocation37_spill] sm:$0xff] }
 0x75d   :  { %v13611_v8 = vadd.f32 %v13531_v34, %v13364_v42  ;;  %v13615_v54 = vadd.f32 %v13531_v34, %v13368_v2  ;;  %v13619_v28 = vadd.f32 %v13531_v34, %v13372_v26  ;;  %v13623_v44 = vadd.f32 %v13531_v34, %v13376_v58 }
 0x75e   :  { %v13627_v11 = vadd.f32 %v13531_v34, %v13380_v25  ;;  %v13631_v63 = vadd.f32 %v13531_v34, %v13384_v36  ;;  %v13635_v42 = vadd.f32 %v13531_v34, %v13388_v50  ;;  %v13639_v2 = vadd.f32 %v13531_v34, %v13392_v9 }
 0x75f   :  { %v13643_v26 = vadd.f32 %v13531_v34, %v13396_v55  ;;  %v13647_v58 = vadd.f32 %v13531_v34, %v13400_v37  ;;  %v13651_v25 = vadd.f32 %v13531_v34, %v13404_v40  ;;  %v13655_v36 = vadd.f32 %v13531_v34, %v13408_v6 }
 0x760   :  { %v13659_v50 = vadd.f32 %v13531_v34, %v13412_v38  ;;  %v13663_v9 = vadd.f32 %v13531_v34, %v13416_v62  ;;  %v13667_v55 = vadd.f32 %v13531_v34, %v13420_v39  ;;  %v13671_v37 = vadd.f32 %v13531_v34, %v13424_v29 }
 0x761   :  { %v13675_v40 = vadd.f32 %v13531_v34, %v13428_v32  ;;  %v13679_v6 = vadd.f32 %v13531_v34, %v13432_v33  ;;  %v13683_v38 = vadd.f32 %v13531_v34, %v13436_v13  ;;  %v13687_v62 = vadd.f32 %v13531_v34, %v13440_v30 }
 0x762   :  { %v13691_v39 = vadd.f32 %v13531_v34, %v13444_v3  ;;  %v13695_v29 = vadd.f32 %v13531_v34, %v13448_v14  ;;  %v13699_v32 = vadd.f32 %v13531_v34, %v13452_v35  ;;  %v13703_v33 = vadd.f32 %v13531_v34, %v13456_v17 }
 0x763   :  { %v13707_v13 = vadd.f32 %v13531_v34, %v13460_v7  ;;  %v13711_v30 = vadd.f32 %v13531_v34, %v13464_v49  ;;  %v13715_v3 = vadd.f32 %v13531_v34, %v13468_v61  ;;  %v13719_v14 = vadd.f32 %v13531_v34, %v13472_v53  ;;  %v14485_v7 = vld [vmem:[#allocation14_spill] sm:$0xff] }
 0x764   :  { %v13723_v35 = vadd.f32 %v13531_v34, %v13476_v16  ;;  %v13727_v17 = vadd.f32 %v13531_v34, %v13480_v27  ;;  %v13731_v49 = vadd.f32 %v13531_v34, %v14485_v7  ;;  %v13735_v61 = vadd.f32 %v13531_v34, %v14487_v15 }
 0x765   :  { %v13739_v53 = vadd.f32 %v13531_v34, %v14489_v12  ;;  %v13743_v16 = vadd.f32 %v13531_v34, %v14490_v52  ;;  %v13761_v12 = vadd.f32 %v13531_v34, %v8615_v21  ;;  %v13764_v52 = vadd.f32 %v13531_v34, %v8616_v0 }
 0x766   :  { %14483 = vst [vmem:[#allocation23_spill] sm:$0xff] %v13723_v35  ;;  %14484 = vst [vmem:[#allocation19_spill] sm:$0xff] %v13727_v17  ;;  %v14491_v35 = vld [vmem:[#allocation40_spill] sm:$0xff]  ;;  %v14493_v17 = vld [vmem:[#allocation13_spill] sm:$0xff] }
 0x767   :  { %14486 = vst [vmem:[#allocation29_spill] sm:$0xff] %v13731_v49  ;;  %14488 = vst [vmem:[#allocation21_spill] sm:$0xff] %v13735_v61  ;;  %v13747_v27 = vadd.f32 %v13531_v34, %v14491_v35  ;;  %v13751_v7 = vadd.f32 %v13531_v34, %v14493_v17  ;;  %v14494_v49 = vld [vmem:[#allocation16_spill] sm:$0xff]  ;;  %v13758_v61 = vadd.f32 %v13531_v34, %v8614_v4  ;;  %v14500_v4 = vld [vmem:[#allocation15_spill] sm:$0xff] }
 0x768   :  { %v13755_v15 = vadd.f32 %v13531_v34, %v14494_v49  ;;  %14496 = vst [vmem:[#allocation22_spill] sm:$0xff] %v13761_v12  ;;  %v13767_v35 = vadd.f32 %v13531_v34, %v8617_v43  ;;  %v13773_v17 = vadd.f32 %v13531_v34, %v8619_v20  ;;  %v14498_v49 = vld [vmem:[#allocation17_spill] sm:$0xff]  ;;  %v13781_v21 = vadd.f32 %v13531_v34, %v14500_v4  ;;  %v14502_v12 = vld [vmem:[#allocation18_spill] sm:$0xff] }
 0x769   :  { %14492 = vst [vmem:[#allocation20_spill] sm:$0xff] %v13747_v27  ;;  %v13770_v27 = vadd.f32 %v13531_v34, %v8618_v57  ;;  %v13785_v0 = vadd.f32 %v13531_v34, %v14502_v12  ;;  %v13789_v43 = vadd.f32 %v13531_v34, %v13528_v60  ;;  %v8694_v57 = vmax.f32 %v13543_v46, 0.0 }
 0x76a   :  { %14495 = vst [vmem:[#allocation25_spill] sm:$0xff] %v13755_v15  ;;  %14497 = vst [vmem:[#allocation28_spill] sm:$0xff] %v13773_v17  ;;  %v13777_v15 = vadd.f32 %v13531_v34, %v14498_v49  ;;  %v8695_v20 = vmax.f32 %v13547_v23, 0.0  ;;  %v8696_v17 = vmax.f32 %v13551_v48, 0.0  ;;  %v8697_v49 = vmax.f32 %v13555_v59, 0.0 }
 0x76b   :  { %14501 = vst [vmem:[#allocation26_spill] sm:$0xff] %v13781_v21  ;;  %14503 = vst [vmem:[#allocation27_spill] sm:$0xff] %v13785_v0  ;;  %v8699_v4 = vmax.f32 %v13563_v24, 0.0  ;;  %v8700_v21 = vmax.f32 %v13567_v19, 0.0  ;;  %v8701_v12 = vmax.f32 %v13571_v22, 0.0  ;;  %v8702_v0 = vmax.f32 %v13575_v1, 0.0 }
 0x76c   :  { %14499 = vst [vmem:[#allocation24_spill] sm:$0xff] %v13777_v15  ;;  %v8698_v15 = vmax.f32 %v13559_v47, 0.0  ;;  %v8703_v60 = vmax.f32 %v13579_v5, 0.0  ;;  %v8704_v34 = vmax.f32 %v13583_v45, 0.0  ;;  %v8705_v46 = vmax.f32 %v13587_v41, 0.0  ;;  %8758 = vst [vmem:[%s14054_s7] sm:$0xff] %v8694_v57 }
 0x76d   :  { %8759 = vst [vmem:[%s14054_s7 + $0x8] sm:$0xff] %v8695_v20  ;;  %8760 = vst [vmem:[%s14054_s7 + $0x10] sm:$0xff] %v8696_v17  ;;  %v8706_v23 = vmax.f32 %v13591_v56, 0.0  ;;  %v8707_v48 = vmax.f32 %v13595_v10, 0.0  ;;  %v8708_v59 = vmax.f32 %v13599_v31, 0.0  ;;  %v8709_v47 = vmax.f32 %v13603_v51, 0.0 }
 0x76e   :  { %8761 = vst [vmem:[%s14054_s7 + $0x18] sm:$0xff] %v8697_v49  ;;  %8762 = vst [vmem:[%s14054_s7 + $0x20] sm:$0xff] %v8698_v15  ;;  %v8710_v24 = vmax.f32 %v13607_v18, 0.0  ;;  %v8711_v19 = vmax.f32 %v13611_v8, 0.0  ;;  %v8712_v22 = vmax.f32 %v13615_v54, 0.0  ;;  %v8713_v1 = vmax.f32 %v13619_v28, 0.0 }
 0x76f   :  { %8763 = vst [vmem:[%s14054_s7 + $0x28] sm:$0xff] %v8699_v4  ;;  %8764 = vst [vmem:[%s14054_s7 + $0x30] sm:$0xff] %v8700_v21  ;;  %v8714_v5 = vmax.f32 %v13623_v44, 0.0  ;;  %v8715_v45 = vmax.f32 %v13627_v11, 0.0  ;;  %v8716_v41 = vmax.f32 %v13631_v63, 0.0  ;;  %v8717_v56 = vmax.f32 %v13635_v42, 0.0 }
 0x770   :  { %8765 = vst [vmem:[%s14054_s7 + $0x38] sm:$0xff] %v8701_v12  ;;  %8766 = vst [vmem:[%s14054_s7 + $0x40] sm:$0xff] %v8702_v0  ;;  %v8718_v10 = vmax.f32 %v13639_v2, 0.0  ;;  %v8719_v31 = vmax.f32 %v13643_v26, 0.0  ;;  %v8720_v51 = vmax.f32 %v13647_v58, 0.0  ;;  %v8721_v18 = vmax.f32 %v13651_v25, 0.0 }
 0x771   :  { %8767 = vst [vmem:[%s14054_s7 + $0x48] sm:$0xff] %v8703_v60  ;;  %8768 = vst [vmem:[%s14054_s7 + $0x50] sm:$0xff] %v8704_v34  ;;  %v8722_v8 = vmax.f32 %v13655_v36, 0.0  ;;  %v8723_v54 = vmax.f32 %v13659_v50, 0.0  ;;  %v8724_v28 = vmax.f32 %v13663_v9, 0.0  ;;  %v8725_v44 = vmax.f32 %v13667_v55, 0.0 }
 0x772   :  { %8769 = vst [vmem:[%s14054_s7 + $0x58] sm:$0xff] %v8705_v46  ;;  %8770 = vst [vmem:[%s14054_s7 + $0x60] sm:$0xff] %v8706_v23  ;;  %v8726_v11 = vmax.f32 %v13671_v37, 0.0  ;;  %v8727_v63 = vmax.f32 %v13675_v40, 0.0  ;;  %v8728_v42 = vmax.f32 %v13679_v6, 0.0  ;;  %v8729_v2 = vmax.f32 %v13683_v38, 0.0 }
 0x773   :  { %8771 = vst [vmem:[%s14054_s7 + $0x68] sm:$0xff] %v8707_v48  ;;  %8772 = vst [vmem:[%s14054_s7 + $0x70] sm:$0xff] %v8708_v59  ;;  %v8730_v26 = vmax.f32 %v13687_v62, 0.0  ;;  %v8731_v58 = vmax.f32 %v13691_v39, 0.0  ;;  %v8732_v25 = vmax.f32 %v13695_v29, 0.0  ;;  %v8733_v36 = vmax.f32 %v13699_v32, 0.0 }
 0x774   :  { %8773 = vst [vmem:[%s14054_s7 + $0x78] sm:$0xff] %v8709_v47  ;;  %8774 = vst [vmem:[%s14054_s7 + $0x80] sm:$0xff] %v8710_v24  ;;  %v8734_v50 = vmax.f32 %v13703_v33, 0.0  ;;  %v8735_v9 = vmax.f32 %v13707_v13, 0.0  ;;  %v8736_v55 = vmax.f32 %v13711_v30, 0.0  ;;  %v8737_v37 = vmax.f32 %v13715_v3, 0.0 }
 0x775   :  { %8775 = vst [vmem:[%s14054_s7 + $0x88] sm:$0xff] %v8711_v19  ;;  %8776 = vst [vmem:[%s14054_s7 + $0x90] sm:$0xff] %v8712_v22  ;;  %v8738_v40 = vmax.f32 %v13719_v14, 0.0  ;;  %v14504_v6 = vld [vmem:[#allocation23_spill] sm:$0xff]  ;;  %v14506_v29 = vld [vmem:[#allocation29_spill] sm:$0xff]  ;;  %v8743_v30 = vmax.f32 %v13739_v53, 0.0 }
 0x776   :  { %8777 = vst [vmem:[%s14054_s7 + $0x98] sm:$0xff] %v8713_v1  ;;  %8778 = vst [vmem:[%s14054_s7 + $0xa0] sm:$0xff] %v8714_v5  ;;  %v8739_v38 = vmax.f32 %v14504_v6, 0.0  ;;  %v14505_v62 = vld [vmem:[#allocation19_spill] sm:$0xff]  ;;  %v8741_v32 = vmax.f32 %v14506_v29, 0.0  ;;  %v14507_v33 = vld [vmem:[#allocation21_spill] sm:$0xff] }
 0x777   :  { %8779 = vst [vmem:[%s14054_s7 + $0xa8] sm:$0xff] %v8715_v45  ;;  %8780 = vst [vmem:[%s14054_s7 + $0xb0] sm:$0xff] %v8716_v41  ;;  %v8740_v39 = vmax.f32 %v14505_v62, 0.0  ;;  %v8742_v13 = vmax.f32 %v14507_v33, 0.0  ;;  %v8744_v3 = vmax.f32 %v13743_v16, 0.0  ;;  %v14508_v14 = vld [vmem:[#allocation20_spill] sm:$0xff] }
 0x778   :  { %8781 = vst [vmem:[%s14054_s7 + $0xb8] sm:$0xff] %v8717_v56  ;;  %8782 = vst [vmem:[%s14054_s7 + $0xc0] sm:$0xff] %v8718_v10  ;;  %v8745_v15 = vmax.f32 %v14508_v14, 0.0  ;;  %v8746_v53 = vmax.f32 %v13751_v7, 0.0  ;;  %v14509_v16 = vld [vmem:[#allocation25_spill] sm:$0xff]  ;;  %v8748_v21 = vmax.f32 %v13758_v61, 0.0 }
 0x779   :  { %8783 = vst [vmem:[%s14054_s7 + $0xc8] sm:$0xff] %v8719_v31  ;;  %8784 = vst [vmem:[%s14054_s7 + $0xd0] sm:$0xff] %v8720_v51  ;;  %v8747_v17 = vmax.f32 %v14509_v16, 0.0  ;;  %v14510_v0 = vld [vmem:[#allocation22_spill] sm:$0xff]  ;;  %v8750_v61 = vmax.f32 %v13764_v52, 0.0  ;;  %v8751_v7 = vmax.f32 %v13767_v35, 0.0 }
 0x77a   :  { %8785 = vst [vmem:[%s14054_s7 + $0xd8] sm:$0xff] %v8721_v18  ;;  %8786 = vst [vmem:[%s14054_s7 + $0xe0] sm:$0xff] %v8722_v8  ;;  %v8749_v57 = vmax.f32 %v14510_v0, 0.0  ;;  %v8752_v20 = vmax.f32 %v13770_v27, 0.0  ;;  %v14511_v49 = vld [vmem:[#allocation28_spill] sm:$0xff]  ;;  %v14513_v35 = vld [vmem:[#allocation26_spill] sm:$0xff] }
 0x77b   :  { %8787 = vst [vmem:[%s14054_s7 + $0xe8] sm:$0xff] %v8723_v54  ;;  %8788 = vst [vmem:[%s14054_s7 + $0xf0] sm:$0xff] %v8724_v28  ;;  %v8753_v4 = vmax.f32 %v14511_v49, 0.0  ;;  %v14512_v52 = vld [vmem:[#allocation24_spill] sm:$0xff]  ;;  %v8755_v12 = vmax.f32 %v14513_v35, 0.0  ;;  %v14514_v60 = vld [vmem:[#allocation27_spill] sm:$0xff] }
 0x77c   :  { %8789 = vst [vmem:[%s14054_s7 + $0xf8] sm:$0xff] %v8725_v44  ;;  %8790 = vst [vmem:[%s14054_s7 + $0x100] sm:$0xff] %v8726_v11  ;;  %v8754_v27 = vmax.f32 %v14512_v52, 0.0  ;;  %v8756_v34 = vmax.f32 %v14514_v60, 0.0  ;;  %v8757_v46 = vmax.f32 %v13789_v43, 0.0 }
 0x77d   :  { %8791 = vst [vmem:[%s14054_s7 + $0x108] sm:$0xff] %v8727_v63  ;;  %8792 = vst [vmem:[%s14054_s7 + $0x110] sm:$0xff] %v8728_v42 }
 0x77e   :  { %8793 = vst [vmem:[%s14054_s7 + $0x118] sm:$0xff] %v8729_v2  ;;  %8794 = vst [vmem:[%s14054_s7 + $0x120] sm:$0xff] %v8730_v26 }
 0x77f   :  { %8795 = vst [vmem:[%s14054_s7 + $0x128] sm:$0xff] %v8731_v58  ;;  %8796 = vst [vmem:[%s14054_s7 + $0x130] sm:$0xff] %v8732_v25 }
 0x780   :  { %8797 = vst [vmem:[%s14054_s7 + $0x138] sm:$0xff] %v8733_v36  ;;  %8798 = vst [vmem:[%s14054_s7 + $0x140] sm:$0xff] %v8734_v50 }
 0x781   :  { %8799 = vst [vmem:[%s14054_s7 + $0x148] sm:$0xff] %v8735_v9  ;;  %8800 = vst [vmem:[%s14054_s7 + $0x150] sm:$0xff] %v8736_v55 }
 0x782   :  { %8801 = vst [vmem:[%s14054_s7 + $0x158] sm:$0xff] %v8737_v37  ;;  %8802 = vst [vmem:[%s14054_s7 + $0x160] sm:$0xff] %v8738_v40 }
 0x783   :  { %8803 = vst [vmem:[%s14054_s7 + $0x168] sm:$0xff] %v8739_v38  ;;  %8804 = vst [vmem:[%s14054_s7 + $0x170] sm:$0xff] %v8740_v39 }
 0x784   :  { %8805 = vst [vmem:[%s14054_s7 + $0x178] sm:$0xff] %v8741_v32  ;;  %8806 = vst [vmem:[%s14054_s7 + $0x180] sm:$0xff] %v8742_v13 }
 0x785   :  { %8807 = vst [vmem:[%s14054_s7 + $0x188] sm:$0xff] %v8743_v30  ;;  %8808 = vst [vmem:[%s14054_s7 + $0x190] sm:$0xff] %v8744_v3 }
 0x786   :  { %8809 = vst [vmem:[%s14054_s7 + $0x198] sm:$0xff] %v8745_v15  ;;  %8810 = vst [vmem:[%s14054_s7 + $0x1a0] sm:$0xff] %v8746_v53 }
 0x787   :  { %8811 = vst [vmem:[%s14054_s7 + $0x1a8] sm:$0xff] %v8747_v17  ;;  %8812 = vst [vmem:[%s14054_s7 + $0x1b0] sm:$0xff] %v8748_v21 }
 0x788   :  { %8813 = vst [vmem:[%s14054_s7 + $0x1b8] sm:$0xff] %v8749_v57  ;;  %8814 = vst [vmem:[%s14054_s7 + $0x1c0] sm:$0xff] %v8750_v61 }
 0x789   :  { %8815 = vst [vmem:[%s14054_s7 + $0x1c8] sm:$0xff] %v8751_v7  ;;  %8816 = vst [vmem:[%s14054_s7 + $0x1d0] sm:$0xff] %v8752_v20 }
 0x78a   :  { %8817 = vst [vmem:[%s14054_s7 + $0x1d8] sm:$0xff] %v8753_v4  ;;  %8818 = vst [vmem:[%s14054_s7 + $0x1e0] sm:$0xff] %v8754_v27 }
 0x78b   :  { %8819 = vst [vmem:[%s14054_s7 + $0x1e8] sm:$0xff] %v8755_v12  ;;  %8820 = vst [vmem:[%s14054_s7 + $0x1f0] sm:$0xff] %v8756_v34 }
 0x78c   :  { %8821 = vst [vmem:[%s14054_s7 + $0x1f8] sm:$0xff] %v8757_v46 }

</bundles_post_ra>
